<compile_context>
chip_gen: v5e
topology: v5e:2x2
jax: 0.10.0
libtpu: 0.0.40
codegen_flags: <defaults>
</compile_context>

<pallas_src>
import functools

import jax
import jax.numpy as jnp
from jax.experimental import pallas as pl
from jax.experimental.pallas import tpu as pltpu


def _ffe_kernel(x_ref, bn0s, bn0b, w1_ref, bn1s, bn1b, w3_ref, bn2s, bn2b,
                w2_ref, o_ref, pbuf, col_ref, ybuf, *, Nb, H, W, Cin, Cmid, Cout):
    HW = H * W
    R = Nb * HW
    Ho, Wo = H // 2, W // 2

    # ---- BatchNorm2d(Cin) + ReLU (f32, VPU) ----
    x = x_ref[...].reshape(R, Cin)
    x = jnp.maximum(x * bn0s[...] + bn0b[...], 0.0)

    # ---- Conv2d 1x1, Cin -> Cmid: a single MXU matmul (K=Cin) ----
    h = jnp.dot(x, w1_ref[...], preferred_element_type=jnp.float32)   # [R, Cmid]

    # ---- BatchNorm2d(Cmid) + ReLU ----
    h = jnp.maximum(h * bn1s[...] + bn1b[...], 0.0)

    # ---- zero-pad into pbuf: only the 1-px border is (re)written each step,
    #      the interior is fully overwritten below ----
    pbuf[:, 0:1, :, :] = jnp.zeros((Nb, 1, W + 2, Cmid), jnp.float32)
    pbuf[:, H + 1:H + 2, :, :] = jnp.zeros((Nb, 1, W + 2, Cmid), jnp.float32)
    pbuf[:, :, 0:1, :] = jnp.zeros((Nb, H + 2, 1, Cmid), jnp.float32)
    pbuf[:, :, W + 1:W + 2, :] = jnp.zeros((Nb, H + 2, 1, Cmid), jnp.float32)
    pbuf[:, 1:H + 1, 1:W + 1, :] = h.reshape(Nb, H, W, Cmid)

    # ---- im2col: 9 shifted windows concatenated on the channel axis ----
    for di in range(3):
        for dj in range(3):
            k = (di * 3 + dj) * Cmid
            col_ref[:, k:k + Cmid] = (
                pbuf[:, di:di + H, dj:dj + W, :]
                .reshape(R, Cmid).astype(jnp.bfloat16))

    # ---- Conv2d 3x3 pad=1 as ONE matmul: [R, 9*Cmid] @ [9*Cmid, Cmid] ----
    acc = jnp.dot(col_ref[...], w3_ref[...],
                  preferred_element_type=jnp.float32)                 # [R, Cmid]

    # ---- BatchNorm2d(Cmid) + ReLU ----
    acc = jnp.maximum(acc * bn2s[...] + bn2b[...], 0.0)

    # ---- Conv2d 1x1, Cmid -> Cout (bf16 MXU operands, f32 accumulation) ----
    y = jnp.dot(acc.astype(jnp.bfloat16), w2_ref[...],
                preferred_element_type=jnp.float32)                   # [R, Cout]

    # ---- MaxPool2d(2, 2): rows of y are (n, h, w) row-major ----
    ybuf[...] = y
    even = ybuf[pl.ds(0, R // 2, 2), :]             # w even
    odd = ybuf[pl.ds(1, R // 2, 2), :]              # w odd
    wp = jnp.maximum(even, odd)                     # [Nb*H*Wo, Cout], W pooled
    # group rows h in pairs: second-minor index = hpar*Wo + w2
    wp4 = wp.reshape(Nb, Ho, 2 * Wo, Cout)
    pooled = jnp.maximum(wp4[:, :, :Wo, :], wp4[:, :, Wo:, :])        # H pooled
    o_ref[...] = pooled.astype(o_ref.dtype)         # (Nb, Ho, Wo, Cout)


def front_feature_extractor(x_nchw, params, *, block_n=None):
    """x_nchw: [N, 3, H, W] float32 (PyTorch layout). Returns [N, Cout, H//2, W//2]."""
    bn0s, bn0b, w1, bn1s, bn1b, w3, bn2s, bn2b, w2 = params
    N, Cin, H, W = x_nchw.shape
    Cmid, Cout = w1.shape[1], w2.shape[1]
    assert H % 2 == 0 and W % 2 == 0, "MaxPool2d(2,2) needs even H, W"
    assert Cout % 2 == 0 and Cmid == Cout // 2
    Ho, Wo = H // 2, W // 2

    if block_n is None:   # largest divisor of N up to 8 images per grid step
        block_n = next(b for b in range(min(N, 8), 0, -1) if N % b == 0)
    assert N % block_n == 0

    # NCHW -> flat (N, H*W, Cin): channels on lanes, dense sublane layout for DMA
    x = jnp.transpose(x_nchw, (0, 2, 3, 1)).reshape(N, H * W, Cin).astype(jnp.float32)

    w1_f = w1.astype(jnp.float32)                                   # (Cin, Cmid)
    w3_flat = w3.reshape(9 * Cmid, Cmid).astype(jnp.bfloat16)       # (kh,kw,ci,co)->(9*ci,co)
    w2_bf = w2.astype(jnp.bfloat16)                                 # (Cmid, Cout)

    kernel = functools.partial(_ffe_kernel, Nb=block_n, H=H, W=W,
                               Cin=Cin, Cmid=Cmid, Cout=Cout)

    def full(a):
        nd = a.ndim
        return pl.BlockSpec(a.shape, lambda n, _nd=nd: (0,) * _nd)

    out = pl.pallas_call(
        kernel,
        out_shape=jax.ShapeDtypeStruct((N, Ho, Wo, Cout), jnp.float32),
        grid=(N // block_n,),
        in_specs=[
            pl.BlockSpec((block_n, H * W, Cin), lambda n: (n, 0, 0)),
            full(bn0s), full(bn0b),
            full(w1_f),
            full(bn1s), full(bn1b),
            full(w3_flat),
            full(bn2s), full(bn2b),
            full(w2_bf),
        ],
        out_specs=pl.BlockSpec((block_n, Ho, Wo, Cout), lambda n: (n, 0, 0, 0)),
        scratch_shapes=[
            pltpu.VMEM((block_n, H + 2, W + 2, Cmid), jnp.float32),   # padded 3x3 input
            pltpu.VMEM((block_n * H * W, 9 * Cmid), jnp.bfloat16),    # im2col buffer
            pltpu.VMEM((block_n * H * W, Cout), jnp.float32),         # pre-pool features
        ],
        # batch axis is fully independent -> shard across v7x's 2 TensorCores
        compiler_params=pltpu.CompilerParams(dimension_semantics=("parallel",)),
    )(x, bn0s, bn0b, w1_f, bn1s, bn1b, w3_flat, bn2s, bn2b, w2_bf)

    return jnp.transpose(out, (0, 3, 1, 2))   # back to NCHW
    # TODO(synk): at real resolutions (H,W >> 16) tile spatially with a 1-row
    # halo so the padded/im2col scratch fits v7x's 64 MiB VMEM.


def make_params(key, out_channel, cin=3, eps=1e-5):
    """Deterministic synthetic parameters matching the torch module's shapes."""
    cmid = out_channel // 2
    ks = iter(jax.random.split(key, 16))

    def bn(c):
        gamma = jax.random.uniform(next(ks), (c,), jnp.float32, 0.5, 1.5)
        beta = jax.random.normal(next(ks), (c,), jnp.float32) * 0.1
        mean = jax.random.normal(next(ks), (c,), jnp.float32) * 0.1
        var = jax.random.uniform(next(ks), (c,), jnp.float32, 0.5, 1.5)
        scale = gamma / jnp.sqrt(var + eps)
        shift = beta - mean * scale
        return scale.reshape(1, c), shift.reshape(1, c)

    bn0s, bn0b = bn(cin)
    w1 = jax.random.normal(next(ks), (cin, cmid), jnp.float32) * 0.2        # 1x1 conv (IO)
    bn1s, bn1b = bn(cmid)
    w3 = jax.random.normal(next(ks), (3, 3, cmid, cmid), jnp.float32) * 0.1  # 3x3 conv (HWIO)
    bn2s, bn2b = bn(cmid)
    w2 = jax.random.normal(next(ks), (cmid, out_channel), jnp.float32) * 0.1  # 1x1 conv (IO)
    return (bn0s, bn0b, w1, bn1s, bn1b, w3, bn2s, bn2b, w2)


def ref_forward(x_nchw, params):
    """Plain-JAX f32 reference of the same forward pass."""
    bn0s, bn0b, w1, bn1s, bn1b, w3, bn2s, bn2b, w2 = params
    x = jnp.transpose(x_nchw, (0, 2, 3, 1))
    x = jnp.maximum(x * bn0s[0] + bn0b[0], 0.0)
    h = jnp.einsum('nhwc,cd->nhwd', x, w1)
    h = jnp.maximum(h * bn1s[0] + bn1b[0], 0.0)
    h = jax.lax.conv_general_dilated(h, w3, (1, 1), 'SAME',
                                     dimension_numbers=('NHWC', 'HWIO', 'NHWC'))
    h = jnp.maximum(h * bn2s[0] + bn2b[0], 0.0)
    y = jnp.einsum('nhwc,cd->nhwd', h, w2)
    y = jax.lax.reduce_window(y, -jnp.inf, jax.lax.max,
                              (1, 2, 2, 1), (1, 2, 2, 1), 'VALID')
    return jnp.transpose(y, (0, 3, 1, 2))


if __name__ == "__main__":
    key = jax.random.PRNGKey(0)
    kx, kp = jax.random.split(key)

    out_channel = 32
    x = jax.random.normal(kx, (2, 3, 16, 16), jnp.float32)
    params = make_params(kp, out_channel)

    out = jax.block_until_ready(jax.jit(front_feature_extractor)(x, params))
    assert out.shape == (2, out_channel, 8, 8), out.shape

    ref = jax.block_until_ready(ref_forward(x, params))
    err = float(jnp.max(jnp.abs(out - ref)))
    assert err < 5e-2, f"max abs err too large: {err}"

    print("KERNEL_OK")
</pallas_src>

<mosaic_0001>
module attributes {stable_mosaic.version = 11 : i64} {
  func.func @_ffe_kernel(%arg0: i32, %arg1: memref<2x256x3xf32, #tpu.memory_space<vmem>>, %arg2: memref<1x3xf32, #tpu.memory_space<vmem>>, %arg3: memref<1x3xf32, #tpu.memory_space<vmem>>, %arg4: memref<3x16xf32, #tpu.memory_space<vmem>>, %arg5: memref<1x16xf32, #tpu.memory_space<vmem>>, %arg6: memref<1x16xf32, #tpu.memory_space<vmem>>, %arg7: memref<144x16xbf16, #tpu.memory_space<vmem>>, %arg8: memref<1x16xf32, #tpu.memory_space<vmem>>, %arg9: memref<1x16xf32, #tpu.memory_space<vmem>>, %arg10: memref<16x32xbf16, #tpu.memory_space<vmem>>, %arg11: memref<2x8x8x32xf32, #tpu.memory_space<vmem>>, %arg12: memref<2x18x18x16xf32, #tpu.memory_space<vmem>>, %arg13: memref<512x144xbf16, #tpu.memory_space<vmem>>, %arg14: memref<512x32xf32, #tpu.memory_space<vmem>>) attributes {dimension_semantics = [#tpu.dimension_semantics<parallel>], iteration_bounds = array<i64: 1>, scalar_prefetch = 0 : i64, scratch_operands = 3 : i64, tpu.core_type = #tpu.core_type<tc>, window_params = [{transform_indices = @transform_0, window_bounds = array<i64: 2, 256, 3>}, {pipeline_mode = #tpu.pipeline_mode<synchronous>, transform_indices = @transform_1, window_bounds = array<i64: 1, 3>}, {pipeline_mode = #tpu.pipeline_mode<synchronous>, transform_indices = @transform_2, window_bounds = array<i64: 1, 3>}, {pipeline_mode = #tpu.pipeline_mode<synchronous>, transform_indices = @transform_3, window_bounds = array<i64: 3, 16>}, {pipeline_mode = #tpu.pipeline_mode<synchronous>, transform_indices = @transform_4, window_bounds = array<i64: 1, 16>}, {pipeline_mode = #tpu.pipeline_mode<synchronous>, transform_indices = @transform_5, window_bounds = array<i64: 1, 16>}, {pipeline_mode = #tpu.pipeline_mode<synchronous>, transform_indices = @transform_6, window_bounds = array<i64: 144, 16>}, {pipeline_mode = #tpu.pipeline_mode<synchronous>, transform_indices = @transform_7, window_bounds = array<i64: 1, 16>}, {pipeline_mode = #tpu.pipeline_mode<synchronous>, transform_indices = @transform_8, window_bounds = array<i64: 1, 16>}, {pipeline_mode = #tpu.pipeline_mode<synchronous>, transform_indices = @transform_9, window_bounds = array<i64: 16, 32>}, {transform_indices = @transform_10, window_bounds = array<i64: 2, 8, 8, 32>}]} {
    %c0 = arith.constant 0 : index
    %c0_0 = arith.constant 0 : index
    %c0_1 = arith.constant 0 : index
    %0 = vector.load %arg1[%c0, %c0_0, %c0_1] : memref<2x256x3xf32, #tpu.memory_space<vmem>>, vector<2x256x3xf32>
    %1 = vector.shape_cast %0 : vector<2x256x3xf32> to vector<512x3xf32>
    %c0_2 = arith.constant 0 : index
    %c0_3 = arith.constant 0 : index
    %2 = vector.load %arg2[%c0_2, %c0_3] : memref<1x3xf32, #tpu.memory_space<vmem>>, vector<1x3xf32>
    %3 = vector.broadcast %2 : vector<1x3xf32> to vector<512x3xf32>
    %4 = arith.mulf %1, %3 : vector<512x3xf32>
    %c0_4 = arith.constant 0 : index
    %c0_5 = arith.constant 0 : index
    %5 = vector.load %arg3[%c0_4, %c0_5] : memref<1x3xf32, #tpu.memory_space<vmem>>, vector<1x3xf32>
    %6 = vector.broadcast %5 : vector<1x3xf32> to vector<512x3xf32>
    %7 = arith.addf %4, %6 : vector<512x3xf32>
    %cst = arith.constant 0.000000e+00 : f32
    %8 = vector.broadcast %cst : f32 to vector<512x3xf32>
    %9 = arith.maximumf %7, %8 : vector<512x3xf32>
    %c0_6 = arith.constant 0 : index
    %c0_7 = arith.constant 0 : index
    %10 = vector.load %arg4[%c0_6, %c0_7] : memref<3x16xf32, #tpu.memory_space<vmem>>, vector<3x16xf32>
    %cst_8 = arith.constant dense<0.000000e+00> : vector<512x16xf32>
    %11 = tpu.matmul %9, %10, %cst_8 {dimension_numbers = #tpu.dot_dimension_numbers<[1], [0], [0], [1], [0, 0, 1, 1], [], []>} : vector<512x3xf32>, vector<3x16xf32>, vector<512x16xf32> -> vector<512x16xf32>
    %c0_9 = arith.constant 0 : index
    %c0_10 = arith.constant 0 : index
    %12 = vector.load %arg5[%c0_9, %c0_10] : memref<1x16xf32, #tpu.memory_space<vmem>>, vector<1x16xf32>
    %13 = vector.broadcast %12 : vector<1x16xf32> to vector<512x16xf32>
    %14 = arith.mulf %11, %13 : vector<512x16xf32>
    %c0_11 = arith.constant 0 : index
    %c0_12 = arith.constant 0 : index
    %15 = vector.load %arg6[%c0_11, %c0_12] : memref<1x16xf32, #tpu.memory_space<vmem>>, vector<1x16xf32>
    %16 = vector.broadcast %15 : vector<1x16xf32> to vector<512x16xf32>
    %17 = arith.addf %14, %16 : vector<512x16xf32>
    %cst_13 = arith.constant 0.000000e+00 : f32
    %18 = vector.broadcast %cst_13 : f32 to vector<512x16xf32>
    %19 = arith.maximumf %17, %18 : vector<512x16xf32>
    %cst_14 = arith.constant 0.000000e+00 : f32
    %20 = vector.broadcast %cst_14 : f32 to vector<2x1x18x16xf32>
    %c0_15 = arith.constant 0 : index
    %c0_16 = arith.constant 0 : index
    %c0_17 = arith.constant 0 : index
    %c0_18 = arith.constant 0 : index
    %21 = vector.load %arg12[%c0_15, %c0_16, %c0_17, %c0_18] : memref<2x18x18x16xf32, #tpu.memory_space<vmem>>, vector<2x1x18x16xf32>
    tpu.vector_store %arg12[%c0_15, %c0_16, %c0_17, %c0_18], %20 {strides = array<i32>} : memref<2x18x18x16xf32, #tpu.memory_space<vmem>>, vector<2x1x18x16xf32>,
    %cst_19 = arith.constant 0.000000e+00 : f32
    %22 = vector.broadcast %cst_19 : f32 to vector<2x1x18x16xf32>
    %c0_20 = arith.constant 0 : index
    %c17 = arith.constant 17 : index
    %c0_21 = arith.constant 0 : index
    %c0_22 = arith.constant 0 : index
    %23 = vector.load %arg12[%c0_20, %c17, %c0_21, %c0_22] : memref<2x18x18x16xf32, #tpu.memory_space<vmem>>, vector<2x1x18x16xf32>
    tpu.vector_store %arg12[%c0_20, %c17, %c0_21, %c0_22], %22 {strides = array<i32>} : memref<2x18x18x16xf32, #tpu.memory_space<vmem>>, vector<2x1x18x16xf32>,
    %cst_23 = arith.constant 0.000000e+00 : f32
    %24 = vector.broadcast %cst_23 : f32 to vector<2x18x1x16xf32>
    %c0_24 = arith.constant 0 : index
    %c0_25 = arith.constant 0 : index
    %c0_26 = arith.constant 0 : index
    %c0_27 = arith.constant 0 : index
    %25 = vector.load %arg12[%c0_24, %c0_25, %c0_26, %c0_27] : memref<2x18x18x16xf32, #tpu.memory_space<vmem>>, vector<2x18x1x16xf32>
    tpu.vector_store %arg12[%c0_24, %c0_25, %c0_26, %c0_27], %24 {strides = array<i32>} : memref<2x18x18x16xf32, #tpu.memory_space<vmem>>, vector<2x18x1x16xf32>,
    %cst_28 = arith.constant 0.000000e+00 : f32
    %26 = vector.broadcast %cst_28 : f32 to vector<2x18x1x16xf32>
    %c0_29 = arith.constant 0 : index
    %c0_30 = arith.constant 0 : index
    %c17_31 = arith.constant 17 : index
    %c0_32 = arith.constant 0 : index
    %27 = vector.load %arg12[%c0_29, %c0_30, %c17_31, %c0_32] : memref<2x18x18x16xf32, #tpu.memory_space<vmem>>, vector<2x18x1x16xf32>
    tpu.vector_store %arg12[%c0_29, %c0_30, %c17_31, %c0_32], %26 {strides = array<i32>} : memref<2x18x18x16xf32, #tpu.memory_space<vmem>>, vector<2x18x1x16xf32>,
    %28 = vector.shape_cast %19 : vector<512x16xf32> to vector<2x16x16x16xf32>
    %c0_33 = arith.constant 0 : index
    %c1 = arith.constant 1 : index
    %c1_34 = arith.constant 1 : index
    %c0_35 = arith.constant 0 : index
    %29 = vector.load %arg12[%c0_33, %c1, %c1_34, %c0_35] : memref<2x18x18x16xf32, #tpu.memory_space<vmem>>, vector<2x16x16x16xf32>
    tpu.vector_store %arg12[%c0_33, %c1, %c1_34, %c0_35], %28 {strides = array<i32>} : memref<2x18x18x16xf32, #tpu.memory_space<vmem>>, vector<2x16x16x16xf32>,
    %c0_36 = arith.constant 0 : index
    %c0_37 = arith.constant 0 : index
    %c0_38 = arith.constant 0 : index
    %c0_39 = arith.constant 0 : index
    %30 = vector.load %arg12[%c0_36, %c0_37, %c0_38, %c0_39] : memref<2x18x18x16xf32, #tpu.memory_space<vmem>>, vector<2x16x16x16xf32>
    %31 = vector.shape_cast %30 : vector<2x16x16x16xf32> to vector<512x16xf32>
    %32 = arith.truncf %31 : vector<512x16xf32> to vector<512x16xbf16>
    %c0_40 = arith.constant 0 : index
    %c0_41 = arith.constant 0 : index
    %33 = vector.load %arg13[%c0_40, %c0_41] : memref<512x144xbf16, #tpu.memory_space<vmem>>, vector<512x16xbf16>
    tpu.vector_store %arg13[%c0_40, %c0_41], %32 {strides = array<i32>} : memref<512x144xbf16, #tpu.memory_space<vmem>>, vector<512x16xbf16>,
    %c0_42 = arith.constant 0 : index
    %c0_43 = arith.constant 0 : index
    %c1_44 = arith.constant 1 : index
    %c0_45 = arith.constant 0 : index
    %34 = vector.load %arg12[%c0_42, %c0_43, %c1_44, %c0_45] : memref<2x18x18x16xf32, #tpu.memory_space<vmem>>, vector<2x16x16x16xf32>
    %35 = vector.shape_cast %34 : vector<2x16x16x16xf32> to vector<512x16xf32>
    %36 = arith.truncf %35 : vector<512x16xf32> to vector<512x16xbf16>
    %c0_46 = arith.constant 0 : index
    %c16 = arith.constant 16 : index
    %37 = vector.load %arg13[%c0_46, %c16] : memref<512x144xbf16, #tpu.memory_space<vmem>>, vector<512x16xbf16>
    tpu.vector_store %arg13[%c0_46, %c16], %36 {strides = array<i32>} : memref<512x144xbf16, #tpu.memory_space<vmem>>, vector<512x16xbf16>,
    %c0_47 = arith.constant 0 : index
    %c0_48 = arith.constant 0 : index
    %c2 = arith.constant 2 : index
    %c0_49 = arith.constant 0 : index
    %38 = vector.load %arg12[%c0_47, %c0_48, %c2, %c0_49] : memref<2x18x18x16xf32, #tpu.memory_space<vmem>>, vector<2x16x16x16xf32>
    %39 = vector.shape_cast %38 : vector<2x16x16x16xf32> to vector<512x16xf32>
    %40 = arith.truncf %39 : vector<512x16xf32> to vector<512x16xbf16>
    %c0_50 = arith.constant 0 : index
    %c32 = arith.constant 32 : index
    %41 = vector.load %arg13[%c0_50, %c32] : memref<512x144xbf16, #tpu.memory_space<vmem>>, vector<512x16xbf16>
    tpu.vector_store %arg13[%c0_50, %c32], %40 {strides = array<i32>} : memref<512x144xbf16, #tpu.memory_space<vmem>>, vector<512x16xbf16>,
    %c0_51 = arith.constant 0 : index
    %c1_52 = arith.constant 1 : index
    %c0_53 = arith.constant 0 : index
    %c0_54 = arith.constant 0 : index
    %42 = vector.load %arg12[%c0_51, %c1_52, %c0_53, %c0_54] : memref<2x18x18x16xf32, #tpu.memory_space<vmem>>, vector<2x16x16x16xf32>
    %43 = vector.shape_cast %42 : vector<2x16x16x16xf32> to vector<512x16xf32>
    %44 = arith.truncf %43 : vector<512x16xf32> to vector<512x16xbf16>
    %c0_55 = arith.constant 0 : index
    %c48 = arith.constant 48 : index
    %45 = vector.load %arg13[%c0_55, %c48] : memref<512x144xbf16, #tpu.memory_space<vmem>>, vector<512x16xbf16>
    tpu.vector_store %arg13[%c0_55, %c48], %44 {strides = array<i32>} : memref<512x144xbf16, #tpu.memory_space<vmem>>, vector<512x16xbf16>,
    %c0_56 = arith.constant 0 : index
    %c1_57 = arith.constant 1 : index
    %c1_58 = arith.constant 1 : index
    %c0_59 = arith.constant 0 : index
    %46 = vector.load %arg12[%c0_56, %c1_57, %c1_58, %c0_59] : memref<2x18x18x16xf32, #tpu.memory_space<vmem>>, vector<2x16x16x16xf32>
    %47 = vector.shape_cast %46 : vector<2x16x16x16xf32> to vector<512x16xf32>
    %48 = arith.truncf %47 : vector<512x16xf32> to vector<512x16xbf16>
    %c0_60 = arith.constant 0 : index
    %c64 = arith.constant 64 : index
    %49 = vector.load %arg13[%c0_60, %c64] : memref<512x144xbf16, #tpu.memory_space<vmem>>, vector<512x16xbf16>
    tpu.vector_store %arg13[%c0_60, %c64], %48 {strides = array<i32>} : memref<512x144xbf16, #tpu.memory_space<vmem>>, vector<512x16xbf16>,
    %c0_61 = arith.constant 0 : index
    %c1_62 = arith.constant 1 : index
    %c2_63 = arith.constant 2 : index
    %c0_64 = arith.constant 0 : index
    %50 = vector.load %arg12[%c0_61, %c1_62, %c2_63, %c0_64] : memref<2x18x18x16xf32, #tpu.memory_space<vmem>>, vector<2x16x16x16xf32>
    %51 = vector.shape_cast %50 : vector<2x16x16x16xf32> to vector<512x16xf32>
    %52 = arith.truncf %51 : vector<512x16xf32> to vector<512x16xbf16>
    %c0_65 = arith.constant 0 : index
    %c80 = arith.constant 80 : index
    %53 = vector.load %arg13[%c0_65, %c80] : memref<512x144xbf16, #tpu.memory_space<vmem>>, vector<512x16xbf16>
    tpu.vector_store %arg13[%c0_65, %c80], %52 {strides = array<i32>} : memref<512x144xbf16, #tpu.memory_space<vmem>>, vector<512x16xbf16>,
    %c0_66 = arith.constant 0 : index
    %c2_67 = arith.constant 2 : index
    %c0_68 = arith.constant 0 : index
    %c0_69 = arith.constant 0 : index
    %54 = vector.load %arg12[%c0_66, %c2_67, %c0_68, %c0_69] : memref<2x18x18x16xf32, #tpu.memory_space<vmem>>, vector<2x16x16x16xf32>
    %55 = vector.shape_cast %54 : vector<2x16x16x16xf32> to vector<512x16xf32>
    %56 = arith.truncf %55 : vector<512x16xf32> to vector<512x16xbf16>
    %c0_70 = arith.constant 0 : index
    %c96 = arith.constant 96 : index
    %57 = vector.load %arg13[%c0_70, %c96] : memref<512x144xbf16, #tpu.memory_space<vmem>>, vector<512x16xbf16>
    tpu.vector_store %arg13[%c0_70, %c96], %56 {strides = array<i32>} : memref<512x144xbf16, #tpu.memory_space<vmem>>, vector<512x16xbf16>,
    %c0_71 = arith.constant 0 : index
    %c2_72 = arith.constant 2 : index
    %c1_73 = arith.constant 1 : index
    %c0_74 = arith.constant 0 : index
    %58 = vector.load %arg12[%c0_71, %c2_72, %c1_73, %c0_74] : memref<2x18x18x16xf32, #tpu.memory_space<vmem>>, vector<2x16x16x16xf32>
    %59 = vector.shape_cast %58 : vector<2x16x16x16xf32> to vector<512x16xf32>
    %60 = arith.truncf %59 : vector<512x16xf32> to vector<512x16xbf16>
    %c0_75 = arith.constant 0 : index
    %c112 = arith.constant 112 : index
    %61 = vector.load %arg13[%c0_75, %c112] : memref<512x144xbf16, #tpu.memory_space<vmem>>, vector<512x16xbf16>
    tpu.vector_store %arg13[%c0_75, %c112], %60 {strides = array<i32>} : memref<512x144xbf16, #tpu.memory_space<vmem>>, vector<512x16xbf16>,
    %c0_76 = arith.constant 0 : index
    %c2_77 = arith.constant 2 : index
    %c2_78 = arith.constant 2 : index
    %c0_79 = arith.constant 0 : index
    %62 = vector.load %arg12[%c0_76, %c2_77, %c2_78, %c0_79] : memref<2x18x18x16xf32, #tpu.memory_space<vmem>>, vector<2x16x16x16xf32>
    %63 = vector.shape_cast %62 : vector<2x16x16x16xf32> to vector<512x16xf32>
    %64 = arith.truncf %63 : vector<512x16xf32> to vector<512x16xbf16>
    %c0_80 = arith.constant 0 : index
    %c128 = arith.constant 128 : index
    %65 = vector.load %arg13[%c0_80, %c128] : memref<512x144xbf16, #tpu.memory_space<vmem>>, vector<512x16xbf16>
    tpu.vector_store %arg13[%c0_80, %c128], %64 {strides = array<i32>} : memref<512x144xbf16, #tpu.memory_space<vmem>>, vector<512x16xbf16>,
    %c0_81 = arith.constant 0 : index
    %c0_82 = arith.constant 0 : index
    %66 = vector.load %arg13[%c0_81, %c0_82] : memref<512x144xbf16, #tpu.memory_space<vmem>>, vector<512x144xbf16>
    %c0_83 = arith.constant 0 : index
    %c0_84 = arith.constant 0 : index
    %67 = vector.load %arg7[%c0_83, %c0_84] : memref<144x16xbf16, #tpu.memory_space<vmem>>, vector<144x16xbf16>
    %cst_85 = arith.constant dense<0.000000e+00> : vector<512x16xf32>
    %68 = tpu.matmul %66, %67, %cst_85 {dimension_numbers = #tpu.dot_dimension_numbers<[1], [0], [0], [1], [0, 0, 1, 1], [], []>} : vector<512x144xbf16>, vector<144x16xbf16>, vector<512x16xf32> -> vector<512x16xf32>
    %c0_86 = arith.constant 0 : index
    %c0_87 = arith.constant 0 : index
    %69 = vector.load %arg8[%c0_86, %c0_87] : memref<1x16xf32, #tpu.memory_space<vmem>>, vector<1x16xf32>
    %70 = vector.broadcast %69 : vector<1x16xf32> to vector<512x16xf32>
    %71 = arith.mulf %68, %70 : vector<512x16xf32>
    %c0_88 = arith.constant 0 : index
    %c0_89 = arith.constant 0 : index
    %72 = vector.load %arg9[%c0_88, %c0_89] : memref<1x16xf32, #tpu.memory_space<vmem>>, vector<1x16xf32>
    %73 = vector.broadcast %72 : vector<1x16xf32> to vector<512x16xf32>
    %74 = arith.addf %71, %73 : vector<512x16xf32>
    %cst_90 = arith.constant 0.000000e+00 : f32
    %75 = vector.broadcast %cst_90 : f32 to vector<512x16xf32>
    %76 = arith.maximumf %74, %75 : vector<512x16xf32>
    %77 = arith.truncf %76 : vector<512x16xf32> to vector<512x16xbf16>
    %c0_91 = arith.constant 0 : index
    %c0_92 = arith.constant 0 : index
    %78 = vector.load %arg10[%c0_91, %c0_92] : memref<16x32xbf16, #tpu.memory_space<vmem>>, vector<16x32xbf16>
    %cst_93 = arith.constant dense<0.000000e+00> : vector<512x32xf32>
    %79 = tpu.matmul %77, %78, %cst_93 {dimension_numbers = #tpu.dot_dimension_numbers<[1], [0], [0], [1], [0, 0, 1, 1], [], []>} : vector<512x16xbf16>, vector<16x32xbf16>, vector<512x32xf32> -> vector<512x32xf32>
    %c0_94 = arith.constant 0 : index
    %c0_95 = arith.constant 0 : index
    %80 = vector.load %arg14[%c0_94, %c0_95] : memref<512x32xf32, #tpu.memory_space<vmem>>, vector<512x32xf32>
    tpu.vector_store %arg14[%c0_94, %c0_95], %79 {strides = array<i32>} : memref<512x32xf32, #tpu.memory_space<vmem>>, vector<512x32xf32>,
    %c0_96 = arith.constant 0 : index
    %c0_97 = arith.constant 0 : index
    %81 = tpu.strided_load %arg14[%c0_96, %c0_97] {strides = array<i32: 2, 1>} : memref<512x32xf32, #tpu.memory_space<vmem>>, vector<256x32xf32>
    %c1_98 = arith.constant 1 : index
    %c0_99 = arith.constant 0 : index
    %82 = tpu.strided_load %arg14[%c1_98, %c0_99] {strides = array<i32: 2, 1>} : memref<512x32xf32, #tpu.memory_space<vmem>>, vector<256x32xf32>
    %83 = arith.maximumf %81, %82 : vector<256x32xf32>
    %84 = vector.shape_cast %83 : vector<256x32xf32> to vector<2x8x16x32xf32>
    %85 = vector.extract_strided_slice %84 {offsets = [0, 0, 0, 0], sizes = [2, 8, 8, 32], strides = [1, 1, 1, 1]} : vector<2x8x16x32xf32> to vector<2x8x8x32xf32>
    %86 = vector.extract_strided_slice %84 {offsets = [0, 0, 8, 0], sizes = [2, 8, 8, 32], strides = [1, 1, 1, 1]} : vector<2x8x16x32xf32> to vector<2x8x8x32xf32>
    %87 = arith.maximumf %85, %86 : vector<2x8x8x32xf32>
    %c0_100 = arith.constant 0 : index
    %c0_101 = arith.constant 0 : index
    %c0_102 = arith.constant 0 : index
    %c0_103 = arith.constant 0 : index
    %88 = vector.load %arg11[%c0_100, %c0_101, %c0_102, %c0_103] : memref<2x8x8x32xf32, #tpu.memory_space<vmem>>, vector<2x8x8x32xf32>
    tpu.vector_store %arg11[%c0_100, %c0_101, %c0_102, %c0_103], %87 {strides = array<i32>} : memref<2x8x8x32xf32, #tpu.memory_space<vmem>>, vector<2x8x8x32xf32>,
    return
  }
  func.func @transform_0(%arg0: i32) -> (i32, i32, i32) {
    %c0_i32 = arith.constant 0 : i32
    %c0_i32_0 = arith.constant 0 : i32
    %c0_i32_1 = arith.constant 0 : i32
    return %arg0, %c0_i32, %c0_i32_0 : i32, i32, i32
  }
  func.func @transform_1(%arg0: i32) -> (i32, i32) {
    %c0_i32 = arith.constant 0 : i32
    %c0_i32_0 = arith.constant 0 : i32
    %c0_i32_1 = arith.constant 0 : i32
    return %c0_i32, %c0_i32_0 : i32, i32
  }
  func.func @transform_2(%arg0: i32) -> (i32, i32) {
    %c0_i32 = arith.constant 0 : i32
    %c0_i32_0 = arith.constant 0 : i32
    %c0_i32_1 = arith.constant 0 : i32
    return %c0_i32, %c0_i32_0 : i32, i32
  }
  func.func @transform_3(%arg0: i32) -> (i32, i32) {
    %c0_i32 = arith.constant 0 : i32
    %c0_i32_0 = arith.constant 0 : i32
    %c0_i32_1 = arith.constant 0 : i32
    return %c0_i32, %c0_i32_0 : i32, i32
  }
  func.func @transform_4(%arg0: i32) -> (i32, i32) {
    %c0_i32 = arith.constant 0 : i32
    %c0_i32_0 = arith.constant 0 : i32
    %c0_i32_1 = arith.constant 0 : i32
    return %c0_i32, %c0_i32_0 : i32, i32
  }
  func.func @transform_5(%arg0: i32) -> (i32, i32) {
    %c0_i32 = arith.constant 0 : i32
    %c0_i32_0 = arith.constant 0 : i32
    %c0_i32_1 = arith.constant 0 : i32
    return %c0_i32, %c0_i32_0 : i32, i32
  }
  func.func @transform_6(%arg0: i32) -> (i32, i32) {
    %c0_i32 = arith.constant 0 : i32
    %c0_i32_0 = arith.constant 0 : i32
    %c0_i32_1 = arith.constant 0 : i32
    return %c0_i32, %c0_i32_0 : i32, i32
  }
  func.func @transform_7(%arg0: i32) -> (i32, i32) {
    %c0_i32 = arith.constant 0 : i32
    %c0_i32_0 = arith.constant 0 : i32
    %c0_i32_1 = arith.constant 0 : i32
    return %c0_i32, %c0_i32_0 : i32, i32
  }
  func.func @transform_8(%arg0: i32) -> (i32, i32) {
    %c0_i32 = arith.constant 0 : i32
    %c0_i32_0 = arith.constant 0 : i32
    %c0_i32_1 = arith.constant 0 : i32
    return %c0_i32, %c0_i32_0 : i32, i32
  }
  func.func @transform_9(%arg0: i32) -> (i32, i32) {
    %c0_i32 = arith.constant 0 : i32
    %c0_i32_0 = arith.constant 0 : i32
    %c0_i32_1 = arith.constant 0 : i32
    return %c0_i32, %c0_i32_0 : i32, i32
  }
  func.func @transform_10(%arg0: i32) -> (i32, i32, i32, i32) {
    %c0_i32 = arith.constant 0 : i32
    %c0_i32_0 = arith.constant 0 : i32
    %c0_i32_1 = arith.constant 0 : i32
    %c0_i32_2 = arith.constant 0 : i32
    return %arg0, %c0_i32, %c0_i32_0, %c0_i32_1 : i32, i32, i32, i32
  }
}

</mosaic_0001>

<bundles_post_ra>
// kernel: front_feature_extractor.1
= control target key start
LH: loop header
LB: loop body
LE: loop exit
PB: predicated region body
PF: predicated region fallthrough
CT: control target
= control target key end

     0   :  { %vm495_vm0 = vcmask 1042432   ;;  %s9518_s0 = inlined_call_operand.vmem [shape: f32[2,256,3], index: 0, kind: input, shape index: {}]   ;;  %s9519_s1 = inlined_call_operand.vmem [shape: f32[1,3], index: 1, kind: input, shape index: {}]   ;;  %s9520_s2 = inlined_call_operand.vmem [shape: f32[1,3], index: 2, kind: input, shape index: {}]   ;;  %s9521_s3 = inlined_call_operand.vmem [shape: f32[3,16], index: 3, kind: input, shape index: {}]   ;;  %s9522_s4 = inlined_call_operand.vmem [shape: f32[1,16], index: 4, kind: input, shape index: {}]   ;;  %s9523_s5 = inlined_call_operand.vmem [shape: f32[1,16], index: 5, kind: input, shape index: {}]   ;;  %s9524_s6 = inlined_call_operand.vmem [shape: bf16[144,16], index: 6, kind: input, shape index: {}]   ;;  %s9525_s7 = inlined_call_operand.vmem [shape: f32[1,16], index: 7, kind: input, shape index: {}]   ;;  %s9526_s8 = inlined_call_operand.vmem [shape: f32[1,16], index: 8, kind: input, shape index: {}]   ;;  %s9527_s9 = inlined_call_operand.vmem [shape: bf16[16,32], index: 9, kind: input, shape index: {}]   ;;  %s9528_s10 = inlined_call_operand.hbm [shape: f32[2,8,8,32], index: 10, kind: output, shape index: {}]  }
   0x1   :  { %v301_v0 = vld [vmem:[%s9521_s3] sm:$0x7]  ;;  %v38_v4 = vld [vmem:[%s9518_s0 + $0x8] sm:$0xff] }
   0x2   :  { %v37_v1 = vld [vmem:[%s9518_s0] sm:$0xff]  ;;  %6227 = vmatpush.msk.msra.mxu0 %vm495_vm0, %v301_v0  ;;  %6726 = vmatpush.msk.msra.mxu2 %vm495_vm0, %v301_v0 }
   0x3   :  { %v6869_v2 = vld [vmem:[%s9519_s1] ss:$0 sm:$0xff] }
   0x4   :  { %v6874_v3 = vld [vmem:[%s9520_s2] ss:$0 sm:$0xff]  ;;  %v105_v5 = vmul.f32 %v6869_v2, %v37_v1 }
   0x5   :  { %15 = vsyncpa [#allocation6], 0  ;;  %v106_v7 = vmul.f32 %v6869_v2, %v38_v4  ;;  %vm302_vm1 = vcmask 23552   ;;  %v39_v10 = vld [vmem:[%s9518_s0 + $0x10] sm:$0xff]  ;;  %v40_v14 = vld [vmem:[%s9518_s0 + $0x18] sm:$0xff]  ;;  %vm908_vm2 = vcmask 130048  }
   0x6   :  { %v173_v6 = vadd.f32 %v6874_v3, %v105_v5  ;;  %v107_v12 = vmul.f32 %v6869_v2, %v39_v10  ;;  %v108_v16 = vmul.f32 %v6869_v2, %v40_v14  ;;  %v41_v18 = vld [vmem:[%s9518_s0 + $0x20] sm:$0xff]  ;;  %v42_v22 = vld [vmem:[%s9518_s0 + $0x28] sm:$0xff]  ;;  %v43_v26 = vld [vmem:[%s9518_s0 + $0x30] sm:$0xff]  ;;  %v6794_v47 = vmov 0.0   ;;  %s6795_s23 = smov 16   ;;  %s6796_s24 = smov 32  }
   0x7   :  { %v174_v9 = vadd.f32 %v6874_v3, %v106_v7  ;;  %v109_v20 = vmul.f32 %v6869_v2, %v41_v18  ;;  %v110_v24 = vmul.f32 %v6869_v2, %v42_v22  ;;  %v111_v28 = vmul.f32 %v6869_v2, %v43_v26  ;;  %v44_v30 = vld [vmem:[%s9518_s0 + $0x38] sm:$0xff]  ;;  %v45_v34 = vld [vmem:[%s9518_s0 + $0x40] sm:$0xff]  ;;  %v46_v38 = vld [vmem:[%s9518_s0 + $0x48] sm:$0xff]  ;;  %909 = vst.msk [vmem:[#allocation2] sm:$0xff] %vm908_vm2, %v6794_v47  ;;  %s6797_s14 = smov 48   ;;  %s6798_s17 = smov 64  }
   0x8   :  { %v237_v8 = vmax.f32 %v173_v6, 0.0  ;;  %v175_v13 = vadd.f32 %v6874_v3, %v107_v12  ;;  %v176_v17 = vadd.f32 %v6874_v3, %v108_v16  ;;  %v112_v32 = vmul.f32 %v6869_v2, %v44_v30  ;;  %v47_v42 = vld [vmem:[%s9518_s0 + $0x50] sm:$0xff]  ;;  %v48_v46 = vld [vmem:[%s9518_s0 + $0x58] sm:$0xff]  ;;  %910 = vst.msk [vmem:[#allocation2 + $0x8] sm:$0xff] %vm908_vm2, %v6794_v47  ;;  %v49_v51 = vld [vmem:[%s9518_s0 + $0x60] sm:$0xff]  ;;  %s6799_s20 = smov 80  }
   0x9   :  { %v238_v11 = vmax.f32 %v174_v9, 0.0  ;;  %v177_v21 = vadd.f32 %v6874_v3, %v109_v20  ;;  %v178_v25 = vadd.f32 %v6874_v3, %v110_v24  ;;  %v179_v29 = vadd.f32 %v6874_v3, %v111_v28  ;;  %913 = vst.msk [vmem:[#allocation2 + $0x1b0] sm:$0xff] %vm908_vm2, %v6794_v47  ;;  %v50_v59 = vld [vmem:[%s9518_s0 + $0x68] sm:$0xff]  ;;  %v51_v63 = vld [vmem:[%s9518_s0 + $0x70] sm:$0xff]  ;;  %v52_v5 = vld [vmem:[%s9518_s0 + $0x78] sm:$0xff]  ;;  %s6800_s26 = smov 112  }
   0xa   :  { %6228 = vmatmul.msk.f32.vlgmr.msra.gmra.mxu0 %vm302_vm1, %v237_v8  ;;  %v239_v15 = vmax.f32 %v175_v13, 0.0  ;;  %v240_v19 = vmax.f32 %v176_v17, 0.0  ;;  %v180_v33 = vadd.f32 %v6874_v3, %v112_v32  ;;  %v113_v36 = vmul.f32 %v6869_v2, %v45_v34  ;;  %914 = vst.msk [vmem:[#allocation2 + $0x1b8] sm:$0xff] %vm908_vm2, %v6794_v47  ;;  %v53_v10 = vld [vmem:[%s9518_s0 + $0x80] sm:$0xff]  ;;  %v54_v17 = vld [vmem:[%s9518_s0 + $0x88] sm:$0xff]  ;;  %s6801_s27 = smov 96  }
   0xb   :  { %v241_v23 = vmax.f32 %v177_v21, 0.0  ;;  %v242_v27 = vmax.f32 %v178_v25, 0.0  ;;  %v243_v31 = vmax.f32 %v179_v29, 0.0  ;;  %v114_v40 = vmul.f32 %v6869_v2, %v46_v38  ;;  %917 = vst.msk [vmem:[#allocation2 + $0x198] sm:$0xff] %vm908_vm2, %v6794_v47  ;;  %v7121_v22 = vld [vmem:[%s9522_s4] ss:$0 sm:$0xff] }
   0xc   :  { %v244_v35 = vmax.f32 %v180_v33, 0.0  ;;  %v181_v37 = vadd.f32 %v6874_v3, %v113_v36  ;;  %v115_v44 = vmul.f32 %v6869_v2, %v47_v42  ;;  %v116_v49 = vmul.f32 %v6869_v2, %v48_v46  ;;  %918 = vst.msk [vmem:[#allocation2 + $0x1a0] sm:$0xff] %vm908_vm2, %v6794_v47  ;;  %v56_v33 = vld [vmem:[%s9518_s0 + $0x98] sm:$0xff]  ;;  %s6215_s19 = sshll.u32 %s9528_s10, 4  ;;  %s6803_s21 = smov 128   ;;  %s6216_s19 = int_to_ptr.hbm [resolvable:$true] %s6215_s19 }
   0xd   :  { %v182_v41 = vadd.f32 %v6874_v3, %v114_v40  ;;  %vm923_vm3 = vcmask 122880   ;;  %920 = vst.msk [vmem:[#allocation2 + $0x348] sm:$0xff] %vm908_vm2, %v6794_v47  ;;  %v117_v57 = vmul.f32 %v6869_v2, %v49_v51  ;;  %v118_v61 = vmul.f32 %v6869_v2, %v50_v59  ;;  %s6804_s22 = smov 8  }
   0xe   :  { %v245_v39 = vmax.f32 %v181_v37, 0.0  ;;  %v183_v45 = vadd.f32 %v6874_v3, %v115_v44  ;;  %v184_v50 = vadd.f32 %v6874_v3, %v116_v49  ;;  %924 = vst.msk [vmem:[#allocation2] sm:$0x1] %vm923_vm3, %v6794_v47  ;;  %v119_v1 = vmul.f32 %v6869_v2, %v51_v63  ;;  %v100_v63 = vld [vmem:[%s9518_s0 + $0x1f8] sm:$0xff] }
   0xf   :  { %v246_v43 = vmax.f32 %v182_v41, 0.0  ;;  %v1254_v52 = vld [vmem:[#allocation2 + $0x1] sm:$0xff]  ;;  %921 = vst.msk [vmem:[#allocation2 + $0x350] sm:$0xff] %vm908_vm2, %v6794_v47  ;;  %v185_v58 = vadd.f32 %v6874_v3, %v117_v57  ;;  %v186_v62 = vadd.f32 %v6874_v3, %v118_v61  ;;  %v120_v7 = vmul.f32 %v6869_v2, %v52_v5 }
  0x10   :  { %v247_v48 = vmax.f32 %v183_v45, 0.0  ;;  %v1703_v53 = vld [vmem:[#allocation2 + $0x2] sm:$0xff]  ;;  %v1318_v54 = vpack.c.bf16 %v1254_v52, %v1254_v52  ;;  %925 = vst.msk [vmem:[#allocation2 + $0x18] sm:$0x1] %vm923_vm3, %v6794_v47  ;;  %v248_v56 = vmax.f32 %v184_v50, 0.0  ;;  %v187_v4 = vadd.f32 %v6874_v3, %v119_v1 }
  0x11   :  { %v1767_v55 = vpack.c.bf16 %v1703_v53, %v1703_v53  ;;  %926 = vst.msk [vmem:[#allocation2 + $0x30] sm:$0x1] %vm923_vm3, %v6794_v47  ;;  %v249_v60 = vmax.f32 %v185_v58, 0.0  ;;  %v250_v0 = vmax.f32 %v186_v62, 0.0  ;;  %v188_v8 = vadd.f32 %v6874_v3, %v120_v7  ;;  %v1286_v12 = vld [vmem:[#allocation2 + $0x1b1] sm:$0xff]  ;;  %v57_v45 = vld [vmem:[%s9518_s0 + $0xa0] sm:$0xff] }
  0x12   :  { %6229 = vmatmul.msk.f32.gmra.mxu0 %vm302_vm1, %v238_v11  ;;  %1446 = vrot.lane.b32.xlu0 %v1318_v54, %s6795_s23  ;;  %927 = vst.msk [vmem:[#allocation2 + $0x48] sm:$0x1] %vm923_vm3, %v6794_v47  ;;  %v251_v6 = vmax.f32 %v187_v4, 0.0  ;;  %v121_v11 = vmul.f32 %v6869_v2, %v53_v10  ;;  %v1350_v13 = vpack.c.bf16 %v1286_v12, %v1286_v12  ;;  %vm911_vm4 = vcmask 123904   ;;  %v58_v62 = vld [vmem:[%s9518_s0 + $0xa8] sm:$0xff] }
  0x13   :  { %1895 = vrot.lane.b32.xlu1 %v1767_v55, %s6796_s24  ;;  %928 = vst.msk [vmem:[#allocation2 + $0x60] sm:$0x1] %vm923_vm3, %v6794_v47  ;;  %v252_v9 = vmax.f32 %v188_v8, 0.0  ;;  %v122_v18 = vmul.f32 %v6869_v2, %v54_v17  ;;  %v124_v34 = vmul.f32 %v6869_v2, %v56_v33  ;;  %v125_v49 = vmul.f32 %v6869_v2, %v57_v45  ;;  %v60_v45 = vld [vmem:[%s9518_s0 + $0xb8] sm:$0xff] }
  0x14   :  { %929 = vst.msk [vmem:[#allocation2 + $0x78] sm:$0x1] %vm923_vm3, %v6794_v47  ;;  %v189_v14 = vadd.f32 %v6874_v3, %v121_v11  ;;  %1510 = vrot.lane.b32.xlu2 %v1350_v13, %s6795_s23  ;;  %vm1189_vm5 = vcmask 125952   ;;  %v126_v4 = vmul.f32 %v6869_v2, %v58_v62  ;;  %v168_v5 = vmul.f32 %v6869_v2, %v100_v63 }
  0x15   :  { %930 = vst.msk [vmem:[#allocation2 + $0x90] sm:$0x1] %vm923_vm3, %v6794_v47  ;;  %v192_v36 = vadd.f32 %v6874_v3, %v124_v34  ;;  %v193_v51 = vadd.f32 %v6874_v3, %v125_v49  ;;  %vm1638_vm6 = vcmask 257152   ;;  %vm2087_vm7 = vcmask 388352  }
  0x16   :  { %931 = vst.msk [vmem:[#allocation2 + $0xa8] sm:$0x1] %vm923_vm3, %v6794_v47  ;;  %v253_v16 = vmax.f32 %v189_v14, 0.0  ;;  %v194_v12 = vadd.f32 %v6874_v3, %v126_v4  ;;  %v236_v13 = vadd.f32 %v6874_v3, %v168_v5  ;;  %v6724_v14 = vld [vmem:[%s9524_s6 + $0x40] sm:$0xff]  ;;  %vm2536_vm8 = vcmask 519552  }
  0x17   :  { %932 = vst.msk [vmem:[#allocation2 + $0xc0] sm:$0x1] %vm923_vm3, %v6794_v47  ;;  %v256_v41 = vmax.f32 %v192_v36, 0.0  ;;  %v257_v55 = vmax.f32 %v193_v51, 0.0  ;;  %5286 = vmatpush.bf16.msrb.mxu2 %v6724_v14  ;;  %vm2985_vm9 = vcmask 650752   ;;  %vm3434_vm10 = vcmask 781952  }
  0x18   :  { %933 = vst.msk [vmem:[#allocation2 + $0xd8] sm:$0x1] %vm923_vm3, %v6794_v47  ;;  %vm3884_vm11 = vcmask 913152   ;;  %vm4333_vm12 = vcmask 1044352   ;;  %vm5953_vm13 = vcmask 261120  }
  0x19   :  { %934 = vst.msk [vmem:[#allocation2 + $0xf0] sm:$0x1] %vm923_vm3, %v6794_v47 }
  0x1a   :  { %6230 = vmatmul.msk.f32.gmra.mxu0 %vm302_vm1, %v239_v15  ;;  %935 = vst.msk [vmem:[#allocation2 + $0x108] sm:$0x1] %vm923_vm3, %v6794_v47 }
  0x1b   :  { %936 = vst.msk [vmem:[#allocation2 + $0x120] sm:$0x1] %vm923_vm3, %v6794_v47 }
  0x1c   :  { %937 = vst.msk [vmem:[#allocation2 + $0x138] sm:$0x1] %vm923_vm3, %v6794_v47 }
  0x1d   :  { %938 = vst.msk [vmem:[#allocation2 + $0x150] sm:$0x1] %vm923_vm3, %v6794_v47 }
  0x1e   :  { %939 = vst.msk [vmem:[#allocation2 + $0x168] sm:$0x1] %vm923_vm3, %v6794_v47 }
  0x1f   :  { %940 = vst.msk [vmem:[#allocation2 + $0x180] sm:$0x1] %vm923_vm3, %v6794_v47 }
  0x20   :  { %943 = vst.msk [vmem:[#allocation2 + $0x1c8] sm:$0x1] %vm923_vm3, %v6794_v47 }
  0x21   :  { %944 = vst.msk [vmem:[#allocation2 + $0x1e0] sm:$0x1] %vm923_vm3, %v6794_v47 }
  0x22   :  { %6231 = vmatmul.msk.f32.gmra.mxu0 %vm302_vm1, %v240_v19  ;;  %945 = vst.msk [vmem:[#allocation2 + $0x1f8] sm:$0x1] %vm923_vm3, %v6794_v47  ;;  %v190_v19 = vadd.f32 %v6874_v3, %v122_v18 }
  0x23   :  { %946 = vst.msk [vmem:[#allocation2 + $0x210] sm:$0x1] %vm923_vm3, %v6794_v47 }
  0x24   :  { %947 = vst.msk [vmem:[#allocation2 + $0x228] sm:$0x1] %vm923_vm3, %v6794_v47  ;;  %v254_v21 = vmax.f32 %v190_v19, 0.0 }
  0x25   :  { %948 = vst.msk [vmem:[#allocation2 + $0x240] sm:$0x1] %vm923_vm3, %v6794_v47 }
  0x26   :  { %949 = vst.msk [vmem:[#allocation2 + $0x258] sm:$0x1] %vm923_vm3, %v6794_v47 }
  0x27   :  { %950 = vst.msk [vmem:[#allocation2 + $0x270] sm:$0x1] %vm923_vm3, %v6794_v47 }
  0x28   :  { %951 = vst.msk [vmem:[#allocation2 + $0x288] sm:$0x1] %vm923_vm3, %v6794_v47 }
  0x29   :  { %952 = vst.msk [vmem:[#allocation2 + $0x2a0] sm:$0x1] %vm923_vm3, %v6794_v47 }
  0x2a   :  { %6232 = vmatmul.msk.f32.gmra.mxu0 %vm302_vm1, %v241_v23  ;;  %953 = vst.msk [vmem:[#allocation2 + $0x2b8] sm:$0x1] %vm923_vm3, %v6794_v47  ;;  %v55_v23 = vld [vmem:[%s9518_s0 + $0x90] sm:$0xff] }
  0x2b   :  { %954 = vst.msk [vmem:[#allocation2 + $0x2d0] sm:$0x1] %vm923_vm3, %v6794_v47  ;;  %v123_v24 = vmul.f32 %v6869_v2, %v55_v23 }
  0x2c   :  { %955 = vst.msk [vmem:[#allocation2 + $0x2e8] sm:$0x1] %vm923_vm3, %v6794_v47 }
  0x2d   :  { %956 = vst.msk [vmem:[#allocation2 + $0x300] sm:$0x1] %vm923_vm3, %v6794_v47  ;;  %v191_v25 = vadd.f32 %v6874_v3, %v123_v24 }
  0x2e   :  { %957 = vst.msk [vmem:[#allocation2 + $0x318] sm:$0x1] %vm923_vm3, %v6794_v47 }
  0x2f   :  { %958 = vst.msk [vmem:[#allocation2 + $0x330] sm:$0x1] %vm923_vm3, %v6794_v47  ;;  %v255_v29 = vmax.f32 %v191_v25, 0.0 }
  0x30   :  { %961 = vst.msk [vmem:[#allocation2 + $0x29] sm:$0x1] %vm923_vm3, %v6794_v47 }
  0x31   :  { %962 = vst.msk [vmem:[#allocation2 + $0x41] sm:$0x1] %vm923_vm3, %v6794_v47 }
  0x32   :  { %6233 = vmatmul.msk.f32.gmra.mxu0 %vm302_vm1, %v242_v27  ;;  %963 = vst.msk [vmem:[#allocation2 + $0x59] sm:$0x1] %vm923_vm3, %v6794_v47  ;;  %v7140_v27 = vld [vmem:[%s9523_s5] ss:$0 sm:$0xff] }
  0x33   :  { %964 = vst.msk [vmem:[#allocation2 + $0x71] sm:$0x1] %vm923_vm3, %v6794_v47 }
  0x34   :  { %965 = vst.msk [vmem:[#allocation2 + $0x89] sm:$0x1] %vm923_vm3, %v6794_v47 }
  0x35   :  { %966 = vst.msk [vmem:[#allocation2 + $0xa1] sm:$0x1] %vm923_vm3, %v6794_v47 }
  0x36   :  { %967 = vst.msk [vmem:[#allocation2 + $0xb9] sm:$0x1] %vm923_vm3, %v6794_v47 }
  0x37   :  { %968 = vst.msk [vmem:[#allocation2 + $0xd1] sm:$0x1] %vm923_vm3, %v6794_v47 }
  0x38   :  { %969 = vst.msk [vmem:[#allocation2 + $0xe9] sm:$0x1] %vm923_vm3, %v6794_v47 }
  0x39   :  { %970 = vst.msk [vmem:[#allocation2 + $0x101] sm:$0x1] %vm923_vm3, %v6794_v47 }
  0x3a   :  { %6234 = vmatmul.msk.f32.gmra.mxu0 %vm302_vm1, %v243_v31  ;;  %971 = vst.msk [vmem:[#allocation2 + $0x119] sm:$0x1] %vm923_vm3, %v6794_v47 }
  0x3b   :  { %972 = vst.msk [vmem:[#allocation2 + $0x131] sm:$0x1] %vm923_vm3, %v6794_v47 }
  0x3c   :  { %973 = vst.msk [vmem:[#allocation2 + $0x149] sm:$0x1] %vm923_vm3, %v6794_v47 }
  0x3d   :  { %974 = vst.msk [vmem:[#allocation2 + $0x161] sm:$0x1] %vm923_vm3, %v6794_v47 }
  0x3e   :  { %975 = vst.msk [vmem:[#allocation2 + $0x179] sm:$0x1] %vm923_vm3, %v6794_v47 }
  0x3f   :  { %976 = vst.msk [vmem:[#allocation2 + $0x191] sm:$0x1] %vm923_vm3, %v6794_v47 }
  0x40   :  { %979 = vst.msk [vmem:[#allocation2 + $0x1d9] sm:$0x1] %vm923_vm3, %v6794_v47 }
  0x41   :  { %980 = vst.msk [vmem:[#allocation2 + $0x1f1] sm:$0x1] %vm923_vm3, %v6794_v47 }
  0x42   :  { %6235 = vmatmul.msk.f32.gmra.mxu0 %vm302_vm1, %v244_v35  ;;  %981 = vst.msk [vmem:[#allocation2 + $0x209] sm:$0x1] %vm923_vm3, %v6794_v47 }
  0x43   :  { %982 = vst.msk [vmem:[#allocation2 + $0x221] sm:$0x1] %vm923_vm3, %v6794_v47 }
  0x44   :  { %983 = vst.msk [vmem:[#allocation2 + $0x239] sm:$0x1] %vm923_vm3, %v6794_v47 }
  0x45   :  { %984 = vst.msk [vmem:[#allocation2 + $0x251] sm:$0x1] %vm923_vm3, %v6794_v47 }
  0x46   :  { %985 = vst.msk [vmem:[#allocation2 + $0x269] sm:$0x1] %vm923_vm3, %v6794_v47 }
  0x47   :  { %986 = vst.msk [vmem:[#allocation2 + $0x281] sm:$0x1] %vm923_vm3, %v6794_v47 }
  0x48   :  { %987 = vst.msk [vmem:[#allocation2 + $0x299] sm:$0x1] %vm923_vm3, %v6794_v47 }
  0x49   :  { %988 = vst.msk [vmem:[#allocation2 + $0x2b1] sm:$0x1] %vm923_vm3, %v6794_v47 }
  0x4a   :  { %6236 = vmatmul.msk.f32.gmra.mxu0 %vm302_vm1, %v245_v39  ;;  %989 = vst.msk [vmem:[#allocation2 + $0x2c9] sm:$0x1] %vm923_vm3, %v6794_v47 }
  0x4b   :  { %990 = vst.msk [vmem:[#allocation2 + $0x2e1] sm:$0x1] %vm923_vm3, %v6794_v47 }
  0x4c   :  { %991 = vst.msk [vmem:[#allocation2 + $0x2f9] sm:$0x1] %vm923_vm3, %v6794_v47 }
  0x4d   :  { %992 = vst.msk [vmem:[#allocation2 + $0x311] sm:$0x1] %vm923_vm3, %v6794_v47 }
  0x4e   :  { %993 = vst.msk [vmem:[#allocation2 + $0x329] sm:$0x1] %vm923_vm3, %v6794_v47 }
  0x4f   :  { %994 = vst.msk [vmem:[#allocation2 + $0x341] sm:$0x1] %vm923_vm3, %v6794_v47 }
  0x50   :  { %941 = vst.msk [vmem:[#allocation2 + $0x198] sm:$0x1] %vm923_vm3, %v6794_v47 }
  0x51   :  { %942 = vst.msk [vmem:[#allocation2 + $0x1b0] sm:$0x1] %vm923_vm3, %v6794_v47 }
  0x52   :  { %6237 = vmatmul.msk.f32.gmra.mxu0 %vm302_vm1, %v246_v43  ;;  %959 = vst.msk [vmem:[#allocation2 + $0x348] sm:$0x1] %vm923_vm3, %v6794_v47 }
  0x53   :  { %912 = vst.msk [vmem:[#allocation2 + $0x10] sm:$0x3] %vm911_vm4, %v6794_v47 }
  0x54   :  { %919 = vst.msk [vmem:[#allocation2 + $0x1a8] sm:$0x3] %vm911_vm4, %v6794_v47 }
  0x55   :  { %977 = vst.msk [vmem:[#allocation2 + $0x1a9] sm:$0x1] %vm923_vm3, %v6794_v47 }
  0x56   :  { %915 = vst.msk [vmem:[#allocation2 + $0x1c0] sm:$0x3] %vm911_vm4, %v6794_v47 }
  0x57   :  { %922 = vst.msk [vmem:[#allocation2 + $0x358] sm:$0x3] %vm911_vm4, %v6794_v47 }
  0x58   :  { %960 = vst.msk [vmem:[#allocation2 + $0x11] sm:$0x1] %vm923_vm3, %v6794_v47 }
  0x59   :  { %978 = vst.msk [vmem:[#allocation2 + $0x1c1] sm:$0x1] %vm923_vm3, %v6794_v47 }
  0x5a   :  { %6238 = vmatmul.msk.f32.gmra.mxu0 %vm302_vm1, %v247_v48  ;;  %v1255_v46 = vld [vmem:[#allocation2 + $0x9] sm:$0xff]  ;;  %995 = vst.msk [vmem:[#allocation2 + $0x359] sm:$0x1] %vm923_vm3, %v6794_v47 }
  0x5b   :  { %v1319_v50 = vpack.c.bf16 %v1255_v46, %v1255_v46 }
  0x5d   :  { %1448 = vrot.lane.b32.xlu0 %v1319_v50, %s6795_s23  ;;  %v1287_v53 = vld [vmem:[#allocation2 + $0x1b9] sm:$0xff] }
  0x5e   :  { %v1351_v59 = vpack.c.bf16 %v1287_v53, %v1287_v53 }
  0x62   :  { %6239 = vmatmul.msk.f32.gmra.mxu0 %vm302_vm1, %v248_v56  ;;  %v1704_v56 = vld [vmem:[#allocation2 + $0xa] sm:$0xff] }
  0x63   :  { %v1768_v57 = vpack.c.bf16 %v1704_v56, %v1704_v56 }
  0x65   :  { %1897 = vrot.lane.b32.xlu2 %v1768_v57, %s6796_s24  ;;  %1512 = vrot.lane.b32.xlu0 %v1351_v59, %s6795_s23  ;;  %v61_v59 = vld [vmem:[%s9518_s0 + $0xc0] sm:$0xff] }
  0x6a   :  { %6240 = vmatmul.msk.f32.gmra.mxu0 %vm302_vm1, %v249_v60  ;;  %v1736_v60 = vld [vmem:[#allocation2 + $0x1ba] sm:$0xff] }
  0x72   :  { %6241 = vmatmul.msk.f32.gmra.mxu0 %vm302_vm1, %v250_v0  ;;  %v1800_v0 = vpack.c.bf16 %v1736_v60, %v1736_v60 }
  0x74   :  { %1961 = vrot.lane.b32.xlu1 %v1800_v0, %s6796_s24 }
  0x7a   :  { %6242 = vmatmul.msk.f32.gmra.mxu0 %vm302_vm1, %v251_v6 }
  0x82   :  { %6243 = vmatmul.msk.f32.gmra.mxu0 %vm302_vm1, %v252_v9 }
  0x87   :  { %v516_v15 = vpop.f32.mrf.mxu0 }
  0x88   :  { %v712_v26 = vmul.f32 %v7121_v22, %v516_v15  ;;  %v1735_v15 = vld [vmem:[#allocation2 + $0x1b2] sm:$0xff] }
  0x8a   :  { %6244 = vmatmul.msk.f32.gmra.mxu0 %vm302_vm1, %v253_v16  ;;  %v780_v31 = vadd.f32 %v7140_v27, %v712_v26  ;;  %v1799_v26 = vpack.c.bf16 %v1735_v15, %v1735_v15 }
  0x8c   :  { %v844_v37 = vmax.f32 %v780_v31, 0.0  ;;  %1959 = vrot.lane.b32.xlu0 %v1799_v26, %s6796_s24 }
  0x8e   :  { %997 = vst.msk [vmem:[#allocation2 + $0x19] sm:$0xff] %vm908_vm2, %v844_v37 }
  0x8f   :  { %v519_v20 = vpop.f32.mrf.mxu0 }
  0x90   :  { %v713_v30 = vmul.f32 %v7121_v22, %v519_v20  ;;  %v258_v20 = vmax.f32 %v194_v12, 0.0 }
  0x92   :  { %6245 = vmatmul.msk.f32.gmra.mxu0 %vm302_vm1, %v254_v21  ;;  %v781_v35 = vadd.f32 %v7140_v27, %v713_v30  ;;  %v300_v21 = vmax.f32 %v236_v13, 0.0 }
  0x94   :  { %v845_v42 = vmax.f32 %v781_v35, 0.0  ;;  %6291 = vmatmul.msk.f32.vlgmr.msra.gmra.mxu2 %vm302_vm1, %v300_v21  ;;  %v63_v21 = vld [vmem:[%s9518_s0 + $0xd0] sm:$0xff] }
  0x95   :  { %v2152_v58 = vld [vmem:[#allocation2 + $0x18] sm:$0xff] }
  0x96   :  { %998 = vst.msk [vmem:[#allocation2 + $0x21] sm:$0xff] %vm908_vm2, %v845_v42  ;;  %v2216_v61 = vpack.c.bf16 %v2152_v58, %v2152_v58  ;;  %v1256_v6 = vld [vmem:[#allocation2 + $0x19] sm:$0xff] }
  0x97   :  { %v522_v28 = vpop.f32.mrf.mxu0  ;;  %v1320_v24 = vpack.c.bf16 %v1256_v6, %v1256_v6 }
  0x98   :  { %v714_v32 = vmul.f32 %v7121_v22, %v522_v28  ;;  %1192 = vst.msk [vmem:[#allocation3 + $0x10] sm:$0xf] %vm1189_vm5, %v2216_v61  ;;  %v59_v28 = vld [vmem:[%s9518_s0 + $0xb0] sm:$0xff]  ;;  %2344 = vrot.lane.b32.xlu2 %v2216_v61, %s6797_s14  ;;  %v129_v61 = vmul.f32 %v6869_v2, %v61_v59 }
  0x99   :  { %v127_v30 = vmul.f32 %v6869_v2, %v59_v28  ;;  %1450 = vrot.lane.b32.xlu1 %v1320_v24, %s6795_s23 }
  0x9a   :  { %6246 = vmatmul.msk.f32.gmra.mxu0 %vm302_vm1, %v255_v29  ;;  %v782_v38 = vadd.f32 %v7140_v27, %v714_v32  ;;  %v197_v63 = vadd.f32 %v6874_v3, %v129_v61 }
  0x9b   :  { %v195_v32 = vadd.f32 %v6874_v3, %v127_v30 }
  0x9c   :  { %v846_v44 = vmax.f32 %v782_v38, 0.0  ;;  %v261_v5 = vmax.f32 %v197_v63, 0.0  ;;  %v1061_v63 = vld [vmem:[#allocation2] sm:$0xff] }
  0x9d   :  { %v2153_v7 = vld [vmem:[#allocation2 + $0x20] sm:$0xff]  ;;  %v259_v38 = vmax.f32 %v195_v32, 0.0 }
  0x9e   :  { %999 = vst.msk [vmem:[#allocation2 + $0x31] sm:$0xff] %vm908_vm2, %v846_v44  ;;  %v7208_v10 = vpack.c.bf16 %v2153_v7, %v2153_v7  ;;  %v1257_v34 = vld [vmem:[#allocation2 + $0x21] sm:$0xff] }
  0x9f   :  { %v525_v39 = vpop.f32.mrf.mxu0  ;;  %v1705_v36 = vld [vmem:[#allocation2 + $0x1a] sm:$0xff]  ;;  %v3051_v53 = vld [vmem:[#allocation2 + $0x22] sm:$0xff] }
  0xa0   :  { %v715_v40 = vmul.f32 %v7121_v22, %v525_v39  ;;  %1193 = vst.msk [vmem:[#allocation3 + $0x18] sm:$0xf] %vm1189_vm5, %v7208_v10  ;;  %2793 = vrot.lane.b32.xlu2 %v1320_v24, %s6798_s17  ;;  %v3115_v58 = vpack.c.bf16 %v3051_v53, %v3051_v53  ;;  %v62_v7 = vld [vmem:[%s9518_s0 + $0xc8] sm:$0xff] }
  0xa2   :  { %v783_v43 = vadd.f32 %v7140_v27, %v715_v40  ;;  %6247 = vmatmul.msk.f32.gmra.mxu0 %vm302_vm1, %v256_v41  ;;  %v1321_v40 = vpack.c.bf16 %v1257_v34, %v1257_v34 }
  0xa4   :  { %v847_v48 = vmax.f32 %v783_v43, 0.0  ;;  %v1769_v43 = vpack.c.bf16 %v1705_v36, %v1705_v36  ;;  %1452 = vrot.lane.b32.xlu1 %v1321_v40, %s6795_s23 }
  0xa5   :  { %v3500_v19 = vld [vmem:[#allocation2 + $0x30] sm:$0xff] }
  0xa6   :  { %1000 = vst.msk [vmem:[#allocation2 + $0x39] sm:$0xff] %vm908_vm2, %v847_v48  ;;  %v7220_v23 = vpack.c.bf16 %v3500_v19, %v3500_v19  ;;  %v128_v48 = vmul.f32 %v6869_v2, %v60_v45  ;;  %1899 = vrot.lane.b32.xlu0 %v1769_v43, %s6796_s24  ;;  %v1258_v62 = vld [vmem:[#allocation2 + $0x31] sm:$0xff] }
  0xa7   :  { %v528_v52 = vpop.f32.mrf.mxu0 }
  0xa8   :  { %v716_v54 = vmul.f32 %v7121_v22, %v528_v52  ;;  %1194 = vst.msk [vmem:[#allocation3 + $0x20] sm:$0xf] %vm1189_vm5, %v7220_v23  ;;  %3244 = vrot.lane.b32.xlu2 %v3115_v58, %s6799_s20 }
  0xaa   :  { %v784_v47 = vadd.f32 %v7140_v27, %v716_v54  ;;  %6248 = vmatmul.msk.f32.gmra.mxu0 %vm302_vm1, %v257_v55  ;;  %v196_v55 = vadd.f32 %v6874_v3, %v128_v48 }
  0xac   :  { %v848_v1 = vmax.f32 %v784_v47, 0.0  ;;  %v260_v57 = vmax.f32 %v196_v55, 0.0  ;;  %1901 = vrot.lane.b32.xlu1 %v3115_v58, %s6796_s24  ;;  %v1511_v58 = vpop.permute.xlu2 %1510 }
  0xad   :  { %v4398_v8 = vld [vmem:[#allocation2 + $0x32] sm:$0xff]  ;;  %v4399_v9 = vld [vmem:[#allocation2 + $0x3a] sm:$0xff] }
  0xae   :  { %1001 = vst.msk [vmem:[#allocation2 + $0x49] sm:$0xff] %vm908_vm2, %v848_v1  ;;  %v7215_v16 = vpack.c.bf16 %v4398_v8, %v4398_v8  ;;  %v7217_v17 = vpack.c.bf16 %v4399_v9, %v4399_v9  ;;  %v3501_v31 = vld [vmem:[#allocation2 + $0x38] sm:$0xff]  ;;  %2346 = vrot.lane.b32.xlu0 %v7208_v10, %s6797_s14  ;;  %v1322_v1 = vpack.c.bf16 %v1258_v62, %v1258_v62 }
  0xaf   :  { %v531_v11 = vpop.f32.mrf.mxu0  ;;  %v7241_v33 = vpack.c.bf16 %v3501_v31, %v3501_v31  ;;  %v130_v9 = vmul.f32 %v6869_v2, %v62_v7  ;;  %v1259_v26 = vld [vmem:[#allocation2 + $0x39] sm:$0xff]  ;;  %v66_v7 = vld [vmem:[%s9518_s0 + $0xe8] sm:$0xff] }
  0xb0   :  { %v717_v18 = vmul.f32 %v7121_v22, %v531_v11  ;;  %4526 = vst.msk [vmem:[#allocation3 + $0x4] sm:$0xf] %vm1189_vm5, %v7215_v16  ;;  %1454 = vrot.lane.b32.xlu2 %v1322_v1, %s6795_s23 }
  0xb1   :  { %4527 = vst.msk [vmem:[#allocation3 + $0xc] sm:$0xf] %vm1189_vm5, %v7217_v17  ;;  %v198_v14 = vadd.f32 %v6874_v3, %v130_v9  ;;  %v134_v9 = vmul.f32 %v6869_v2, %v66_v7 }
  0xb2   :  { %v785_v25 = vadd.f32 %v7140_v27, %v717_v18  ;;  %6249 = vmatmul.msk.f32.gmra.mxu0 %vm302_vm1, %v258_v20  ;;  %1195 = vst.msk [vmem:[#allocation3 + $0x28] sm:$0xf] %vm1189_vm5, %v7241_v33 }
  0xb3   :  { %v262_v19 = vmax.f32 %v198_v14, 0.0 }
  0xb4   :  { %v849_v29 = vmax.f32 %v785_v25, 0.0  ;;  %3242 = vrot.lane.b32.xlu1 %v1769_v43, %s6799_s20  ;;  %v131_v25 = vmul.f32 %v6869_v2, %v63_v21 }
  0xb5   :  { %v3502_v28 = vld [vmem:[#allocation2 + $0x48] sm:$0xff] }
  0xb6   :  { %1002 = vst.msk [vmem:[#allocation2 + $0x51] sm:$0xff] %vm908_vm2, %v849_v29  ;;  %2795 = vrot.lane.b32.xlu0 %v1321_v40, %s6798_s17  ;;  %v199_v30 = vadd.f32 %v6874_v3, %v131_v25  ;;  %v7312_v31 = vpack.c.bf16 %v3502_v28, %v3502_v28 }
  0xb7   :  { %v534_v35 = vpop.f32.mrf.mxu0  ;;  %v6652_v39 = vld [vmem:[#allocation3 + $0x4] sm:$0xf] }
  0xb8   :  { %v718_v37 = vmul.f32 %v7121_v22, %v534_v35  ;;  %v6296_v42 = vld [vmem:[#allocation3 + $0x8] sm:$0xf0]  ;;  %4141 = vrot.lane.b32.xlu2 %v1322_v1, %s6800_s26  ;;  %1196 = vst.msk [vmem:[#allocation3 + $0x30] sm:$0xf] %vm1189_vm5, %v7312_v31 }
  0xb9   :  { %v6299_v44 = vor.u32 %v6652_v39, %v6296_v42  ;;  %v263_v39 = vmax.f32 %v199_v30, 0.0 }
  0xba   :  { %v786_v41 = vadd.f32 %v7140_v27, %v718_v37  ;;  %6250 = vmatmul.msk.f32.gmra.mxu0 %vm302_vm1, %v259_v38  ;;  %v7318_v37 = vpack.c.bf16 %v1259_v26, %v1259_v26 }
  0xbb   :  { %6584 = vmatmul.msk.bf16.vlgmr.msrb.gmra.mxu2 %vm908_vm2, %v6299_v44 }
  0xbc   :  { %v850_v46 = vmax.f32 %v786_v41, 0.0  ;;  %2348 = vrot.lane.b32.xlu1 %v7220_v23, %s6797_s14 }
  0xbd   :  { %v4400_v49 = vld [vmem:[#allocation2 + $0x4a] sm:$0xff]  ;;  %v4401_v50 = vld [vmem:[#allocation2 + $0x52] sm:$0xff] }
  0xbe   :  { %v7256_v51 = vpack.c.bf16 %v4400_v49, %v4400_v49  ;;  %v7258_v52 = vpack.c.bf16 %v4401_v50, %v4401_v50  ;;  %1003 = vst.msk [vmem:[#allocation2 + $0x61] sm:$0xff] %vm908_vm2, %v850_v46  ;;  %v3503_v29 = vld [vmem:[#allocation2 + $0x50] sm:$0xff]  ;;  %3692 = vrot.lane.b32.xlu0 %v7220_v23, %s6801_s27  ;;  %v64_v23 = vld [vmem:[%s9518_s0 + $0xd8] sm:$0xff] }
  0xbf   :  { %v537_v54 = vpop.f32.mrf.mxu0  ;;  %v7314_v32 = vpack.c.bf16 %v3503_v29, %v3503_v29  ;;  %v132_v43 = vmul.f32 %v6869_v2, %v64_v23  ;;  %v1093_v50 = vld [vmem:[#allocation2 + $0x1b0] sm:$0xff] }
  0xc0   :  { %4528 = vst.msk [vmem:[#allocation3 + $0x14] sm:$0xf] %vm1189_vm5, %v7256_v51  ;;  %v719_v56 = vmul.f32 %v7121_v22, %v537_v54  ;;  %1456 = vrot.lane.b32.xlu2 %v7318_v37, %s6795_s23  ;;  %v1157_v55 = vpack.c.bf16 %v1093_v50, %v1093_v50  ;;  %v1261_v30 = vld [vmem:[#allocation2 + $0x51] sm:$0xff] }
  0xc1   :  { %4529 = vst.msk [vmem:[#allocation3 + $0x1c] sm:$0xf] %vm1189_vm5, %v7258_v52  ;;  %v200_v53 = vadd.f32 %v6874_v3, %v132_v43 }
  0xc2   :  { %v787_v47 = vadd.f32 %v7140_v27, %v719_v56  ;;  %6251 = vmatmul.msk.f32.gmra.mxu0 %vm302_vm1, %v260_v57  ;;  %1197 = vst.msk [vmem:[#allocation3 + $0x38] sm:$0xf] %vm1189_vm5, %v7314_v32 }
  0xc3   :  { %v264_v56 = vmax.f32 %v200_v53, 0.0  ;;  %1222 = vst.msk [vmem:[#allocation3 + $0x100] sm:$0xf] %vm1189_vm5, %v1157_v55  ;;  %v1094_v53 = vld [vmem:[#allocation2 + $0x1b8] sm:$0xff] }
  0xc4   :  { %v851_v60 = vmax.f32 %v787_v47, 0.0  ;;  %2797 = vrot.lane.b32.xlu1 %v1322_v1, %s6798_s17  ;;  %1671 = vst.msk [vmem:[#allocation3 + $0x100] sm:$0xf] %vm1638_vm6, %v1511_v58  ;;  %v65_v47 = vld [vmem:[%s9518_s0 + $0xe0] sm:$0xff] }
  0xc6   :  { %1004 = vst.msk [vmem:[#allocation2 + $0x69] sm:$0xff] %vm908_vm2, %v851_v60  ;;  %1905 = vrot.lane.b32.xlu0 %v7217_v17, %s6796_s24  ;;  %v133_v60 = vmul.f32 %v6869_v2, %v65_v47 }
  0xc7   :  { %v540_v0 = vpop.f32.mrf.mxu0  ;;  %v6654_v35 = vld [vmem:[#allocation3 + $0x14] sm:$0xf] }
  0xc8   :  { %v720_v4 = vmul.f32 %v7121_v22, %v540_v0  ;;  %v6304_v36 = vld [vmem:[#allocation3 + $0x18] sm:$0xf0]  ;;  %1903 = vrot.lane.b32.xlu2 %v7215_v16, %s6796_s24  ;;  %v201_v61 = vadd.f32 %v6874_v3, %v133_v60 }
  0xc9   :  { %v6307_v40 = vor.u32 %v6654_v35, %v6304_v36  ;;  %v1062_v35 = vld [vmem:[#allocation2 + $0x8] sm:$0xff] }
  0xca   :  { %v788_v6 = vadd.f32 %v7140_v27, %v720_v4  ;;  %6252 = vmatmul.msk.f32.gmra.mxu0 %vm302_vm1, %v261_v5  ;;  %v265_v1 = vmax.f32 %v201_v61, 0.0  ;;  %v1447_v4 = vpop.permute.xlu0 %1446  ;;  %v1125_v5 = vpack.c.bf16 %v1061_v63, %v1061_v63 }
  0xcb   :  { %6585 = vmatmul.msk.bf16.gmra.mxu2 %vm908_vm2, %v6307_v40 }
  0xcc   :  { %v852_v8 = vmax.f32 %v788_v6, 0.0  ;;  %3694 = vrot.lane.b32.xlu1 %v7241_v33, %s6801_s27  ;;  %1190 = vst.msk [vmem:[#allocation3] sm:$0xf] %vm1189_vm5, %v1125_v5  ;;  %v7457_v5 = vld [vmem:[%s9520_s2] ss:$0 sm:$0xff] }
  0xcd   :  { %v4402_v11 = vld [vmem:[#allocation2 + $0x62] sm:$0xff]  ;;  %v4403_v10 = vld [vmem:[#allocation2 + $0x6a] sm:$0xff]  ;;  %1639 = vst.msk [vmem:[#allocation3] sm:$0xf] %vm1638_vm6, %v1447_v4  ;;  %v1898_v4 = vpop.permute.xlu2 %1897 }
  0xce   :  { %v7289_v12 = vpack.c.bf16 %v4402_v11, %v4402_v11  ;;  %v7291_v13 = vpack.c.bf16 %v4403_v10, %v4403_v10  ;;  %1005 = vst.msk [vmem:[#allocation2 + $0x79] sm:$0xff] %vm908_vm2, %v852_v8  ;;  %4143 = vrot.lane.b32.xlu0 %v7318_v37, %s6800_s26 }
  0xcf   :  { %v543_v15 = vpop.f32.mrf.mxu0 }
  0xd0   :  { %4530 = vst.msk [vmem:[#allocation3 + $0x24] sm:$0xf] %vm1189_vm5, %v7289_v12  ;;  %v721_v18 = vmul.f32 %v7121_v22, %v543_v15  ;;  %2350 = vrot.lane.b32.xlu2 %v7241_v33, %s6797_s14  ;;  %v3951_v33 = vld [vmem:[#allocation2 + $0x49] sm:$0xff] }
  0xd1   :  { %4531 = vst.msk [vmem:[#allocation3 + $0x2c] sm:$0xf] %vm1189_vm5, %v7291_v13 }
  0xd2   :  { %v789_v20 = vadd.f32 %v7140_v27, %v721_v18  ;;  %6253 = vmatmul.msk.f32.gmra.mxu0 %vm302_vm1, %v262_v19  ;;  %v202_v18 = vadd.f32 %v6874_v3, %v134_v9 }
  0xd4   :  { %v853_v24 = vmax.f32 %v789_v20, 0.0  ;;  %3248 = vrot.lane.b32.xlu1 %v7217_v17, %s6799_s20  ;;  %v1896_v20 = vpop.permute.xlu1 %1895  ;;  %v266_v21 = vmax.f32 %v202_v18, 0.0 }
  0xd5   :  { %2088 = vst.msk [vmem:[#allocation3] sm:$0xf] %vm2087_vm7, %v1896_v20 }
  0xd6   :  { %1006 = vst.msk [vmem:[#allocation2 + $0x81] sm:$0xff] %vm908_vm2, %v853_v24  ;;  %3246 = vrot.lane.b32.xlu0 %v7215_v16, %s6799_s20  ;;  %v7390_v24 = vpack.c.bf16 %v3951_v33, %v3951_v33  ;;  %v67_v16 = vld [vmem:[%s9518_s0 + $0xf0] sm:$0xff] }
  0xd7   :  { %v546_v34 = vpop.f32.mrf.mxu0  ;;  %v135_v28 = vmul.f32 %v6869_v2, %v67_v16  ;;  %v6656_v58 = vld [vmem:[#allocation3 + $0x24] sm:$0xf] }
  0xd8   :  { %v722_v38 = vmul.f32 %v7121_v22, %v546_v34  ;;  %2799 = vrot.lane.b32.xlu2 %v7318_v37, %s6798_s17  ;;  %v6312_v47 = vld [vmem:[#allocation3 + $0x28] sm:$0xf0] }
  0xd9   :  { %v203_v29 = vadd.f32 %v6874_v3, %v135_v28  ;;  %v6315_v60 = vor.u32 %v6656_v58, %v6312_v47 }
  0xda   :  { %v790_v41 = vadd.f32 %v7140_v27, %v722_v38  ;;  %6254 = vmatmul.msk.f32.gmra.mxu0 %vm302_vm1, %v263_v39  ;;  %v1126_v38 = vpack.c.bf16 %v1062_v35, %v1062_v35  ;;  %v7408_v39 = vpack.c.bf16 %v1261_v30, %v1261_v30  ;;  %v71_v30 = vld [vmem:[%s9518_s0 + $0x110] sm:$0xff]  ;;  %v3953_v35 = vld [vmem:[#allocation2 + $0x61] sm:$0xff] }
  0xdb   :  { %v267_v37 = vmax.f32 %v203_v29, 0.0  ;;  %6586 = vmatmul.msk.bf16.gmra.mxu2 %vm908_vm2, %v6315_v60  ;;  %v1263_v60 = vld [vmem:[#allocation2 + $0x69] sm:$0xff] }
  0xdc   :  { %v854_v42 = vmax.f32 %v790_v41, 0.0  ;;  %4145 = vrot.lane.b32.xlu1 %v7390_v24, %s6800_s26  ;;  %1191 = vst.msk [vmem:[#allocation3 + $0x8] sm:$0xf] %vm1189_vm5, %v1126_v38  ;;  %v68_v41 = vld [vmem:[%s9518_s0 + $0xf8] sm:$0xff] }
  0xdd   :  { %v4404_v44 = vld [vmem:[#allocation2 + $0x7a] sm:$0xff]  ;;  %v4405_v45 = vld [vmem:[#allocation2 + $0x82] sm:$0xff] }
  0xde   :  { %v7335_v46 = vpack.c.bf16 %v4404_v44, %v4404_v44  ;;  %v7337_v48 = vpack.c.bf16 %v4405_v45, %v4405_v45  ;;  %1007 = vst.msk [vmem:[#allocation2 + $0x91] sm:$0xff] %vm908_vm2, %v854_v42  ;;  %1458 = vrot.lane.b32.xlu0 %v7390_v24, %s6795_s23  ;;  %v136_v42 = vmul.f32 %v6869_v2, %v68_v41  ;;  %v3504_v45 = vld [vmem:[#allocation2 + $0x60] sm:$0xff] }
  0xdf   :  { %v549_v49 = vpop.f32.mrf.mxu0 }
  0xe0   :  { %4532 = vst.msk [vmem:[#allocation3 + $0x34] sm:$0xf] %vm1189_vm5, %v7335_v46  ;;  %v723_v54 = vmul.f32 %v7121_v22, %v549_v49  ;;  %3696 = vrot.lane.b32.xlu2 %v7312_v31, %s6801_s27  ;;  %v204_v2 = vadd.f32 %v6874_v3, %v136_v42  ;;  %v69_v3 = vld [vmem:[%s9518_s0 + $0x100] sm:$0xff] }
  0xe1   :  { %4533 = vst.msk [vmem:[#allocation3 + $0x3c] sm:$0xf] %vm1189_vm5, %v7337_v48 }
  0xe2   :  { %v791_v57 = vadd.f32 %v7140_v27, %v723_v54  ;;  %6255 = vmatmul.msk.f32.gmra.mxu0 %vm302_vm1, %v264_v56  ;;  %v3505_v54 = vld [vmem:[#allocation2 + $0x68] sm:$0xff]  ;;  %v7424_v56 = vpack.c.bf16 %v3504_v45, %v3504_v45 }
  0xe3   :  { %v7429_v61 = vpack.c.bf16 %v3505_v54, %v3505_v54  ;;  %v3506_v54 = vld [vmem:[#allocation2 + $0x78] sm:$0xff] }
  0xe4   :  { %v855_v59 = vmax.f32 %v791_v57, 0.0  ;;  %1460 = vrot.lane.b32.xlu1 %v7408_v39, %s6795_s23  ;;  %v1158_v57 = vpack.c.bf16 %v1094_v53, %v1094_v53  ;;  %1198 = vst.msk [vmem:[#allocation3 + $0x40] sm:$0xf] %vm1189_vm5, %v7424_v56 }
  0xe5   :  { %1199 = vst.msk [vmem:[#allocation3 + $0x48] sm:$0xf] %vm1189_vm5, %v7429_v61 }
  0xe6   :  { %1008 = vst.msk [vmem:[#allocation2 + $0x99] sm:$0xff] %vm908_vm2, %v855_v59  ;;  %2352 = vrot.lane.b32.xlu0 %v7312_v31, %s6797_s14 }
  0xe7   :  { %v552_v62 = vpop.f32.mrf.mxu0  ;;  %1223 = vst.msk [vmem:[#allocation3 + $0x108] sm:$0xf] %vm1189_vm5, %v1158_v57  ;;  %v6658_v58 = vld [vmem:[#allocation3 + $0x34] sm:$0xf] }
  0xe8   :  { %v724_v0 = vmul.f32 %v7121_v22, %v552_v62  ;;  %v268_v62 = vmax.f32 %v204_v2, 0.0  ;;  %1909 = vrot.lane.b32.xlu2 %v7258_v52, %s6796_s24  ;;  %v6320_v47 = vld [vmem:[#allocation3 + $0x38] sm:$0xf0] }
  0xea   :  { %v792_v6 = vadd.f32 %v7140_v27, %v724_v0  ;;  %6256 = vmatmul.msk.f32.gmra.mxu0 %vm302_vm1, %v265_v1  ;;  %v7446_v0 = vld [vmem:[%s9519_s1] ss:$0 sm:$0xff] }
  0xeb   :  { %v137_v1 = vmul.f32 %v7446_v0, %v69_v3 }
  0xec   :  { %v856_v8 = vmax.f32 %v792_v6, 0.0  ;;  %1907 = vrot.lane.b32.xlu1 %v7256_v51, %s6796_s24 }
  0xed   :  { %v4406_v11 = vld [vmem:[#allocation2 + $0x92] sm:$0xff]  ;;  %v4407_v10 = vld [vmem:[#allocation2 + $0x9a] sm:$0xff]  ;;  %v205_v6 = vadd.f32 %v7457_v5, %v137_v1 }
  0xee   :  { %v7377_v14 = vpack.c.bf16 %v4406_v11, %v4406_v11  ;;  %v7379_v15 = vpack.c.bf16 %v4407_v10, %v4407_v10  ;;  %1009 = vst.msk [vmem:[#allocation2 + $0xa9] sm:$0xff] %vm908_vm2, %v856_v8  ;;  %2801 = vrot.lane.b32.xlu0 %v7390_v24, %s6798_s17  ;;  %v70_v10 = vld [vmem:[%s9518_s0 + $0x108] sm:$0xff] }
  0xef   :  { %v555_v19 = vpop.f32.mrf.mxu0  ;;  %v269_v9 = vmax.f32 %v205_v6, 0.0  ;;  %v138_v33 = vmul.f32 %v7446_v0, %v70_v10 }
  0xf0   :  { %4534 = vst.msk [vmem:[#allocation3 + $0x44] sm:$0xf] %vm1189_vm5, %v7377_v14  ;;  %v725_v17 = vmul.f32 %v7121_v22, %v555_v19  ;;  %4147 = vrot.lane.b32.xlu2 %v7408_v39, %s6800_s26 }
  0xf1   :  { %4535 = vst.msk [vmem:[#allocation3 + $0x4c] sm:$0xf] %vm1189_vm5, %v7379_v15 }
  0xf2   :  { %v793_v25 = vadd.f32 %v7140_v27, %v725_v17  ;;  %6257 = vmatmul.msk.f32.gmra.mxu0 %vm302_vm1, %v266_v21  ;;  %v2345_v17 = vpop.permute.xlu2 %2344 }
  0xf3   :  { %2537 = vst.msk [vmem:[#allocation3] sm:$0xf] %vm2536_vm8, %v2345_v17 }
  0xf4   :  { %v857_v26 = vmax.f32 %v793_v25, 0.0  ;;  %2354 = vrot.lane.b32.xlu1 %v7314_v32, %s6797_s14  ;;  %v206_v25 = vadd.f32 %v7457_v5, %v138_v33 }
  0xf6   :  { %1010 = vst.msk [vmem:[#allocation2 + $0xb1] sm:$0xff] %vm908_vm2, %v857_v26  ;;  %3698 = vrot.lane.b32.xlu0 %v7314_v32, %s6801_s27  ;;  %v270_v28 = vmax.f32 %v206_v25, 0.0 }
  0xf7   :  { %v558_v34 = vpop.f32.mrf.mxu0 }
  0xf8   :  { %v726_v36 = vmul.f32 %v7121_v22, %v558_v34  ;;  %3250 = vrot.lane.b32.xlu2 %v7256_v51, %s6799_s20  ;;  %v139_v34 = vmul.f32 %v7446_v0, %v71_v30  ;;  %v7496_v51 = vpack.c.bf16 %v3953_v35, %v3953_v35 }
  0xfa   :  { %v794_v40 = vadd.f32 %v7140_v27, %v726_v36  ;;  %6258 = vmatmul.msk.f32.gmra.mxu0 %vm302_vm1, %v267_v37  ;;  %v2794_v36 = vpop.permute.xlu2 %2793  ;;  %v207_v38 = vadd.f32 %v7457_v5, %v139_v34 }
  0xfb   :  { %2986 = vst.msk [vmem:[#allocation3] sm:$0xf] %vm2985_vm9, %v2794_v36 }
  0xfc   :  { %v858_v23 = vmax.f32 %v794_v40, 0.0  ;;  %2803 = vrot.lane.b32.xlu1 %v7408_v39, %s6798_s17  ;;  %v271_v41 = vmax.f32 %v207_v38, 0.0 }
  0xfd   :  { %v4408_v43 = vld [vmem:[#allocation2 + $0xaa] sm:$0xff]  ;;  %v4409_v44 = vld [vmem:[#allocation2 + $0xb2] sm:$0xff] }
  0xfe   :  { %v4472_v49 = vpack.c.bf16 %v4408_v43, %v4408_v43  ;;  %v4473_v50 = vpack.c.bf16 %v4409_v44, %v4409_v44  ;;  %1011 = vst.msk [vmem:[#allocation2 + $0xc1] sm:$0xff] %vm908_vm2, %v858_v23  ;;  %3252 = vrot.lane.b32.xlu0 %v7258_v52, %s6799_s20  ;;  %v1449_v23 = vpop.permute.xlu0 %1448  ;;  %v72_v52 = vld [vmem:[%s9518_s0 + $0x118] sm:$0xff] }
  0xff   :  { %v561_v55 = vpop.f32.mrf.mxu0  ;;  %1640 = vst.msk [vmem:[#allocation3 + $0x8] sm:$0xf] %vm1638_vm6, %v1449_v23  ;;  %v140_v43 = vmul.f32 %v7446_v0, %v72_v52 }
 0x100   :  { %4536 = vst.msk [vmem:[#allocation3 + $0x54] sm:$0xf] %vm1189_vm5, %v4472_v49  ;;  %v727_v59 = vmul.f32 %v7121_v22, %v561_v55  ;;  %1462 = vrot.lane.b32.xlu2 %v7496_v51, %s6795_s23  ;;  %v3507_v55 = vld [vmem:[#allocation2 + $0x80] sm:$0xff] }
 0x101   :  { %4537 = vst.msk [vmem:[#allocation3 + $0x5c] sm:$0xf] %vm1189_vm5, %v4473_v50  ;;  %v208_v2 = vadd.f32 %v7457_v5, %v140_v43  ;;  %v7519_v3 = vpack.c.bf16 %v3507_v55, %v3507_v55 }
 0x102   :  { %v795_v31 = vadd.f32 %v7140_v27, %v727_v59  ;;  %6259 = vmatmul.msk.f32.gmra.mxu0 %vm302_vm1, %v268_v62  ;;  %2089 = vst.msk [vmem:[#allocation3 + $0x8] sm:$0xf] %vm2087_vm7, %v1898_v4  ;;  %v7511_v49 = vpop.permute.xlu2 %3244  ;;  %v1962_v59 = vpop.permute.xlu1 %1961  ;;  %v7522_v4 = vpack.c.bf16 %v3506_v54, %v3506_v54 }
 0x103   :  { %v272_v1 = vmax.f32 %v208_v2, 0.0  ;;  %1201 = vst.msk [vmem:[#allocation3 + $0x58] sm:$0xf] %vm1189_vm5, %v7519_v3 }
 0x104   :  { %v859_v63 = vmax.f32 %v795_v31, 0.0  ;;  %3700 = vrot.lane.b32.xlu1 %v7424_v56, %s6801_s27  ;;  %v6323_v31 = vor.u32 %v6658_v58, %v6320_v47  ;;  %1200 = vst.msk [vmem:[#allocation3 + $0x50] sm:$0xf] %vm1189_vm5, %v7522_v4  ;;  %v76_v47 = vld [vmem:[%s9518_s0 + $0x138] sm:$0xff] }
 0x106   :  { %1012 = vst.msk [vmem:[#allocation2 + $0xc9] sm:$0xff] %vm908_vm2, %v859_v63  ;;  %4149 = vrot.lane.b32.xlu0 %v7496_v51, %s6800_s26  ;;  %v1513_v63 = vpop.permute.xlu0 %1512  ;;  %6587 = vmatmul.msk.bf16.gmra.mxu2 %vm908_vm2, %v6323_v31 }
 0x107   :  { %v564_v7 = vpop.f32.mrf.mxu0  ;;  %1672 = vst.msk [vmem:[#allocation3 + $0x108] sm:$0xf] %vm1638_vm6, %v1513_v63 }
 0x108   :  { %v728_v8 = vmul.f32 %v7121_v22, %v564_v7  ;;  %2121 = vst.msk [vmem:[#allocation3 + $0x108] sm:$0xf] %vm2087_vm7, %v1962_v59  ;;  %v7528_v7 = vpack.c.bf16 %v1263_v60, %v1263_v60  ;;  %2356 = vrot.lane.b32.xlu2 %v7424_v56, %s6797_s14  ;;  %v144_v59 = vmul.f32 %v7446_v0, %v76_v47  ;;  %v79_v47 = vld [vmem:[%s9518_s0 + $0x150] sm:$0xff] }
 0x10a   :  { %v796_v11 = vadd.f32 %v7140_v27, %v728_v8  ;;  %6260 = vmatmul.msk.f32.gmra.mxu0 %vm302_vm1, %v269_v9  ;;  %v73_v8 = vld [vmem:[%s9518_s0 + $0x120] sm:$0xff]  ;;  %v1455_v10 = vpop.permute.xlu2 %1454 }
 0x10b   :  { %1643 = vst.msk [vmem:[#allocation3 + $0x20] sm:$0xf] %vm1638_vm6, %v1455_v10  ;;  %v1451_v33 = vpop.permute.xlu1 %1450  ;;  %v77_v10 = vld [vmem:[%s9518_s0 + $0x140] sm:$0xff] }
 0x10c   :  { %v860_v18 = vmax.f32 %v796_v11, 0.0  ;;  %v141_v11 = vmul.f32 %v7446_v0, %v73_v8  ;;  %1913 = vrot.lane.b32.xlu1 %v7291_v13, %s6796_s24  ;;  %1641 = vst.msk [vmem:[#allocation3 + $0x10] sm:$0xf] %vm1638_vm6, %v1451_v33 }
 0x10d   :  { %v4410_v19 = vld [vmem:[#allocation2 + $0xc2] sm:$0xff]  ;;  %v4411_v20 = vld [vmem:[#allocation2 + $0xca] sm:$0xff] }
 0x10e   :  { %v4474_v21 = vpack.c.bf16 %v4410_v19, %v4410_v19  ;;  %v4475_v24 = vpack.c.bf16 %v4411_v20, %v4411_v20  ;;  %1013 = vst.msk [vmem:[#allocation2 + $0xd9] sm:$0xff] %vm908_vm2, %v860_v18  ;;  %v209_v18 = vadd.f32 %v7457_v5, %v141_v11  ;;  %1464 = vrot.lane.b32.xlu0 %v7528_v7, %s6795_s23  ;;  %v1960_v17 = vpop.permute.xlu0 %1959 }
 0x10f   :  { %v567_v16 = vpop.f32.mrf.mxu0  ;;  %2120 = vst.msk [vmem:[#allocation3 + $0x100] sm:$0xf] %vm2087_vm7, %v1960_v17 }
 0x110   :  { %4538 = vst.msk [vmem:[#allocation3 + $0x64] sm:$0xf] %vm1189_vm5, %v4474_v21  ;;  %v729_v26 = vmul.f32 %v7121_v22, %v567_v16  ;;  %v273_v20 = vmax.f32 %v209_v18, 0.0  ;;  %2805 = vrot.lane.b32.xlu2 %v7496_v51, %s6798_s17 }
 0x111   :  { %4539 = vst.msk [vmem:[#allocation3 + $0x6c] sm:$0xf] %vm1189_vm5, %v4475_v24  ;;  %v74_v24 = vld [vmem:[%s9518_s0 + $0x128] sm:$0xff] }
 0x112   :  { %v797_v29 = vadd.f32 %v7140_v27, %v729_v26  ;;  %6261 = vmatmul.msk.f32.gmra.mxu0 %vm302_vm1, %v270_v28  ;;  %v142_v16 = vmul.f32 %v7446_v0, %v74_v24  ;;  %v3508_v24 = vld [vmem:[#allocation2 + $0x90] sm:$0xff] }
 0x114   :  { %v861_v32 = vmax.f32 %v797_v29, 0.0  ;;  %4151 = vrot.lane.b32.xlu1 %v7528_v7, %s6800_s26  ;;  %v7561_v29 = vpop.permute.xlu2 %4141  ;;  %v210_v34 = vadd.f32 %v7457_v5, %v142_v16  ;;  %v6660_v16 = vld [vmem:[#allocation3 + $0x44] sm:$0xf] }
 0x116   :  { %1014 = vst.msk [vmem:[#allocation2 + $0xe1] sm:$0xff] %vm908_vm2, %v861_v32  ;;  %1911 = vrot.lane.b32.xlu0 %v7289_v12, %s6796_s24  ;;  %v1453_v35 = vpop.permute.xlu1 %1452  ;;  %v274_v51 = vmax.f32 %v210_v34, 0.0 }
 0x117   :  { %v570_v37 = vpop.f32.mrf.mxu0  ;;  %1642 = vst.msk [vmem:[#allocation3 + $0x18] sm:$0xf] %vm1638_vm6, %v1453_v35 }
 0x118   :  { %v730_v40 = vmul.f32 %v7121_v22, %v570_v37  ;;  %v1900_v38 = vpop.permute.xlu0 %1899  ;;  %3702 = vrot.lane.b32.xlu2 %v7429_v61, %s6801_s27 }
 0x119   :  { %2090 = vst.msk [vmem:[#allocation3 + $0x10] sm:$0xf] %vm2087_vm7, %v1900_v38 }
 0x11a   :  { %v798_v39 = vadd.f32 %v7140_v27, %v730_v40  ;;  %6262 = vmatmul.msk.f32.gmra.mxu0 %vm302_vm1, %v271_v41  ;;  %v75_v41 = vld [vmem:[%s9518_s0 + $0x130] sm:$0xff] }
 0x11b   :  { %v143_v23 = vmul.f32 %v7446_v0, %v75_v41  ;;  %v78_v41 = vld [vmem:[%s9518_s0 + $0x148] sm:$0xff] }
 0x11c   :  { %v862_v42 = vmax.f32 %v798_v39, 0.0  ;;  %3254 = vrot.lane.b32.xlu1 %v7289_v12, %s6799_s20  ;;  %v1457_v52 = vpop.permute.xlu2 %1456 }
 0x11d   :  { %v4412_v44 = vld [vmem:[#allocation2 + $0xda] sm:$0xff]  ;;  %v4413_v45 = vld [vmem:[#allocation2 + $0xe2] sm:$0xff]  ;;  %v211_v43 = vadd.f32 %v7457_v5, %v143_v23  ;;  %1644 = vst.msk [vmem:[#allocation3 + $0x28] sm:$0xf] %vm1638_vm6, %v1457_v52 }
 0x11e   :  { %v4476_v50 = vpack.c.bf16 %v4412_v44, %v4412_v44  ;;  %v4477_v53 = vpack.c.bf16 %v4413_v45, %v4413_v45  ;;  %1015 = vst.msk [vmem:[#allocation2 + $0xf1] sm:$0xff] %vm908_vm2, %v862_v42  ;;  %v705_v42 = vpop.f32.mrf.mxu2  ;;  %2358 = vrot.lane.b32.xlu0 %v7429_v61, %s6797_s14  ;;  %v1264_v44 = vld [vmem:[#allocation2 + $0x79] sm:$0xff] }
 0x11f   :  { %v573_v57 = vpop.f32.mrf.mxu0  ;;  %v775_v45 = vmul.f32 %v7121_v22, %v705_v42  ;;  %v275_v54 = vmax.f32 %v211_v43, 0.0  ;;  %v7592_v61 = vpack.c.bf16 %v1264_v44, %v1264_v44 }
 0x120   :  { %4540 = vst.msk [vmem:[#allocation3 + $0x74] sm:$0xf] %vm1189_vm5, %v4476_v50  ;;  %v731_v62 = vmul.f32 %v7121_v22, %v573_v57  ;;  %v1902_v50 = vpop.permute.xlu1 %1901  ;;  %v2347_v55 = vpop.permute.xlu0 %2346  ;;  %3256 = vrot.lane.b32.xlu2 %v7291_v13, %s6799_s20 }
 0x121   :  { %4541 = vst.msk [vmem:[#allocation3 + $0x7c] sm:$0xf] %vm1189_vm5, %v4477_v53  ;;  %v843_v12 = vadd.f32 %v7140_v27, %v775_v45 }
 0x122   :  { %v799_v6 = vadd.f32 %v7140_v27, %v731_v62  ;;  %6263 = vmatmul.msk.f32.gmra.mxu0 %vm302_vm1, %v272_v1  ;;  %2091 = vst.msk [vmem:[#allocation3 + $0x18] sm:$0xf] %vm2087_vm7, %v1902_v50 }
 0x123   :  { %2538 = vst.msk [vmem:[#allocation3 + $0x8] sm:$0xf] %vm2536_vm8, %v2347_v55  ;;  %v907_v2 = vmax.f32 %v843_v12, 0.0 }
 0x124   :  { %v863_v9 = vmax.f32 %v799_v6, 0.0  ;;  %1466 = vrot.lane.b32.xlu1 %v7592_v61, %s6795_s23  ;;  %v1904_v60 = vpop.permute.xlu2 %1903 }
 0x125   :  { %1060 = vst.msk [vmem:[#allocation2 + $0x339] sm:$0xff] %vm908_vm2, %v907_v2 }
 0x126   :  { %1016 = vst.msk [vmem:[#allocation2 + $0xf9] sm:$0xff] %vm908_vm2, %v863_v9  ;;  %2807 = vrot.lane.b32.xlu0 %v7528_v7, %s6798_s17  ;;  %v7615_v7 = vld [vmem:[%s9522_s4] ss:$0 sm:$0xff] }
 0x127   :  { %v576_v56 = vpop.f32.mrf.mxu0  ;;  %2092 = vst.msk [vmem:[#allocation3 + $0x20] sm:$0xf] %vm2087_vm7, %v1904_v60 }
 0x128   :  { %v732_v19 = vmul.f32 %v7121_v22, %v576_v56  ;;  %v3243_v13 = vpop.permute.xlu1 %3242  ;;  %v2796_v6 = vpop.permute.xlu0 %2795  ;;  %4153 = vrot.lane.b32.xlu2 %v7592_v61, %s6800_s26  ;;  %v7630_v56 = vld [vmem:[%s9523_s5] ss:$0 sm:$0xff] }
 0x129   :  { %3435 = vst.msk [vmem:[#allocation3] sm:$0xf] %vm3434_vm10, %v3243_v13 }
 0x12a   :  { %v800_v21 = vadd.f32 %v7140_v27, %v732_v19  ;;  %6264 = vmatmul.msk.f32.gmra.mxu0 %vm302_vm1, %v273_v20  ;;  %2987 = vst.msk [vmem:[#allocation3 + $0x8] sm:$0xf] %vm2985_vm9, %v2796_v6  ;;  %v1265_v19 = vld [vmem:[#allocation2 + $0x81] sm:$0xff] }
 0x12b   :  { %3436 = vst.msk [vmem:[#allocation3 + $0x8] sm:$0xf] %vm3434_vm10, %v7511_v49  ;;  %v145_v49 = vmul.f32 %v7446_v0, %v77_v10 }
 0x12c   :  { %v864_v25 = vmax.f32 %v800_v21, 0.0  ;;  %v4459_v18 = vld [vmem:[#allocation2 + $0x33a] sm:$0xff]  ;;  %2360 = vrot.lane.b32.xlu1 %v7522_v4, %s6797_s14  ;;  %v2351_v17 = vpop.permute.xlu2 %2350 }
 0x12d   :  { %v4414_v26 = vld [vmem:[#allocation2 + $0xf2] sm:$0xff]  ;;  %v4415_v28 = vld [vmem:[#allocation2 + $0xfa] sm:$0xff]  ;;  %v4523_v20 = vpack.c.bf16 %v4459_v18, %v4459_v18  ;;  %v213_v21 = vadd.f32 %v7457_v5, %v145_v49  ;;  %2540 = vst.msk [vmem:[#allocation3 + $0x18] sm:$0xf] %vm2536_vm8, %v2351_v17 }
 0x12e   :  { %v4478_v30 = vpack.c.bf16 %v4414_v26, %v4414_v26  ;;  %1017 = vst.msk [vmem:[#allocation2 + $0x109] sm:$0xff] %vm908_vm2, %v864_v25  ;;  %v4479_v32 = vpack.c.bf16 %v4415_v28, %v4415_v28  ;;  %v3509_v25 = vld [vmem:[#allocation2 + $0x98] sm:$0xff]  ;;  %3704 = vrot.lane.b32.xlu0 %v7522_v4, %s6801_s27  ;;  %v6328_v26 = vld [vmem:[#allocation3 + $0x48] sm:$0xf0] }
 0x12f   :  { %v579_v36 = vpop.f32.mrf.mxu0  ;;  %4587 = vst.msk [vmem:[#allocation3 + $0x1ec] sm:$0xf] %vm1189_vm5, %v4523_v20  ;;  %v277_v34 = vmax.f32 %v213_v21, 0.0  ;;  %v6331_v35 = vor.u32 %v6660_v16, %v6328_v26  ;;  %v2164_v20 = vld [vmem:[#allocation2 + $0xa8] sm:$0xff]  ;;  %v6662_v21 = vld [vmem:[#allocation3 + $0x54] sm:$0xf] }
 0x130   :  { %4542 = vst.msk [vmem:[#allocation3 + $0x84] sm:$0xf] %vm1189_vm5, %v4478_v30  ;;  %v733_v37 = vmul.f32 %v7121_v22, %v579_v36  ;;  %v2349_v28 = vpop.permute.xlu1 %2348  ;;  %v7641_v30 = vpack.c.bf16 %v1265_v19, %v1265_v19  ;;  %v3693_v36 = vpop.permute.xlu0 %3692  ;;  %v2165_v26 = vld [vmem:[#allocation2 + $0xb0] sm:$0xff] }
 0x131   :  { %4543 = vst.msk [vmem:[#allocation3 + $0x8c] sm:$0xf] %vm1189_vm5, %v4479_v32  ;;  %6588 = vmatmul.msk.bf16.gmra.mxu2 %vm908_vm2, %v6331_v35 }
 0x132   :  { %v801_v40 = vadd.f32 %v7140_v27, %v733_v37  ;;  %6265 = vmatmul.msk.f32.gmra.mxu0 %vm302_vm1, %v274_v51  ;;  %2539 = vst.msk [vmem:[#allocation3 + $0x10] sm:$0xf] %vm2536_vm8, %v2349_v28  ;;  %v7645_v37 = vpack.c.bf16 %v3508_v24, %v3508_v24  ;;  %v6723_v51 = vld [vmem:[%s9524_s6 + $0x38] sm:$0xff]  ;;  %1468 = vrot.lane.b32.xlu2 %v7641_v30, %s6795_s23 }
 0x133   :  { %3885 = vst.msk [vmem:[#allocation3] sm:$0xf] %vm3884_vm11, %v3693_v36  ;;  %6727 = vmatpush.bf16.msra.mxu1 %v6723_v51  ;;  %5110 = vmatpush.bf16.msrb.mxu0 %v6723_v51  ;;  %v81_v51 = vld [vmem:[%s9518_s0 + $0x160] sm:$0xff] }
 0x134   :  { %v865_v39 = vmax.f32 %v801_v40, 0.0  ;;  %v7653_v40 = vpack.c.bf16 %v3509_v25, %v3509_v25  ;;  %4334 = vst.msk [vmem:[#allocation3] sm:$0xf] %vm4333_vm12, %v7561_v29  ;;  %2809 = vrot.lane.b32.xlu1 %v7592_v61, %s6798_s17  ;;  %v2800_v29 = vpop.permute.xlu2 %2799 }
 0x135   :  { %1202 = vst.msk [vmem:[#allocation3 + $0x60] sm:$0xf] %vm1189_vm5, %v7645_v37 }
 0x136   :  { %1018 = vst.msk [vmem:[#allocation2 + $0x111] sm:$0xff] %vm908_vm2, %v865_v39  ;;  %v146_v39 = vmul.f32 %v7446_v0, %v78_v41  ;;  %1917 = vrot.lane.b32.xlu0 %v7337_v48, %s6796_s24  ;;  %v7743_v41 = vpack.c.bf16 %v2165_v26, %v2165_v26 }
 0x137   :  { %v582_v53 = vpop.f32.mrf.mxu0  ;;  %1203 = vst.msk [vmem:[#allocation3 + $0x68] sm:$0xf] %vm1189_vm5, %v7653_v40 }
 0x138   :  { %v734_v57 = vmul.f32 %v7121_v22, %v582_v53  ;;  %v214_v42 = vadd.f32 %v7457_v5, %v146_v39  ;;  %2989 = vst.msk [vmem:[#allocation3 + $0x18] sm:$0xf] %vm2985_vm9, %v2800_v29  ;;  %v2798_v43 = vpop.permute.xlu1 %2797  ;;  %v1906_v45 = vpop.permute.xlu0 %1905  ;;  %v6722_v53 = vld [vmem:[%s9524_s6 + $0x30] sm:$0xff]  ;;  %v6717_v39 = vld [vmem:[%s9524_s6 + $0x8] sm:$0xff]  ;;  %v149_v29 = vmul.f32 %v7446_v0, %v81_v51 }
 0x139   :  { %2988 = vst.msk [vmem:[#allocation3 + $0x10] sm:$0xf] %vm2985_vm9, %v2798_v43  ;;  %6728 = vmatpush.bf16.msra.mxu1 %v6722_v53  ;;  %5111 = vmatpush.bf16.msrb.mxu0 %v6722_v53  ;;  %v1267_v43 = vld [vmem:[#allocation2 + $0x99] sm:$0xff] }
 0x13a   :  { %v802_v58 = vadd.f32 %v7140_v27, %v734_v57  ;;  %6266 = vmatmul.msk.f32.gmra.mxu0 %vm302_vm1, %v275_v54  ;;  %v212_v27 = vadd.f32 %v7457_v5, %v144_v59  ;;  %v278_v44 = vmax.f32 %v214_v42, 0.0  ;;  %2093 = vst.msk [vmem:[#allocation3 + $0x28] sm:$0xf] %vm2087_vm7, %v1906_v45  ;;  %v6721_v57 = vld [vmem:[%s9524_s6 + $0x28] sm:$0xff]  ;;  %1915 = vrot.lane.b32.xlu2 %v7335_v46, %s6796_s24 }
 0x13b   :  { %v147_v59 = vmul.f32 %v7446_v0, %v79_v47  ;;  %v217_v42 = vadd.f32 %v7457_v5, %v149_v29  ;;  %1205 = vst.msk [vmem:[#allocation3 + $0x78] sm:$0xf] %vm1189_vm5, %v7743_v41  ;;  %v1269_v29 = vld [vmem:[#allocation2 + $0xb1] sm:$0xff] }
 0x13c   :  { %v866_v22 = vmax.f32 %v802_v58, 0.0  ;;  %v276_v1 = vmax.f32 %v212_v27, 0.0  ;;  %3706 = vrot.lane.b32.xlu1 %v7519_v3, %s6801_s27 }
 0x13d   :  { %v4416_v62 = vld [vmem:[#allocation2 + $0x10a] sm:$0xff]  ;;  %v4417_v31 = vld [vmem:[#allocation2 + $0x112] sm:$0xff]  ;;  %6729 = vmatpush.bf16.msra.mxu1 %v6721_v57  ;;  %v215_v27 = vadd.f32 %v7457_v5, %v147_v59  ;;  %5112 = vmatpush.bf16.msrb.mxu0 %v6721_v57  ;;  %v281_v45 = vmax.f32 %v217_v42, 0.0 }
 0x13e   :  { %v4480_v63 = vpack.c.bf16 %v4416_v62, %v4416_v62  ;;  %1019 = vst.msk [vmem:[#allocation2 + $0x121] sm:$0xff] %vm908_vm2, %v866_v22  ;;  %v4481_v8 = vpack.c.bf16 %v4417_v31, %v4417_v31  ;;  %v3697_v22 = vpop.permute.xlu2 %3696  ;;  %4155 = vrot.lane.b32.xlu0 %v7641_v30, %s6800_s26  ;;  %v82_v57 = vld [vmem:[%s9518_s0 + $0x168] sm:$0xff] }
 0x13f   :  { %v585_v9 = vpop.f32.mrf.mxu0 }
 0x140   :  { %v735_v11 = vmul.f32 %v7615_v7, %v585_v9  ;;  %4544 = vst.msk [vmem:[#allocation3 + $0x94] sm:$0xf] %vm1189_vm5, %v4480_v63  ;;  %v3695_v62 = vpop.permute.xlu1 %3694  ;;  %v4144_v31 = vpop.permute.xlu0 %4143  ;;  %v279_v63 = vmax.f32 %v215_v27, 0.0  ;;  %v80_v9 = vld [vmem:[%s9518_s0 + $0x158] sm:$0xff] }
 0x141   :  { %4545 = vst.msk [vmem:[#allocation3 + $0x9c] sm:$0xf] %vm1189_vm5, %v4481_v8  ;;  %v6719_v8 = vld [vmem:[%s9524_s6 + $0x18] sm:$0xff]  ;;  %v148_v10 = vmul.f32 %v7446_v0, %v80_v9 }
 0x142   :  { %6267 = vmatmul.msk.f32.gmra.mxu0 %vm302_vm1, %v276_v1  ;;  %v803_v33 = vadd.f32 %v7630_v56, %v735_v11  ;;  %3886 = vst.msk [vmem:[#allocation3 + $0x8] sm:$0xf] %vm3884_vm11, %v3695_v62  ;;  %v6720_v1 = vld [vmem:[%s9524_s6 + $0x20] sm:$0xff]  ;;  %2362 = vrot.lane.b32.xlu2 %v7519_v3, %s6797_s14 }
 0x143   :  { %4335 = vst.msk [vmem:[#allocation3 + $0x8] sm:$0xf] %vm4333_vm12, %v4144_v31  ;;  %6730 = vmatpush.bf16.msra.mxu1 %v6720_v1  ;;  %5113 = vmatpush.bf16.msrb.mxu0 %v6720_v1  ;;  %v216_v19 = vadd.f32 %v7457_v5, %v148_v10  ;;  %v6664_v62 = vld [vmem:[#allocation3 + $0x64] sm:$0xf]  ;;  %v6344_v1 = vld [vmem:[#allocation3 + $0x68] sm:$0xf0] }
 0x144   :  { %v867_v32 = vmax.f32 %v803_v33, 0.0  ;;  %3260 = vrot.lane.b32.xlu1 %v7337_v48, %s6799_s20  ;;  %v3957_v33 = vld [vmem:[#allocation2 + $0x91] sm:$0xff]  ;;  %v6336_v48 = vld [vmem:[#allocation3 + $0x58] sm:$0xf0] }
 0x145   :  { %v280_v16 = vmax.f32 %v216_v19, 0.0  ;;  %v6339_v35 = vor.u32 %v6662_v21, %v6336_v48  ;;  %v7732_v36 = vpack.c.bf16 %v3957_v33, %v3957_v33  ;;  %v83_v33 = vld [vmem:[%s9518_s0 + $0x170] sm:$0xff]  ;;  %v84_v48 = vld [vmem:[%s9518_s0 + $0x178] sm:$0xff] }
 0x146   :  { %1020 = vst.msk [vmem:[#allocation2 + $0x129] sm:$0xff] %vm908_vm2, %v867_v32  ;;  %v7721_v18 = vpop.permute.xlu2 %1909  ;;  %3258 = vrot.lane.b32.xlu0 %v7335_v46, %s6799_s20  ;;  %v6718_v46 = vld [vmem:[%s9524_s6 + $0x10] sm:$0xff]  ;;  %v151_v19 = vmul.f32 %v7446_v0, %v83_v33  ;;  %v86_v33 = vld [vmem:[%s9518_s0 + $0x188] sm:$0xff] }
 0x147   :  { %v588_v38 = vpop.f32.mrf.mxu0  ;;  %6731 = vmatpush.bf16.msra.mxu1 %v6719_v8  ;;  %5114 = vmatpush.bf16.msrb.mxu0 %v6719_v8 }
 0x148   :  { %v736_v4 = vmul.f32 %v7615_v7, %v588_v38  ;;  %v3249_v24 = vpop.permute.xlu1 %3248  ;;  %v3247_v28 = vpop.permute.xlu0 %3246  ;;  %6589 = vmatmul.msk.bf16.gmra.mxu2 %vm908_vm2, %v6339_v35 }
 0x149   :  { %3438 = vst.msk [vmem:[#allocation3 + $0x18] sm:$0xf] %vm3434_vm10, %v3249_v24 }
 0x14a   :  { %6268 = vmatmul.msk.f32.gmra.mxu0 %vm302_vm1, %v277_v34  ;;  %v804_v23 = vadd.f32 %v7630_v56, %v736_v4  ;;  %3437 = vst.msk [vmem:[#allocation3 + $0x10] sm:$0xf] %vm3434_vm10, %v3247_v28  ;;  %v7735_v4 = vpack.c.bf16 %v2164_v20, %v2164_v20  ;;  %2811 = vrot.lane.b32.xlu2 %v7641_v30, %s6798_s17 }
 0x14b   :  { %3887 = vst.msk [vmem:[#allocation3 + $0x10] sm:$0xf] %vm3884_vm11, %v3697_v22  ;;  %6732 = vmatpush.bf16.msra.mxu1 %v6718_v46  ;;  %5115 = vmatpush.bf16.msrb.mxu0 %v6718_v46  ;;  %v2167_v22 = vld [vmem:[#allocation2 + $0xc8] sm:$0xff]  ;;  %v152_v28 = vmul.f32 %v7446_v0, %v84_v48  ;;  %v6668_v48 = vld [vmem:[#allocation3 + $0x84] sm:$0xf] }
 0x14c   :  { %v868_v52 = vmax.f32 %v804_v23, 0.0  ;;  %4157 = vrot.lane.b32.xlu1 %v7732_v36, %s6800_s26  ;;  %1204 = vst.msk [vmem:[#allocation3 + $0x70] sm:$0xf] %vm1189_vm5, %v7735_v4 }
 0x14d   :  { %v4418_v55 = vld [vmem:[#allocation2 + $0x122] sm:$0xff]  ;;  %v4419_v12 = vld [vmem:[#allocation2 + $0x12a] sm:$0xff]  ;;  %v220_v46 = vadd.f32 %v7457_v5, %v152_v28 }
 0x14e   :  { %1021 = vst.msk [vmem:[#allocation2 + $0x139] sm:$0xff] %vm908_vm2, %v868_v52  ;;  %v4482_v61 = vpack.c.bf16 %v4418_v55, %v4418_v55  ;;  %v4483_v2 = vpack.c.bf16 %v4419_v12, %v4419_v12  ;;  %v7756_v52 = vpop.permute.xlu2 %4147  ;;  %1470 = vrot.lane.b32.xlu0 %v7732_v36, %s6795_s23  ;;  %v7771_v55 = vpack.c.bf16 %v1267_v43, %v1267_v43  ;;  %v6352_v43 = vld [vmem:[#allocation3 + $0x78] sm:$0xf0] }
 0x14f   :  { %v591_v50 = vpop.f32.mrf.mxu0  ;;  %6733 = vmatpush.bf16.msra.mxu1 %v6717_v39  ;;  %5116 = vmatpush.bf16.msrb.mxu0 %v6717_v39  ;;  %v284_v42 = vmax.f32 %v220_v46, 0.0 }
 0x150   :  { %v737_v54 = vmul.f32 %v7615_v7, %v591_v50  ;;  %4546 = vst.msk [vmem:[#allocation3 + $0xa4] sm:$0xf] %vm1189_vm5, %v4482_v61  ;;  %v1459_v50 = vpop.permute.xlu0 %1458 }
 0x151   :  { %4547 = vst.msk [vmem:[#allocation3 + $0xac] sm:$0xf] %vm1189_vm5, %v4483_v2  ;;  %v150_v2 = vmul.f32 %v7446_v0, %v82_v57  ;;  %v1333_v57 = vpack.c.bf16 %v1269_v29, %v1269_v29 }
 0x152   :  { %6269 = vmatmul.msk.f32.gmra.mxu0 %vm302_vm1, %v278_v44  ;;  %v805_v58 = vadd.f32 %v7630_v56, %v737_v54  ;;  %v4146_v44 = vpop.permute.xlu1 %4145  ;;  %v6716_v54 = vld [vmem:[%s9524_s6] sm:$0xff]  ;;  %1645 = vst.msk [vmem:[#allocation3 + $0x30] sm:$0xf] %vm1638_vm6, %v1459_v50  ;;  %3708 = vrot.lane.b32.xlu2 %v7645_v37, %s6801_s27 }
 0x153   :  { %4336 = vst.msk [vmem:[#allocation3 + $0x10] sm:$0xf] %vm4333_vm12, %v4146_v44  ;;  %6734 = vmatpush.bf16.msra.mxu1 %v6716_v54  ;;  %5117 = vmatpush.bf16.msrb.mxu0 %v6716_v54  ;;  %v218_v59 = vadd.f32 %v7457_v5, %v150_v2 }
 0x154   :  { %v869_v60 = vmax.f32 %v805_v58, 0.0  ;;  %1472 = vrot.lane.b32.xlu1 %v7771_v55, %s6795_s23 }
 0x156   :  { %1022 = vst.msk [vmem:[#allocation2 + $0x141] sm:$0xff] %vm908_vm2, %v869_v60  ;;  %v3251_v58 = vpop.permute.xlu2 %3250  ;;  %2364 = vrot.lane.b32.xlu0 %v7645_v37, %s6797_s14  ;;  %v7791_v37 = vpack.c.bf16 %v2167_v22, %v2167_v22 }
 0x157   :  { %v594_v13 = vpop.f32.mrf.mxu0 }
 0x158   :  { %v738_v6 = vmul.f32 %v7615_v7, %v594_v13  ;;  %1207 = vst.msk [vmem:[#allocation3 + $0x88] sm:$0xf] %vm1189_vm5, %v7791_v37 }
 0x15a   :  { %6270 = vmatmul.msk.f32.gmra.mxu0 %vm302_vm1, %v279_v63  ;;  %v806_v11 = vadd.f32 %v7630_v56, %v738_v6  ;;  %v1461_v31 = vpop.permute.xlu1 %1460  ;;  %v282_v63 = vmax.f32 %v218_v59, 0.0  ;;  %v2353_v6 = vpop.permute.xlu0 %2352  ;;  %1921 = vrot.lane.b32.xlu2 %v7379_v15, %s6796_s24 }
 0x15b   :  { %1646 = vst.msk [vmem:[#allocation3 + $0x38] sm:$0xf] %vm1638_vm6, %v1461_v31 }
 0x15c   :  { %v870_v49 = vmax.f32 %v806_v11, 0.0  ;;  %v6347_v11 = vor.u32 %v6664_v62, %v6344_v1  ;;  %2541 = vst.msk [vmem:[#allocation3 + $0x20] sm:$0xf] %vm2536_vm8, %v2353_v6  ;;  %1919 = vrot.lane.b32.xlu1 %v7377_v14, %s6796_s24  ;;  %v6302_v6 = vld [vmem:[#allocation3 + $0x10] sm:$0xf] }
 0x15d   :  { %v4420_v17 = vld [vmem:[#allocation2 + $0x13a] sm:$0xff]  ;;  %v4421_v3 = vld [vmem:[#allocation2 + $0x142] sm:$0xff]  ;;  %2095 = vst.msk [vmem:[#allocation3 + $0x38] sm:$0xf] %vm2087_vm7, %v7721_v18 }
 0x15e   :  { %v4484_v25 = vpack.c.bf16 %v4420_v17, %v4420_v17  ;;  %1023 = vst.msk [vmem:[#allocation2 + $0x151] sm:$0xff] %vm908_vm2, %v870_v49  ;;  %v4485_v32 = vpack.c.bf16 %v4421_v3, %v4421_v3  ;;  %6590 = vmatmul.msk.bf16.gmra.mxu2 %vm908_vm2, %v6347_v11  ;;  %v2166_v18 = vld [vmem:[#allocation2 + $0xc0] sm:$0xff]  ;;  %v1463_v20 = vpop.permute.xlu2 %1462  ;;  %v219_v3 = vadd.f32 %v7457_v5, %v151_v19 }
 0x15f   :  { %v597_v34 = vpop.f32.mrf.mxu0  ;;  %2813 = vrot.lane.b32.xlu0 %v7732_v36, %s6798_s17  ;;  %1647 = vst.msk [vmem:[#allocation3 + $0x40] sm:$0xf] %vm1638_vm6, %v1463_v20  ;;  %v7815_v24 = vpack.c.bf16 %v2166_v18, %v2166_v18  ;;  %v2168_v36 = vld [vmem:[#allocation2 + $0xd8] sm:$0xff]  ;;  %v154_v18 = vmul.f32 %v7446_v0, %v86_v33 }
 0x160   :  { %v739_v38 = vmul.f32 %v7615_v7, %v597_v34  ;;  %4548 = vst.msk [vmem:[#allocation3 + $0xb4] sm:$0xf] %vm1189_vm5, %v4484_v25  ;;  %v283_v21 = vmax.f32 %v219_v3, 0.0  ;;  %v3060_v34 = vld [vmem:[#allocation2 + $0x92] sm:$0xff] }
 0x161   :  { %4549 = vst.msk [vmem:[#allocation3 + $0xbc] sm:$0xf] %vm1189_vm5, %v4485_v32 }
 0x162   :  { %6271 = vmatmul.msk.f32.gmra.mxu0 %vm302_vm1, %v280_v16  ;;  %v807_v23 = vadd.f32 %v7630_v56, %v739_v38  ;;  %v1908_v15 = vpop.permute.xlu1 %1907  ;;  %v2802_v25 = vpop.permute.xlu0 %2801  ;;  %4159 = vrot.lane.b32.xlu2 %v7771_v55, %s6800_s26  ;;  %1206 = vst.msk [vmem:[#allocation3 + $0x80] sm:$0xf] %vm1189_vm5, %v7815_v24 }
 0x163   :  { %2094 = vst.msk [vmem:[#allocation3 + $0x30] sm:$0xf] %vm2087_vm7, %v1908_v15  ;;  %v222_v15 = vadd.f32 %v7457_v5, %v154_v18 }
 0x164   :  { %v871_v30 = vmax.f32 %v807_v23, 0.0  ;;  %2990 = vst.msk [vmem:[#allocation3 + $0x20] sm:$0xf] %vm2985_vm9, %v2802_v25  ;;  %2366 = vrot.lane.b32.xlu1 %v7653_v40, %s6797_s14  ;;  %v6666_v23 = vld [vmem:[#allocation3 + $0x74] sm:$0xf]  ;;  %v2171_v25 = vld [vmem:[#allocation2 + $0xf8] sm:$0xff] }
 0x165   :  { %3439 = vst.msk [vmem:[#allocation3 + $0x20] sm:$0xf] %vm3434_vm10, %v3251_v58  ;;  %v7887_v29 = vpack.c.bf16 %v2171_v25, %v2171_v25 }
 0x166   :  { %1024 = vst.msk [vmem:[#allocation2 + $0x159] sm:$0xff] %vm908_vm2, %v871_v30  ;;  %v2357_v32 = vpop.permute.xlu2 %2356 }
 0x167   :  { %v600_v53 = vpop.f32.mrf.mxu0  ;;  %3710 = vrot.lane.b32.xlu0 %v7653_v40, %s6801_s27  ;;  %2543 = vst.msk [vmem:[#allocation3 + $0x30] sm:$0xf] %vm2536_vm8, %v2357_v32  ;;  %v3124_v40 = vpack.c.bf16 %v3060_v34, %v3060_v34  ;;  %v286_v34 = vmax.f32 %v222_v15, 0.0  ;;  %v1272_v15 = vld [vmem:[#allocation2 + $0xd9] sm:$0xff] }
 0x168   :  { %v740_v12 = vmul.f32 %v7615_v7, %v600_v53  ;;  %v6355_v53 = vor.u32 %v6666_v23, %v6352_v43  ;;  %1211 = vst.msk [vmem:[#allocation3 + $0xa8] sm:$0xf] %vm1189_vm5, %v7887_v29 }
 0x16a   :  { %6272 = vmatmul.msk.f32.gmra.mxu0 %vm302_vm1, %v281_v45  ;;  %v808_v61 = vadd.f32 %v7630_v56, %v740_v12  ;;  %v2355_v39 = vpop.permute.xlu1 %2354  ;;  %v3699_v44 = vpop.permute.xlu0 %3698  ;;  %v7841_v12 = vpack.c.bf16 %v2168_v36, %v2168_v36  ;;  %3262 = vrot.lane.b32.xlu2 %v3124_v40, %s6799_s20  ;;  %v1270_v36 = vld [vmem:[#allocation2 + $0xc1] sm:$0xff] }
 0x16b   :  { %2542 = vst.msk [vmem:[#allocation3 + $0x28] sm:$0xf] %vm2536_vm8, %v2355_v39 }
 0x16c   :  { %v872_v47 = vmax.f32 %v808_v61, 0.0  ;;  %3888 = vst.msk [vmem:[#allocation3 + $0x18] sm:$0xf] %vm3884_vm11, %v3699_v44  ;;  %v85_v61 = vld [vmem:[%s9518_s0 + $0x180] sm:$0xff]  ;;  %2815 = vrot.lane.b32.xlu1 %v7771_v55, %s6798_s17  ;;  %v1718_v55 = vld [vmem:[#allocation2 + $0xb2] sm:$0xff] }
 0x16d   :  { %v4422_v60 = vld [vmem:[#allocation2 + $0x152] sm:$0xff]  ;;  %v4423_v27 = vld [vmem:[#allocation2 + $0x15a] sm:$0xff]  ;;  %4337 = vst.msk [vmem:[#allocation3 + $0x18] sm:$0xf] %vm4333_vm12, %v7756_v52  ;;  %v153_v58 = vmul.f32 %v7446_v0, %v85_v61 }
 0x16e   :  { %v4486_v13 = vpack.c.bf16 %v4422_v60, %v4422_v60  ;;  %1025 = vst.msk [vmem:[#allocation2 + $0x169] sm:$0xff] %vm908_vm2, %v872_v47  ;;  %v4487_v8 = vpack.c.bf16 %v4423_v27, %v4423_v27  ;;  %6591 = vmatmul.msk.bf16.gmra.mxu2 %vm908_vm2, %v6355_v53  ;;  %v2169_v47 = vld [vmem:[#allocation2 + $0xe0] sm:$0xff]  ;;  %v2806_v52 = vpop.permute.xlu2 %2805  ;;  %v1268_v60 = vld [vmem:[#allocation2 + $0xa9] sm:$0xff] }
 0x16f   :  { %v603_v9 = vpop.f32.mrf.mxu0  ;;  %v221_v22 = vadd.f32 %v7457_v5, %v153_v58  ;;  %1208 = vst.msk [vmem:[#allocation3 + $0x90] sm:$0xf] %vm1189_vm5, %v7841_v12  ;;  %1476 = vrot.lane.b32.xlu0 %v1333_v57, %s6795_s23  ;;  %v7862_v27 = vpack.c.bf16 %v2169_v47, %v2169_v47  ;;  %v1720_v58 = vld [vmem:[#allocation2 + $0xca] sm:$0xff] }
 0x170   :  { %v741_v10 = vmul.f32 %v7615_v7, %v603_v9  ;;  %4550 = vst.msk [vmem:[#allocation3 + $0xc4] sm:$0xf] %vm1189_vm5, %v4486_v13  ;;  %v1332_v9 = vpack.c.bf16 %v1268_v60, %v1268_v60  ;;  %v1784_v60 = vpack.c.bf16 %v1720_v58, %v1720_v58 }
 0x171   :  { %4551 = vst.msk [vmem:[#allocation3 + $0xcc] sm:$0xf] %vm1189_vm5, %v4487_v8  ;;  %v285_v31 = vmax.f32 %v221_v22, 0.0 }
 0x172   :  { %6273 = vmatmul.msk.f32.gmra.mxu0 %vm302_vm1, %v282_v63  ;;  %v809_v49 = vadd.f32 %v7630_v56, %v741_v10  ;;  %2992 = vst.msk [vmem:[#allocation3 + $0x30] sm:$0xf] %vm2985_vm9, %v2806_v52  ;;  %v2804_v62 = vpop.permute.xlu1 %2803  ;;  %v3253_v13 = vpop.permute.xlu0 %3252  ;;  %v1717_v63 = vld [vmem:[#allocation2 + $0xaa] sm:$0xff]  ;;  %1474 = vrot.lane.b32.xlu2 %v1332_v9, %s6795_s23  ;;  %v6670_v9 = vld [vmem:[#allocation3 + $0x94] sm:$0xf] }
 0x173   :  { %2991 = vst.msk [vmem:[#allocation3 + $0x28] sm:$0xf] %vm2985_vm9, %v2804_v62  ;;  %v1781_v20 = vpack.c.bf16 %v1717_v63, %v1717_v63  ;;  %v2172_v62 = vld [vmem:[#allocation2 + $0x108] sm:$0xff]  ;;  %v7935_v63 = vld [vmem:[%s9520_s2] ss:$0 sm:$0xff] }
 0x174   :  { %v873_v17 = vmax.f32 %v809_v49, 0.0  ;;  %3440 = vst.msk [vmem:[#allocation3 + $0x28] sm:$0xf] %vm3434_vm10, %v3253_v13  ;;  %v6655_v8 = vld [vmem:[#allocation3 + $0x14] sm:$0xf0]  ;;  %v1782_v49 = vpack.c.bf16 %v1718_v55, %v1718_v55  ;;  %v1719_v13 = vld [vmem:[#allocation2 + $0xc2] sm:$0xff]  ;;  %v7944_v18 = vpack.c.bf16 %v2172_v62, %v2172_v62 }
 0x175   :  { %v6303_v10 = vor.u32 %v6655_v8, %v6302_v6  ;;  %1209 = vst.msk [vmem:[#allocation3 + $0x98] sm:$0xf] %vm1189_vm5, %v7862_v27  ;;  %v2173_v6 = vld [vmem:[#allocation2 + $0x110] sm:$0xff]  ;;  %v1273_v8 = vld [vmem:[#allocation2 + $0xe1] sm:$0xff] }
 0x176   :  { %1026 = vst.msk [vmem:[#allocation2 + $0x171] sm:$0xff] %vm908_vm2, %v873_v17  ;;  %1925 = vrot.lane.b32.xlu1 %v1782_v49, %s6796_s24  ;;  %v3703_v17 = vpop.permute.xlu2 %3702 }
 0x177   :  { %v606_v14 = vpop.f32.mrf.mxu0  ;;  %5123 = vmatmul.bf16.vlgmr.msra.gmra.mxu1 %v6303_v10  ;;  %1923 = vrot.lane.b32.xlu0 %v1781_v20, %s6796_s24  ;;  %3890 = vst.msk [vmem:[#allocation3 + $0x28] sm:$0xf] %vm3884_vm11, %v3703_v17  ;;  %v7939_v10 = vpack.c.bf16 %v2173_v6, %v2173_v6 }
 0x178   :  { %v742_v16 = vmul.f32 %v7615_v7, %v606_v14  ;;  %1212 = vst.msk [vmem:[#allocation3 + $0xb0] sm:$0xf] %vm1189_vm5, %v7944_v18 }
 0x179   :  { %1213 = vst.msk [vmem:[#allocation3 + $0xb8] sm:$0xf] %vm1189_vm5, %v7939_v10 }
 0x17a   :  { %6274 = vmatmul.msk.f32.gmra.mxu0 %vm302_vm1, %v283_v21  ;;  %v810_v26 = vadd.f32 %v7630_v56, %v742_v16  ;;  %v2170_v21 = vld [vmem:[#allocation2 + $0xf0] sm:$0xff]  ;;  %v4150_v46 = vpop.permute.xlu0 %4149  ;;  %2368 = vrot.lane.b32.xlu2 %v7735_v4, %s6797_s14 }
 0x17b   :  { %v7883_v23 = vpack.c.bf16 %v2170_v21, %v2170_v21  ;;  %v1337_v21 = vpack.c.bf16 %v1273_v8, %v1273_v8 }
 0x17c   :  { %v874_v35 = vmax.f32 %v810_v26, 0.0  ;;  %v3701_v26 = vpop.permute.xlu1 %3700 }
 0x17d   :  { %v4424_v38 = vld [vmem:[#allocation2 + $0x16a] sm:$0xff]  ;;  %v4425_v51 = vld [vmem:[#allocation2 + $0x172] sm:$0xff]  ;;  %3889 = vst.msk [vmem:[#allocation3 + $0x20] sm:$0xf] %vm3884_vm11, %v3701_v26  ;;  %v1336_v26 = vpack.c.bf16 %v1272_v15, %v1272_v15 }
 0x17e   :  { %v4488_v30 = vpack.c.bf16 %v4424_v38, %v4424_v38  ;;  %1027 = vst.msk [vmem:[#allocation2 + $0x181] sm:$0xff] %vm908_vm2, %v874_v35  ;;  %v4489_v45 = vpack.c.bf16 %v4425_v51, %v4425_v51  ;;  %v6360_v35 = vld [vmem:[#allocation3 + $0x88] sm:$0xf0] }
 0x17f   :  { %v609_v50 = vpop.f32.mrf.mxu0  ;;  %v6363_v51 = vor.u32 %v6668_v48, %v6360_v35  ;;  %4338 = vst.msk [vmem:[#allocation3 + $0x20] sm:$0xf] %vm4333_vm12, %v4150_v46  ;;  %2370 = vrot.lane.b32.xlu0 %v7743_v41, %s6797_s14  ;;  %v2175_v15 = vld [vmem:[#allocation2 + $0x128] sm:$0xff] }
 0x180   :  { %v743_v54 = vmul.f32 %v7615_v7, %v609_v50  ;;  %4552 = vst.msk [vmem:[#allocation3 + $0xd4] sm:$0xf] %vm1189_vm5, %v4488_v30  ;;  %v87_v30 = vld [vmem:[%s9518_s0 + $0x190] sm:$0xff]  ;;  %v7905_v50 = vpop.permute.xlu2 %3256 }
 0x181   :  { %4553 = vst.msk [vmem:[#allocation3 + $0xdc] sm:$0xf] %vm1189_vm5, %v4489_v45  ;;  %6592 = vmatmul.msk.bf16.gmra.mxu2 %vm908_vm2, %v6363_v51  ;;  %v155_v44 = vmul.f32 %v7446_v0, %v87_v30  ;;  %v7902_v45 = vpop.f32.mrf.mxu2 }
 0x182   :  { %6275 = vmatmul.msk.f32.gmra.mxu0 %vm302_vm1, %v284_v42  ;;  %v811_v2 = vadd.f32 %v7630_v56, %v743_v54  ;;  %v1334_v42 = vpack.c.bf16 %v1270_v36, %v1270_v36  ;;  %1210 = vst.msk [vmem:[#allocation3 + $0xa0] sm:$0xf] %vm1189_vm5, %v7883_v23  ;;  %v1271_v54 = vld [vmem:[#allocation2 + $0xc9] sm:$0xff]  ;;  %v1465_v61 = vpop.permute.xlu0 %1464 }
 0x183   :  { %v223_v40 = vadd.f32 %v7457_v5, %v155_v44  ;;  %1648 = vst.msk [vmem:[#allocation3 + $0x48] sm:$0xf] %vm1638_vm6, %v1465_v61  ;;  %v1335_v47 = vpack.c.bf16 %v1271_v54, %v1271_v54  ;;  %v88_v5 = vld [vmem:[%s9518_s0 + $0x198] sm:$0xff]  ;;  %v1722_v61 = vld [vmem:[#allocation2 + $0xe2] sm:$0xff] }
 0x184   :  { %v875_v59 = vmax.f32 %v811_v2, 0.0  ;;  %1478 = vrot.lane.b32.xlu1 %v1334_v42, %s6795_s23  ;;  %v1914_v0 = vpop.permute.xlu1 %1913  ;;  %v1721_v42 = vld [vmem:[#allocation2 + $0xda] sm:$0xff] }
 0x185   :  { %v287_v57 = vmax.f32 %v223_v40, 0.0  ;;  %2097 = vst.msk [vmem:[#allocation3 + $0x48] sm:$0xf] %vm2087_vm7, %v1914_v0  ;;  %1480 = vrot.lane.b32.xlu2 %v1335_v47, %s6795_s23  ;;  %v1785_v40 = vpack.c.bf16 %v1721_v42, %v1721_v42 }
 0x186   :  { %1028 = vst.msk [vmem:[#allocation2 + $0x189] sm:$0xff] %vm908_vm2, %v875_v59  ;;  %v7925_v59 = vld [vmem:[%s9519_s1] ss:$0 sm:$0xff] }
 0x187   :  { %v612_v1 = vpop.f32.mrf.mxu0  ;;  %v156_v22 = vmul.f32 %v7925_v59, %v88_v5  ;;  %1929 = vrot.lane.b32.xlu0 %v1784_v60, %s6796_s24  ;;  %v6310_v36 = vld [vmem:[#allocation3 + $0x20] sm:$0xf]  ;;  %v6672_v5 = vld [vmem:[#allocation3 + $0xa4] sm:$0xf]  ;;  %v6376_v60 = vld [vmem:[#allocation3 + $0xa8] sm:$0xf0] }
 0x188   :  { %v744_v11 = vmul.f32 %v7615_v7, %v612_v1 }
 0x189   :  { %v224_v1 = vadd.f32 %v7935_v63, %v156_v22 }
 0x18a   :  { %6276 = vmatmul.msk.f32.gmra.mxu0 %vm302_vm1, %v285_v31  ;;  %v812_v19 = vadd.f32 %v7630_v56, %v744_v11  ;;  %v7930_v31 = vpop.permute.xlu2 %4153  ;;  %v6368_v11 = vld [vmem:[#allocation3 + $0x98] sm:$0xf0]  ;;  %v1912_v20 = vpop.permute.xlu0 %1911 }
 0x18b   :  { %v288_v49 = vmax.f32 %v224_v1, 0.0  ;;  %2096 = vst.msk [vmem:[#allocation3 + $0x40] sm:$0xf] %vm2087_vm7, %v1912_v20  ;;  %v6379_v1 = vor.u32 %v6672_v5, %v6376_v60 }
 0x18c   :  { %v876_v3 = vmax.f32 %v812_v19, 0.0  ;;  %2372 = vrot.lane.b32.xlu1 %v7815_v24, %s6797_s14  ;;  %v7941_v24 = vpop.f32.mrf.mxu2  ;;  %v4152_v33 = vpop.permute.xlu1 %4151  ;;  %v6371_v19 = vor.u32 %v6670_v9, %v6368_v11 }
 0x18d   :  { %v4426_v14 = vld [vmem:[#allocation2 + $0x182] sm:$0xff]  ;;  %v4427_v16 = vld [vmem:[#allocation2 + $0x18a] sm:$0xff]  ;;  %4339 = vst.msk [vmem:[#allocation3 + $0x28] sm:$0xf] %vm4333_vm12, %v4152_v33 }
 0x18e   :  { %v4490_v28 = vpack.c.bf16 %v4426_v14, %v4426_v14  ;;  %v4491_v32 = vpack.c.bf16 %v4427_v16, %v4427_v16  ;;  %1029 = vst.msk [vmem:[#allocation2 + $0x1c9] sm:$0xff] %vm908_vm2, %v876_v3  ;;  %v1783_v3 = vpack.c.bf16 %v1719_v13, %v1719_v13  ;;  %v89_v14 = vld [vmem:[%s9518_s0 + $0x1a0] sm:$0xff]  ;;  %v91_v33 = vld [vmem:[%s9518_s0 + $0x1b0] sm:$0xff] }
 0x18f   :  { %v615_v38 = vpop.f32.mrf.mxu0  ;;  %v157_v48 = vmul.f32 %v7925_v59, %v89_v14  ;;  %1482 = vrot.lane.b32.xlu0 %v1336_v26, %s6795_s23 }
 0x190   :  { %v745_v39 = vmul.f32 %v7615_v7, %v615_v38  ;;  %4554 = vst.msk [vmem:[#allocation3 + $0xe4] sm:$0xf] %vm1189_vm5, %v4490_v28  ;;  %1927 = vrot.lane.b32.xlu2 %v1783_v3, %s6796_s24 }
 0x191   :  { %4555 = vst.msk [vmem:[#allocation3 + $0xec] sm:$0xf] %vm1189_vm5, %v4491_v32  ;;  %6593 = vmatmul.msk.bf16.gmra.mxu2 %vm908_vm2, %v6371_v19  ;;  %v159_v19 = vmul.f32 %v7925_v59, %v91_v33 }
 0x192   :  { %6277 = vmatmul.msk.f32.gmra.mxu0 %vm302_vm1, %v286_v34  ;;  %v813_v43 = vadd.f32 %v7630_v56, %v745_v39  ;;  %v1469_v28 = vpop.permute.xlu2 %1468  ;;  %v225_v34 = vadd.f32 %v7935_v63, %v157_v48  ;;  %v2359_v39 = vpop.permute.xlu0 %2358 }
 0x193   :  { %1650 = vst.msk [vmem:[#allocation3 + $0x58] sm:$0xf] %vm1638_vm6, %v1469_v28  ;;  %v227_v3 = vadd.f32 %v7935_v63, %v159_v19  ;;  %v8011_v28 = vpack.c.bf16 %v2175_v15, %v2175_v15  ;;  %v94_v15 = vld [vmem:[%s9518_s0 + $0x1c8] sm:$0xff] }
 0x194   :  { %v877_v53 = vmax.f32 %v813_v43, 0.0  ;;  %1484 = vrot.lane.b32.xlu1 %v1337_v21, %s6795_s23  ;;  %v7965_v35 = vpop.f32.mrf.mxu2  ;;  %v3255_v46 = vpop.permute.xlu1 %3254  ;;  %v6657_v38 = vld [vmem:[#allocation3 + $0x24] sm:$0xf0]  ;;  %v289_v51 = vmax.f32 %v225_v34, 0.0  ;;  %2544 = vst.msk [vmem:[#allocation3 + $0x38] sm:$0xf] %vm2536_vm8, %v2359_v39 }
 0x195   :  { %3441 = vst.msk [vmem:[#allocation3 + $0x30] sm:$0xf] %vm3434_vm10, %v3255_v46  ;;  %v6311_v30 = vor.u32 %v6657_v38, %v6310_v36  ;;  %v1274_v21 = vld [vmem:[#allocation2 + $0xf1] sm:$0xff]  ;;  %v291_v14 = vmax.f32 %v227_v3, 0.0  ;;  %v8069_v3 = vld [vmem:[%s9522_s4] ss:$0 sm:$0xff] }
 0x196   :  { %1030 = vst.msk [vmem:[#allocation2 + $0x1d1] sm:$0xff] %vm908_vm2, %v877_v53  ;;  %v90_v53 = vld [vmem:[%s9518_s0 + $0x1a8] sm:$0xff]  ;;  %v1338_v34 = vpack.c.bf16 %v1274_v21, %v1274_v21  ;;  %v1723_v46 = vld [vmem:[#allocation2 + $0xf2] sm:$0xff] }
 0x197   :  { %v618_v2 = vpop.f32.mrf.mxu0  ;;  %5128 = vmatmul.bf16.gmra.mxu1 %v6311_v30  ;;  %v158_v0 = vmul.f32 %v7925_v59, %v90_v53  ;;  %2376 = vrot.lane.b32.xlu0 %v7841_v12, %s6797_s14  ;;  %v1786_v12 = vpack.c.bf16 %v1722_v61, %v1722_v61  ;;  %v92_v38 = vld [vmem:[%s9518_s0 + $0x1b8] sm:$0xff]  ;;  %v1787_v42 = vpack.c.bf16 %v1723_v46, %v1723_v46  ;;  %v1279_v46 = vld [vmem:[#allocation2 + $0x129] sm:$0xff] }
 0x198   :  { %v746_v52 = vmul.f32 %v7615_v7, %v618_v2  ;;  %2374 = vrot.lane.b32.xlu2 %v7791_v37, %s6797_s14  ;;  %v1275_v37 = vld [vmem:[#allocation2 + $0xf9] sm:$0xff]  ;;  %v160_v30 = vmul.f32 %v7925_v59, %v92_v38  ;;  %1215 = vst.msk [vmem:[#allocation3 + $0xc8] sm:$0xf] %vm1189_vm5, %v8011_v28 }
 0x199   :  { %v226_v58 = vadd.f32 %v7935_v63, %v158_v0  ;;  %v1339_v11 = vpack.c.bf16 %v1275_v37, %v1275_v37  ;;  %v2176_v53 = vld [vmem:[#allocation2 + $0x138] sm:$0xff]  ;;  %v2177_v0 = vld [vmem:[#allocation2 + $0x140] sm:$0xff] }
 0x19a   :  { %6278 = vmatmul.msk.f32.gmra.mxu0 %vm302_vm1, %v287_v57  ;;  %v814_v41 = vadd.f32 %v7630_v56, %v746_v52  ;;  %v1916_v57 = vpop.permute.xlu2 %1915  ;;  %v2808_v62 = vpop.permute.xlu0 %2807  ;;  %v8036_v60 = vpack.c.bf16 %v2176_v53, %v2176_v53  ;;  %v6676_v53 = vld [vmem:[#allocation3 + $0xc4] sm:$0xf] }
 0x19b   :  { %v290_v22 = vmax.f32 %v226_v58, 0.0  ;;  %2993 = vst.msk [vmem:[#allocation3 + $0x38] sm:$0xf] %vm2985_vm9, %v2808_v62 }
 0x19c   :  { %v878_v55 = vmax.f32 %v814_v41, 0.0  ;;  %1931 = vrot.lane.b32.xlu1 %v1785_v40, %s6796_s24  ;;  %v1467_v41 = vpop.permute.xlu1 %1466  ;;  %v7985_v6 = vpop.f32.mrf.mxu2  ;;  %3442 = vst.msk [vmem:[#allocation3 + $0x38] sm:$0xf] %vm3434_vm10, %v7905_v50  ;;  %v2174_v50 = vld [vmem:[#allocation2 + $0x120] sm:$0xff] }
 0x19d   :  { %1649 = vst.msk [vmem:[#allocation3 + $0x50] sm:$0xf] %vm1638_vm6, %v1467_v41  ;;  %v1276_v41 = vld [vmem:[#allocation2 + $0x109] sm:$0xff] }
 0x19e   :  { %1031 = vst.msk [vmem:[#allocation2 + $0x1e1] sm:$0xff] %vm908_vm2, %v878_v55 }
 0x19f   :  { %v621_v17 = vpop.f32.mrf.mxu0  ;;  %2098 = vst.msk [vmem:[#allocation3 + $0x50] sm:$0xf] %vm2087_vm7, %v1916_v57  ;;  %1488 = vrot.lane.b32.xlu0 %v1339_v11, %s6795_s23 }
 0x1a0   :  { %v747_v25 = vmul.f32 %v7615_v7, %v621_v17  ;;  %1933 = vrot.lane.b32.xlu2 %v1786_v12, %s6796_s24  ;;  %v1340_v12 = vpack.c.bf16 %v1276_v41, %v1276_v41  ;;  %1216 = vst.msk [vmem:[#allocation3 + $0xd0] sm:$0xf] %vm1189_vm5, %v8036_v60 }
 0x1a1   :  { %6594 = vmatmul.msk.bf16.gmra.mxu2 %vm908_vm2, %v6379_v1 }
 0x1a2   :  { %6279 = vmatmul.msk.f32.gmra.mxu0 %vm302_vm1, %v288_v49  ;;  %v815_v16 = vadd.f32 %v7630_v56, %v747_v25  ;;  %v2363_v20 = vpop.permute.xlu2 %2362  ;;  %v3705_v48 = vpop.permute.xlu0 %3704 }
 0x1a3   :  { %2546 = vst.msk [vmem:[#allocation3 + $0x48] sm:$0xf] %vm2536_vm8, %v2363_v20  ;;  %v1726_v20 = vld [vmem:[#allocation2 + $0x112] sm:$0xff] }
 0x1a4   :  { %v879_v32 = vmax.f32 %v815_v16, 0.0  ;;  %2378 = vrot.lane.b32.xlu1 %v7862_v27, %s6797_s14  ;;  %v2361_v25 = vpop.permute.xlu1 %2360  ;;  %v8008_v16 = vpack.c.bf16 %v2174_v50, %v2174_v50  ;;  %v1724_v27 = vld [vmem:[#allocation2 + $0xfa] sm:$0xff]  ;;  %3891 = vst.msk [vmem:[#allocation3 + $0x30] sm:$0xf] %vm3884_vm11, %v3705_v48  ;;  %v162_v48 = vmul.f32 %v7925_v59, %v94_v15 }
 0x1a5   :  { %2545 = vst.msk [vmem:[#allocation3 + $0x40] sm:$0xf] %vm2536_vm8, %v2361_v25  ;;  %v8082_v25 = vld [vmem:[%s9523_s5] ss:$0 sm:$0xff] }
 0x1a6   :  { %1032 = vst.msk [vmem:[#allocation2 + $0x1e9] sm:$0xff] %vm908_vm2, %v879_v32  ;;  %v8013_v32 = vpop.f32.mrf.mxu2  ;;  %v230_v38 = vadd.f32 %v7935_v63, %v162_v48 }
 0x1a7   :  { %v624_v43 = vpop.f32.mrf.mxu0  ;;  %4340 = vst.msk [vmem:[#allocation3 + $0x30] sm:$0xf] %vm4333_vm12, %v7930_v31  ;;  %1935 = vrot.lane.b32.xlu0 %v1787_v42, %s6796_s24  ;;  %v2179_v42 = vld [vmem:[#allocation2 + $0x158] sm:$0xff] }
 0x1a8   :  { %v748_v44 = vmul.f32 %v7615_v7, %v624_v43  ;;  %1486 = vrot.lane.b32.xlu2 %v1338_v34, %s6795_s23  ;;  %1214 = vst.msk [vmem:[#allocation3 + $0xc0] sm:$0xf] %vm1189_vm5, %v8008_v16  ;;  %v1725_v34 = vld [vmem:[#allocation2 + $0x10a] sm:$0xff] }
 0x1aa   :  { %6280 = vmatmul.msk.f32.gmra.mxu0 %vm302_vm1, %v289_v51  ;;  %v816_v54 = vadd.f32 %v7630_v56, %v748_v44  ;;  %v1788_v51 = vpack.c.bf16 %v1724_v27, %v1724_v27  ;;  %v2812_v31 = vpop.permute.xlu2 %2811  ;;  %v228_v44 = vadd.f32 %v7935_v63, %v160_v30  ;;  %v1918_v5 = vpop.permute.xlu0 %1917  ;;  %v1790_v27 = vpack.c.bf16 %v1726_v20, %v1726_v20 }
 0x1ab   :  { %2995 = vst.msk [vmem:[#allocation3 + $0x48] sm:$0xf] %vm2985_vm9, %v2812_v31 }
 0x1ac   :  { %v880_v2 = vmax.f32 %v816_v54, 0.0  ;;  %1937 = vrot.lane.b32.xlu1 %v1788_v51, %s6796_s24  ;;  %v2810_v57 = vpop.permute.xlu1 %2809  ;;  %v292_v58 = vmax.f32 %v228_v44, 0.0  ;;  %2099 = vst.msk [vmem:[#allocation3 + $0x58] sm:$0xf] %vm2087_vm7, %v1918_v5  ;;  %v2178_v51 = vld [vmem:[#allocation2 + $0x150] sm:$0xff]  ;;  %v294_v44 = vmax.f32 %v230_v38, 0.0  ;;  %v1343_v5 = vpack.c.bf16 %v1279_v46, %v1279_v46 }
 0x1ad   :  { %v4430_v47 = vld [vmem:[#allocation2 + $0x1e2] sm:$0xff]  ;;  %v4431_v52 = vld [vmem:[#allocation2 + $0x1ea] sm:$0xff]  ;;  %2994 = vst.msk [vmem:[#allocation3 + $0x40] sm:$0xf] %vm2985_vm9, %v2810_v57  ;;  %v1789_v57 = vpack.c.bf16 %v1725_v34, %v1725_v34 }
 0x1ae   :  { %1033 = vst.msk [vmem:[#allocation2 + $0x1f9] sm:$0xff] %vm908_vm2, %v880_v2  ;;  %v4494_v13 = vpack.c.bf16 %v4430_v47, %v4430_v47  ;;  %v4495_v8 = vpack.c.bf16 %v4431_v52, %v4431_v52  ;;  %v6674_v47 = vld [vmem:[#allocation3 + $0xb4] sm:$0xf]  ;;  %v6384_v52 = vld [vmem:[#allocation3 + $0xb8] sm:$0xf0]  ;;  %v8048_v1 = vpop.f32.mrf.mxu2 }
 0x1af   :  { %v627_v55 = vpop.f32.mrf.mxu0  ;;  %2382 = vrot.lane.b32.xlu0 %v7887_v29, %s6797_s14 }
 0x1b0   :  { %v749_v9 = vmul.f32 %v7615_v7, %v627_v55  ;;  %4558 = vst.msk [vmem:[#allocation3 + $0x104] sm:$0xf] %vm1189_vm5, %v4494_v13  ;;  %v8040_v13 = vpack.c.bf16 %v2177_v0, %v2177_v0  ;;  %v93_v55 = vld [vmem:[%s9518_s0 + $0x1c0] sm:$0xff]  ;;  %2380 = vrot.lane.b32.xlu2 %v7883_v23, %s6797_s14  ;;  %v1277_v23 = vld [vmem:[#allocation2 + $0x111] sm:$0xff] }
 0x1b1   :  { %4559 = vst.msk [vmem:[#allocation3 + $0x10c] sm:$0xf] %vm1189_vm5, %v4495_v8  ;;  %v161_v8 = vmul.f32 %v7925_v59, %v93_v55 }
 0x1b2   :  { %6281 = vmatmul.msk.f32.gmra.mxu0 %vm302_vm1, %v290_v22  ;;  %v817_v49 = vadd.f32 %v7630_v56, %v749_v9  ;;  %v6387_v22 = vor.u32 %v6674_v47, %v6384_v52  ;;  %v3709_v9 = vpop.permute.xlu2 %3708  ;;  %1217 = vst.msk [vmem:[#allocation3 + $0xd8] sm:$0xf] %vm1189_vm5, %v8040_v13  ;;  %v4156_v19 = vpop.permute.xlu0 %4155  ;;  %v1278_v52 = vld [vmem:[#allocation2 + $0x121] sm:$0xff] }
 0x1b3   :  { %v229_v33 = vadd.f32 %v7935_v63, %v161_v8 }
 0x1b4   :  { %v881_v17 = vmax.f32 %v817_v49, 0.0  ;;  %6595 = vmatmul.msk.bf16.gmra.mxu2 %vm908_vm2, %v6387_v22  ;;  %1490 = vrot.lane.b32.xlu1 %v1340_v12, %s6795_s23  ;;  %v3707_v49 = vpop.permute.xlu1 %3706  ;;  %v95_v22 = vld [vmem:[%s9518_s0 + $0x1d0] sm:$0xff] }
 0x1b5   :  { %3892 = vst.msk [vmem:[#allocation3 + $0x38] sm:$0xf] %vm3884_vm11, %v3707_v49  ;;  %v163_v12 = vmul.f32 %v7925_v59, %v95_v22  ;;  %v1280_v22 = vld [vmem:[#allocation2 + $0x139] sm:$0xff] }
 0x1b6   :  { %1034 = vst.msk [vmem:[#allocation2 + $0x201] sm:$0xff] %vm908_vm2, %v881_v17  ;;  %v1341_v17 = vpack.c.bf16 %v1277_v23, %v1277_v23  ;;  %v8076_v21 = vpop.f32.mrf.mxu2 }
 0x1b7   :  { %v630_v26 = vpop.f32.mrf.mxu0  ;;  %4341 = vst.msk [vmem:[#allocation3 + $0x38] sm:$0xf] %vm4333_vm12, %v4156_v19  ;;  %1941 = vrot.lane.b32.xlu0 %v1790_v27, %s6796_s24  ;;  %v1727_v19 = vld [vmem:[#allocation2 + $0x122] sm:$0xff]  ;;  %v1728_v27 = vld [vmem:[#allocation2 + $0x12a] sm:$0xff] }
 0x1b8   :  { %v750_v36 = vmul.f32 %v7615_v7, %v630_v26  ;;  %1492 = vrot.lane.b32.xlu2 %v1341_v17, %s6795_s23  ;;  %v96_v17 = vld [vmem:[%s9518_s0 + $0x1d8] sm:$0xff] }
 0x1ba   :  { %6282 = vmatmul.msk.f32.gmra.mxu0 %vm302_vm1, %v291_v14  ;;  %v818_v39 = vadd.f32 %v7630_v56, %v750_v36  ;;  %v8088_v26 = vpop.permute.xlu2 %1921 }
 0x1bc   :  { %v882_v43 = vmax.f32 %v818_v39, 0.0  ;;  %2384 = vrot.lane.b32.xlu1 %v7944_v18, %s6797_s14  ;;  %v3261_v31 = vpop.permute.xlu1 %3260  ;;  %v6392_v18 = vld [vmem:[#allocation3 + $0xc8] sm:$0xf0] }
 0x1bd   :  { %v4432_v40 = vld [vmem:[#allocation2 + $0x1fa] sm:$0xff]  ;;  %v4433_v54 = vld [vmem:[#allocation2 + $0x202] sm:$0xff]  ;;  %3444 = vst.msk [vmem:[#allocation3 + $0x48] sm:$0xf] %vm3434_vm10, %v3261_v31 }
 0x1be   :  { %v4496_v61 = vpack.c.bf16 %v4432_v40, %v4432_v40  ;;  %v4497_v2 = vpack.c.bf16 %v4433_v54, %v4433_v54  ;;  %1035 = vst.msk [vmem:[#allocation2 + $0x211] sm:$0xff] %vm908_vm2, %v882_v43  ;;  %v3259_v40 = vpop.permute.xlu0 %3258  ;;  %v6318_v54 = vld [vmem:[#allocation3 + $0x30] sm:$0xf]  ;;  %v6659_v0 = vld [vmem:[#allocation3 + $0x34] sm:$0xf0]  ;;  %v8111_v8 = vpop.f32.mrf.mxu2 }
 0x1bf   :  { %v633_v37 = vpop.f32.mrf.mxu0  ;;  %3443 = vst.msk [vmem:[#allocation3 + $0x40] sm:$0xf] %vm3434_vm10, %v3259_v40  ;;  %v6319_v47 = vor.u32 %v6659_v0, %v6318_v54  ;;  %v6400_v40 = vld [vmem:[#allocation3 + $0xd8] sm:$0xf0]  ;;  %v1792_v54 = vpack.c.bf16 %v1728_v27, %v1728_v27 }
 0x1c0   :  { %v751_v62 = vmul.f32 %v7615_v7, %v633_v37  ;;  %4560 = vst.msk [vmem:[#allocation3 + $0x114] sm:$0xf] %vm1189_vm5, %v4496_v61  ;;  %v8096_v37 = vpack.c.bf16 %v2179_v42, %v2179_v42  ;;  %1939 = vrot.lane.b32.xlu2 %v1789_v57, %s6796_s24 }
 0x1c1   :  { %4561 = vst.msk [vmem:[#allocation3 + $0x11c] sm:$0xf] %vm1189_vm5, %v4497_v2  ;;  %5133 = vmatmul.bf16.gmra.mxu1 %v6319_v47 }
 0x1c2   :  { %6283 = vmatmul.msk.f32.gmra.mxu0 %vm302_vm1, %v292_v58  ;;  %v819_v7 = vadd.f32 %v7630_v56, %v751_v62  ;;  %v293_v56 = vmax.f32 %v229_v33, 0.0  ;;  %v6395_v58 = vor.u32 %v6676_v53, %v6392_v18  ;;  %3893 = vst.msk [vmem:[#allocation3 + $0x40] sm:$0xf] %vm3884_vm11, %v3709_v9  ;;  %v8104_v62 = vpack.c.bf16 %v2178_v51, %v2178_v51  ;;  %v8114_v9 = vpop.permute.xlu2 %4159 }
 0x1c3   :  { %v231_v33 = vadd.f32 %v7935_v63, %v163_v12  ;;  %1219 = vst.msk [vmem:[#allocation3 + $0xe8] sm:$0xf] %vm1189_vm5, %v8096_v37 }
 0x1c4   :  { %v883_v11 = vmax.f32 %v819_v7, 0.0  ;;  %6596 = vmatmul.msk.bf16.gmra.mxu2 %vm908_vm2, %v6395_v58  ;;  %v1342_v7 = vpack.c.bf16 %v1278_v52, %v1278_v52  ;;  %1496 = vrot.lane.b32.xlu1 %v1343_v5, %s6795_s23  ;;  %1218 = vst.msk [vmem:[#allocation3 + $0xe0] sm:$0xf] %vm1189_vm5, %v8104_v62  ;;  %v4158_v23 = vpop.permute.xlu1 %4157 }
 0x1c5   :  { %v295_v49 = vmax.f32 %v231_v33, 0.0  ;;  %4342 = vst.msk [vmem:[#allocation3 + $0x40] sm:$0xf] %vm4333_vm12, %v4158_v23  ;;  %v1730_v33 = vld [vmem:[#allocation2 + $0x142] sm:$0xff] }
 0x1c6   :  { %1036 = vst.msk [vmem:[#allocation2 + $0x219] sm:$0xff] %vm908_vm2, %v883_v11  ;;  %1494 = vrot.lane.b32.xlu0 %v1342_v7, %s6795_s23  ;;  %v8135_v34 = vpop.f32.mrf.mxu2 }
 0x1c7   :  { %v636_v50 = vpop.f32.mrf.mxu0 }
 0x1c8   :  { %v752_v29 = vmul.f32 %v8069_v3, %v636_v50  ;;  %2386 = vrot.lane.b32.xlu2 %v7939_v10, %s6797_s14  ;;  %v2180_v10 = vld [vmem:[#allocation2 + $0x168] sm:$0xff] }
 0x1c9   :  { %v8144_v57 = vpack.c.bf16 %v2180_v10, %v2180_v10 }
 0x1ca   :  { %6284 = vmatmul.msk.f32.gmra.mxu0 %vm302_vm1, %v293_v56  ;;  %v820_v14 = vadd.f32 %v8082_v25, %v752_v29  ;;  %v1471_v56 = vpop.permute.xlu0 %1470  ;;  %v1791_v29 = vpack.c.bf16 %v1727_v19, %v1727_v19  ;;  %v3263_v48 = vpop.permute.xlu2 %3262 }
 0x1cb   :  { %1651 = vst.msk [vmem:[#allocation3 + $0x60] sm:$0xf] %vm1638_vm6, %v1471_v56  ;;  %v1729_v56 = vld [vmem:[#allocation2 + $0x13a] sm:$0xff] }
 0x1cc   :  { %v884_v36 = vmax.f32 %v820_v14, 0.0  ;;  %v164_v14 = vmul.f32 %v7925_v59, %v96_v17  ;;  %1943 = vrot.lane.b32.xlu1 %v1791_v29, %s6796_s24  ;;  %1220 = vst.msk [vmem:[#allocation3 + $0xf0] sm:$0xf] %vm1189_vm5, %v8144_v57 }
 0x1cd   :  { %v4434_v39 = vld [vmem:[#allocation2 + $0x212] sm:$0xff]  ;;  %v4435_v30 = vld [vmem:[#allocation2 + $0x21a] sm:$0xff] }
 0x1ce   :  { %v4498_v43 = vpack.c.bf16 %v4434_v39, %v4434_v39  ;;  %1037 = vst.msk [vmem:[#allocation2 + $0x229] sm:$0xff] %vm908_vm2, %v884_v36  ;;  %v4499_v61 = vpack.c.bf16 %v4435_v30, %v4435_v30  ;;  %v232_v36 = vadd.f32 %v7935_v63, %v164_v14  ;;  %2388 = vrot.lane.b32.xlu0 %v8008_v16, %s6797_s14  ;;  %v1473_v39 = vpop.permute.xlu1 %1472  ;;  %v1281_v30 = vld [vmem:[#allocation2 + $0x141] sm:$0xff]  ;;  %v8165_v12 = vpop.f32.mrf.mxu2 }
 0x1cf   :  { %v639_v2 = vpop.f32.mrf.mxu0  ;;  %1652 = vst.msk [vmem:[#allocation3 + $0x68] sm:$0xf] %vm1638_vm6, %v1473_v39 }
 0x1d0   :  { %v753_v41 = vmul.f32 %v8069_v3, %v639_v2  ;;  %4562 = vst.msk [vmem:[#allocation3 + $0x124] sm:$0xf] %vm1189_vm5, %v4498_v43  ;;  %v296_v31 = vmax.f32 %v232_v36, 0.0  ;;  %v6678_v43 = vld [vmem:[#allocation3 + $0xd4] sm:$0xf]  ;;  %v97_v2 = vld [vmem:[%s9518_s0 + $0x1e0] sm:$0xff]  ;;  %1945 = vrot.lane.b32.xlu2 %v1792_v54, %s6796_s24 }
 0x1d1   :  { %4563 = vst.msk [vmem:[#allocation3 + $0x12c] sm:$0xf] %vm1189_vm5, %v4499_v61  ;;  %v6403_v0 = vor.u32 %v6678_v43, %v6400_v40  ;;  %v1345_v61 = vpack.c.bf16 %v1281_v30, %v1281_v30  ;;  %v165_v47 = vmul.f32 %v7925_v59, %v97_v2  ;;  %v6680_v30 = vld [vmem:[#allocation3 + $0xe4] sm:$0xf]  ;;  %v1282_v43 = vld [vmem:[#allocation2 + $0x151] sm:$0xff] }
 0x1d2   :  { %6285 = vmatmul.msk.f32.gmra.mxu0 %vm302_vm1, %v294_v44  ;;  %v821_v55 = vadd.f32 %v8082_v25, %v753_v41  ;;  %v2365_v44 = vpop.permute.xlu0 %2364  ;;  %2101 = vst.msk [vmem:[#allocation3 + $0x68] sm:$0xf] %vm2087_vm7, %v8088_v26  ;;  %v2181_v26 = vld [vmem:[#allocation2 + $0x170] sm:$0xff]  ;;  %v1475_v52 = vpop.permute.xlu2 %1474 }
 0x1d3   :  { %2547 = vst.msk [vmem:[#allocation3 + $0x50] sm:$0xf] %vm2536_vm8, %v2365_v44  ;;  %v233_v41 = vadd.f32 %v7935_v63, %v165_v47  ;;  %v99_v54 = vld [vmem:[%s9518_s0 + $0x1f0] sm:$0xff]  ;;  %v4428_v47 = vld [vmem:[#allocation2 + $0x19a] sm:$0xff] }
 0x1d4   :  { %v885_v11 = vmax.f32 %v821_v55, 0.0  ;;  %6597 = vmatmul.msk.bf16.gmra.mxu2 %vm908_vm2, %v6403_v0  ;;  %2390 = vrot.lane.b32.xlu1 %v8011_v28, %s6797_s14  ;;  %1653 = vst.msk [vmem:[#allocation3 + $0x70] sm:$0xf] %vm1638_vm6, %v1475_v52  ;;  %v4492_v52 = vpack.c.bf16 %v4428_v47, %v4428_v47 }
 0x1d5   :  { %v297_v7 = vmax.f32 %v233_v41, 0.0 }
 0x1d6   :  { %1038 = vst.msk [vmem:[#allocation2 + $0x231] sm:$0xff] %vm908_vm2, %v885_v11  ;;  %1500 = vrot.lane.b32.xlu0 %v1345_v61, %s6795_s23  ;;  %v1920_v55 = vpop.permute.xlu1 %1919  ;;  %v8168_v11 = vpack.c.bf16 %v2181_v26, %v2181_v26  ;;  %v8187_v10 = vpop.f32.mrf.mxu2  ;;  %v167_v61 = vmul.f32 %v7925_v59, %v99_v54  ;;  %v4429_v26 = vld [vmem:[#allocation2 + $0x1a2] sm:$0xff] }
 0x1d7   :  { %v642_v50 = vpop.f32.mrf.mxu0  ;;  %2100 = vst.msk [vmem:[#allocation3 + $0x60] sm:$0xf] %vm2087_vm7, %v1920_v55  ;;  %v4493_v41 = vpack.c.bf16 %v4429_v26, %v4429_v26  ;;  %v1732_v55 = vld [vmem:[#allocation2 + $0x15a] sm:$0xff]  ;;  %v1285_v26 = vld [vmem:[#allocation2 + $0x171] sm:$0xff] }
 0x1d8   :  { %v754_v20 = vmul.f32 %v8069_v3, %v642_v50  ;;  %v98_v50 = vld [vmem:[%s9518_s0 + $0x1e8] sm:$0xff]  ;;  %1221 = vst.msk [vmem:[#allocation3 + $0xf8] sm:$0xf] %vm1189_vm5, %v8168_v11 }
 0x1d9   :  { %v166_v29 = vmul.f32 %v7925_v59, %v98_v50  ;;  %4556 = vst.msk [vmem:[#allocation3 + $0xf4] sm:$0xf] %vm1189_vm5, %v4492_v52  ;;  %v1349_v52 = vpack.c.bf16 %v1285_v26, %v1285_v26 }
 0x1da   :  { %6286 = vmatmul.msk.f32.gmra.mxu0 %vm302_vm1, %v295_v49  ;;  %v822_v15 = vadd.f32 %v8082_v25, %v754_v20  ;;  %v2814_v28 = vpop.permute.xlu0 %2813  ;;  %v1344_v49 = vpack.c.bf16 %v1280_v22, %v1280_v22  ;;  %v1794_v20 = vpack.c.bf16 %v1730_v33, %v1730_v33  ;;  %v2369_v14 = vpop.permute.xlu2 %2368  ;;  %4557 = vst.msk [vmem:[#allocation3 + $0xfc] sm:$0xf] %vm1189_vm5, %v4493_v41  ;;  %v3511_v41 = vld [vmem:[#allocation2 + $0xb0] sm:$0xff] }
 0x1db   :  { %2996 = vst.msk [vmem:[#allocation3 + $0x50] sm:$0xf] %vm2985_vm9, %v2814_v28  ;;  %v234_v27 = vadd.f32 %v7935_v63, %v166_v29  ;;  %v6653_v29 = vld [vmem:[#allocation3 + $0x4] sm:$0xf0] }
 0x1dc   :  { %v886_v46 = vmax.f32 %v822_v15, 0.0  ;;  %3445 = vst.msk [vmem:[#allocation3 + $0x50] sm:$0xf] %vm3434_vm10, %v3263_v48  ;;  %1498 = vrot.lane.b32.xlu2 %v1344_v49, %s6795_s23  ;;  %v1793_v15 = vpack.c.bf16 %v1729_v56, %v1729_v56  ;;  %1949 = vrot.lane.b32.xlu1 %v1794_v20, %s6796_s24  ;;  %v1731_v20 = vld [vmem:[#allocation2 + $0x152] sm:$0xff] }
 0x1dd   :  { %v4436_v38 = vld [vmem:[#allocation2 + $0x22a] sm:$0xff]  ;;  %v4437_v51 = vld [vmem:[#allocation2 + $0x232] sm:$0xff]  ;;  %2549 = vst.msk [vmem:[#allocation3 + $0x60] sm:$0xf] %vm2536_vm8, %v2369_v14  ;;  %v298_v39 = vmax.f32 %v234_v27, 0.0 }
 0x1de   :  { %v4500_v42 = vpack.c.bf16 %v4436_v38, %v4436_v38  ;;  %1039 = vst.msk [vmem:[#allocation2 + $0x241] sm:$0xff] %vm908_vm2, %v886_v46  ;;  %v4501_v53 = vpack.c.bf16 %v4437_v51, %v4437_v51  ;;  %1947 = vrot.lane.b32.xlu0 %v1793_v15, %s6796_s24  ;;  %v2367_v38 = vpop.permute.xlu1 %2366  ;;  %v2184_v15 = vld [vmem:[#allocation2 + $0x1c8] sm:$0xff]  ;;  %v2185_v27 = vld [vmem:[#allocation2 + $0x1d0] sm:$0xff] }
 0x1df   :  { %v645_v18 = vpop.f32.mrf.mxu0  ;;  %2548 = vst.msk [vmem:[#allocation3 + $0x58] sm:$0xf] %vm2536_vm8, %v2367_v38 }
 0x1e0   :  { %v755_v16 = vmul.f32 %v8069_v3, %v645_v18  ;;  %4564 = vst.msk [vmem:[#allocation3 + $0x134] sm:$0xf] %vm1189_vm5, %v4500_v42  ;;  %v6408_v42 = vld [vmem:[#allocation3 + $0xe8] sm:$0xf0] }
 0x1e1   :  { %4565 = vst.msk [vmem:[#allocation3 + $0x13c] sm:$0xf] %vm1189_vm5, %v4501_v53  ;;  %v6411_v18 = vor.u32 %v6680_v30, %v6408_v42  ;;  %v8227_v42 = vpack.c.bf16 %v2185_v27, %v2185_v27 }
 0x1e2   :  { %6287 = vmatmul.msk.f32.gmra.mxu0 %vm302_vm1, %v296_v31  ;;  %v823_v58 = vadd.f32 %v8082_v25, %v755_v16  ;;  %v3711_v31 = vpop.permute.xlu0 %3710  ;;  %v1346_v16 = vpack.c.bf16 %v1282_v43, %v1282_v43  ;;  %v1284_v43 = vld [vmem:[#allocation2 + $0x169] sm:$0xff] }
 0x1e3   :  { %3894 = vst.msk [vmem:[#allocation3 + $0x48] sm:$0xf] %vm3884_vm11, %v3711_v31  ;;  %v1795_v31 = vpack.c.bf16 %v1731_v20, %v1731_v20  ;;  %v1733_v20 = vld [vmem:[#allocation2 + $0x16a] sm:$0xff] }
 0x1e4   :  { %v887_v5 = vmax.f32 %v823_v58, 0.0  ;;  %4343 = vst.msk [vmem:[#allocation3 + $0x48] sm:$0xf] %vm4333_vm12, %v8114_v9  ;;  %2392 = vrot.lane.b32.xlu2 %v8036_v60, %s6797_s14  ;;  %6598 = vmatmul.msk.bf16.gmra.mxu2 %vm908_vm2, %v6411_v18  ;;  %v1481_v9 = vpop.permute.xlu2 %1480  ;;  %v235_v58 = vadd.f32 %v7935_v63, %v167_v61  ;;  %v1283_v60 = vld [vmem:[#allocation2 + $0x159] sm:$0xff]  ;;  %v8231_v18 = vpack.c.bf16 %v2184_v15, %v2184_v15 }
 0x1e5   :  { %1502 = vrot.lane.b32.xlu1 %v1346_v16, %s6795_s23  ;;  %1656 = vst.msk [vmem:[#allocation3 + $0x88] sm:$0xf] %vm1638_vm6, %v1481_v9  ;;  %v6326_v63 = vld [vmem:[#allocation3 + $0x40] sm:$0xf]  ;;  %v1347_v33 = vpack.c.bf16 %v1283_v60, %v1283_v60  ;;  %v1348_v61 = vpack.c.bf16 %v1284_v43, %v1284_v43 }
 0x1e6   :  { %1040 = vst.msk [vmem:[#allocation2 + $0x249] sm:$0xff] %vm908_vm2, %v887_v5  ;;  %2394 = vrot.lane.b32.xlu0 %v8040_v13, %s6797_s14  ;;  %v2816_v5 = vpop.permute.xlu1 %2815  ;;  %v299_v59 = vmax.f32 %v235_v58, 0.0  ;;  %v8214_v13 = vpop.f32.mrf.mxu2  ;;  %v3061_v15 = vld [vmem:[#allocation2 + $0x9a] sm:$0xff] }
 0x1e7   :  { %v648_v23 = vpop.f32.mrf.mxu0  ;;  %2997 = vst.msk [vmem:[#allocation3 + $0x58] sm:$0xf] %vm2985_vm9, %v2816_v5 }
 0x1e8   :  { %v756_v19 = vmul.f32 %v8069_v3, %v648_v23  ;;  %1225 = vst.msk [vmem:[#allocation3 + $0x118] sm:$0xf] %vm1189_vm5, %v8227_v42 }
 0x1e9   :  { %1224 = vst.msk [vmem:[#allocation3 + $0x110] sm:$0xf] %vm1189_vm5, %v8231_v18 }
 0x1ea   :  { %6288 = vmatmul.msk.f32.gmra.mxu0 %vm302_vm1, %v297_v7  ;;  %v824_v17 = vadd.f32 %v8082_v25, %v756_v19  ;;  %v1477_v22 = vpop.permute.xlu0 %1476  ;;  %v1796_v19 = vpack.c.bf16 %v1732_v55, %v1732_v55 }
 0x1eb   :  { %1654 = vst.msk [vmem:[#allocation3 + $0x78] sm:$0xf] %vm1638_vm6, %v1477_v22  ;;  %v6661_v28 = vld [vmem:[#allocation3 + $0x44] sm:$0xf0] }
 0x1ec   :  { %v888_v48 = vmax.f32 %v824_v17, 0.0  ;;  %v6327_v49 = vor.u32 %v6661_v28, %v6326_v63  ;;  %1504 = vrot.lane.b32.xlu2 %v1347_v33, %s6795_s23  ;;  %v1928_v50 = vpop.permute.xlu2 %1927  ;;  %v2187_v33 = vld [vmem:[#allocation2 + $0x1e8] sm:$0xff] }
 0x1ed   :  { %v4438_v46 = vld [vmem:[#allocation2 + $0x242] sm:$0xff]  ;;  %v4439_v36 = vld [vmem:[#allocation2 + $0x24a] sm:$0xff]  ;;  %2396 = vrot.lane.b32.xlu1 %v8104_v62, %s6797_s14  ;;  %v8267_v27 = vpack.c.bf16 %v2187_v33, %v2187_v33 }
 0x1ee   :  { %v4502_v51 = vpack.c.bf16 %v4438_v46, %v4438_v46  ;;  %1041 = vst.msk [vmem:[#allocation2 + $0x259] sm:$0xff] %vm908_vm2, %v888_v48  ;;  %v4503_v44 = vpack.c.bf16 %v4439_v36, %v4439_v36  ;;  %5138 = vmatmul.bf16.gmra.mxu1 %v6327_v49  ;;  %1953 = vrot.lane.b32.xlu0 %v1796_v19, %s6796_s24  ;;  %v1926_v46 = vpop.permute.xlu1 %1925  ;;  %v8236_v54 = vpop.f32.mrf.mxu2  ;;  %v6424_v19 = vld [vmem:[#allocation3 + $0x108] sm:$0xf0] }
 0x1ef   :  { %v651_v53 = vpop.f32.mrf.mxu0  ;;  %2103 = vst.msk [vmem:[#allocation3 + $0x78] sm:$0xf] %vm2087_vm7, %v1926_v46  ;;  %v1797_v46 = vpack.c.bf16 %v1733_v20, %v1733_v20 }
 0x1f0   :  { %v757_v40 = vmul.f32 %v8069_v3, %v651_v53  ;;  %4566 = vst.msk [vmem:[#allocation3 + $0x144] sm:$0xf] %vm1189_vm5, %v4502_v51  ;;  %v6294_v51 = vld [vmem:[#allocation3] sm:$0xf]  ;;  %v6682_v53 = vld [vmem:[#allocation3 + $0xf4] sm:$0xf] }
 0x1f1   :  { %4567 = vst.msk [vmem:[#allocation3 + $0x14c] sm:$0xf] %vm1189_vm5, %v4503_v44  ;;  %v6295_v30 = vor.u32 %v6653_v29, %v6294_v51 }
 0x1f2   :  { %6289 = vmatmul.msk.f32.gmra.mxu0 %vm302_vm1, %v298_v39  ;;  %v825_v0 = vadd.f32 %v8082_v25, %v757_v40  ;;  %v1924_v39 = vpop.permute.xlu0 %1923  ;;  %v6416_v40 = vld [vmem:[#allocation3 + $0xf8] sm:$0xf0]  ;;  %1227 = vst.msk [vmem:[#allocation3 + $0x128] sm:$0xf] %vm1189_vm5, %v8267_v27 }
 0x1f3   :  { %2102 = vst.msk [vmem:[#allocation3 + $0x70] sm:$0xf] %vm2087_vm7, %v1924_v39 }
 0x1f4   :  { %v889_v2 = vmax.f32 %v825_v0, 0.0  ;;  %1951 = vrot.lane.b32.xlu2 %v1795_v31, %s6796_s24  ;;  %v6419_v0 = vor.u32 %v6682_v53, %v6416_v40  ;;  %v2375_v9 = vpop.permute.xlu2 %2374  ;;  %v3959_v53 = vld [vmem:[#allocation2 + $0xa9] sm:$0xff] }
 0x1f5   :  { %3712 = vrot.lane.b32.xlu1 %v7735_v4, %s6801_s27  ;;  %2552 = vst.msk [vmem:[#allocation3 + $0x78] sm:$0xf] %vm2536_vm8, %v2375_v9 }
 0x1f6   :  { %1042 = vst.msk [vmem:[#allocation2 + $0x261] sm:$0xff] %vm908_vm2, %v889_v2  ;;  %6599 = vmatmul.msk.bf16.gmra.mxu2 %vm908_vm2, %v6419_v0  ;;  %1506 = vrot.lane.b32.xlu0 %v1348_v61, %s6795_s23  ;;  %v1479_v58 = vpop.permute.xlu1 %1478  ;;  %v8257_v22 = vpop.f32.mrf.mxu2  ;;  %v8290_v61 = vpack.c.bf16 %v3959_v53, %v3959_v53 }
 0x1f7   :  { %v654_v7 = vpop.f32.mrf.mxu0  ;;  %1655 = vst.msk [vmem:[#allocation3 + $0x80] sm:$0xf] %vm1638_vm6, %v1479_v58 }
 0x1f8   :  { %v758_v23 = vmul.f32 %v8069_v3, %v654_v7  ;;  %2104 = vst.msk [vmem:[#allocation3 + $0x80] sm:$0xf] %vm2087_vm7, %v1928_v50  ;;  %v2186_v7 = vld [vmem:[#allocation2 + $0x1e0] sm:$0xff] }
 0x1f9   :  { %v8263_v29 = vpack.c.bf16 %v2186_v7, %v2186_v7 }
 0x1fa   :  { %6290 = vmatmul.msk.f32.gmra.mxu0 %vm302_vm1, %v299_v59  ;;  %v826_v56 = vadd.f32 %v8082_v25, %v758_v23  ;;  %v2371_v47 = vpop.permute.xlu0 %2370 }
 0x1fb   :  { %2550 = vst.msk [vmem:[#allocation3 + $0x68] sm:$0xf] %vm2536_vm8, %v2371_v47 }
 0x1fc   :  { %v890_v17 = vmax.f32 %v826_v56, 0.0  ;;  %2398 = vrot.lane.b32.xlu2 %v8096_v37, %s6797_s14  ;;  %v1934_v59 = vpop.permute.xlu2 %1933  ;;  %v6684_v56 = vld [vmem:[#allocation3 + $0x104] sm:$0xf]  ;;  %1226 = vst.msk [vmem:[#allocation3 + $0x120] sm:$0xf] %vm1189_vm5, %v8263_v29 }
 0x1fd   :  { %v4440_v14 = vld [vmem:[#allocation2 + $0x25a] sm:$0xff]  ;;  %v4441_v48 = vld [vmem:[#allocation2 + $0x262] sm:$0xff]  ;;  %1508 = vrot.lane.b32.xlu1 %v1349_v52, %s6795_s23 }
 0x1fe   :  { %v4504_v36 = vpack.c.bf16 %v4440_v14, %v4440_v14  ;;  %v4505_v38 = vpack.c.bf16 %v4441_v48, %v4441_v48  ;;  %1043 = vst.msk [vmem:[#allocation2 + $0x271] sm:$0xff] %vm908_vm2, %v890_v17  ;;  %2400 = vrot.lane.b32.xlu0 %v8144_v57, %s6797_s14  ;;  %v2373_v23 = vpop.permute.xlu1 %2372  ;;  %v3575_v57 = vpack.c.bf16 %v3511_v41, %v3511_v41  ;;  %v8281_v31 = vpop.f32.mrf.mxu2 }
 0x1ff   :  { %v657_v62 = vpop.f32.mrf.mxu0  ;;  %2551 = vst.msk [vmem:[#allocation3 + $0x70] sm:$0xf] %vm2536_vm8, %v2373_v23  ;;  %v6427_v48 = vor.u32 %v6684_v56, %v6424_v19 }
 0x200   :  { %v759_v44 = vmul.f32 %v8069_v3, %v657_v62  ;;  %4568 = vst.msk [vmem:[#allocation3 + $0x154] sm:$0xf] %vm1189_vm5, %v4504_v36  ;;  %v1734_v62 = vld [vmem:[#allocation2 + $0x172] sm:$0xff] }
 0x201   :  { %4569 = vst.msk [vmem:[#allocation3 + $0x15c] sm:$0xf] %vm1189_vm5, %v4505_v38  ;;  %v3125_v38 = vpack.c.bf16 %v3061_v15, %v3061_v15  ;;  %v1798_v40 = vpack.c.bf16 %v1734_v62, %v1734_v62  ;;  %v1289_v15 = vld [vmem:[#allocation2 + $0x1d1] sm:$0xff] }
 0x202   :  { %5118 = vmatmul.bf16.vlgmr.msrb.gmra.mxu0 %v6295_v30  ;;  %v827_v16 = vadd.f32 %v8082_v25, %v759_v44  ;;  %v1930_v50 = vpop.permute.xlu0 %1929 }
 0x203   :  { %2105 = vst.msk [vmem:[#allocation3 + $0x88] sm:$0xf] %vm2087_vm7, %v1930_v50  ;;  %v2189_v50 = vld [vmem:[#allocation2 + $0x200] sm:$0xff] }
 0x204   :  { %v891_v2 = vmax.f32 %v827_v16, 0.0  ;;  %3714 = vrot.lane.b32.xlu2 %v3575_v57, %s6801_s27  ;;  %v1487_v51 = vpop.permute.xlu2 %1486 }
 0x205   :  { %1955 = vrot.lane.b32.xlu1 %v1797_v46, %s6796_s24  ;;  %1659 = vst.msk [vmem:[#allocation3 + $0xa0] sm:$0xf] %vm1638_vm6, %v1487_v51  ;;  %v1738_v51 = vld [vmem:[#allocation2 + $0x1d2] sm:$0xff] }
 0x206   :  { %1044 = vst.msk [vmem:[#allocation2 + $0x279] sm:$0xff] %vm908_vm2, %v891_v2  ;;  %6600 = vmatmul.msk.bf16.gmra.mxu2 %vm908_vm2, %v6427_v48  ;;  %3264 = vrot.lane.b32.xlu0 %v3125_v38, %s6799_s20  ;;  %v1485_v30 = vpop.permute.xlu1 %1484  ;;  %v2182_v2 = vld [vmem:[#allocation2 + $0x180] sm:$0xff]  ;;  %v8301_v33 = vpop.f32.mrf.mxu2  ;;  %v1802_v53 = vpack.c.bf16 %v1738_v51, %v1738_v51 }
 0x207   :  { %v660_v60 = vpop.f32.mrf.mxu0  ;;  %1658 = vst.msk [vmem:[#allocation3 + $0x98] sm:$0xf] %vm1638_vm6, %v1485_v30 }
 0x208   :  { %v760_v4 = vmul.f32 %v8069_v3, %v660_v60  ;;  %2107 = vst.msk [vmem:[#allocation3 + $0x98] sm:$0xf] %vm2087_vm7, %v1934_v59  ;;  %v2188_v60 = vld [vmem:[#allocation2 + $0x1f8] sm:$0xff] }
 0x209   :  { %v6432_v59 = vld [vmem:[#allocation3 + $0x118] sm:$0xf0] }
 0x20a   :  { %v828_v5 = vadd.f32 %v8082_v25, %v760_v4  ;;  %v1483_v43 = vpop.permute.xlu0 %1482 }
 0x20b   :  { %1657 = vst.msk [vmem:[#allocation3 + $0x90] sm:$0xf] %vm1638_vm6, %v1483_v43 }
 0x20c   :  { %v892_v55 = vmax.f32 %v828_v5, 0.0  ;;  %1957 = vrot.lane.b32.xlu2 %v1798_v40, %s6796_s24  ;;  %v2381_v9 = vpop.permute.xlu2 %2380  ;;  %v6686_v5 = vld [vmem:[#allocation3 + $0x114] sm:$0xf] }
 0x20d   :  { %v4442_v63 = vld [vmem:[#allocation2 + $0x272] sm:$0xff]  ;;  %v4443_v28 = vld [vmem:[#allocation2 + $0x27a] sm:$0xff]  ;;  %2402 = vrot.lane.b32.xlu1 %v8168_v11, %s6797_s14 }
 0x20e   :  { %v4506_v49 = vpack.c.bf16 %v4442_v63, %v4442_v63  ;;  %v4507_v37 = vpack.c.bf16 %v4443_v28, %v4443_v28  ;;  %1045 = vst.msk [vmem:[#allocation2 + $0x289] sm:$0xff] %vm908_vm2, %v892_v55  ;;  %4161 = vrot.lane.b32.xlu0 %v8290_v61, %s6800_s26  ;;  %v1932_v4 = vpop.permute.xlu1 %1931  ;;  %v3960_v11 = vld [vmem:[#allocation2 + $0xb1] sm:$0xff]  ;;  %v2246_v63 = vpack.c.bf16 %v2182_v2, %v2182_v2  ;;  %v2183_v28 = vld [vmem:[#allocation2 + $0x188] sm:$0xff]  ;;  %v8330_v43 = vpop.f32.mrf.mxu2 }
 0x20f   :  { %v663_v17 = vpop.f32.mrf.mxu0  ;;  %2106 = vst.msk [vmem:[#allocation3 + $0x90] sm:$0xf] %vm2087_vm7, %v1932_v4  ;;  %v8307_v56 = vpack.c.bf16 %v3960_v11, %v3960_v11  ;;  %v2247_v20 = vpack.c.bf16 %v2183_v28, %v2183_v28 }
 0x210   :  { %v761_v14 = vmul.f32 %v8069_v3, %v663_v17  ;;  %4570 = vst.msk [vmem:[#allocation3 + $0x164] sm:$0xf] %vm1189_vm5, %v4506_v49  ;;  %v6435_v49 = vor.u32 %v6686_v5, %v6432_v59  ;;  %v1290_v59 = vld [vmem:[#allocation2 + $0x1e1] sm:$0xff] }
 0x211   :  { %4571 = vst.msk [vmem:[#allocation3 + $0x16c] sm:$0xf] %vm1189_vm5, %v4507_v37  ;;  %v8304_v37 = vpack.c.bf16 %v2188_v60, %v2188_v60 }
 0x212   :  { %v829_v36 = vadd.f32 %v8082_v25, %v761_v14  ;;  %v2377_v41 = vpop.permute.xlu0 %2376  ;;  %2555 = vst.msk [vmem:[#allocation3 + $0x90] sm:$0xf] %vm2536_vm8, %v2381_v9  ;;  %v8321_v14 = vpack.c.bf16 %v2189_v50, %v2189_v50  ;;  %v6688_v50 = vld [vmem:[#allocation3 + $0x124] sm:$0xf] }
 0x213   :  { %2553 = vst.msk [vmem:[#allocation3 + $0x80] sm:$0xf] %vm2536_vm8, %v2377_v41 }
 0x214   :  { %v893_v39 = vmax.f32 %v829_v36, 0.0  ;;  %2404 = vrot.lane.b32.xlu2 %v2246_v63, %s6797_s14  ;;  %v1493_v17 = vpop.permute.xlu2 %1492  ;;  %1228 = vst.msk [vmem:[#allocation3 + $0x130] sm:$0xf] %vm1189_vm5, %v8304_v37  ;;  %v1288_v36 = vld [vmem:[#allocation2 + $0x1c9] sm:$0xff] }
 0x215   :  { %4163 = vrot.lane.b32.xlu1 %v8307_v56, %s6800_s26  ;;  %1662 = vst.msk [vmem:[#allocation3 + $0xb8] sm:$0xf] %vm1638_vm6, %v1493_v17  ;;  %v1352_v30 = vpack.c.bf16 %v1288_v36, %v1288_v36 }
 0x216   :  { %1046 = vst.msk [vmem:[#allocation2 + $0x291] sm:$0xff] %vm908_vm2, %v893_v39  ;;  %6601 = vmatmul.msk.bf16.gmra.mxu2 %vm908_vm2, %v6435_v49  ;;  %2406 = vrot.lane.b32.xlu0 %v2247_v20, %s6797_s14  ;;  %v2379_v48 = vpop.permute.xlu1 %2378  ;;  %v1353_v39 = vpack.c.bf16 %v1289_v15, %v1289_v15  ;;  %v8351_v63 = vpop.f32.mrf.mxu2  ;;  %v1102_v49 = vld [vmem:[#allocation2 + $0x218] sm:$0xff]  ;;  %v6440_v20 = vld [vmem:[#allocation3 + $0x128] sm:$0xf0] }
 0x217   :  { %v666_v44 = vpop.f32.mrf.mxu0  ;;  %2554 = vst.msk [vmem:[#allocation3 + $0x88] sm:$0xf] %vm2536_vm8, %v2379_v48  ;;  %v1166_v17 = vpack.c.bf16 %v1102_v49, %v1102_v49  ;;  %v6443_v48 = vor.u32 %v6688_v50, %v6440_v20  ;;  %v6448_v50 = vld [vmem:[#allocation3 + $0x138] sm:$0xf0] }
 0x218   :  { %v762_v16 = vmul.f32 %v8069_v3, %v666_v44  ;;  %1229 = vst.msk [vmem:[#allocation3 + $0x138] sm:$0xf] %vm1189_vm5, %v8321_v14 }
 0x219   :  { %1231 = vst.msk [vmem:[#allocation3 + $0x148] sm:$0xf] %vm1189_vm5, %v1166_v17 }
 0x21a   :  { %v830_v0 = vadd.f32 %v8082_v25, %v762_v16  ;;  %v1489_v46 = vpop.permute.xlu0 %1488 }
 0x21b   :  { %1660 = vst.msk [vmem:[#allocation3 + $0xa8] sm:$0xf] %vm1638_vm6, %v1489_v46 }
 0x21c   :  { %v894_v58 = vmax.f32 %v830_v0, 0.0  ;;  %1516 = vrot.lane.b32.xlu2 %v1353_v39, %s6795_s23  ;;  %v1940_v40 = vpop.permute.xlu2 %1939  ;;  %v1737_v0 = vld [vmem:[#allocation2 + $0x1ca] sm:$0xff] }
 0x21d   :  { %v4444_v47 = vld [vmem:[#allocation2 + $0x28a] sm:$0xff]  ;;  %v4445_v26 = vld [vmem:[#allocation2 + $0x292] sm:$0xff]  ;;  %1514 = vrot.lane.b32.xlu1 %v1352_v30, %s6795_s23  ;;  %v1801_v5 = vpack.c.bf16 %v1737_v0, %v1737_v0 }
 0x21e   :  { %v8296_v52 = vpack.c.bf16 %v4444_v47, %v4444_v47  ;;  %1047 = vst.msk [vmem:[#allocation2 + $0x2a1] sm:$0xff] %vm908_vm2, %v894_v58  ;;  %v4509_v55 = vpack.c.bf16 %v4445_v26, %v4445_v26  ;;  %1965 = vrot.lane.b32.xlu0 %v1802_v53, %s6796_s24  ;;  %v1938_v58 = vpop.permute.xlu1 %1937  ;;  %v1740_v30 = vld [vmem:[#allocation2 + $0x1ea] sm:$0xff] }
 0x21f   :  { %v669_v7 = vpop.f32.mrf.mxu0  ;;  %2109 = vst.msk [vmem:[#allocation3 + $0xa8] sm:$0xf] %vm2087_vm7, %v1938_v58  ;;  %v1739_v58 = vld [vmem:[#allocation2 + $0x1e2] sm:$0xff] }
 0x220   :  { %v763_v23 = vmul.f32 %v8069_v3, %v669_v7  ;;  %4572 = vst.msk [vmem:[#allocation3 + $0x174] sm:$0xf] %vm1189_vm5, %v8296_v52 }
 0x221   :  { %4573 = vst.msk [vmem:[#allocation3 + $0x17c] sm:$0xf] %vm1189_vm5, %v4509_v55  ;;  %v1354_v55 = vpack.c.bf16 %v1290_v59, %v1290_v59  ;;  %v1803_v59 = vpack.c.bf16 %v1739_v58, %v1739_v58 }
 0x222   :  { %v831_v19 = vadd.f32 %v8082_v25, %v763_v23  ;;  %v1936_v60 = vpop.permute.xlu0 %1935  ;;  %v2190_v23 = vld [vmem:[#allocation2 + $0x210] sm:$0xff] }
 0x223   :  { %2108 = vst.msk [vmem:[#allocation3 + $0xa0] sm:$0xf] %vm2087_vm7, %v1936_v60  ;;  %v8357_v46 = vpack.c.bf16 %v2190_v23, %v2190_v23  ;;  %v1104_v23 = vld [vmem:[#allocation2 + $0x230] sm:$0xff] }
 0x224   :  { %v895_v57 = vmax.f32 %v831_v19, 0.0  ;;  %1963 = vrot.lane.b32.xlu2 %v1801_v5, %s6796_s24  ;;  %v2387_v7 = vpop.permute.xlu2 %2386 }
 0x225   :  { %2408 = vrot.lane.b32.xlu1 %v8231_v18, %s6797_s14  ;;  %2558 = vst.msk [vmem:[#allocation3 + $0xa8] sm:$0xf] %vm2536_vm8, %v2387_v7  ;;  %v1291_v18 = vld [vmem:[#allocation2 + $0x1e9] sm:$0xff] }
 0x226   :  { %1048 = vst.msk [vmem:[#allocation2 + $0x2a9] sm:$0xff] %vm908_vm2, %v895_v57  ;;  %1518 = vrot.lane.b32.xlu0 %v1354_v55, %s6795_s23  ;;  %v1491_v19 = vpop.permute.xlu1 %1490  ;;  %6602 = vmatmul.msk.bf16.gmra.mxu2 %vm908_vm2, %v6443_v48  ;;  %v1103_v7 = vld [vmem:[#allocation2 + $0x228] sm:$0xff] }
 0x227   :  { %v672_v38 = vpop.f32.mrf.mxu0  ;;  %1661 = vst.msk [vmem:[#allocation3 + $0xb0] sm:$0xf] %vm1638_vm6, %v1491_v19  ;;  %v6690_v19 = vld [vmem:[#allocation3 + $0x134] sm:$0xf]  ;;  %v1167_v20 = vpack.c.bf16 %v1103_v7, %v1103_v7 }
 0x228   :  { %v764_v62 = vmul.f32 %v8069_v3, %v672_v38  ;;  %2110 = vst.msk [vmem:[#allocation3 + $0xb0] sm:$0xf] %vm2087_vm7, %v1940_v40  ;;  %v1355_v38 = vpack.c.bf16 %v1291_v18, %v1291_v18  ;;  %v6451_v18 = vor.u32 %v6690_v19, %v6448_v50  ;;  %v1294_v50 = vld [vmem:[#allocation2 + $0x211] sm:$0xff] }
 0x229   :  { %1230 = vst.msk [vmem:[#allocation3 + $0x140] sm:$0xf] %vm1189_vm5, %v8357_v46 }
 0x22a   :  { %v832_v44 = vadd.f32 %v8082_v25, %v764_v62  ;;  %v2383_v57 = vpop.permute.xlu0 %2382  ;;  %1232 = vst.msk [vmem:[#allocation3 + $0x150] sm:$0xf] %vm1189_vm5, %v1167_v20 }
 0x22b   :  { %2556 = vst.msk [vmem:[#allocation3 + $0x98] sm:$0xf] %vm2536_vm8, %v2383_v57 }
 0x22c   :  { %v896_v16 = vmax.f32 %v832_v44, 0.0  ;;  %2410 = vrot.lane.b32.xlu2 %v8227_v42, %s6797_s14  ;;  %v1946_v39 = vpop.permute.xlu2 %1945  ;;  %v8372_v42 = vpop.f32.mrf.mxu2 }
 0x22d   :  { %v4446_v9 = vld [vmem:[#allocation2 + $0x2a2] sm:$0xff]  ;;  %v4447_v2 = vld [vmem:[#allocation2 + $0x2aa] sm:$0xff]  ;;  %1520 = vrot.lane.b32.xlu1 %v1355_v38, %s6795_s23 }
 0x22e   :  { %v8335_v47 = vpack.c.bf16 %v4446_v9, %v4446_v9  ;;  %v8337_v26 = vpack.c.bf16 %v4447_v2, %v4447_v2  ;;  %1049 = vst.msk [vmem:[#allocation2 + $0x2b9] sm:$0xff] %vm908_vm2, %v896_v16  ;;  %2412 = vrot.lane.b32.xlu0 %v8263_v29, %s6797_s14  ;;  %v2385_v40 = vpop.permute.xlu1 %2384  ;;  %v1293_v16 = vld [vmem:[#allocation2 + $0x201] sm:$0xff]  ;;  %v1804_v29 = vpack.c.bf16 %v1740_v30, %v1740_v30 }
 0x22f   :  { %v675_v4 = vpop.f32.mrf.mxu0  ;;  %2557 = vst.msk [vmem:[#allocation3 + $0xa0] sm:$0xf] %vm2536_vm8, %v2385_v40  ;;  %v1357_v5 = vpack.c.bf16 %v1293_v16, %v1293_v16 }
 0x230   :  { %v765_v41 = vmul.f32 %v8069_v3, %v675_v4  ;;  %4574 = vst.msk [vmem:[#allocation3 + $0x184] sm:$0xf] %vm1189_vm5, %v8335_v47 }
 0x231   :  { %4575 = vst.msk [vmem:[#allocation3 + $0x18c] sm:$0xf] %vm1189_vm5, %v8337_v26 }
 0x232   :  { %v833_v11 = vadd.f32 %v8082_v25, %v765_v41  ;;  %v1942_v2 = vpop.permute.xlu0 %1941 }
 0x233   :  { %2111 = vst.msk [vmem:[#allocation3 + $0xb8] sm:$0xf] %vm2087_vm7, %v1942_v2 }
 0x234   :  { %v897_v28 = vmax.f32 %v833_v11, 0.0  ;;  %1969 = vrot.lane.b32.xlu2 %v1804_v29, %s6796_s24 }
 0x235   :  { %1967 = vrot.lane.b32.xlu1 %v1803_v59, %s6796_s24 }
 0x236   :  { %1050 = vst.msk [vmem:[#allocation2 + $0x2c1] sm:$0xff] %vm908_vm2, %v897_v28  ;;  %v1499_v11 = vpop.permute.xlu2 %1498  ;;  %1524 = vrot.lane.b32.xlu0 %v1357_v5, %s6795_s23  ;;  %v1292_v28 = vld [vmem:[#allocation2 + $0x1f9] sm:$0xff]  ;;  %v1497_v49 = vpop.permute.xlu1 %1496  ;;  %6603 = vmatmul.msk.bf16.gmra.mxu2 %vm908_vm2, %v6451_v18  ;;  %v1358_v18 = vpack.c.bf16 %v1294_v50, %v1294_v50 }
 0x237   :  { %v678_v15 = vpop.f32.mrf.mxu0  ;;  %1665 = vst.msk [vmem:[#allocation3 + $0xd0] sm:$0xf] %vm1638_vm6, %v1499_v11  ;;  %v1356_v48 = vpack.c.bf16 %v1292_v28, %v1292_v28  ;;  %v6692_v28 = vld [vmem:[#allocation3 + $0x144] sm:$0xf] }
 0x238   :  { %v766_v36 = vmul.f32 %v8069_v3, %v678_v15  ;;  %1664 = vst.msk [vmem:[#allocation3 + $0xc8] sm:$0xf] %vm1638_vm6, %v1497_v49  ;;  %v1168_v15 = vpack.c.bf16 %v1104_v23, %v1104_v23  ;;  %v6456_v23 = vld [vmem:[#allocation3 + $0x148] sm:$0xf0] }
 0x239   :  { %2113 = vst.msk [vmem:[#allocation3 + $0xc8] sm:$0xf] %vm2087_vm7, %v1946_v39 }
 0x23a   :  { %v834_v51 = vadd.f32 %v8082_v25, %v766_v36  ;;  %v1495_v17 = vpop.permute.xlu0 %1494  ;;  %v1741_v36 = vld [vmem:[#allocation2 + $0x1fa] sm:$0xff]  ;;  %1233 = vst.msk [vmem:[#allocation3 + $0x158] sm:$0xf] %vm1189_vm5, %v1168_v15 }
 0x23b   :  { %1663 = vst.msk [vmem:[#allocation3 + $0xc0] sm:$0xf] %vm1638_vm6, %v1495_v17  ;;  %v1805_v30 = vpack.c.bf16 %v1741_v36, %v1741_v36  ;;  %v8444_v15 = vld [vmem:[%s9523_s5] ss:$0 sm:$0xff] }
 0x23c   :  { %v898_v62 = vmax.f32 %v834_v51, 0.0  ;;  %v8396_v51 = vpop.f32.mrf.mxu2  ;;  %1522 = vrot.lane.b32.xlu2 %v1356_v48, %s6795_s23 }
 0x23d   :  { %v4448_v44 = vld [vmem:[#allocation2 + $0x2ba] sm:$0xff]  ;;  %v4449_v53 = vld [vmem:[#allocation2 + $0x2c2] sm:$0xff]  ;;  %2414 = vrot.lane.b32.xlu1 %v8267_v27, %s6797_s14 }
 0x23e   :  { %v8374_v0 = vpack.c.bf16 %v4448_v44, %v4448_v44  ;;  %v8376_v9 = vpack.c.bf16 %v4449_v53, %v4449_v53  ;;  %1051 = vst.msk [vmem:[#allocation2 + $0x2d1] sm:$0xff] %vm908_vm2, %v898_v62  ;;  %v2393_v44 = vpop.permute.xlu2 %2392  ;;  %1971 = vrot.lane.b32.xlu0 %v1805_v30, %s6796_s24  ;;  %v1944_v16 = vpop.permute.xlu1 %1943 }
 0x23f   :  { %v681_v60 = vpop.f32.mrf.mxu0  ;;  %2112 = vst.msk [vmem:[#allocation3 + $0xc0] sm:$0xf] %vm2087_vm7, %v1944_v16 }
 0x240   :  { %v767_v4 = vmul.f32 %v8069_v3, %v681_v60  ;;  %4576 = vst.msk [vmem:[#allocation3 + $0x194] sm:$0xf] %vm1189_vm5, %v8374_v0  ;;  %v1742_v60 = vld [vmem:[#allocation2 + $0x202] sm:$0xff] }
 0x241   :  { %4577 = vst.msk [vmem:[#allocation3 + $0x19c] sm:$0xf] %vm1189_vm5, %v8376_v9  ;;  %v1806_v5 = vpack.c.bf16 %v1742_v60, %v1742_v60 }
 0x242   :  { %v835_v41 = vadd.f32 %v8082_v25, %v767_v4  ;;  %v2389_v58 = vpop.permute.xlu0 %2388  ;;  %2561 = vst.msk [vmem:[#allocation3 + $0xc0] sm:$0xf] %vm2536_vm8, %v2393_v44 }
 0x243   :  { %2559 = vst.msk [vmem:[#allocation3 + $0xb0] sm:$0xf] %vm2536_vm8, %v2389_v58 }
 0x244   :  { %v899_v55 = vmax.f32 %v835_v41, 0.0  ;;  %2416 = vrot.lane.b32.xlu2 %v8304_v37, %s6797_s14  ;;  %v8419_v59 = vpop.f32.mrf.mxu2  ;;  %v1106_v37 = vld [vmem:[#allocation2 + $0x248] sm:$0xff] }
 0x245   :  { %1973 = vrot.lane.b32.xlu1 %v1806_v5, %s6796_s24  ;;  %v1170_v20 = vpack.c.bf16 %v1106_v37, %v1106_v37 }
 0x246   :  { %1052 = vst.msk [vmem:[#allocation2 + $0x2d9] sm:$0xff] %vm908_vm2, %v899_v55  ;;  %v1505_v11 = vpop.permute.xlu2 %1504  ;;  %v1105_v55 = vld [vmem:[#allocation2 + $0x240] sm:$0xff]  ;;  %2418 = vrot.lane.b32.xlu0 %v8321_v14, %s6797_s14  ;;  %v2391_v7 = vpop.permute.xlu1 %2390 }
 0x247   :  { %v684_v57 = vpop.f32.mrf.mxu0  ;;  %1668 = vst.msk [vmem:[#allocation3 + $0xe8] sm:$0xf] %vm1638_vm6, %v1505_v11  ;;  %v1169_v49 = vpack.c.bf16 %v1105_v55, %v1105_v55  ;;  %v8434_v14 = vld [vmem:[%s9522_s4] ss:$0 sm:$0xff]  ;;  %v1743_v55 = vld [vmem:[#allocation2 + $0x212] sm:$0xff] }
 0x248   :  { %v768_v38 = vmul.f32 %v8069_v3, %v684_v57  ;;  %2560 = vst.msk [vmem:[#allocation3 + $0xb8] sm:$0xf] %vm2536_vm8, %v2391_v7  ;;  %v1108_v11 = vld [vmem:[#allocation2 + $0x260] sm:$0xff] }
 0x249   :  { %1234 = vst.msk [vmem:[#allocation3 + $0x160] sm:$0xf] %vm1189_vm5, %v1169_v49 }
 0x24a   :  { %v836_v62 = vadd.f32 %v8082_v25, %v768_v38  ;;  %v1501_v19 = vpop.permute.xlu0 %1500  ;;  %1235 = vst.msk [vmem:[#allocation3 + $0x168] sm:$0xf] %vm1189_vm5, %v1170_v20  ;;  %v1807_v20 = vpack.c.bf16 %v1743_v55, %v1743_v55 }
 0x24b   :  { %1666 = vst.msk [vmem:[#allocation3 + $0xd8] sm:$0xf] %vm1638_vm6, %v1501_v19 }
 0x24c   :  { %v900_v53 = vmax.f32 %v836_v62, 0.0  ;;  %2817 = vrot.lane.b32.xlu2 %v8290_v61, %s6798_s17  ;;  %v8449_v38 = vpop.f32.mrf.mxu2  ;;  %v1295_v61 = vld [vmem:[#allocation2 + $0x219] sm:$0xff] }
 0x24d   :  { %v4450_v39 = vld [vmem:[#allocation2 + $0x2d2] sm:$0xff]  ;;  %v4451_v40 = vld [vmem:[#allocation2 + $0x2da] sm:$0xff]  ;;  %1526 = vrot.lane.b32.xlu1 %v1358_v18, %s6795_s23 }
 0x24e   :  { %v8406_v2 = vpack.c.bf16 %v4450_v39, %v4450_v39  ;;  %1053 = vst.msk [vmem:[#allocation2 + $0x2e9] sm:$0xff] %vm908_vm2, %v900_v53  ;;  %v8410_v29 = vpack.c.bf16 %v4451_v40, %v4451_v40  ;;  %v1952_v36 = vpop.permute.xlu2 %1951  ;;  %2819 = vrot.lane.b32.xlu0 %v8307_v56, %s6798_s17  ;;  %v1950_v30 = vpop.permute.xlu1 %1949  ;;  %v1744_v53 = vld [vmem:[#allocation2 + $0x21a] sm:$0xff]  ;;  %v1359_v39 = vpack.c.bf16 %v1295_v61, %v1295_v61 }
 0x24f   :  { %v687_v27 = vpop.f32.mrf.mxu0  ;;  %2115 = vst.msk [vmem:[#allocation3 + $0xd8] sm:$0xf] %vm2087_vm7, %v1950_v30 }
 0x250   :  { %v769_v4 = vmul.f32 %v8069_v3, %v687_v27  ;;  %4578 = vst.msk [vmem:[#allocation3 + $0x1a4] sm:$0xf] %vm1189_vm5, %v8406_v2 }
 0x251   :  { %4579 = vst.msk [vmem:[#allocation3 + $0x1ac] sm:$0xf] %vm1189_vm5, %v8410_v29 }
 0x252   :  { %v837_v41 = vadd.f32 %v8082_v25, %v769_v4  ;;  %v6459_v25 = vor.u32 %v6692_v28, %v6456_v23  ;;  %v1948_v44 = vpop.permute.xlu0 %1947  ;;  %v1808_v4 = vpack.c.bf16 %v1744_v53, %v1744_v53  ;;  %v6694_v28 = vld [vmem:[#allocation3 + $0x154] sm:$0xf]  ;;  %v6464_v23 = vld [vmem:[#allocation3 + $0x158] sm:$0xf0] }
 0x253   :  { %2114 = vst.msk [vmem:[#allocation3 + $0xd0] sm:$0xf] %vm2087_vm7, %v1948_v44  ;;  %v6467_v50 = vor.u32 %v6694_v28, %v6464_v23 }
 0x254   :  { %v901_v3 = vmax.f32 %v837_v41, 0.0  ;;  %6604 = vmatmul.msk.bf16.gmra.mxu2 %vm908_vm2, %v6459_v25  ;;  %1528 = vrot.lane.b32.xlu2 %v1359_v39, %s6795_s23  ;;  %v8471_v49 = vpop.f32.mrf.mxu2  ;;  %v1172_v25 = vpack.c.bf16 %v1108_v11, %v1108_v11 }
 0x255   :  { %2420 = vrot.lane.b32.xlu1 %v8357_v46, %s6797_s14  ;;  %v3062_v46 = vld [vmem:[#allocation2 + $0xaa] sm:$0xff] }
 0x256   :  { %1054 = vst.msk [vmem:[#allocation2 + $0x2f1] sm:$0xff] %vm908_vm2, %v901_v3  ;;  %v2399_v41 = vpop.permute.xlu2 %2398  ;;  %1977 = vrot.lane.b32.xlu0 %v1808_v4, %s6796_s24  ;;  %v1107_v3 = vld [vmem:[#allocation2 + $0x258] sm:$0xff]  ;;  %v3126_v61 = vpack.c.bf16 %v3062_v46, %v3062_v46  ;;  %v1109_v46 = vld [vmem:[#allocation2 + $0x270] sm:$0xff] }
 0x257   :  { %v690_v17 = vpop.f32.mrf.mxu0  ;;  %2564 = vst.msk [vmem:[#allocation3 + $0xd8] sm:$0xf] %vm2536_vm8, %v2399_v41  ;;  %v1503_v37 = vpop.permute.xlu1 %1502  ;;  %v1171_v18 = vpack.c.bf16 %v1107_v3, %v1107_v3 }
 0x258   :  { %v770_v57 = vmul.f32 %v8434_v14, %v690_v17  ;;  %1667 = vst.msk [vmem:[#allocation3 + $0xe0] sm:$0xf] %vm1638_vm6, %v1503_v37  ;;  %v1296_v17 = vld [vmem:[#allocation2 + $0x229] sm:$0xff] }
 0x259   :  { %2116 = vst.msk [vmem:[#allocation3 + $0xe0] sm:$0xf] %vm2087_vm7, %v1952_v36  ;;  %v3063_v36 = vld [vmem:[#allocation2 + $0xb2] sm:$0xff] }
 0x25a   :  { %v838_v48 = vadd.f32 %v8444_v15, %v770_v57  ;;  %v2395_v19 = vpop.permute.xlu0 %2394  ;;  %1237 = vst.msk [vmem:[#allocation3 + $0x178] sm:$0xf] %vm1189_vm5, %v1172_v25 }
 0x25b   :  { %2562 = vst.msk [vmem:[#allocation3 + $0xc8] sm:$0xf] %vm2536_vm8, %v2395_v19 }
 0x25c   :  { %v902_v62 = vmax.f32 %v838_v48, 0.0  ;;  %1975 = vrot.lane.b32.xlu2 %v1807_v20, %s6796_s24  ;;  %1236 = vst.msk [vmem:[#allocation3 + $0x170] sm:$0xf] %vm1189_vm5, %v1171_v18  ;;  %v1110_v20 = vld [vmem:[#allocation2 + $0x278] sm:$0xff]  ;;  %v6696_v18 = vld [vmem:[#allocation3 + $0x164] sm:$0xf] }
 0x25d   :  { %v4452_v40 = vld [vmem:[#allocation2 + $0x2ea] sm:$0xff]  ;;  %v4453_v16 = vld [vmem:[#allocation2 + $0x2f2] sm:$0xff]  ;;  %3266 = vrot.lane.b32.xlu1 %v3126_v61, %s6799_s20  ;;  %v1173_v61 = vpack.c.bf16 %v1109_v46, %v1109_v46 }
 0x25e   :  { %v8455_v60 = vpack.c.bf16 %v4452_v40, %v4452_v40  ;;  %v8457_v27 = vpack.c.bf16 %v4453_v16, %v4453_v16  ;;  %1055 = vst.msk [vmem:[#allocation2 + $0x301] sm:$0xff] %vm908_vm2, %v902_v62  ;;  %v1360_v62 = vpack.c.bf16 %v1296_v17, %v1296_v17  ;;  %v8483_v44 = vpop.permute.xlu2 %3714  ;;  %v1297_v16 = vld [vmem:[#allocation2 + $0x231] sm:$0xff]  ;;  %v3513_v46 = vld [vmem:[#allocation2 + $0xc8] sm:$0xff] }
 0x25f   :  { %v693_v58 = vpop.f32.mrf.mxu0  ;;  %v2397_v39 = vpop.permute.xlu1 %2396  ;;  %v1361_v3 = vpack.c.bf16 %v1297_v16, %v1297_v16  ;;  %1238 = vst.msk [vmem:[#allocation3 + $0x180] sm:$0xf] %vm1189_vm5, %v1173_v61 }
 0x260   :  { %v771_v56 = vmul.f32 %v8434_v14, %v693_v58  ;;  %4580 = vst.msk [vmem:[#allocation3 + $0x1b4] sm:$0xf] %vm1189_vm5, %v8455_v60  ;;  %1530 = vrot.lane.b32.xlu0 %v1360_v62, %s6795_s23  ;;  %v3127_v58 = vpack.c.bf16 %v3063_v36, %v3063_v36 }
 0x261   :  { %4581 = vst.msk [vmem:[#allocation3 + $0x1bc] sm:$0xf] %vm1189_vm5, %v8457_v27 }
 0x262   :  { %v839_v5 = vadd.f32 %v8444_v15, %v771_v56  ;;  %2563 = vst.msk [vmem:[#allocation3 + $0xd0] sm:$0xf] %vm2536_vm8, %v2397_v39  ;;  %v1954_v40 = vpop.permute.xlu0 %1953  ;;  %v3512_v56 = vld [vmem:[#allocation2 + $0xc0] sm:$0xff] }
 0x263   :  { %2117 = vst.msk [vmem:[#allocation3 + $0xe8] sm:$0xf] %vm2087_vm7, %v1954_v40  ;;  %v3576_v28 = vpack.c.bf16 %v3512_v56, %v3512_v56 }
 0x264   :  { %v903_v7 = vmax.f32 %v839_v5, 0.0  ;;  %6605 = vmatmul.msk.bf16.gmra.mxu2 %vm908_vm2, %v6467_v50  ;;  %v8489_v5 = vpop.f32.mrf.mxu2  ;;  %3268 = vrot.lane.b32.xlu2 %v3127_v58, %s6799_s20  ;;  %v1746_v50 = vld [vmem:[#allocation2 + $0x232] sm:$0xff] }
 0x265   :  { %1532 = vrot.lane.b32.xlu1 %v1361_v3, %s6795_s23  ;;  %v1810_v39 = vpack.c.bf16 %v1746_v50, %v1746_v50 }
 0x266   :  { %1056 = vst.msk [vmem:[#allocation2 + $0x309] sm:$0xff] %vm908_vm2, %v903_v7  ;;  %v1958_v19 = vpop.permute.xlu2 %1957 }
 0x267   :  { %v696_v57 = vpop.f32.mrf.mxu0  ;;  %v3713_v17 = vpop.permute.xlu1 %3712 }
 0x268   :  { %v772_v48 = vmul.f32 %v8434_v14, %v696_v57  ;;  %3716 = vrot.lane.b32.xlu0 %v3576_v28, %s6801_s27  ;;  %v1299_v57 = vld [vmem:[#allocation2 + $0x249] sm:$0xff]  ;;  %3895 = vst.msk [vmem:[#allocation3 + $0x50] sm:$0xf] %vm3884_vm11, %v3713_v17 }
 0x269   :  { %v1363_v16 = vpack.c.bf16 %v1299_v57, %v1299_v57 }
 0x26a   :  { %v840_v30 = vadd.f32 %v8444_v15, %v772_v48  ;;  %v6472_v48 = vld [vmem:[#allocation3 + $0x168] sm:$0xf0]  ;;  %v1507_v62 = vpop.permute.xlu0 %1506 }
 0x26b   :  { %v6475_v36 = vor.u32 %v6696_v18, %v6472_v48  ;;  %1669 = vst.msk [vmem:[#allocation3 + $0xf0] sm:$0xf] %vm1638_vm6, %v1507_v62  ;;  %v3577_v48 = vpack.c.bf16 %v3513_v46, %v3513_v46 }
 0x26c   :  { %v904_v53 = vmax.f32 %v840_v30, 0.0  ;;  %v1745_v30 = vld [vmem:[#allocation2 + $0x22a] sm:$0xff]  ;;  %1981 = vrot.lane.b32.xlu2 %v1810_v39, %s6796_s24  ;;  %v3961_v39 = vld [vmem:[#allocation2 + $0xc1] sm:$0xff] }
 0x26d   :  { %v4454_v41 = vld [vmem:[#allocation2 + $0x302] sm:$0xff]  ;;  %v4455_v11 = vld [vmem:[#allocation2 + $0x30a] sm:$0xff]  ;;  %v1809_v56 = vpack.c.bf16 %v1745_v30, %v1745_v30  ;;  %v8547_v46 = vpack.c.bf16 %v3961_v39, %v3961_v39 }
 0x26e   :  { %1057 = vst.msk [vmem:[#allocation2 + $0x319] sm:$0xff] %vm908_vm2, %v904_v53  ;;  %v8494_v37 = vpack.c.bf16 %v4454_v41, %v4454_v41  ;;  %v8496_v7 = vpack.c.bf16 %v4455_v11, %v4455_v11  ;;  %v1174_v53 = vpack.c.bf16 %v1110_v20, %v1110_v20  ;;  %v2405_v11 = vpop.permute.xlu2 %2404 }
 0x26f   :  { %v699_v4 = vpop.f32.mrf.mxu0  ;;  %1979 = vrot.lane.b32.xlu1 %v1809_v56, %s6796_s24  ;;  %v1509_v3 = vpop.permute.xlu1 %1508 }
 0x270   :  { %v773_v55 = vmul.f32 %v8434_v14, %v699_v4  ;;  %4582 = vst.msk [vmem:[#allocation3 + $0x1c4] sm:$0xf] %vm1189_vm5, %v8494_v37  ;;  %v8512_v4 = vpop.f32.mrf.mxu2  ;;  %1536 = vrot.lane.b32.xlu0 %v1363_v16, %s6795_s23  ;;  %v6480_v16 = vld [vmem:[#allocation3 + $0x178] sm:$0xf0] }
 0x271   :  { %4583 = vst.msk [vmem:[#allocation3 + $0x1cc] sm:$0xf] %vm1189_vm5, %v8496_v7 }
 0x272   :  { %v841_v23 = vadd.f32 %v8444_v15, %v773_v55  ;;  %1239 = vst.msk [vmem:[#allocation3 + $0x188] sm:$0xf] %vm1189_vm5, %v1174_v53  ;;  %v1298_v55 = vld [vmem:[#allocation2 + $0x241] sm:$0xff] }
 0x273   :  { %1670 = vst.msk [vmem:[#allocation3 + $0xf8] sm:$0xf] %vm1638_vm6, %v1509_v3  ;;  %v1362_v50 = vpack.c.bf16 %v1298_v55, %v1298_v55 }
 0x274   :  { %v905_v25 = vmax.f32 %v841_v23, 0.0  ;;  %6606 = vmatmul.msk.bf16.gmra.mxu2 %vm908_vm2, %v6475_v36  ;;  %v2401_v23 = vpop.permute.xlu0 %2400  ;;  %2119 = vst.msk [vmem:[#allocation3 + $0xf8] sm:$0xf] %vm2087_vm7, %v1958_v19  ;;  %v1111_v19 = vld [vmem:[#allocation2 + $0x288] sm:$0xff]  ;;  %v8538_v36 = vld [vmem:[%s9525_s7] ss:$0 sm:$0xff] }
 0x275   :  { %2565 = vst.msk [vmem:[#allocation3 + $0xe0] sm:$0xf] %vm2536_vm8, %v2401_v23  ;;  %1534 = vrot.lane.b32.xlu2 %v1362_v50, %s6795_s23  ;;  %v3962_v50 = vld [vmem:[#allocation2 + $0xc9] sm:$0xff] }
 0x276   :  { %1058 = vst.msk [vmem:[#allocation2 + $0x321] sm:$0xff] %vm908_vm2, %v905_v25  ;;  %v1517_v30 = vpop.permute.xlu2 %1516 }
 0x277   :  { %v702_v40 = vpop.f32.mrf.mxu0  ;;  %3718 = vrot.lane.b32.xlu1 %v3577_v48, %s6801_s27  ;;  %1674 = vst.msk [vmem:[#allocation3 + $0x118] sm:$0xf] %vm1638_vm6, %v1517_v30 }
 0x278   :  { %v774_v58 = vmul.f32 %v8434_v14, %v702_v40  ;;  %v8518_v14 = vpop.f32.mrf.mxu1  ;;  %v8540_v53 = vpop.f32.mrf.mxu2  ;;  %v6698_v40 = vld [vmem:[#allocation3 + $0x174] sm:$0xf] }
 0x279   :  { %v6483_v3 = vor.u32 %v6698_v40, %v6480_v16 }
 0x27a   :  { %v842_v41 = vadd.f32 %v8444_v15, %v774_v58  ;;  %v1747_v15 = vld [vmem:[#allocation2 + $0x242] sm:$0xff]  ;;  %v1112_v58 = vld [vmem:[#allocation2 + $0x290] sm:$0xff] }
 0x27b   :  { %v1811_v61 = vpack.c.bf16 %v1747_v15, %v1747_v15 }
 0x27c   :  { %v906_v28 = vmax.f32 %v842_v41, 0.0  ;;  %v3265_v56 = vpop.permute.xlu0 %3264  ;;  %v1748_v41 = vld [vmem:[#allocation2 + $0x24a] sm:$0xff] }
 0x27d   :  { %v4456_v25 = vld [vmem:[#allocation2 + $0x31a] sm:$0xff]  ;;  %v4457_v20 = vld [vmem:[#allocation2 + $0x322] sm:$0xff]  ;;  %1983 = vrot.lane.b32.xlu0 %v1811_v61, %s6796_s24  ;;  %3446 = vst.msk [vmem:[#allocation3 + $0x58] sm:$0xf] %vm3434_vm10, %v3265_v56  ;;  %v1176_v61 = vpack.c.bf16 %v1112_v58, %v1112_v58  ;;  %4165 = vrot.lane.b32.xlu2 %v8547_v46, %s6800_s26 }
 0x27e   :  { %v8523_v57 = vpack.c.bf16 %v4456_v25, %v4456_v25  ;;  %v8525_v18 = vpack.c.bf16 %v4457_v20, %v4457_v20  ;;  %1059 = vst.msk [vmem:[#allocation2 + $0x331] sm:$0xff] %vm908_vm2, %v906_v28  ;;  %v1175_v28 = vpack.c.bf16 %v1111_v19, %v1111_v19  ;;  %v6725_v25 = vld [vmem:[%s9527_s9] sm:$0xff]  ;;  %v8564_v19 = vpack.c.bf16 %v3962_v50, %v3962_v50 }
 0x27f   :  { %v5119_v17 = vpop.f32.mrf.mxu0  ;;  %v8555_v20 = vld [vmem:[%s9526_s8] ss:$0 sm:$0xff]  ;;  %3896 = vst.msk [vmem:[#allocation3 + $0x58] sm:$0xf] %vm3884_vm11, %v8483_v44  ;;  %5791 = vmatpush.bf16.msra.mxu3 %v6725_v25 }
 0x280   :  { %4584 = vst.msk [vmem:[#allocation3 + $0x1d4] sm:$0xf] %vm1189_vm5, %v8523_v57  ;;  %v5289_v62 = vadd.f32 %v7902_v45, %v5119_v17  ;;  %v1956_v45 = vpop.permute.xlu1 %1955  ;;  %v5126_v23 = vpop.f32.mrf.mxu1  ;;  %v1300_v56 = vld [vmem:[#allocation2 + $0x259] sm:$0xff] }
 0x281   :  { %4585 = vst.msk [vmem:[#allocation3 + $0x1dc] sm:$0xf] %vm1189_vm5, %v8525_v18  ;;  %v8577_v16 = vpop.f32.mrf.mxu2 }
 0x282   :  { %2118 = vst.msk [vmem:[#allocation3 + $0xf0] sm:$0xf] %vm2087_vm7, %v1956_v45  ;;  %v5452_v55 = vmul.f32 %v8538_v36, %v5289_v62  ;;  %v1812_v62 = vpack.c.bf16 %v1748_v41, %v1748_v41 }
 0x283   :  { %2567 = vst.msk [vmem:[#allocation3 + $0xf0] sm:$0xf] %vm2536_vm8, %v2405_v11  ;;  %v1301_v11 = vld [vmem:[#allocation2 + $0x261] sm:$0xff] }
 0x284   :  { %6607 = vmatmul.msk.bf16.gmra.mxu2 %vm908_vm2, %v6483_v3  ;;  %v5520_v39 = vadd.f32 %v8555_v20, %v5452_v55  ;;  %1240 = vst.msk [vmem:[#allocation3 + $0x190] sm:$0xf] %vm1189_vm5, %v1175_v28  ;;  %1985 = vrot.lane.b32.xlu1 %v1812_v62, %s6796_s24  ;;  %v4162_v58 = vpop.permute.xlu0 %4161  ;;  %v1750_v28 = vld [vmem:[#allocation2 + $0x262] sm:$0xff]  ;;  %v1365_v50 = vpack.c.bf16 %v1301_v11, %v1301_v11 }
 0x285   :  { %v4458_v17 = vld [vmem:[#allocation2 + $0x332] sm:$0xff]  ;;  %4167 = vrot.lane.b32.xlu0 %v8564_v19, %s6800_s26  ;;  %1241 = vst.msk [vmem:[#allocation3 + $0x198] sm:$0xf] %vm1189_vm5, %v1176_v61  ;;  %v1814_v61 = vpack.c.bf16 %v1750_v28, %v1750_v28 }
 0x286   :  { %v4522_v30 = vpack.c.bf16 %v4458_v17, %v4458_v17  ;;  %v5584_v41 = vmax.f32 %v5520_v39, 0.0  ;;  %4344 = vst.msk [vmem:[#allocation3 + $0x50] sm:$0xf] %vm4333_vm12, %v4162_v58  ;;  %v1364_v17 = vpack.c.bf16 %v1300_v56, %v1300_v56  ;;  %1540 = vrot.lane.b32.xlu2 %v1365_v50, %s6795_s23  ;;  %v1113_v39 = vld [vmem:[#allocation2 + $0x2a0] sm:$0xff] }
 0x287   :  { %v5121_v15 = vpop.f32.mrf.mxu0 }
 0x288   :  { %v5291_v48 = vadd.f32 %v7941_v24, %v5121_v15  ;;  %v8570_v24 = vpop.permute.xlu2 %1963  ;;  %4586 = vst.msk [vmem:[#allocation3 + $0x1e4] sm:$0xf] %vm1189_vm5, %v4522_v30  ;;  %v2403_v40 = vpop.permute.xlu1 %2402  ;;  %v5296_v15 = vadd.f32 %v7985_v6, %v5126_v23  ;;  %v1114_v30 = vld [vmem:[#allocation2 + $0x2a8] sm:$0xff]  ;;  %v1749_v6 = vld [vmem:[#allocation2 + $0x25a] sm:$0xff] }
 0x289   :  { %2566 = vst.msk [vmem:[#allocation3 + $0xe8] sm:$0xf] %vm2536_vm8, %v2403_v40  ;;  %v5129_v3 = vpop.f32.mrf.mxu1  ;;  %v1178_v23 = vpack.c.bf16 %v1114_v30, %v1114_v30  ;;  %v6488_v40 = vld [vmem:[#allocation3 + $0x188] sm:$0xf0]  ;;  %v8594_v50 = vpop.f32.mrf.mxu2 }
 0x28a   :  { %v5453_v44 = vmul.f32 %v8538_v36, %v5291_v48  ;;  %v5294_v48 = vadd.f32 %v7965_v35, %v8518_v14  ;;  %v1177_v35 = vpack.c.bf16 %v1113_v39, %v1113_v39 }
 0x28b   :  { %1243 = vst.msk [vmem:[#allocation3 + $0x1a8] sm:$0xf] %vm1189_vm5, %v1178_v23 }
 0x28c   :  { %v5521_v45 = vadd.f32 %v8555_v20, %v5453_v44  ;;  %1538 = vrot.lane.b32.xlu1 %v1364_v17, %s6795_s23  ;;  %v5455_v44 = vmul.f32 %v8538_v36, %v5296_v15  ;;  %v5454_v14 = vmul.f32 %v8538_v36, %v5294_v48  ;;  %v2407_v58 = vpop.permute.xlu0 %2406  ;;  %1242 = vst.msk [vmem:[#allocation3 + $0x1a0] sm:$0xf] %vm1189_vm5, %v1177_v35 }
 0x28d   :  { %1989 = vrot.lane.b32.xlu0 %v1814_v61, %s6796_s24  ;;  %2568 = vst.msk [vmem:[#allocation3 + $0xf8] sm:$0xf] %vm2536_vm8, %v2407_v58  ;;  %v6334_v30 = vld [vmem:[#allocation3 + $0x50] sm:$0xf]  ;;  %v5299_v58 = vadd.f32 %v8013_v32, %v5129_v3  ;;  %v6702_v3 = vld [vmem:[#allocation3 + $0x194] sm:$0xf] }
 0x28e   :  { %v5585_v55 = vmax.f32 %v5521_v45, 0.0  ;;  %v6700_v45 = vld [vmem:[#allocation3 + $0x184] sm:$0xf]  ;;  %v5523_v28 = vadd.f32 %v8555_v20, %v5455_v44  ;;  %v1305_v32 = vld [vmem:[#allocation2 + $0x291] sm:$0xff] }
 0x28f   :  { %v6491_v56 = vor.u32 %v6700_v45, %v6488_v40  ;;  %v3064_v45 = vld [vmem:[#allocation2 + $0xc2] sm:$0xff] }
 0x290   :  { %v5648_v25 = vpack.c.bf16 %v5585_v55, %v5584_v41  ;;  %v2411_v62 = vpop.permute.xlu2 %2410  ;;  %v4164_v11 = vpop.permute.xlu1 %4163  ;;  %v1813_v41 = vpack.c.bf16 %v1749_v6, %v1749_v6  ;;  %v1302_v55 = vld [vmem:[#allocation2 + $0x271] sm:$0xff]  ;;  %v5587_v61 = vmax.f32 %v5523_v28, 0.0 }
 0x291   :  { %2570 = vst.msk [vmem:[#allocation3 + $0x108] sm:$0xf] %vm2536_vm8, %v2411_v62  ;;  %v5131_v15 = vpop.f32.mrf.mxu1  ;;  %v1366_v17 = vpack.c.bf16 %v1302_v55, %v1302_v55  ;;  %v1116_v55 = vld [vmem:[#allocation2 + $0x2c0] sm:$0xff] }
 0x292   :  { %6620 = vmatmul.msk.bf16.vlgmr.msra.gmra.mxu3 %vm908_vm2, %v5648_v25  ;;  %4345 = vst.msk [vmem:[#allocation3 + $0x58] sm:$0xf] %vm4333_vm12, %v4164_v11  ;;  %1987 = vrot.lane.b32.xlu2 %v1813_v41, %s6796_s24  ;;  %v5522_v25 = vadd.f32 %v8555_v20, %v5454_v14  ;;  %v1303_v11 = vld [vmem:[#allocation2 + $0x279] sm:$0xff]  ;;  %v3128_v41 = vpack.c.bf16 %v3064_v45, %v3064_v45 }
 0x293   :  { %v1367_v14 = vpack.c.bf16 %v1303_v11, %v1303_v11  ;;  %v1369_v11 = vpack.c.bf16 %v1305_v32, %v1305_v32 }
 0x294   :  { %6608 = vmatmul.msk.bf16.gmra.mxu2 %vm908_vm2, %v6491_v56  ;;  %2821 = vrot.lane.b32.xlu1 %v8547_v46, %s6798_s17  ;;  %v5586_v44 = vmax.f32 %v5522_v25, 0.0  ;;  %v1966_v6 = vpop.permute.xlu0 %1965  ;;  %v5301_v46 = vadd.f32 %v8048_v1, %v5131_v15  ;;  %v8614_v56 = vpop.f32.mrf.mxu2  ;;  %v1115_v1 = vld [vmem:[#allocation2 + $0x2b8] sm:$0xff] }
 0x295   :  { %1542 = vrot.lane.b32.xlu0 %v1366_v17, %s6795_s23  ;;  %2123 = vst.msk [vmem:[#allocation3 + $0x118] sm:$0xf] %vm2087_vm7, %v1966_v6  ;;  %v1179_v15 = vpack.c.bf16 %v1115_v1, %v1115_v1  ;;  %v6496_v17 = vld [vmem:[#allocation3 + $0x198] sm:$0xf0] }
 0x296   :  { %v5649_v40 = vpack.c.bf16 %v5587_v61, %v5586_v44  ;;  %v5457_v28 = vmul.f32 %v8538_v36, %v5301_v46  ;;  %v1180_v61 = vpack.c.bf16 %v1116_v55, %v1116_v55  ;;  %v6499_v44 = vor.u32 %v6702_v3, %v6496_v17 }
 0x297   :  { %1244 = vst.msk [vmem:[#allocation3 + $0x1b0] sm:$0xf] %vm1189_vm5, %v1179_v15 }
 0x298   :  { %v8603_v48 = vpop.permute.xlu2 %1969  ;;  %v1515_v62 = vpop.permute.xlu1 %1514  ;;  %1245 = vst.msk [vmem:[#allocation3 + $0x1b8] sm:$0xf] %vm1189_vm5, %v1180_v61 }
 0x299   :  { %v6663_v39 = vld [vmem:[#allocation3 + $0x54] sm:$0xf0]  ;;  %1673 = vst.msk [vmem:[#allocation3 + $0x110] sm:$0xf] %vm1638_vm6, %v1515_v62  ;;  %v5134_v35 = vpop.f32.mrf.mxu1  ;;  %v5456_v62 = vmul.f32 %v8538_v36, %v5299_v58 }
 0x29a   :  { %v6335_v23 = vor.u32 %v6663_v39, %v6334_v30  ;;  %2122 = vst.msk [vmem:[#allocation3 + $0x110] sm:$0xf] %vm2087_vm7, %v8570_v24  ;;  %2823 = vrot.lane.b32.xlu2 %v8564_v19, %s6798_s17  ;;  %v1752_v19 = vld [vmem:[#allocation2 + $0x27a] sm:$0xff]  ;;  %v1751_v39 = vld [vmem:[#allocation2 + $0x272] sm:$0xff]  ;;  %v5304_v17 = vadd.f32 %v8076_v21, %v5134_v35 }
 0x29b   :  { %v1816_v6 = vpack.c.bf16 %v1752_v19, %v1752_v19  ;;  %v1815_v45 = vpack.c.bf16 %v1751_v39, %v1751_v39  ;;  %v5524_v46 = vadd.f32 %v8555_v20, %v5456_v62  ;;  %v3065_v19 = vld [vmem:[#allocation2 + $0xca] sm:$0xff]  ;;  %v1118_v39 = vld [vmem:[#allocation2 + $0x2d8] sm:$0xff] }
 0x29c   :  { %5143 = vmatmul.bf16.gmra.mxu1 %v6335_v23  ;;  %1544 = vrot.lane.b32.xlu1 %v1367_v14, %s6795_s23  ;;  %v1519_v30 = vpop.permute.xlu0 %1518  ;;  %v5525_v23 = vadd.f32 %v8555_v20, %v5457_v28  ;;  %v8631_v58 = vpop.f32.mrf.mxu2  ;;  %v3129_v3 = vpack.c.bf16 %v3065_v19, %v3065_v19  ;;  %v5458_v35 = vmul.f32 %v8538_v36, %v5304_v17 }
 0x29d   :  { %3270 = vrot.lane.b32.xlu0 %v3128_v41, %s6799_s20  ;;  %1675 = vst.msk [vmem:[#allocation3 + $0x120] sm:$0xf] %vm1638_vm6, %v1519_v30  ;;  %v1304_v41 = vld [vmem:[#allocation2 + $0x289] sm:$0xff]  ;;  %v5588_v55 = vmax.f32 %v5524_v46, 0.0  ;;  %v1754_v46 = vld [vmem:[#allocation2 + $0x292] sm:$0xff] }
 0x29e   :  { %v1368_v15 = vpack.c.bf16 %v1304_v41, %v1304_v41  ;;  %v1117_v30 = vld [vmem:[#allocation2 + $0x2d0] sm:$0xff]  ;;  %v1182_v41 = vpack.c.bf16 %v1118_v39, %v1118_v39 }
 0x29f   :  { %v1181_v21 = vpack.c.bf16 %v1117_v30, %v1117_v30  ;;  %v1306_v30 = vld [vmem:[#allocation2 + $0x2a1] sm:$0xff] }
 0x2a0   :  { %v1523_v24 = vpop.permute.xlu2 %1522  ;;  %v2409_v25 = vpop.permute.xlu1 %2408  ;;  %1247 = vst.msk [vmem:[#allocation3 + $0x1c8] sm:$0xf] %vm1189_vm5, %v1182_v41  ;;  %v6706_v41 = vld [vmem:[#allocation3 + $0x1b4] sm:$0xf] }
 0x2a1   :  { %1677 = vst.msk [vmem:[#allocation3 + $0x130] sm:$0xf] %vm1638_vm6, %v1523_v24  ;;  %v5589_v24 = vmax.f32 %v5525_v23, 0.0  ;;  %v6504_v23 = vld [vmem:[#allocation3 + $0x1a8] sm:$0xf0] }
 0x2a2   :  { %6621 = vmatmul.msk.bf16.gmra.mxu3 %vm908_vm2, %v5649_v40  ;;  %2569 = vst.msk [vmem:[#allocation3 + $0x100] sm:$0xf] %vm2536_vm8, %v2409_v25  ;;  %1993 = vrot.lane.b32.xlu2 %v1816_v6, %s6796_s24  ;;  %v5136_v40 = vpop.f32.mrf.mxu1  ;;  %v6704_v6 = vld [vmem:[#allocation3 + $0x1a4] sm:$0xf] }
 0x2a3   :  { %v5306_v25 = vadd.f32 %v8111_v8, %v5136_v40  ;;  %v5650_v32 = vpack.c.bf16 %v5589_v24, %v5588_v55  ;;  %v3514_v8 = vld [vmem:[#allocation2 + $0xd8] sm:$0xff]  ;;  %v6507_v40 = vor.u32 %v6704_v6, %v6504_v23  ;;  %v3515_v24 = vld [vmem:[#allocation2 + $0xe0] sm:$0xff]  ;;  %v1818_v55 = vpack.c.bf16 %v1754_v46, %v1754_v46  ;;  %1246 = vst.msk [vmem:[#allocation3 + $0x1c0] sm:$0xf] %vm1189_vm5, %v1181_v21 }
 0x2a4   :  { %6609 = vmatmul.msk.bf16.gmra.mxu2 %vm908_vm2, %v6499_v44  ;;  %1991 = vrot.lane.b32.xlu1 %v1815_v45, %s6796_s24  ;;  %v2413_v28 = vpop.permute.xlu0 %2412  ;;  %v3579_v19 = vpack.c.bf16 %v3515_v24, %v3515_v24  ;;  %v1370_v6 = vpack.c.bf16 %v1306_v30, %v1306_v30 }
 0x2a5   :  { %1548 = vrot.lane.b32.xlu0 %v1369_v11, %s6795_s23  ;;  %2571 = vst.msk [vmem:[#allocation3 + $0x110] sm:$0xf] %vm2536_vm8, %v2413_v28  ;;  %v5459_v44 = vmul.f32 %v8538_v36, %v5306_v25  ;;  %v8648_v11 = vpop.f32.mrf.mxu2  ;;  %v5526_v28 = vadd.f32 %v8555_v20, %v5458_v35  ;;  %v1120_v35 = vld [vmem:[#allocation2 + $0x2f0] sm:$0xff] }
 0x2a7   :  { %v5590_v17 = vmax.f32 %v5526_v28, 0.0  ;;  %v1308_v28 = vld [vmem:[#allocation2 + $0x2b9] sm:$0xff] }
 0x2a8   :  { %v2417_v14 = vpop.permute.xlu2 %2416  ;;  %v1521_v1 = vpop.permute.xlu1 %1520 }
 0x2a9   :  { %1676 = vst.msk [vmem:[#allocation3 + $0x128] sm:$0xf] %vm1638_vm6, %v1521_v1  ;;  %v5527_v1 = vadd.f32 %v8555_v20, %v5459_v44 }
 0x2aa   :  { %2125 = vst.msk [vmem:[#allocation3 + $0x128] sm:$0xf] %vm2087_vm7, %v8603_v48  ;;  %1546 = vrot.lane.b32.xlu2 %v1368_v15, %s6795_s23  ;;  %v5139_v61 = vpop.f32.mrf.mxu1  ;;  %v1307_v15 = vld [vmem:[#allocation2 + $0x2a9] sm:$0xff] }
 0x2ab   :  { %v5591_v25 = vmax.f32 %v5527_v1, 0.0  ;;  %v1371_v39 = vpack.c.bf16 %v1307_v15, %v1307_v15  ;;  %v5309_v23 = vadd.f32 %v8135_v34, %v5139_v61  ;;  %v3963_v61 = vld [vmem:[#allocation2 + $0xd9] sm:$0xff] }
 0x2ac   :  { %3272 = vrot.lane.b32.xlu1 %v3129_v3, %s6799_s20  ;;  %v1525_v45 = vpop.permute.xlu0 %1524 }
 0x2ad   :  { %1995 = vrot.lane.b32.xlu0 %v8296_v52, %s6796_s24  ;;  %v3578_v52 = vpack.c.bf16 %v3514_v8, %v3514_v8  ;;  %1678 = vst.msk [vmem:[#allocation3 + $0x138] sm:$0xf] %vm1638_vm6, %v1525_v45  ;;  %v8665_v8 = vpop.f32.mrf.mxu2  ;;  %v1119_v45 = vld [vmem:[#allocation2 + $0x2e8] sm:$0xff]  ;;  %v5460_v1 = vmul.f32 %v8538_v36, %v5309_v23 }
 0x2ae   :  { %v1183_v24 = vpack.c.bf16 %v1119_v45, %v1119_v45  ;;  %v1122_v45 = vld [vmem:[#allocation2 + $0x308] sm:$0xff] }
 0x2b0   :  { %v2818_v62 = vpop.permute.xlu2 %2817  ;;  %v1968_v48 = vpop.permute.xlu1 %1967  ;;  %1248 = vst.msk [vmem:[#allocation3 + $0x1d0] sm:$0xf] %vm1189_vm5, %v1183_v24  ;;  %v1186_v24 = vpack.c.bf16 %v1122_v45, %v1122_v45 }
 0x2b1   :  { %2998 = vst.msk [vmem:[#allocation3 + $0x60] sm:$0xf] %vm2985_vm9, %v2818_v62 }
 0x2b2   :  { %6622 = vmatmul.msk.bf16.gmra.mxu3 %vm908_vm2, %v5650_v32  ;;  %2124 = vst.msk [vmem:[#allocation3 + $0x120] sm:$0xf] %vm2087_vm7, %v1968_v48  ;;  %3720 = vrot.lane.b32.xlu2 %v3578_v52, %s6801_s27  ;;  %v5141_v32 = vpop.f32.mrf.mxu1  ;;  %v5651_v48 = vpack.c.bf16 %v5591_v25, %v5590_v17  ;;  %v6512_v52 = vld [vmem:[#allocation3 + $0x1b8] sm:$0xf0]  ;;  %v1372_v25 = vpack.c.bf16 %v1308_v28, %v1308_v28  ;;  %v1310_v28 = vld [vmem:[#allocation2 + $0x2d1] sm:$0xff] }
 0x2b3   :  { %2573 = vst.msk [vmem:[#allocation3 + $0x120] sm:$0xf] %vm2536_vm8, %v2417_v14  ;;  %v5311_v44 = vadd.f32 %v8165_v12, %v5141_v32  ;;  %v1184_v12 = vpack.c.bf16 %v1120_v35, %v1120_v35  ;;  %v1121_v35 = vld [vmem:[#allocation2 + $0x300] sm:$0xff] }
 0x2b4   :  { %6610 = vmatmul.msk.bf16.gmra.mxu2 %vm908_vm2, %v6507_v40  ;;  %1997 = vrot.lane.b32.xlu1 %v1818_v55, %s6796_s24  ;;  %v1972_v62 = vpop.permute.xlu0 %1971  ;;  %v6515_v55 = vor.u32 %v6706_v41, %v6512_v52  ;;  %v6708_v41 = vld [vmem:[#allocation3 + $0x1c4] sm:$0xf]  ;;  %v6520_v52 = vld [vmem:[#allocation3 + $0x1c8] sm:$0xf0]  ;;  %1251 = vst.msk [vmem:[#allocation3 + $0x1e8] sm:$0xf] %vm1189_vm5, %v1186_v24 }
 0x2b5   :  { %3722 = vrot.lane.b32.xlu0 %v3579_v19, %s6801_s27  ;;  %2126 = vst.msk [vmem:[#allocation3 + $0x130] sm:$0xf] %vm2087_vm7, %v1972_v62  ;;  %v5461_v46 = vmul.f32 %v8538_v36, %v5311_v44  ;;  %v8684_v15 = vpop.f32.mrf.mxu2 }
 0x2b6   :  { %1249 = vst.msk [vmem:[#allocation3 + $0x1d8] sm:$0xf] %vm1189_vm5, %v1184_v12  ;;  %v1185_v12 = vpack.c.bf16 %v1121_v35, %v1121_v35  ;;  %v3067_v35 = vld [vmem:[#allocation2 + $0xe2] sm:$0xff] }
 0x2b7   :  { %v5529_v19 = vadd.f32 %v8555_v20, %v5461_v46 }
 0x2b8   :  { %v1529_v14 = vpop.permute.xlu2 %1528  ;;  %v2415_v3 = vpop.permute.xlu1 %2414  ;;  %1250 = vst.msk [vmem:[#allocation3 + $0x1e0] sm:$0xf] %vm1189_vm5, %v1185_v12 }
 0x2b9   :  { %1680 = vst.msk [vmem:[#allocation3 + $0x148] sm:$0xf] %vm1638_vm6, %v1529_v14  ;;  %v5528_v14 = vadd.f32 %v8555_v20, %v5460_v1  ;;  %v5593_v17 = vmax.f32 %v5529_v19, 0.0 }
 0x2ba   :  { %2572 = vst.msk [vmem:[#allocation3 + $0x118] sm:$0xf] %vm2536_vm8, %v2415_v3  ;;  %1552 = vrot.lane.b32.xlu2 %v1371_v39, %s6795_s23  ;;  %v3964_v3 = vld [vmem:[#allocation2 + $0xe1] sm:$0xff] }
 0x2bb   :  { %v5592_v30 = vmax.f32 %v5528_v14, 0.0  ;;  %v4028_v44 = vpack.c.bf16 %v3964_v3, %v3964_v3  ;;  %v1124_v3 = vld [vmem:[#allocation2 + $0x320] sm:$0xff] }
 0x2bc   :  { %1550 = vrot.lane.b32.xlu1 %v1370_v6, %s6795_s23  ;;  %v2419_v34 = vpop.permute.xlu0 %2418 }
 0x2bd   :  { %2001 = vrot.lane.b32.xlu0 %v8337_v26, %s6796_s24  ;;  %2574 = vst.msk [vmem:[#allocation3 + $0x128] sm:$0xf] %vm2536_vm8, %v2419_v34  ;;  %v4027_v26 = vpack.c.bf16 %v3963_v61, %v3963_v61  ;;  %v8695_v46 = vpop.f32.mrf.mxu2  ;;  %v6523_v34 = vor.u32 %v6708_v41, %v6520_v52  ;;  %v1312_v41 = vld [vmem:[#allocation2 + $0x2e9] sm:$0xff] }
 0x2be   :  { %v1376_v24 = vpack.c.bf16 %v1312_v41, %v1312_v41 }
 0x2c0   :  { %v1976_v21 = vpop.permute.xlu2 %1975  ;;  %v1974_v40 = vpop.permute.xlu1 %1973 }
 0x2c1   :  { %2127 = vst.msk [vmem:[#allocation3 + $0x138] sm:$0xf] %vm2087_vm7, %v1974_v40 }
 0x2c2   :  { %6623 = vmatmul.msk.bf16.gmra.mxu3 %vm908_vm2, %v5651_v48  ;;  %1999 = vrot.lane.b32.xlu2 %v8335_v47, %s6796_s24  ;;  %v1309_v47 = vld [vmem:[#allocation2 + $0x2c1] sm:$0xff]  ;;  %v5652_v48 = vpack.c.bf16 %v5593_v17, %v5592_v30  ;;  %v6528_v30 = vld [vmem:[#allocation3 + $0x1d8] sm:$0xf0] }
 0x2c3   :  { %v1373_v6 = vpack.c.bf16 %v1309_v47, %v1309_v47 }
 0x2c4   :  { %6611 = vmatmul.msk.bf16.gmra.mxu2 %vm908_vm2, %v6515_v55  ;;  %4169 = vrot.lane.b32.xlu1 %v4027_v26, %s6800_s26  ;;  %v2820_v39 = vpop.permute.xlu0 %2819 }
 0x2c5   :  { %1554 = vrot.lane.b32.xlu0 %v1372_v25, %s6795_s23  ;;  %2999 = vst.msk [vmem:[#allocation3 + $0x68] sm:$0xf] %vm2985_vm9, %v2820_v39  ;;  %v1123_v25 = vld [vmem:[#allocation2 + $0x318] sm:$0xff] }
 0x2c8   :  { %v3269_v32 = vpop.permute.xlu2 %3268  ;;  %v1527_v62 = vpop.permute.xlu1 %1526 }
 0x2c9   :  { %1679 = vst.msk [vmem:[#allocation3 + $0x140] sm:$0xf] %vm1638_vm6, %v1527_v62  ;;  %v6710_v62 = vld [vmem:[#allocation3 + $0x1d4] sm:$0xf] }
 0x2ca   :  { %2128 = vst.msk [vmem:[#allocation3 + $0x140] sm:$0xf] %vm2087_vm7, %v1976_v21  ;;  %4171 = vrot.lane.b32.xlu2 %v4028_v44, %s6800_s26  ;;  %v1311_v21 = vld [vmem:[#allocation2 + $0x2d9] sm:$0xff]  ;;  %v6531_v47 = vor.u32 %v6710_v62, %v6528_v30 }
 0x2cb   :  { %3448 = vst.msk [vmem:[#allocation3 + $0x68] sm:$0xf] %vm3434_vm10, %v3269_v32  ;;  %v1375_v61 = vpack.c.bf16 %v1311_v21, %v1311_v21  ;;  %v3066_v32 = vld [vmem:[#allocation2 + $0xda] sm:$0xff] }
 0x2cc   :  { %1556 = vrot.lane.b32.xlu1 %v1373_v6, %s6795_s23  ;;  %v1978_v1 = vpop.permute.xlu0 %1977  ;;  %v3130_v6 = vpack.c.bf16 %v3066_v32, %v3066_v32 }
 0x2cd   :  { %2825 = vrot.lane.b32.xlu0 %v4027_v26, %s6798_s17  ;;  %2129 = vst.msk [vmem:[#allocation3 + $0x148] sm:$0xf] %vm2087_vm7, %v1978_v1  ;;  %v8709_v26 = vpop.f32.mrf.mxu2 }
 0x2d0   :  { %v1982_v23 = vpop.permute.xlu2 %1981  ;;  %v2421_v40 = vpop.permute.xlu1 %2420 }
 0x2d1   :  { %2575 = vst.msk [vmem:[#allocation3 + $0x130] sm:$0xf] %vm2536_vm8, %v2421_v40 }
 0x2d2   :  { %6624 = vmatmul.msk.bf16.gmra.mxu3 %vm908_vm2, %v5652_v48  ;;  %2005 = vrot.lane.b32.xlu2 %v8376_v9, %s6796_s24  ;;  %v1374_v9 = vpack.c.bf16 %v1310_v28, %v1310_v28  ;;  %v1187_v48 = vpack.c.bf16 %v1123_v25, %v1123_v25  ;;  %v1315_v25 = vld [vmem:[#allocation2 + $0x309] sm:$0xff] }
 0x2d4   :  { %6612 = vmatmul.msk.bf16.gmra.mxu2 %vm908_vm2, %v6523_v34  ;;  %2003 = vrot.lane.b32.xlu1 %v8374_v0, %s6796_s24  ;;  %v1531_v14 = vpop.permute.xlu0 %1530  ;;  %1252 = vst.msk [vmem:[#allocation3 + $0x1f0] sm:$0xf] %vm1189_vm5, %v1187_v48 }
 0x2d5   :  { %1560 = vrot.lane.b32.xlu0 %v1375_v61, %s6795_s23  ;;  %1681 = vst.msk [vmem:[#allocation3 + $0x150] sm:$0xf] %vm1638_vm6, %v1531_v14  ;;  %v8719_v45 = vpop.f32.mrf.mxu2  ;;  %v3516_v61 = vld [vmem:[#allocation2 + $0xf0] sm:$0xff] }
 0x2d6   :  { %v3580_v28 = vpack.c.bf16 %v3516_v61, %v3516_v61 }
 0x2d8   :  { %v1535_v55 = vpop.permute.xlu2 %1534  ;;  %v3267_v19 = vpop.permute.xlu1 %3266 }
 0x2d9   :  { %1683 = vst.msk [vmem:[#allocation3 + $0x160] sm:$0xf] %vm1638_vm6, %v1535_v55  ;;  %v1314_v55 = vld [vmem:[#allocation2 + $0x301] sm:$0xff] }
 0x2da   :  { %3447 = vst.msk [vmem:[#allocation3 + $0x60] sm:$0xf] %vm3434_vm10, %v3267_v19  ;;  %1558 = vrot.lane.b32.xlu2 %v1374_v9, %s6795_s23  ;;  %v1378_v19 = vpack.c.bf16 %v1314_v55, %v1314_v55 }
 0x2dc   :  { %2827 = vrot.lane.b32.xlu1 %v4028_v44, %s6798_s17  ;;  %v3717_v39 = vpop.permute.xlu0 %3716  ;;  %v1188_v44 = vpack.c.bf16 %v1124_v3, %v1124_v3  ;;  %v3965_v3 = vld [vmem:[#allocation2 + $0xf1] sm:$0xff] }
 0x2dd   :  { %2007 = vrot.lane.b32.xlu0 %v8406_v2, %s6796_s24  ;;  %3897 = vst.msk [vmem:[#allocation3 + $0x60] sm:$0xf] %vm3884_vm11, %v3717_v39  ;;  %v3131_v2 = vpack.c.bf16 %v3067_v35, %v3067_v35  ;;  %v1317_v39 = vld [vmem:[#allocation2 + $0x321] sm:$0xff] }
 0x2de   :  { %1253 = vst.msk [vmem:[#allocation3 + $0x1f8] sm:$0xf] %vm1189_vm5, %v1188_v44  ;;  %v1381_v44 = vpack.c.bf16 %v1317_v39, %v1317_v39 }
 0x2e0   :  { %v4166_v0 = vpop.permute.xlu2 %4165  ;;  %v1533_v17 = vpop.permute.xlu1 %1532 }
 0x2e1   :  { %1682 = vst.msk [vmem:[#allocation3 + $0x158] sm:$0xf] %vm1638_vm6, %v1533_v17  ;;  %v4029_v17 = vpack.c.bf16 %v3965_v3, %v3965_v3  ;;  %v3967_v3 = vld [vmem:[#allocation2 + $0x109] sm:$0xff] }
 0x2e2   :  { %2131 = vst.msk [vmem:[#allocation3 + $0x158] sm:$0xf] %vm2087_vm7, %v1982_v23  ;;  %3274 = vrot.lane.b32.xlu2 %v3130_v6, %s6799_s20  ;;  %v1313_v23 = vld [vmem:[#allocation2 + $0x2f1] sm:$0xff] }
 0x2e3   :  { %4346 = vst.msk [vmem:[#allocation3 + $0x60] sm:$0xf] %vm4333_vm12, %v4166_v0  ;;  %v1377_v52 = vpack.c.bf16 %v1313_v23, %v1313_v23 }
 0x2e4   :  { %6613 = vmatmul.msk.bf16.gmra.mxu2 %vm908_vm2, %v6531_v47  ;;  %2009 = vrot.lane.b32.xlu1 %v8410_v29, %s6796_s24  ;;  %v1537_v21 = vpop.permute.xlu0 %1536 }
 0x2e5   :  { %3276 = vrot.lane.b32.xlu0 %v3131_v2, %s6799_s20  ;;  %1684 = vst.msk [vmem:[#allocation3 + $0x168] sm:$0xf] %vm1638_vm6, %v1537_v21  ;;  %v3966_v21 = vld [vmem:[#allocation2 + $0xf9] sm:$0xff] }
 0x2e8   :  { %v1541_v12 = vpop.permute.xlu2 %1540  ;;  %v1980_v40 = vpop.permute.xlu1 %1979 }
 0x2e9   :  { %1686 = vst.msk [vmem:[#allocation3 + $0x178] sm:$0xf] %vm1638_vm6, %v1541_v12  ;;  %v1316_v12 = vld [vmem:[#allocation2 + $0x319] sm:$0xff] }
 0x2ea   :  { %2130 = vst.msk [vmem:[#allocation3 + $0x150] sm:$0xf] %vm2087_vm7, %v1980_v40  ;;  %1564 = vrot.lane.b32.xlu2 %v1377_v52, %s6795_s23  ;;  %v6342_v48 = vld [vmem:[#allocation3 + $0x60] sm:$0xf]  ;;  %v1380_v41 = vpack.c.bf16 %v1316_v12, %v1316_v12  ;;  %v4030_v52 = vpack.c.bf16 %v3966_v21, %v3966_v21 }
 0x2ec   :  { %1562 = vrot.lane.b32.xlu1 %v1376_v24, %s6795_s23 }
 0x2ed   :  { %2013 = vrot.lane.b32.xlu0 %v8457_v27, %s6796_s24  ;;  %v3517_v27 = vld [vmem:[#allocation2 + $0xf8] sm:$0xff] }
 0x2ee   :  { %v3581_v32 = vpack.c.bf16 %v3517_v27, %v3517_v27  ;;  %v3518_v27 = vld [vmem:[#allocation2 + $0x108] sm:$0xff] }
 0x2ef   :  { %v1984_v34 = vpop.permute.xlu0 %1983 }
 0x2f0   :  { %v1988_v29 = vpop.permute.xlu2 %1987  ;;  %v3719_v1 = vpop.permute.xlu1 %3718  ;;  %2132 = vst.msk [vmem:[#allocation3 + $0x160] sm:$0xf] %vm2087_vm7, %v1984_v34 }
 0x2f1   :  { %3898 = vst.msk [vmem:[#allocation3 + $0x68] sm:$0xf] %vm3884_vm11, %v3719_v1  ;;  %v3069_v1 = vld [vmem:[#allocation2 + $0xfa] sm:$0xff] }
 0x2f2   :  { %2011 = vrot.lane.b32.xlu2 %v8455_v60, %s6796_s24  ;;  %v1379_v60 = vpack.c.bf16 %v1315_v25, %v1315_v25 }
 0x2f4   :  { %3724 = vrot.lane.b32.xlu1 %v3580_v28, %s6801_s27  ;;  %v3068_v28 = vld [vmem:[#allocation2 + $0xf2] sm:$0xff] }
 0x2f5   :  { %1566 = vrot.lane.b32.xlu0 %v1378_v19, %s6795_s23 }
 0x2f7   :  { %v4168_v0 = vpop.permute.xlu0 %4167 }
 0x2f8   :  { %v2824_v14 = vpop.permute.xlu2 %2823  ;;  %v1986_v9 = vpop.permute.xlu1 %1985  ;;  %4347 = vst.msk [vmem:[#allocation3 + $0x68] sm:$0xf] %vm4333_vm12, %v4168_v0  ;;  %v3582_v0 = vpack.c.bf16 %v3518_v27, %v3518_v27 }
 0x2f9   :  { %3001 = vst.msk [vmem:[#allocation3 + $0x78] sm:$0xf] %vm2985_vm9, %v2824_v14  ;;  %v3133_v14 = vpack.c.bf16 %v3069_v1, %v3069_v1 }
 0x2fa   :  { %2133 = vst.msk [vmem:[#allocation3 + $0x168] sm:$0xf] %vm2087_vm7, %v1986_v9  ;;  %3726 = vrot.lane.b32.xlu2 %v3581_v32, %s6801_s27 }
 0x2fc   :  { %1568 = vrot.lane.b32.xlu1 %v1379_v60, %s6795_s23 }
 0x2fd   :  { %4173 = vrot.lane.b32.xlu0 %v4029_v17, %s6800_s26 }
 0x2ff   :  { %v1990_v47 = vpop.permute.xlu0 %1989  ;;  %v6665_v6 = vld [vmem:[#allocation3 + $0x64] sm:$0xf0] }
 0x300   :  { %v1994_v62 = vpop.permute.xlu2 %1993  ;;  %v1539_v30 = vpop.permute.xlu1 %1538  ;;  %v6343_v35 = vor.u32 %v6665_v6, %v6342_v48  ;;  %2135 = vst.msk [vmem:[#allocation3 + $0x178] sm:$0xf] %vm2087_vm7, %v1990_v47  ;;  %v4031_v47 = vpack.c.bf16 %v3967_v3, %v3967_v3  ;;  %v3968_v48 = vld [vmem:[#allocation2 + $0x111] sm:$0xff] }
 0x301   :  { %1685 = vst.msk [vmem:[#allocation3 + $0x170] sm:$0xf] %vm1638_vm6, %v1539_v30  ;;  %v3519_v30 = vld [vmem:[#allocation2 + $0x110] sm:$0xff] }
 0x302   :  { %2134 = vst.msk [vmem:[#allocation3 + $0x170] sm:$0xf] %vm2087_vm7, %v1988_v29  ;;  %5148 = vmatmul.bf16.gmra.mxu1 %v6343_v35  ;;  %2017 = vrot.lane.b32.xlu2 %v8496_v7, %s6796_s24 }
 0x304   :  { %2015 = vrot.lane.b32.xlu1 %v8494_v37, %s6796_s24 }
 0x305   :  { %1572 = vrot.lane.b32.xlu0 %v1381_v44, %s6795_s23  ;;  %v3583_v44 = vpack.c.bf16 %v3519_v30, %v3519_v30 }
 0x307   :  { %v1543_v40 = vpop.permute.xlu0 %1542 }
 0x308   :  { %v1547_v2 = vpop.permute.xlu2 %1546  ;;  %v2822_v23 = vpop.permute.xlu1 %2821  ;;  %1687 = vst.msk [vmem:[#allocation3 + $0x180] sm:$0xf] %vm1638_vm6, %v1543_v40 }
 0x309   :  { %1689 = vst.msk [vmem:[#allocation3 + $0x190] sm:$0xf] %vm1638_vm6, %v1547_v2  ;;  %v4032_v2 = vpack.c.bf16 %v3968_v48, %v3968_v48 }
 0x30a   :  { %3000 = vst.msk [vmem:[#allocation3 + $0x70] sm:$0xf] %vm2985_vm9, %v2822_v23  ;;  %1570 = vrot.lane.b32.xlu2 %v1380_v41, %s6795_s23 }
 0x30c   :  { %4175 = vrot.lane.b32.xlu1 %v4030_v52, %s6800_s26 }
 0x30d   :  { %2019 = vrot.lane.b32.xlu0 %v8523_v57, %s6796_s24 }
 0x30f   :  { %v3271_v29 = vpop.permute.xlu0 %3270 }
 0x310   :  { %v3721_v37 = vpop.permute.xlu2 %3720  ;;  %v1545_v7 = vpop.permute.xlu1 %1544  ;;  %3449 = vst.msk [vmem:[#allocation3 + $0x70] sm:$0xf] %vm3434_vm10, %v3271_v29 }
 0x311   :  { %1688 = vst.msk [vmem:[#allocation3 + $0x188] sm:$0xf] %vm1638_vm6, %v1545_v7 }
 0x312   :  { %2137 = vst.msk [vmem:[#allocation3 + $0x188] sm:$0xf] %vm2087_vm7, %v1994_v62  ;;  %2829 = vrot.lane.b32.xlu2 %v4029_v17, %s6798_s17 }
 0x313   :  { %3899 = vst.msk [vmem:[#allocation3 + $0x70] sm:$0xf] %vm3884_vm11, %v3721_v37  ;;  %v3070_v37 = vld [vmem:[#allocation2 + $0x10a] sm:$0xff] }
 0x314   :  { %2021 = vrot.lane.b32.xlu1 %v8525_v18, %s6796_s24  ;;  %v3132_v18 = vpack.c.bf16 %v3068_v28, %v3068_v28 }
 0x315   :  { %v5793_v24 = vpop.f32.mrf.mxu3  ;;  %2831 = vrot.lane.b32.xlu0 %v4030_v52, %s6798_s17 }
 0x316   :  { %5954 = vst.msk [vmem:[#allocation4] sm:$0xff] %vm5953_vm13, %v5793_v24  ;;  %v3520_v24 = vld [vmem:[#allocation2 + $0x120] sm:$0xff] }
 0x317   :  { %v1549_v55 = vpop.permute.xlu0 %1548  ;;  %v3584_v28 = vpack.c.bf16 %v3520_v24, %v3520_v24 }
 0x318   :  { %v1553_v57 = vpop.permute.xlu2 %1552  ;;  %v1992_v61 = vpop.permute.xlu1 %1991  ;;  %1690 = vst.msk [vmem:[#allocation3 + $0x198] sm:$0xf] %vm1638_vm6, %v1549_v55 }
 0x319   :  { %1692 = vst.msk [vmem:[#allocation3 + $0x1a8] sm:$0xf] %vm1638_vm6, %v1553_v57  ;;  %v5144_v34 = vpop.f32.mrf.mxu1  ;;  %v3071_v57 = vld [vmem:[#allocation2 + $0x112] sm:$0xff] }
 0x31a   :  { %2136 = vst.msk [vmem:[#allocation3 + $0x180] sm:$0xf] %vm2087_vm7, %v1992_v61  ;;  %v5314_v9 = vadd.f32 %v8187_v10, %v5144_v34  ;;  %3280 = vrot.lane.b32.xlu2 %v3133_v14, %s6799_s20 }
 0x31c   :  { %3278 = vrot.lane.b32.xlu1 %v3132_v18, %s6799_s20  ;;  %v5462_v32 = vmul.f32 %v8538_v36, %v5314_v9  ;;  %v3135_v18 = vpack.c.bf16 %v3071_v57, %v3071_v57  ;;  %v3971_v57 = vld [vmem:[#allocation2 + $0x139] sm:$0xff] }
 0x31d   :  { %v5795_v19 = vpop.f32.mrf.mxu3  ;;  %3728 = vrot.lane.b32.xlu0 %v3582_v0, %s6801_s27 }
 0x31e   :  { %5955 = vst.msk [vmem:[#allocation4 + $0x8] sm:$0xff] %vm5953_vm13, %v5795_v19  ;;  %v5530_v6 = vadd.f32 %v8555_v20, %v5462_v32  ;;  %v3521_v19 = vld [vmem:[#allocation2 + $0x128] sm:$0xff] }
 0x31f   :  { %v1996_v10 = vpop.permute.xlu0 %1995  ;;  %v3585_v32 = vpack.c.bf16 %v3521_v19, %v3521_v19 }
 0x320   :  { %v2000_v25 = vpop.permute.xlu2 %1999  ;;  %v3273_v17 = vpop.permute.xlu1 %3272  ;;  %2138 = vst.msk [vmem:[#allocation3 + $0x190] sm:$0xf] %vm2087_vm7, %v1996_v10  ;;  %v5594_v23 = vmax.f32 %v5530_v6, 0.0  ;;  %v3969_v10 = vld [vmem:[#allocation2 + $0x121] sm:$0xff] }
 0x321   :  { %v5146_v60 = vpop.f32.mrf.mxu1  ;;  %3450 = vst.msk [vmem:[#allocation3 + $0x78] sm:$0xf] %vm3434_vm10, %v3273_v17  ;;  %v3072_v6 = vld [vmem:[#allocation2 + $0x122] sm:$0xff] }
 0x322   :  { %v5316_v62 = vadd.f32 %v8214_v13, %v5146_v60  ;;  %4177 = vrot.lane.b32.xlu2 %v4031_v47, %s6800_s26 }
 0x324   :  { %v5463_v35 = vmul.f32 %v8538_v36, %v5316_v62  ;;  %3730 = vrot.lane.b32.xlu1 %v3583_v44, %s6801_s27 }
 0x325   :  { %v5798_v39 = vpop.f32.mrf.mxu3  ;;  %4179 = vrot.lane.b32.xlu0 %v4032_v2, %s6800_s26  ;;  %v6018_v34 = vld [vmem:[#allocation4] ss:$2 sm:$0xff]  ;;  %v6082_v61 = vld [vmem:[#allocation4 + $0x1] ss:$2 sm:$0xff] }
 0x326   :  { %5956 = vst.msk [vmem:[#allocation4 + $0x10] sm:$0xff] %vm5953_vm13, %v5798_v39  ;;  %v5531_v13 = vadd.f32 %v8555_v20, %v5463_v35  ;;  %v3134_v20 = vpack.c.bf16 %v3070_v37, %v3070_v37  ;;  %v6145_v9 = vmax.f32 %v6018_v34, %v6082_v61  ;;  %v4035_v34 = vpack.c.bf16 %v3971_v57, %v3971_v57 }
 0x327   :  { %v3723_v41 = vpop.permute.xlu0 %3722 }
 0x328   :  { %v4172_v12 = vpop.permute.xlu2 %4171  ;;  %v5595_v40 = vmax.f32 %v5531_v13, 0.0  ;;  %v1998_v21 = vpop.permute.xlu1 %1997  ;;  %3900 = vst.msk [vmem:[#allocation3 + $0x78] sm:$0xf] %vm3884_vm11, %v3723_v41 }
 0x329   :  { %2139 = vst.msk [vmem:[#allocation3 + $0x198] sm:$0xf] %vm2087_vm7, %v1998_v21  ;;  %v3073_v21 = vld [vmem:[#allocation2 + $0x12a] sm:$0xff] }
 0x32a   :  { %v5653_v36 = vpack.c.bf16 %v5595_v40, %v5594_v23  ;;  %4349 = vst.msk [vmem:[#allocation3 + $0x78] sm:$0xf] %vm4333_vm12, %v4172_v12  ;;  %2835 = vrot.lane.b32.xlu2 %v4032_v2, %s6798_s17  ;;  %v3136_v40 = vpack.c.bf16 %v3072_v6, %v3072_v6  ;;  %v3137_v41 = vpack.c.bf16 %v3073_v21, %v3073_v21  ;;  %v3524_v6 = vld [vmem:[#allocation2 + $0x150] sm:$0xff] }
 0x32c   :  { %6625 = vmatmul.msk.bf16.gmra.mxu3 %vm908_vm2, %v5653_v36  ;;  %2833 = vrot.lane.b32.xlu1 %v4031_v47, %s6798_s17  ;;  %v4033_v47 = vpack.c.bf16 %v3969_v10, %v3969_v10 }
 0x32d   :  { %v5800_v52 = vpop.f32.mrf.mxu3  ;;  %3282 = vrot.lane.b32.xlu0 %v3134_v20, %s6799_s20 }
 0x32e   :  { %5957 = vst.msk [vmem:[#allocation4 + $0x18] sm:$0xff] %vm5953_vm13, %v5800_v52  ;;  %v3523_v52 = vld [vmem:[#allocation2 + $0x140] sm:$0xff] }
 0x32f   :  { %v2002_v1 = vpop.permute.xlu0 %2001 }
 0x330   :  { %v2006_v7 = vpop.permute.xlu2 %2005  ;;  %v1551_v29 = vpop.permute.xlu1 %1550  ;;  %2141 = vst.msk [vmem:[#allocation3 + $0x1a8] sm:$0xf] %vm2087_vm7, %v2002_v1 }
 0x331   :  { %1691 = vst.msk [vmem:[#allocation3 + $0x1a0] sm:$0xf] %vm1638_vm6, %v1551_v29  ;;  %v6667_v13 = vld [vmem:[#allocation3 + $0x74] sm:$0xf0]  ;;  %v3587_v29 = vpack.c.bf16 %v3523_v52, %v3523_v52 }
 0x332   :  { %2140 = vst.msk [vmem:[#allocation3 + $0x1a0] sm:$0xf] %vm2087_vm7, %v2000_v25  ;;  %3732 = vrot.lane.b32.xlu2 %v3584_v28, %s6801_s27  ;;  %v3970_v25 = vld [vmem:[#allocation2 + $0x129] sm:$0xff] }
 0x333   :  { %v4034_v39 = vpack.c.bf16 %v3970_v25, %v3970_v25 }
 0x334   :  { %3284 = vrot.lane.b32.xlu1 %v3135_v18, %s6799_s20 }
 0x335   :  { %v5803_v55 = vpop.f32.mrf.mxu3  ;;  %v6020_v14 = vld [vmem:[#allocation4 + $0x10] ss:$2 sm:$0xff]  ;;  %v6084_v27 = vld [vmem:[#allocation4 + $0x11] ss:$2 sm:$0xff]  ;;  %3734 = vrot.lane.b32.xlu0 %v3585_v32, %s6801_s27 }
 0x336   :  { %v6146_v0 = vmax.f32 %v6020_v14, %v6084_v27  ;;  %5958 = vst.msk [vmem:[#allocation4 + $0x20] sm:$0xff] %vm5953_vm13, %v5803_v55  ;;  %v3972_v27 = vld [vmem:[#allocation2 + $0x141] sm:$0xff] }
 0x337   :  { %v1555_v62 = vpop.permute.xlu0 %1554 }
 0x338   :  { %v1559_v3 = vpop.permute.xlu2 %1558  ;;  %v6177_v60 = vmax.f32 %v6145_v9, %v6146_v0  ;;  %v4170_v17 = vpop.permute.xlu1 %4169  ;;  %1693 = vst.msk [vmem:[#allocation3 + $0x1b0] sm:$0xf] %vm1638_vm6, %v1555_v62  ;;  %v3075_v62 = vld [vmem:[#allocation2 + $0x142] sm:$0xff] }
 0x339   :  { %1695 = vst.msk [vmem:[#allocation3 + $0x1c0] sm:$0xf] %vm1638_vm6, %v1559_v3 }
 0x33a   :  { %6193 = vst.msk [vmem:[#allocation5] sm:$0xff] %vm5953_vm13, %v6177_v60  ;;  %4183 = vrot.lane.b32.xlu2 %v4034_v39, %s6800_s26  ;;  %v4036_v60 = vpack.c.bf16 %v3972_v27, %v3972_v27 }
 0x33b   :  { %4348 = vst.msk [vmem:[#allocation3 + $0x70] sm:$0xf] %vm4333_vm12, %v4170_v17 }
 0x33c   :  { %4181 = vrot.lane.b32.xlu1 %v4033_v47, %s6800_s26 }
 0x33d   :  { %v5805_v30 = vpop.f32.mrf.mxu3  ;;  %2837 = vrot.lane.b32.xlu0 %v4033_v47, %s6798_s17 }
 0x33e   :  { %5959 = vst.msk [vmem:[#allocation4 + $0x28] sm:$0xff] %vm5953_vm13, %v5805_v30 }
 0x33f   :  { %v2826_v2 = vpop.permute.xlu0 %2825 }
 0x340   :  { %v3275_v48 = vpop.permute.xlu2 %3274  ;;  %v1557_v35 = vpop.permute.xlu1 %1556  ;;  %3002 = vst.msk [vmem:[#allocation3 + $0x80] sm:$0xf] %vm2985_vm9, %v2826_v2  ;;  %v3973_v2 = vld [vmem:[#allocation2 + $0x151] sm:$0xff] }
 0x341   :  { %1694 = vst.msk [vmem:[#allocation3 + $0x1b8] sm:$0xf] %vm1638_vm6, %v1557_v35  ;;  %v4037_v21 = vpack.c.bf16 %v3973_v2, %v3973_v2  ;;  %v8878_v2 = vld [vmem:[%s9525_s7] ss:$0 sm:$0xff] }
 0x342   :  { %v6350_v44 = vld [vmem:[#allocation3 + $0x70] sm:$0xf]  ;;  %2143 = vst.msk [vmem:[#allocation3 + $0x1b8] sm:$0xf] %vm2087_vm7, %v2006_v7  ;;  %3286 = vrot.lane.b32.xlu2 %v3136_v40, %s6799_s20  ;;  %v3522_v7 = vld [vmem:[#allocation2 + $0x138] sm:$0xff] }
 0x343   :  { %v6351_v12 = vor.u32 %v6667_v13, %v6350_v44  ;;  %3451 = vst.msk [vmem:[#allocation3 + $0x80] sm:$0xf] %vm3434_vm10, %v3275_v48  ;;  %v3586_v1 = vpack.c.bf16 %v3522_v7, %v3522_v7  ;;  %v3139_v48 = vpack.c.bf16 %v3075_v62, %v3075_v62  ;;  %v3588_v44 = vpack.c.bf16 %v3524_v6, %v3524_v6  ;;  %v3525_v40 = vld [vmem:[#allocation2 + $0x158] sm:$0xff]  ;;  %v3078_v62 = vld [vmem:[#allocation2 + $0x16a] sm:$0xff] }
 0x344   :  { %2839 = vrot.lane.b32.xlu1 %v4034_v39, %s6798_s17  ;;  %v3074_v39 = vld [vmem:[#allocation2 + $0x13a] sm:$0xff] }
 0x345   :  { %v5808_v23 = vpop.f32.mrf.mxu3  ;;  %5153 = vmatmul.bf16.gmra.mxu1 %v6351_v12  ;;  %3288 = vrot.lane.b32.xlu0 %v3137_v41, %s6799_s20  ;;  %v6022_v28 = vld [vmem:[#allocation4 + $0x20] ss:$2 sm:$0xff]  ;;  %v6086_v19 = vld [vmem:[#allocation4 + $0x21] ss:$2 sm:$0xff]  ;;  %v3138_v35 = vpack.c.bf16 %v3074_v39, %v3074_v39 }
 0x346   :  { %5960 = vst.msk [vmem:[#allocation4 + $0x30] sm:$0xff] %vm5953_vm13, %v5808_v23  ;;  %v6147_v32 = vmax.f32 %v6022_v28, %v6086_v19  ;;  %v3974_v41 = vld [vmem:[#allocation2 + $0x159] sm:$0xff]  ;;  %v3527_v19 = vld [vmem:[#allocation2 + $0x170] sm:$0xff] }
 0x347   :  { %v1561_v20 = vpop.permute.xlu0 %1560  ;;  %v4038_v52 = vpack.c.bf16 %v3974_v41, %v3974_v41  ;;  %v3591_v27 = vpack.c.bf16 %v3527_v19, %v3527_v19 }
 0x348   :  { %v1565_v36 = vpop.permute.xlu2 %1564  ;;  %v2004_v37 = vpop.permute.xlu1 %2003  ;;  %1696 = vst.msk [vmem:[#allocation3 + $0x1c8] sm:$0xf] %vm1638_vm6, %v1561_v20 }
 0x349   :  { %1698 = vst.msk [vmem:[#allocation3 + $0x1d8] sm:$0xf] %vm1638_vm6, %v1565_v36  ;;  %v3589_v36 = vpack.c.bf16 %v3525_v40, %v3525_v40 }
 0x34a   :  { %2142 = vst.msk [vmem:[#allocation3 + $0x1b0] sm:$0xf] %vm2087_vm7, %v2004_v37  ;;  %3738 = vrot.lane.b32.xlu2 %v3587_v29, %s6801_s27 }
 0x34c   :  { %3736 = vrot.lane.b32.xlu1 %v3586_v1, %s6801_s27  ;;  %v3526_v1 = vld [vmem:[#allocation2 + $0x168] sm:$0xff] }
 0x34d   :  { %v5810_v24 = vpop.f32.mrf.mxu3  ;;  %4185 = vrot.lane.b32.xlu0 %v4035_v34, %s6800_s26  ;;  %v3590_v28 = vpack.c.bf16 %v3526_v1, %v3526_v1 }
 0x34e   :  { %5961 = vst.msk [vmem:[#allocation4 + $0x38] sm:$0xff] %vm5953_vm13, %v5810_v24  ;;  %v3076_v24 = vld [vmem:[#allocation2 + $0x152] sm:$0xff] }
 0x34f   :  { %v2008_v14 = vpop.permute.xlu0 %2007  ;;  %v3140_v29 = vpack.c.bf16 %v3076_v24, %v3076_v24  ;;  %v8888_v24 = vld [vmem:[%s9526_s8] ss:$0 sm:$0xff] }
 0x350   :  { %v2012_v61 = vpop.permute.xlu2 %2011  ;;  %v2828_v55 = vpop.permute.xlu1 %2827  ;;  %2144 = vst.msk [vmem:[#allocation3 + $0x1c0] sm:$0xf] %vm2087_vm7, %v2008_v14 }
 0x351   :  { %3003 = vst.msk [vmem:[#allocation3 + $0x88] sm:$0xf] %vm2985_vm9, %v2828_v55  ;;  %v3077_v55 = vld [vmem:[#allocation2 + $0x15a] sm:$0xff] }
 0x352   :  { %2841 = vrot.lane.b32.xlu2 %v4035_v34, %s6798_s17  ;;  %v3141_v14 = vpack.c.bf16 %v3077_v55, %v3077_v55 }
 0x354   :  { %4187 = vrot.lane.b32.xlu1 %v4036_v60, %s6800_s26 }
 0x355   :  { %v5813_v9 = vpop.f32.mrf.mxu3  ;;  %v6024_v18 = vld [vmem:[#allocation4 + $0x30] ss:$2 sm:$0xff]  ;;  %v6088_v0 = vld [vmem:[#allocation4 + $0x31] ss:$2 sm:$0xff]  ;;  %2843 = vrot.lane.b32.xlu0 %v4036_v60, %s6798_s17 }
 0x356   :  { %v6148_v3 = vmax.f32 %v6024_v18, %v6088_v0  ;;  %5962 = vst.msk [vmem:[#allocation4 + $0x40] sm:$0xff] %vm5953_vm13, %v5813_v9  ;;  %v3976_v18 = vld [vmem:[#allocation2 + $0x171] sm:$0xff] }
 0x357   :  { %v3277_v30 = vpop.permute.xlu0 %3276  ;;  %v4040_v60 = vpack.c.bf16 %v3976_v18, %v3976_v18 }
 0x358   :  { %v6178_v25 = vmax.f32 %v6147_v32, %v6148_v3  ;;  %v3727_v17 = vpop.permute.xlu2 %3726  ;;  %v2010_v10 = vpop.permute.xlu1 %2009  ;;  %3452 = vst.msk [vmem:[#allocation3 + $0x88] sm:$0xf] %vm3434_vm10, %v3277_v30  ;;  %v3975_v3 = vld [vmem:[#allocation2 + $0x169] sm:$0xff] }
 0x359   :  { %2145 = vst.msk [vmem:[#allocation3 + $0x1c8] sm:$0xf] %vm2087_vm7, %v2010_v10 }
 0x35a   :  { %6194 = vst.msk [vmem:[#allocation5 + $0x8] sm:$0xff] %vm5953_vm13, %v6178_v25  ;;  %3292 = vrot.lane.b32.xlu2 %v3139_v48, %s6799_s20  ;;  %v4039_v25 = vpack.c.bf16 %v3975_v3, %v3975_v3  ;;  %v3079_v48 = vld [vmem:[#allocation2 + $0x172] sm:$0xff] }
 0x35b   :  { %3902 = vst.msk [vmem:[#allocation3 + $0x88] sm:$0xf] %vm3884_vm11, %v3727_v17 }
 0x35c   :  { %3290 = vrot.lane.b32.xlu1 %v3138_v35, %s6799_s20  ;;  %v3143_v35 = vpack.c.bf16 %v3079_v48, %v3079_v48  ;;  %v3531_v48 = vld [vmem:[#allocation2 + $0x1a0] sm:$0xff] }
 0x35d   :  { %v5815_v47 = vpop.f32.mrf.mxu3  ;;  %3740 = vrot.lane.b32.xlu0 %v3588_v44, %s6801_s27 }
 0x35e   :  { %5963 = vst.msk [vmem:[#allocation4 + $0x48] sm:$0xff] %vm5953_vm13, %v5815_v47  ;;  %v3142_v47 = vpack.c.bf16 %v3078_v62, %v3078_v62  ;;  %v3080_v62 = vld [vmem:[#allocation2 + $0x182] sm:$0xff] }
 0x35f   :  { %v2014_v23 = vpop.permute.xlu0 %2013 }
 0x360   :  { %v2018_v13 = vpop.permute.xlu2 %2017  ;;  %v1563_v12 = vpop.permute.xlu1 %1562  ;;  %2147 = vst.msk [vmem:[#allocation3 + $0x1d8] sm:$0xf] %vm2087_vm7, %v2014_v23 }
 0x361   :  { %1697 = vst.msk [vmem:[#allocation3 + $0x1d0] sm:$0xf] %vm1638_vm6, %v1563_v12 }
 0x362   :  { %2146 = vst.msk [vmem:[#allocation3 + $0x1d0] sm:$0xf] %vm2087_vm7, %v2012_v61  ;;  %4189 = vrot.lane.b32.xlu2 %v4037_v21, %s6800_s26 }
 0x364   :  { %3742 = vrot.lane.b32.xlu1 %v3589_v36, %s6801_s27 }
 0x365   :  { %4191 = vrot.lane.b32.xlu0 %v4038_v52, %s6800_s26 }
 0x367   :  { %v1567_v7 = vpop.permute.xlu0 %1566 }
 0x368   :  { %v1571_v37 = vpop.permute.xlu2 %1570  ;;  %v3725_v20 = vpop.permute.xlu1 %3724  ;;  %1699 = vst.msk [vmem:[#allocation3 + $0x1e0] sm:$0xf] %vm1638_vm6, %v1567_v7  ;;  %v3977_v7 = vld [vmem:[#allocation2 + $0x181] sm:$0xff] }
 0x369   :  { %1701 = vst.msk [vmem:[#allocation3 + $0x1f0] sm:$0xf] %vm1638_vm6, %v1571_v37 }
 0x36a   :  { %3901 = vst.msk [vmem:[#allocation3 + $0x80] sm:$0xf] %vm3884_vm11, %v3725_v20  ;;  %2847 = vrot.lane.b32.xlu2 %v4038_v52, %s6798_s17  ;;  %v3528_v52 = vld [vmem:[#allocation2 + $0x180] sm:$0xff] }
 0x36b   :  { %v3592_v1 = vpack.c.bf16 %v3528_v52, %v3528_v52 }
 0x36c   :  { %2845 = vrot.lane.b32.xlu1 %v4037_v21, %s6798_s17 }
 0x36d   :  { %3294 = vrot.lane.b32.xlu0 %v3140_v29, %s6799_s20 }
 0x36f   :  { %v4174_v61 = vpop.permute.xlu0 %4173 }
 0x370   :  { %v2830_v57 = vpop.permute.xlu2 %2829  ;;  %v1569_v34 = vpop.permute.xlu1 %1568  ;;  %4350 = vst.msk [vmem:[#allocation3 + $0x80] sm:$0xf] %vm4333_vm12, %v4174_v61 }
 0x371   :  { %3004 = vst.msk [vmem:[#allocation3 + $0x90] sm:$0xf] %vm2985_vm9, %v2830_v57 }
 0x372   :  { %1700 = vst.msk [vmem:[#allocation3 + $0x1e8] sm:$0xf] %vm1638_vm6, %v1569_v34  ;;  %3744 = vrot.lane.b32.xlu2 %v3590_v28, %s6801_s27 }
 0x373   :  { %2149 = vst.msk [vmem:[#allocation3 + $0x1e8] sm:$0xf] %vm2087_vm7, %v2018_v13  ;;  %v3529_v13 = vld [vmem:[#allocation2 + $0x188] sm:$0xff] }
 0x374   :  { %3296 = vrot.lane.b32.xlu1 %v3141_v14, %s6799_s20  ;;  %v3593_v20 = vpack.c.bf16 %v3529_v13, %v3529_v13 }
 0x375   :  { %3746 = vrot.lane.b32.xlu0 %v3591_v27, %s6801_s27  ;;  %v3978_v27 = vld [vmem:[#allocation2 + $0x189] sm:$0xff] }
 0x376   :  { %v4042_v18 = vpack.c.bf16 %v3978_v27, %v3978_v27  ;;  %v3533_v27 = vld [vmem:[#allocation2 + $0x1e8] sm:$0xff] }
 0x377   :  { %v1573_v32 = vpop.permute.xlu0 %1572 }
 0x378   :  { %v3281_v9 = vpop.permute.xlu2 %3280  ;;  %v2016_v0 = vpop.permute.xlu1 %2015  ;;  %1702 = vst.msk [vmem:[#allocation3 + $0x1f8] sm:$0xf] %vm1638_vm6, %v1573_v32  ;;  %v3081_v32 = vld [vmem:[#allocation2 + $0x18a] sm:$0xff] }
 0x379   :  { %2148 = vst.msk [vmem:[#allocation3 + $0x1e0] sm:$0xf] %vm2087_vm7, %v2016_v0 }
 0x37a   :  { %4195 = vrot.lane.b32.xlu2 %v4040_v60, %s6800_s26 }
 0x37c   :  { %4193 = vrot.lane.b32.xlu1 %v4039_v25, %s6800_s26 }
 0x37d   :  { %2849 = vrot.lane.b32.xlu0 %v4039_v25, %s6798_s17 }
 0x37f   :  { %v5149_v30 = vpop.f32.mrf.mxu1  ;;  %v2020_v39 = vpop.permute.xlu0 %2019 }
 0x380   :  { %v4178_v17 = vpop.permute.xlu2 %4177  ;;  %v4176_v10 = vpop.permute.xlu1 %4175  ;;  %2150 = vst.msk [vmem:[#allocation3 + $0x1f0] sm:$0xf] %vm2087_vm7, %v2020_v39  ;;  %v5319_v6 = vadd.f32 %v8236_v54, %v5149_v30  ;;  %v6358_v54 = vld [vmem:[#allocation3 + $0x80] sm:$0xf]  ;;  %v3144_v30 = vpack.c.bf16 %v3080_v62, %v3080_v62 }
 0x381   :  { %4351 = vst.msk [vmem:[#allocation3 + $0x88] sm:$0xf] %vm4333_vm12, %v4176_v10  ;;  %v3979_v39 = vld [vmem:[#allocation2 + $0x199] sm:$0xff] }
 0x382   :  { %3298 = vrot.lane.b32.xlu2 %v3142_v47, %s6799_s20  ;;  %v5464_v12 = vmul.f32 %v8878_v2, %v5319_v6 }
 0x384   :  { %2851 = vrot.lane.b32.xlu1 %v4040_v60, %s6798_s17  ;;  %v5532_v29 = vadd.f32 %v8888_v24, %v5464_v12  ;;  %v3530_v60 = vld [vmem:[#allocation2 + $0x198] sm:$0xff] }
 0x385   :  { %3300 = vrot.lane.b32.xlu0 %v3143_v35, %s6799_s20  ;;  %v3594_v10 = vpack.c.bf16 %v3530_v60, %v3530_v60  ;;  %v4043_v35 = vpack.c.bf16 %v3979_v39, %v3979_v39 }
 0x386   :  { %v5596_v55 = vmax.f32 %v5532_v29, 0.0  ;;  %v3082_v29 = vld [vmem:[#allocation2 + $0x1ca] sm:$0xff] }
 0x387   :  { %v5151_v21 = vpop.f32.mrf.mxu1  ;;  %v2832_v41 = vpop.permute.xlu0 %2831 }
 0x388   :  { %v2836_v44 = vpop.permute.xlu2 %2835  ;;  %v2022_v23 = vpop.permute.xlu1 %2021  ;;  %v6669_v40 = vld [vmem:[#allocation3 + $0x84] sm:$0xf0]  ;;  %v5321_v37 = vadd.f32 %v8257_v22, %v5151_v21  ;;  %3005 = vst.msk [vmem:[#allocation3 + $0x98] sm:$0xf] %vm2985_vm9, %v2832_v41  ;;  %v4041_v22 = vpack.c.bf16 %v3977_v7, %v3977_v7 }
 0x389   :  { %3007 = vst.msk [vmem:[#allocation3 + $0xa8] sm:$0xf] %vm2985_vm9, %v2836_v44  ;;  %v6359_v36 = vor.u32 %v6669_v40, %v6358_v54  ;;  %v3980_v44 = vld [vmem:[#allocation2 + $0x1a1] sm:$0xff]  ;;  %v3595_v40 = vpack.c.bf16 %v3531_v48, %v3531_v48 }
 0x38a   :  { %2151 = vst.msk [vmem:[#allocation3 + $0x1f8] sm:$0xf] %vm2087_vm7, %v2022_v23  ;;  %v5465_v57 = vmul.f32 %v8878_v2, %v5321_v37  ;;  %3750 = vrot.lane.b32.xlu2 %v3593_v20, %s6801_s27  ;;  %v4044_v21 = vpack.c.bf16 %v3980_v44, %v3980_v44  ;;  %v2633_v20 = vld [vmem:[#allocation2 + $0x1c9] sm:$0xff] }
 0x38b   :  { %3454 = vst.msk [vmem:[#allocation3 + $0x98] sm:$0xf] %vm3434_vm10, %v3281_v9  ;;  %5158 = vmatmul.bf16.gmra.mxu1 %v6359_v36  ;;  %v2634_v36 = vld [vmem:[#allocation2 + $0x1d1] sm:$0xff]  ;;  %v6090_v48 = vld [vmem:[#allocation4 + $0x41] ss:$2 sm:$0xff] }
 0x38c   :  { %v5533_v34 = vadd.f32 %v8888_v24, %v5465_v57  ;;  %3748 = vrot.lane.b32.xlu1 %v3592_v1, %s6801_s27  ;;  %v2698_v7 = vpack.c.bf16 %v2634_v36, %v2634_v36  ;;  %v2697_v57 = vpack.c.bf16 %v2633_v20, %v2633_v20  ;;  %v3146_v1 = vpack.c.bf16 %v3082_v29, %v3082_v29 }
 0x38d   :  { %4197 = vrot.lane.b32.xlu0 %v4041_v22, %s6800_s26 }
 0x38e   :  { %v5597_v19 = vmax.f32 %v5533_v34, 0.0 }
 0x38f   :  { %v3729_v14 = vpop.permute.xlu0 %3728 }
 0x390   :  { %v3733_v61 = vpop.permute.xlu2 %3732  ;;  %v3279_v28 = vpop.permute.xlu1 %3278  ;;  %v5654_v9 = vpack.c.bf16 %v5597_v19, %v5596_v55  ;;  %v3083_v19 = vld [vmem:[#allocation2 + $0x1d2] sm:$0xff] }
 0x391   :  { %3453 = vst.msk [vmem:[#allocation3 + $0x90] sm:$0xf] %vm3434_vm10, %v3279_v28 }
 0x392   :  { %3903 = vst.msk [vmem:[#allocation3 + $0x90] sm:$0xf] %vm3884_vm11, %v3729_v14  ;;  %6626 = vmatmul.msk.bf16.gmra.mxu3 %vm908_vm2, %v5654_v9  ;;  %2853 = vrot.lane.b32.xlu2 %v4041_v22, %s6798_s17  ;;  %v3147_v9 = vpack.c.bf16 %v3083_v19, %v3083_v19  ;;  %v3983_v19 = vld [vmem:[#allocation2 + $0x1f9] sm:$0xff] }
 0x393   :  { %4352 = vst.msk [vmem:[#allocation3 + $0x90] sm:$0xf] %vm4333_vm12, %v4178_v17  ;;  %v3145_v17 = vpack.c.bf16 %v3081_v32, %v3081_v32 }
 0x394   :  { %4199 = vrot.lane.b32.xlu1 %v4042_v18, %s6800_s26 }
 0x395   :  { %2855 = vrot.lane.b32.xlu0 %v4042_v18, %s6798_s17  ;;  %v3597_v18 = vpack.c.bf16 %v3533_v27, %v3533_v27 }
 0x397   :  { %v4180_v25 = vpop.permute.xlu0 %4179 }
 0x398   :  { %v4184_v0 = vpop.permute.xlu2 %4183  ;;  %v3731_v3 = vpop.permute.xlu1 %3730 }
 0x399   :  { %3904 = vst.msk [vmem:[#allocation3 + $0x98] sm:$0xf] %vm3884_vm11, %v3731_v3  ;;  %v3982_v3 = vld [vmem:[#allocation2 + $0x1e9] sm:$0xff] }
 0x39a   :  { %4353 = vst.msk [vmem:[#allocation3 + $0x98] sm:$0xf] %vm4333_vm12, %v4180_v25  ;;  %3304 = vrot.lane.b32.xlu2 %v3145_v17, %s6799_s20  ;;  %v6366_v12 = vld [vmem:[#allocation3 + $0x90] sm:$0xf]  ;;  %v4046_v39 = vpack.c.bf16 %v3982_v3, %v3982_v3 }
 0x39c   :  { %3302 = vrot.lane.b32.xlu1 %v3144_v30, %s6799_s20  ;;  %v3981_v30 = vld [vmem:[#allocation2 + $0x1e1] sm:$0xff] }
 0x39d   :  { %3752 = vrot.lane.b32.xlu0 %v3594_v10, %s6801_s27 }
 0x39f   :  { %v3283_v13 = vpop.permute.xlu0 %3282 }
 0x3a0   :  { %v3287_v47 = vpop.permute.xlu2 %3286  ;;  %v2834_v6 = vpop.permute.xlu1 %2833 }
 0x3a1   :  { %3006 = vst.msk [vmem:[#allocation3 + $0xa0] sm:$0xf] %vm2985_vm9, %v2834_v6  ;;  %v6671_v23 = vld [vmem:[#allocation3 + $0x94] sm:$0xf0]  ;;  %v4045_v6 = vpack.c.bf16 %v3981_v30, %v3981_v30 }
 0x3a2   :  { %3455 = vst.msk [vmem:[#allocation3 + $0xa0] sm:$0xf] %vm3434_vm10, %v3283_v13  ;;  %v6367_v54 = vor.u32 %v6671_v23, %v6366_v12  ;;  %4201 = vrot.lane.b32.xlu2 %v4043_v35, %s6800_s26 }
 0x3a3   :  { %3905 = vst.msk [vmem:[#allocation3 + $0xa0] sm:$0xf] %vm3884_vm11, %v3733_v61  ;;  %v3532_v61 = vld [vmem:[#allocation2 + $0x1e0] sm:$0xff] }
 0x3a4   :  { %5163 = vmatmul.bf16.gmra.mxu1 %v6367_v54  ;;  %3754 = vrot.lane.b32.xlu1 %v3595_v40, %s6801_s27  ;;  %v3596_v14 = vpack.c.bf16 %v3532_v61, %v3532_v61  ;;  %v3084_v54 = vld [vmem:[#allocation2 + $0x1e2] sm:$0xff] }
 0x3a5   :  { %4203 = vrot.lane.b32.xlu0 %v4044_v21, %s6800_s26 }
 0x3a7   :  { %v3735_v37 = vpop.permute.xlu0 %3734 }
 0x3a8   :  { %v3739_v41 = vpop.permute.xlu2 %3738  ;;  %v3285_v52 = vpop.permute.xlu1 %3284 }
 0x3a9   :  { %3456 = vst.msk [vmem:[#allocation3 + $0xa8] sm:$0xf] %vm3434_vm10, %v3285_v52  ;;  %v3148_v52 = vpack.c.bf16 %v3084_v54, %v3084_v54 }
 0x3aa   :  { %3906 = vst.msk [vmem:[#allocation3 + $0xa8] sm:$0xf] %vm3884_vm11, %v3735_v37  ;;  %2859 = vrot.lane.b32.xlu2 %v2698_v7, %s6798_s17  ;;  %v3085_v37 = vld [vmem:[#allocation2 + $0x1ea] sm:$0xff] }
 0x3ab   :  { %4355 = vst.msk [vmem:[#allocation3 + $0xa8] sm:$0xf] %vm4333_vm12, %v4184_v0  ;;  %v3149_v7 = vpack.c.bf16 %v3085_v37, %v3085_v37 }
 0x3ac   :  { %2857 = vrot.lane.b32.xlu1 %v2697_v57, %s6798_s17 }
 0x3ad   :  { %3306 = vrot.lane.b32.xlu0 %v3146_v1, %s6799_s20  ;;  %v3535_v1 = vld [vmem:[#allocation2 + $0x200] sm:$0xff] }
 0x3af   :  { %v5818_v22 = vpop.f32.mrf.mxu3  ;;  %v2838_v28 = vpop.permute.xlu0 %2837 }
 0x3b0   :  { %v2842_v34 = vpop.permute.xlu2 %2841  ;;  %5964 = vst.msk [vmem:[#allocation4 + $0x50] sm:$0xff] %vm5953_vm13, %v5818_v22  ;;  %v4182_v55 = vpop.permute.xlu1 %4181 }
 0x3b1   :  { %3010 = vst.msk [vmem:[#allocation3 + $0xc0] sm:$0xf] %vm2985_vm9, %v2842_v34 }
 0x3b2   :  { %4354 = vst.msk [vmem:[#allocation3 + $0xa0] sm:$0xf] %vm4333_vm12, %v4182_v55  ;;  %3756 = vrot.lane.b32.xlu2 %v3596_v14, %s6801_s27  ;;  %v6673_v62 = vld [vmem:[#allocation3 + $0xa4] sm:$0xf0]  ;;  %v3534_v55 = vld [vmem:[#allocation2 + $0x1f8] sm:$0xff] }
 0x3b3   :  { %3008 = vst.msk [vmem:[#allocation3 + $0xb0] sm:$0xf] %vm2985_vm9, %v2838_v28  ;;  %v3599_v28 = vpack.c.bf16 %v3535_v1, %v3535_v1  ;;  %v3986_v1 = vld [vmem:[#allocation2 + $0x219] sm:$0xff] }
 0x3b4   :  { %3457 = vst.msk [vmem:[#allocation3 + $0xb0] sm:$0xf] %vm3434_vm10, %v3287_v47  ;;  %3308 = vrot.lane.b32.xlu1 %v3147_v9, %s6799_s20  ;;  %v6026_v47 = vld [vmem:[#allocation4 + $0x40] ss:$2 sm:$0xff]  ;;  %v3598_v9 = vpack.c.bf16 %v3534_v55, %v3534_v55 }
 0x3b5   :  { %3758 = vrot.lane.b32.xlu0 %v3597_v18, %s6801_s27  ;;  %v6149_v12 = vmax.f32 %v6026_v47, %v6090_v48 }
 0x3b7   :  { %v5820_v0 = vpop.f32.mrf.mxu3  ;;  %v3289_v17 = vpop.permute.xlu0 %3288 }
 0x3b8   :  { %v3293_v32 = vpop.permute.xlu2 %3292  ;;  %5965 = vst.msk [vmem:[#allocation4 + $0x58] sm:$0xff] %vm5953_vm13, %v5820_v0  ;;  %v2840_v60 = vpop.permute.xlu1 %2839 }
 0x3b9   :  { %v6374_v25 = vld [vmem:[#allocation3 + $0xa0] sm:$0xf]  ;;  %3009 = vst.msk [vmem:[#allocation3 + $0xb8] sm:$0xf] %vm2985_vm9, %v2840_v60 }
 0x3ba   :  { %v6375_v10 = vor.u32 %v6673_v62, %v6374_v25  ;;  %3458 = vst.msk [vmem:[#allocation3 + $0xb8] sm:$0xf] %vm3434_vm10, %v3289_v17  ;;  %4207 = vrot.lane.b32.xlu2 %v4046_v39, %s6800_s26 }
 0x3bb   :  { %3908 = vst.msk [vmem:[#allocation3 + $0xb8] sm:$0xf] %vm3884_vm11, %v3739_v41 }
 0x3bc   :  { %5168 = vmatmul.bf16.gmra.mxu1 %v6375_v10  ;;  %4205 = vrot.lane.b32.xlu1 %v4045_v6, %s6800_s26 }
 0x3bd   :  { %2861 = vrot.lane.b32.xlu0 %v4045_v6, %s6798_s17  ;;  %v3087_v6 = vld [vmem:[#allocation2 + $0x202] sm:$0xff] }
 0x3bf   :  { %v6028_v35 = vld [vmem:[#allocation4 + $0x50] ss:$2 sm:$0xff]  ;;  %v6092_v44 = vld [vmem:[#allocation4 + $0x51] ss:$2 sm:$0xff]  ;;  %v4186_v41 = vpop.permute.xlu0 %4185 }
 0x3c0   :  { %v4190_v13 = vpop.permute.xlu2 %4189  ;;  %v6150_v23 = vmax.f32 %v6028_v35, %v6092_v44  ;;  %v3737_v21 = vpop.permute.xlu1 %3736 }
 0x3c1   :  { %3907 = vst.msk [vmem:[#allocation3 + $0xb0] sm:$0xf] %vm3884_vm11, %v3737_v21 }
 0x3c2   :  { %v5154_v40 = vpop.f32.mrf.mxu1  ;;  %v6179_v36 = vmax.f32 %v6149_v12, %v6150_v23  ;;  %4356 = vst.msk [vmem:[#allocation3 + $0xb0] sm:$0xf] %vm4333_vm12, %v4186_v41  ;;  %3310 = vrot.lane.b32.xlu2 %v3148_v52, %s6799_s20  ;;  %v3086_v12 = vld [vmem:[#allocation2 + $0x1fa] sm:$0xff]  ;;  %v3536_v23 = vld [vmem:[#allocation2 + $0x210] sm:$0xff] }
 0x3c3   :  { %v5324_v20 = vadd.f32 %v8281_v31, %v5154_v40  ;;  %v3150_v54 = vpack.c.bf16 %v3086_v12, %v3086_v12  ;;  %v3600_v40 = vpack.c.bf16 %v3536_v23, %v3536_v23  ;;  %v3537_v52 = vld [vmem:[#allocation2 + $0x218] sm:$0xff] }
 0x3c4   :  { %6195 = vst.msk [vmem:[#allocation5 + $0x10] sm:$0xff] %vm5953_vm13, %v6179_v36  ;;  %2863 = vrot.lane.b32.xlu1 %v4046_v39, %s6798_s17  ;;  %v3984_v39 = vld [vmem:[#allocation2 + $0x201] sm:$0xff]  ;;  %v3985_v36 = vld [vmem:[#allocation2 + $0x211] sm:$0xff] }
 0x3c5   :  { %v5466_v57 = vmul.f32 %v8878_v2, %v5324_v20  ;;  %3312 = vrot.lane.b32.xlu0 %v3149_v7, %s6799_s20  ;;  %v4048_v47 = vpack.c.bf16 %v3984_v39, %v3984_v39  ;;  %v3539_v39 = vld [vmem:[#allocation2 + $0x230] sm:$0xff] }
 0x3c7   :  { %v2844_v31 = vpop.permute.xlu0 %2843  ;;  %v5534_v14 = vadd.f32 %v8888_v24, %v5466_v57  ;;  %v4049_v57 = vpack.c.bf16 %v3985_v36, %v3985_v36 }
 0x3c8   :  { %v2848_v29 = vpop.permute.xlu2 %2847  ;;  %v4188_v34 = vpop.permute.xlu1 %4187  ;;  %3011 = vst.msk [vmem:[#allocation3 + $0xc8] sm:$0xf] %vm2985_vm9, %v2844_v31 }
 0x3c9   :  { %3013 = vst.msk [vmem:[#allocation3 + $0xd8] sm:$0xf] %vm2985_vm9, %v2848_v29  ;;  %v5598_v3 = vmax.f32 %v5534_v14, 0.0  ;;  %v6382_v62 = vld [vmem:[#allocation3 + $0xb0] sm:$0xf] }
 0x3ca   :  { %v5156_v22 = vpop.f32.mrf.mxu1  ;;  %4357 = vst.msk [vmem:[#allocation3 + $0xb8] sm:$0xf] %vm4333_vm12, %v4188_v34  ;;  %3762 = vrot.lane.b32.xlu2 %v3599_v28, %s6801_s27  ;;  %v4050_v34 = vpack.c.bf16 %v3986_v1, %v3986_v1 }
 0x3cb   :  { %v5326_v61 = vadd.f32 %v8301_v33, %v5156_v22  ;;  %3460 = vst.msk [vmem:[#allocation3 + $0xc8] sm:$0xf] %vm3434_vm10, %v3293_v32  ;;  %v4047_v33 = vpack.c.bf16 %v3983_v19, %v3983_v19  ;;  %v3601_v22 = vpack.c.bf16 %v3537_v52, %v3537_v52  ;;  %v3089_v19 = vld [vmem:[#allocation2 + $0x21a] sm:$0xff]  ;;  %v3091_v52 = vld [vmem:[#allocation2 + $0x232] sm:$0xff] }
 0x3cc   :  { %3760 = vrot.lane.b32.xlu1 %v3598_v9, %s6801_s27  ;;  %v3088_v9 = vld [vmem:[#allocation2 + $0x212] sm:$0xff] }
 0x3cd   :  { %v5467_v27 = vmul.f32 %v8878_v2, %v5326_v61  ;;  %4209 = vrot.lane.b32.xlu0 %v4047_v33, %s6800_s26 }
 0x3cf   :  { %v5535_v18 = vadd.f32 %v8888_v24, %v5467_v27  ;;  %v3741_v10 = vpop.permute.xlu0 %3740 }
 0x3d0   :  { %v3745_v0 = vpop.permute.xlu2 %3744  ;;  %v3291_v25 = vpop.permute.xlu1 %3290 }
 0x3d1   :  { %v5599_v60 = vmax.f32 %v5535_v18, 0.0  ;;  %v6675_v17 = vld [vmem:[#allocation3 + $0xb4] sm:$0xf0]  ;;  %3459 = vst.msk [vmem:[#allocation3 + $0xc0] sm:$0xf] %vm3434_vm10, %v3291_v25  ;;  %v3153_v18 = vpack.c.bf16 %v3089_v19, %v3089_v19  ;;  %v3987_v25 = vld [vmem:[#allocation2 + $0x229] sm:$0xff] }
 0x3d2   :  { %v6383_v32 = vor.u32 %v6675_v17, %v6382_v62  ;;  %3909 = vst.msk [vmem:[#allocation3 + $0xc0] sm:$0xf] %vm3884_vm11, %v3741_v10  ;;  %2865 = vrot.lane.b32.xlu2 %v4047_v33, %s6798_s17  ;;  %v3538_v33 = vld [vmem:[#allocation2 + $0x228] sm:$0xff] }
 0x3d3   :  { %v5655_v30 = vpack.c.bf16 %v5599_v60, %v5598_v3  ;;  %4358 = vst.msk [vmem:[#allocation3 + $0xc0] sm:$0xf] %vm4333_vm12, %v4190_v13  ;;  %v3151_v13 = vpack.c.bf16 %v3087_v6, %v3087_v6  ;;  %v3602_v3 = vpack.c.bf16 %v3538_v33, %v3538_v33  ;;  %v3603_v6 = vpack.c.bf16 %v3539_v39, %v3539_v39 }
 0x3d4   :  { %5173 = vmatmul.bf16.gmra.mxu1 %v6383_v32  ;;  %4211 = vrot.lane.b32.xlu1 %v4048_v47, %s6800_s26 }
 0x3d5   :  { %6627 = vmatmul.msk.bf16.gmra.mxu3 %vm908_vm2, %v5655_v30  ;;  %2867 = vrot.lane.b32.xlu0 %v4048_v47, %s6798_s17  ;;  %v4051_v47 = vpack.c.bf16 %v3987_v25, %v3987_v25 }
 0x3d7   :  { %v4192_v44 = vpop.permute.xlu0 %4191 }
 0x3d8   :  { %v4196_v48 = vpop.permute.xlu2 %4195  ;;  %v3743_v35 = vpop.permute.xlu1 %3742 }
 0x3d9   :  { %3910 = vst.msk [vmem:[#allocation3 + $0xc8] sm:$0xf] %vm3884_vm11, %v3743_v35 }
 0x3da   :  { %4359 = vst.msk [vmem:[#allocation3 + $0xc8] sm:$0xf] %vm4333_vm12, %v4192_v44  ;;  %3316 = vrot.lane.b32.xlu2 %v3151_v13, %s6799_s20  ;;  %v6390_v20 = vld [vmem:[#allocation3 + $0xc0] sm:$0xf] }
 0x3dc   :  { %3314 = vrot.lane.b32.xlu1 %v3150_v54, %s6799_s20  ;;  %v3090_v54 = vld [vmem:[#allocation2 + $0x22a] sm:$0xff] }
 0x3dd   :  { %3764 = vrot.lane.b32.xlu0 %v3600_v40, %s6801_s27 }
 0x3df   :  { %v3295_v37 = vpop.permute.xlu0 %3294 }
 0x3e0   :  { %v3299_v21 = vpop.permute.xlu2 %3298  ;;  %v2846_v41 = vpop.permute.xlu1 %2845 }
 0x3e1   :  { %3012 = vst.msk [vmem:[#allocation3 + $0xd0] sm:$0xf] %vm2985_vm9, %v2846_v41  ;;  %v6677_v7 = vld [vmem:[#allocation3 + $0xc4] sm:$0xf0]  ;;  %v3154_v41 = vpack.c.bf16 %v3090_v54, %v3090_v54 }
 0x3e2   :  { %3461 = vst.msk [vmem:[#allocation3 + $0xd0] sm:$0xf] %vm3434_vm10, %v3295_v37  ;;  %v6391_v29 = vor.u32 %v6677_v7, %v6390_v20  ;;  %4213 = vrot.lane.b32.xlu2 %v4049_v57, %s6800_s26  ;;  %v3155_v20 = vpack.c.bf16 %v3091_v52, %v3091_v52 }
 0x3e3   :  { %3911 = vst.msk [vmem:[#allocation3 + $0xd0] sm:$0xf] %vm3884_vm11, %v3745_v0  ;;  %v3152_v0 = vpack.c.bf16 %v3088_v9, %v3088_v9 }
 0x3e4   :  { %5178 = vmatmul.bf16.gmra.mxu1 %v6391_v29  ;;  %3766 = vrot.lane.b32.xlu1 %v3601_v22, %s6801_s27 }
 0x3e5   :  { %4215 = vrot.lane.b32.xlu0 %v4050_v34, %s6800_s26 }
 0x3e7   :  { %v3747_v55 = vpop.permute.xlu0 %3746 }
 0x3e8   :  { %v3751_v61 = vpop.permute.xlu2 %3750  ;;  %v3297_v31 = vpop.permute.xlu1 %3296 }
 0x3e9   :  { %3462 = vst.msk [vmem:[#allocation3 + $0xd8] sm:$0xf] %vm3434_vm10, %v3297_v31 }
 0x3ea   :  { %3912 = vst.msk [vmem:[#allocation3 + $0xd8] sm:$0xf] %vm3884_vm11, %v3747_v55  ;;  %2869 = vrot.lane.b32.xlu2 %v4049_v57, %s6798_s17  ;;  %v3541_v57 = vld [vmem:[#allocation2 + $0x248] sm:$0xff] }
 0x3eb   :  { %4361 = vst.msk [vmem:[#allocation3 + $0xd8] sm:$0xf] %vm4333_vm12, %v4196_v48  ;;  %v3988_v48 = vld [vmem:[#allocation2 + $0x231] sm:$0xff]  ;;  %v3605_v19 = vpack.c.bf16 %v3541_v57, %v3541_v57  ;;  %v3543_v57 = vld [vmem:[#allocation2 + $0x260] sm:$0xff] }
 0x3ec   :  { %2422 = vrot.lane.b32.xlu1 %v3601_v22, %s6797_s14  ;;  %v4052_v35 = vpack.c.bf16 %v3988_v48, %v3988_v48 }
 0x3ed   :  { %2871 = vrot.lane.b32.xlu0 %v4050_v34, %s6798_s17 }
 0x3ef   :  { %v2850_v27 = vpop.permute.xlu0 %2849 }
 0x3f0   :  { %v2854_v28 = vpop.permute.xlu2 %2853  ;;  %v4194_v14 = vpop.permute.xlu1 %4193  ;;  %3014 = vst.msk [vmem:[#allocation3 + $0xe0] sm:$0xf] %vm2985_vm9, %v2850_v27 }
 0x3f1   :  { %3016 = vst.msk [vmem:[#allocation3 + $0xf0] sm:$0xf] %vm2985_vm9, %v2854_v28  ;;  %v3540_v28 = vld [vmem:[#allocation2 + $0x240] sm:$0xff] }
 0x3f2   :  { %4360 = vst.msk [vmem:[#allocation3 + $0xd0] sm:$0xf] %vm4333_vm12, %v4194_v14  ;;  %3320 = vrot.lane.b32.xlu2 %v3153_v18, %s6799_s20  ;;  %v6679_v10 = vld [vmem:[#allocation3 + $0xd4] sm:$0xf0]  ;;  %v3989_v14 = vld [vmem:[#allocation2 + $0x241] sm:$0xff]  ;;  %v3604_v18 = vpack.c.bf16 %v3540_v28, %v3540_v28 }
 0x3f3   :  { %3463 = vst.msk [vmem:[#allocation3 + $0xe0] sm:$0xf] %vm3434_vm10, %v3299_v21  ;;  %v4053_v33 = vpack.c.bf16 %v3989_v14, %v3989_v14 }
 0x3f4   :  { %3318 = vrot.lane.b32.xlu1 %v3152_v0, %s6799_s20 }
 0x3f5   :  { %3768 = vrot.lane.b32.xlu0 %v3602_v3, %s6801_s27 }
 0x3f7   :  { %v3301_v32 = vpop.permute.xlu0 %3300 }
 0x3f8   :  { %v3305_v60 = vpop.permute.xlu2 %3304  ;;  %v2852_v62 = vpop.permute.xlu1 %2851 }
 0x3f9   :  { %v6398_v17 = vld [vmem:[#allocation3 + $0xd0] sm:$0xf]  ;;  %3015 = vst.msk [vmem:[#allocation3 + $0xe8] sm:$0xf] %vm2985_vm9, %v2852_v62 }
 0x3fa   :  { %v6399_v30 = vor.u32 %v6679_v10, %v6398_v17  ;;  %3464 = vst.msk [vmem:[#allocation3 + $0xe8] sm:$0xf] %vm3434_vm10, %v3301_v32  ;;  %4217 = vrot.lane.b32.xlu2 %v4051_v47, %s6800_s26  ;;  %v3990_v32 = vld [vmem:[#allocation2 + $0x249] sm:$0xff] }
 0x3fb   :  { %3914 = vst.msk [vmem:[#allocation3 + $0xe8] sm:$0xf] %vm3884_vm11, %v3751_v61 }
 0x3fc   :  { %5183 = vmatmul.bf16.gmra.mxu1 %v6399_v30  ;;  %3770 = vrot.lane.b32.xlu1 %v3603_v6, %s6801_s27  ;;  %v4054_v30 = vpack.c.bf16 %v3990_v32, %v3990_v32 }
 0x3fd   :  { %4219 = vrot.lane.b32.xlu0 %v4052_v35, %s6800_s26 }
 0x3ff   :  { %v4198_v13 = vpop.permute.xlu0 %4197 }
 0x400   :  { %v4202_v44 = vpop.permute.xlu2 %4201  ;;  %v3749_v12 = vpop.permute.xlu1 %3748 }
 0x401   :  { %3913 = vst.msk [vmem:[#allocation3 + $0xe0] sm:$0xf] %vm3884_vm11, %v3749_v12 }
 0x402   :  { %4362 = vst.msk [vmem:[#allocation3 + $0xe0] sm:$0xf] %vm4333_vm12, %v4198_v13  ;;  %2426 = vrot.lane.b32.xlu2 %v3603_v6, %s6797_s14 }
 0x404   :  { %2424 = vrot.lane.b32.xlu1 %v3602_v3, %s6797_s14 }
 0x405   :  { %2873 = vrot.lane.b32.xlu0 %v4051_v47, %s6798_s17 }
 0x407   :  { %v2856_v36 = vpop.permute.xlu0 %2855 }
 0x408   :  { %v2860_v23 = vpop.permute.xlu2 %2859  ;;  %v5159_v40 = vpop.f32.mrf.mxu1  ;;  %3017 = vst.msk [vmem:[#allocation3 + $0xf8] sm:$0xf] %vm2985_vm9, %v2856_v36  ;;  %v3542_v36 = vld [vmem:[#allocation2 + $0x258] sm:$0xff] }
 0x409   :  { %3019 = vst.msk [vmem:[#allocation3 + $0x108] sm:$0xf] %vm2985_vm9, %v2860_v23  ;;  %v4200_v21 = vpop.permute.xlu1 %4199  ;;  %v5329_v37 = vadd.f32 %v8330_v43, %v5159_v40  ;;  %v6406_v34 = vld [vmem:[#allocation3 + $0xe0] sm:$0xf] }
 0x40a   :  { %4363 = vst.msk [vmem:[#allocation3 + $0xe8] sm:$0xf] %vm4333_vm12, %v4200_v21  ;;  %3322 = vrot.lane.b32.xlu2 %v3154_v41, %s6799_s20  ;;  %v3092_v23 = vld [vmem:[#allocation2 + $0x242] sm:$0xff] }
 0x40b   :  { %3466 = vst.msk [vmem:[#allocation3 + $0xf8] sm:$0xf] %vm3434_vm10, %v3305_v60  ;;  %v5468_v29 = vmul.f32 %v8878_v2, %v5329_v37  ;;  %v3156_v40 = vpack.c.bf16 %v3092_v23, %v3092_v23 }
 0x40c   :  { %2875 = vrot.lane.b32.xlu1 %v4052_v35, %s6798_s17 }
 0x40d   :  { %3324 = vrot.lane.b32.xlu0 %v3155_v20, %s6799_s20  ;;  %v5536_v27 = vadd.f32 %v8888_v24, %v5468_v29  ;;  %v3606_v29 = vpack.c.bf16 %v3542_v36, %v3542_v36 }
 0x40f   :  { %v3753_v43 = vpop.permute.xlu0 %3752  ;;  %v5600_v3 = vmax.f32 %v5536_v27, 0.0 }
 0x410   :  { %v3757_v7 = vpop.permute.xlu2 %3756  ;;  %v5161_v1 = vpop.f32.mrf.mxu1 }
 0x411   :  { %v3303_v22 = vpop.permute.xlu1 %3302  ;;  %v6681_v61 = vld [vmem:[#allocation3 + $0xe4] sm:$0xf0]  ;;  %v5331_v31 = vadd.f32 %v8351_v63, %v5161_v1  ;;  %v9035_v1 = vpop.f32.mrf.mxu2 }
 0x412   :  { %3465 = vst.msk [vmem:[#allocation3 + $0xf0] sm:$0xf] %vm3434_vm10, %v3303_v22  ;;  %v6407_v55 = vor.u32 %v6681_v61, %v6406_v34  ;;  %3774 = vrot.lane.b32.xlu2 %v3605_v19, %s6801_s27 }
 0x413   :  { %3915 = vst.msk [vmem:[#allocation3 + $0xf0] sm:$0xf] %vm3884_vm11, %v3753_v43  ;;  %v5469_v9 = vmul.f32 %v8878_v2, %v5331_v31  ;;  %v3607_v31 = vpack.c.bf16 %v3543_v57, %v3543_v57 }
 0x414   :  { %4364 = vst.msk [vmem:[#allocation3 + $0xf0] sm:$0xf] %vm4333_vm12, %v4202_v44  ;;  %5188 = vmatmul.bf16.gmra.mxu1 %v6407_v55  ;;  %3772 = vrot.lane.b32.xlu1 %v3604_v18, %s6801_s27 }
 0x415   :  { %v5537_v63 = vadd.f32 %v8888_v24, %v5469_v9  ;;  %4221 = vrot.lane.b32.xlu0 %v4053_v33, %s6800_s26  ;;  %v5823_v60 = vpop.f32.mrf.mxu3  ;;  %v3991_v9 = vld [vmem:[#allocation2 + $0x259] sm:$0xff] }
 0x416   :  { %5966 = vst.msk [vmem:[#allocation4 + $0x60] sm:$0xff] %vm5953_vm13, %v5823_v60 }
 0x417   :  { %v5601_v25 = vmax.f32 %v5537_v63, 0.0  ;;  %v4204_v17 = vpop.permute.xlu0 %4203 }
 0x418   :  { %v4208_v0 = vpop.permute.xlu2 %4207 }
 0x419   :  { %v3755_v62 = vpop.permute.xlu1 %3754  ;;  %v5656_v10 = vpack.c.bf16 %v5601_v25, %v5600_v3  ;;  %v4055_v3 = vpack.c.bf16 %v3991_v9, %v3991_v9  ;;  %v9049_v25 = vpop.f32.mrf.mxu2 }
 0x41a   :  { %3916 = vst.msk [vmem:[#allocation3 + $0xf8] sm:$0xf] %vm3884_vm11, %v3755_v62  ;;  %2428 = vrot.lane.b32.xlu2 %v3604_v18, %s6797_s14 }
 0x41b   :  { %4365 = vst.msk [vmem:[#allocation3 + $0xf8] sm:$0xf] %vm4333_vm12, %v4204_v17  ;;  %6628 = vmatmul.msk.bf16.gmra.mxu3 %vm908_vm2, %v5656_v10  ;;  %v6414_v48 = vld [vmem:[#allocation3 + $0xf0] sm:$0xf] }
 0x41c   :  { %4223 = vrot.lane.b32.xlu1 %v4054_v30, %s6800_s26 }
 0x41d   :  { %2430 = vrot.lane.b32.xlu0 %v3605_v19, %s6797_s14  ;;  %v5825_v47 = vpop.f32.mrf.mxu3 }
 0x41e   :  { %5967 = vst.msk [vmem:[#allocation4 + $0x68] sm:$0xff] %vm5953_vm13, %v5825_v47 }
 0x41f   :  { %v3307_v35 = vpop.permute.xlu0 %3306 }
 0x420   :  { %v3311_v39 = vpop.permute.xlu2 %3310 }
 0x421   :  { %v2858_v6 = vpop.permute.xlu1 %2857  ;;  %v5164_v44 = vpop.f32.mrf.mxu1 }
 0x422   :  { %3018 = vst.msk [vmem:[#allocation3 + $0x100] sm:$0xf] %vm2985_vm9, %v2858_v6  ;;  %v6683_v12 = vld [vmem:[#allocation3 + $0xf4] sm:$0xf0]  ;;  %v5334_v54 = vadd.f32 %v8372_v42, %v5164_v44  ;;  %2879 = vrot.lane.b32.xlu2 %v4054_v30, %s6798_s17  ;;  %v3095_v44 = vld [vmem:[#allocation2 + $0x262] sm:$0xff] }
 0x423   :  { %3467 = vst.msk [vmem:[#allocation3 + $0x100] sm:$0xf] %vm3434_vm10, %v3307_v35  ;;  %v6415_v13 = vor.u32 %v6683_v12, %v6414_v48 }
 0x424   :  { %3917 = vst.msk [vmem:[#allocation3 + $0x100] sm:$0xf] %vm3884_vm11, %v3757_v7  ;;  %2877 = vrot.lane.b32.xlu1 %v4053_v33, %s6798_s17  ;;  %v5470_v41 = vmul.f32 %v8878_v2, %v5334_v54  ;;  %v3093_v7 = vld [vmem:[#allocation2 + $0x24a] sm:$0xff]  ;;  %v6712_v33 = vld [vmem:[#allocation3 + $0x1e4] sm:$0xf]  ;;  %v3094_v54 = vld [vmem:[#allocation2 + $0x25a] sm:$0xff] }
 0x425   :  { %5193 = vmatmul.bf16.gmra.mxu1 %v6415_v13  ;;  %3326 = vrot.lane.b32.xlu0 %v3156_v40, %s6799_s20  ;;  %v3157_v61 = vpack.c.bf16 %v3093_v7, %v3093_v7  ;;  %v3159_v40 = vpack.c.bf16 %v3095_v44, %v3095_v44 }
 0x426   :  { %v5538_v22 = vadd.f32 %v8888_v24, %v5470_v41 }
 0x427   :  { %v3759_v37 = vpop.permute.xlu0 %3758 }
 0x428   :  { %v3763_v21 = vpop.permute.xlu2 %3762  ;;  %v5602_v28 = vmax.f32 %v5538_v22, 0.0 }
 0x429   :  { %v3309_v52 = vpop.permute.xlu1 %3308  ;;  %v5166_v20 = vpop.f32.mrf.mxu1 }
 0x42a   :  { %3468 = vst.msk [vmem:[#allocation3 + $0x108] sm:$0xf] %vm3434_vm10, %v3309_v52  ;;  %v5336_v42 = vadd.f32 %v8396_v51, %v5166_v20  ;;  %3776 = vrot.lane.b32.xlu2 %v3606_v29, %s6801_s27  ;;  %v3992_v51 = vld [vmem:[#allocation2 + $0x261] sm:$0xff]  ;;  %v3158_v52 = vpack.c.bf16 %v3094_v54, %v3094_v54 }
 0x42b   :  { %3918 = vst.msk [vmem:[#allocation3 + $0x108] sm:$0xf] %vm3884_vm11, %v3759_v37  ;;  %v4056_v63 = vpack.c.bf16 %v3992_v51, %v3992_v51 }
 0x42c   :  { %4367 = vst.msk [vmem:[#allocation3 + $0x108] sm:$0xf] %vm4333_vm12, %v4208_v0  ;;  %v5471_v34 = vmul.f32 %v8878_v2, %v5336_v42  ;;  %3328 = vrot.lane.b32.xlu1 %v3157_v61, %s6799_s20  ;;  %v6536_v0 = vld [vmem:[#allocation3 + $0x1e8] sm:$0xf0]  ;;  %v3545_v61 = vld [vmem:[#allocation2 + $0x278] sm:$0xff] }
 0x42d   :  { %3778 = vrot.lane.b32.xlu0 %v3607_v31, %s6801_s27  ;;  %v6539_v60 = vor.u32 %v6712_v33, %v6536_v0 }
 0x42e   :  { %v5539_v43 = vadd.f32 %v8888_v24, %v5471_v34 }
 0x42f   :  { %v2862_v27 = vpop.permute.xlu0 %2861  ;;  %6614 = vmatmul.msk.bf16.gmra.mxu2 %vm908_vm2, %v6539_v60 }
 0x430   :  { %v2866_v55 = vpop.permute.xlu2 %2865  ;;  %v5603_v14 = vmax.f32 %v5539_v43, 0.0  ;;  %3020 = vst.msk [vmem:[#allocation3 + $0x110] sm:$0xf] %vm2985_vm9, %v2862_v27  ;;  %v3994_v43 = vld [vmem:[#allocation2 + $0x279] sm:$0xff] }
 0x431   :  { %3022 = vst.msk [vmem:[#allocation3 + $0x120] sm:$0xf] %vm2985_vm9, %v2866_v55  ;;  %v4206_v19 = vpop.permute.xlu1 %4205  ;;  %v3609_v55 = vpack.c.bf16 %v3545_v61, %v3545_v61  ;;  %v4058_v51 = vpack.c.bf16 %v3994_v43, %v3994_v43  ;;  %v9112_v43 = vld [vmem:[%s9525_s7] ss:$0 sm:$0xff] }
 0x432   :  { %4366 = vst.msk [vmem:[#allocation3 + $0x100] sm:$0xf] %vm4333_vm12, %v4206_v19  ;;  %v5657_v18 = vpack.c.bf16 %v5603_v14, %v5602_v28  ;;  %4227 = vrot.lane.b32.xlu2 %v4056_v63, %s6800_s26 }
 0x433   :  { %3469 = vst.msk [vmem:[#allocation3 + $0x110] sm:$0xf] %vm3434_vm10, %v3311_v39  ;;  %v6685_v30 = vld [vmem:[#allocation3 + $0x104] sm:$0xf0] }
 0x434   :  { %6629 = vmatmul.msk.bf16.gmra.mxu3 %vm908_vm2, %v5657_v18  ;;  %4225 = vrot.lane.b32.xlu1 %v4055_v3, %s6800_s26 }
 0x435   :  { %2432 = vrot.lane.b32.xlu0 %v3606_v29, %s6797_s14  ;;  %v3993_v29 = vld [vmem:[#allocation2 + $0x271] sm:$0xff] }
 0x437   :  { %v3313_v39 = vpop.permute.xlu0 %3312 }
 0x438   :  { %v3317_v62 = vpop.permute.xlu2 %3316 }
 0x439   :  { %v2864_v17 = vpop.permute.xlu1 %2863  ;;  %v5169_v10 = vpop.f32.mrf.mxu1  ;;  %v6422_v32 = vld [vmem:[#allocation3 + $0x100] sm:$0xf] }
 0x43a   :  { %3021 = vst.msk [vmem:[#allocation3 + $0x118] sm:$0xf] %vm2985_vm9, %v2864_v17  ;;  %v6423_v47 = vor.u32 %v6685_v30, %v6422_v32  ;;  %v5339_v48 = vadd.f32 %v8419_v59, %v5169_v10  ;;  %2881 = vrot.lane.b32.xlu2 %v4055_v3, %s6798_s17 }
 0x43b   :  { %3470 = vst.msk [vmem:[#allocation3 + $0x118] sm:$0xf] %vm3434_vm10, %v3313_v39  ;;  %v3097_v39 = vld [vmem:[#allocation2 + $0x27a] sm:$0xff] }
 0x43c   :  { %3920 = vst.msk [vmem:[#allocation3 + $0x118] sm:$0xf] %vm3884_vm11, %v3763_v21  ;;  %5198 = vmatmul.bf16.gmra.mxu1 %v6423_v47  ;;  %2434 = vrot.lane.b32.xlu1 %v3607_v31, %s6797_s14  ;;  %v5472_v35 = vmul.f32 %v8878_v2, %v5339_v48  ;;  %v3544_v21 = vld [vmem:[#allocation2 + $0x270] sm:$0xff]  ;;  %v4057_v31 = vpack.c.bf16 %v3993_v29, %v3993_v29 }
 0x43d   :  { %2883 = vrot.lane.b32.xlu0 %v4056_v63, %s6798_s17  ;;  %v3608_v20 = vpack.c.bf16 %v3544_v21, %v3544_v21 }
 0x43e   :  { %v5540_v36 = vadd.f32 %v8888_v24, %v5472_v35  ;;  %v3161_v35 = vpack.c.bf16 %v3097_v39, %v3097_v39  ;;  %v3548_v39 = vld [vmem:[#allocation2 + $0x2a0] sm:$0xff] }
 0x43f   :  { %v4210_v59 = vpop.permute.xlu0 %4209 }
 0x440   :  { %v4214_v6 = vpop.permute.xlu2 %4213 }
 0x441   :  { %v3761_v12 = vpop.permute.xlu1 %3760  ;;  %v5171_v13 = vpop.f32.mrf.mxu1 }
 0x442   :  { %3919 = vst.msk [vmem:[#allocation3 + $0x110] sm:$0xf] %vm3884_vm11, %v3761_v12  ;;  %v5341_v23 = vadd.f32 %v8449_v38, %v5171_v13  ;;  %3332 = vrot.lane.b32.xlu2 %v3159_v40, %s6799_s20  ;;  %v5604_v38 = vmax.f32 %v5540_v36, 0.0 }
 0x443   :  { %4368 = vst.msk [vmem:[#allocation3 + $0x110] sm:$0xf] %vm4333_vm12, %v4210_v59 }
 0x444   :  { %v5473_v41 = vmul.f32 %v8878_v2, %v5341_v23  ;;  %3330 = vrot.lane.b32.xlu1 %v3158_v52, %s6799_s20  ;;  %v3547_v23 = vld [vmem:[#allocation2 + $0x290] sm:$0xff] }
 0x445   :  { %3780 = vrot.lane.b32.xlu0 %v3608_v20, %s6801_s27  ;;  %v3611_v52 = vpack.c.bf16 %v3547_v23, %v3547_v23  ;;  %v3549_v23 = vld [vmem:[#allocation2 + $0x2a8] sm:$0xff] }
 0x446   :  { %v5541_v37 = vadd.f32 %v8888_v24, %v5473_v41 }
 0x447   :  { %v2868_v22 = vpop.permute.xlu0 %2867 }
 0x448   :  { %v2870_v7 = vpop.permute.xlu2 %2869  ;;  %v5605_v42 = vmax.f32 %v5541_v37, 0.0  ;;  %3023 = vst.msk [vmem:[#allocation3 + $0x128] sm:$0xf] %vm2985_vm9, %v2868_v22  ;;  %v3995_v37 = vld [vmem:[#allocation2 + $0x289] sm:$0xff] }
 0x449   :  { %3024 = vst.msk [vmem:[#allocation3 + $0x130] sm:$0xf] %vm2985_vm9, %v2870_v7  ;;  %v4212_v57 = vpop.permute.xlu1 %4211  ;;  %v6094_v7 = vld [vmem:[#allocation4 + $0x61] ss:$2 sm:$0xff]  ;;  %v4059_v29 = vpack.c.bf16 %v3995_v37, %v3995_v37 }
 0x44a   :  { %4369 = vst.msk [vmem:[#allocation3 + $0x118] sm:$0xf] %vm4333_vm12, %v4212_v57  ;;  %v5658_v34 = vpack.c.bf16 %v5605_v42, %v5604_v38  ;;  %4229 = vrot.lane.b32.xlu2 %v4057_v31, %s6800_s26  ;;  %v6430_v27 = vld [vmem:[#allocation3 + $0x110] sm:$0xf]  ;;  %v3997_v37 = vld [vmem:[#allocation2 + $0x2a1] sm:$0xff] }
 0x44b   :  { %3472 = vst.msk [vmem:[#allocation3 + $0x128] sm:$0xf] %vm3434_vm10, %v3317_v62  ;;  %v3096_v62 = vld [vmem:[#allocation2 + $0x272] sm:$0xff] }
 0x44c   :  { %6630 = vmatmul.msk.bf16.gmra.mxu3 %vm908_vm2, %v5658_v34  ;;  %3782 = vrot.lane.b32.xlu1 %v3609_v55, %s6801_s27  ;;  %v3160_v30 = vpack.c.bf16 %v3096_v62, %v3096_v62 }
 0x44d   :  { %4231 = vrot.lane.b32.xlu0 %v4058_v51, %s6800_s26 }
 0x44f   :  { %v3765_v18 = vpop.permute.xlu0 %3764 }
 0x450   :  { %v3321_v28 = vpop.permute.xlu2 %3320 }
 0x451   :  { %v3315_v19 = vpop.permute.xlu1 %3314  ;;  %v5174_v14 = vpop.f32.mrf.mxu1  ;;  %v6687_v9 = vld [vmem:[#allocation3 + $0x114] sm:$0xf0] }
 0x452   :  { %3471 = vst.msk [vmem:[#allocation3 + $0x120] sm:$0xf] %vm3434_vm10, %v3315_v19  ;;  %v6431_v63 = vor.u32 %v6687_v9, %v6430_v27  ;;  %v5344_v33 = vadd.f32 %v8471_v49, %v5174_v14  ;;  %2438 = vrot.lane.b32.xlu2 %v3609_v55, %s6797_s14  ;;  %v3996_v14 = vld [vmem:[#allocation2 + $0x291] sm:$0xff]  ;;  %v9122_v9 = vld [vmem:[%s9526_s8] ss:$0 sm:$0xff] }
 0x453   :  { %3921 = vst.msk [vmem:[#allocation3 + $0x120] sm:$0xf] %vm3884_vm11, %v3765_v18 }
 0x454   :  { %4370 = vst.msk [vmem:[#allocation3 + $0x120] sm:$0xf] %vm4333_vm12, %v4214_v6  ;;  %5203 = vmatmul.bf16.gmra.mxu1 %v6431_v63  ;;  %2436 = vrot.lane.b32.xlu1 %v3608_v20, %s6797_s14  ;;  %v5474_v60 = vmul.f32 %v8878_v2, %v5344_v33  ;;  %v6030_v20 = vld [vmem:[#allocation4 + $0x60] ss:$2 sm:$0xff]  ;;  %v4060_v33 = vpack.c.bf16 %v3996_v14, %v3996_v14 }
 0x455   :  { %2885 = vrot.lane.b32.xlu0 %v4057_v31, %s6798_s17  ;;  %v6151_v61 = vmax.f32 %v6030_v20, %v6094_v7  ;;  %v3100_v14 = vld [vmem:[#allocation2 + $0x2a2] sm:$0xff] }
 0x456   :  { %v5542_v47 = vadd.f32 %v8888_v24, %v5474_v60 }
 0x457   :  { %v4216_v32 = vpop.permute.xlu0 %4215 }
 0x458   :  { %v5828_v0 = vpop.f32.mrf.mxu3  ;;  %v9085_v3 = vpop.permute.xlu2 %4217  ;;  %v5606_v13 = vmax.f32 %v5542_v47, 0.0 }
 0x459   :  { %5968 = vst.msk [vmem:[#allocation4 + $0x70] sm:$0xff] %vm5953_vm13, %v5828_v0  ;;  %v3767_v17 = vpop.permute.xlu1 %3766  ;;  %v5176_v10 = vpop.f32.mrf.mxu1 }
 0x45a   :  { %3922 = vst.msk [vmem:[#allocation3 + $0x128] sm:$0xf] %vm3884_vm11, %v3767_v17  ;;  %v5346_v49 = vadd.f32 %v8489_v5, %v5176_v10  ;;  %3334 = vrot.lane.b32.xlu2 %v3160_v30, %s6799_s20 }
 0x45b   :  { %4371 = vst.msk [vmem:[#allocation3 + $0x128] sm:$0xf] %vm4333_vm12, %v4216_v32  ;;  %v6438_v21 = vld [vmem:[#allocation3 + $0x120] sm:$0xf] }
 0x45c   :  { %v5475_v48 = vmul.f32 %v8878_v2, %v5346_v49  ;;  %2887 = vrot.lane.b32.xlu1 %v4058_v51, %s6798_s17  ;;  %v3546_v2 = vld [vmem:[#allocation2 + $0x288] sm:$0xff] }
 0x45d   :  { %3336 = vrot.lane.b32.xlu0 %v3161_v35, %s6799_s20  ;;  %v3610_v42 = vpack.c.bf16 %v3546_v2, %v3546_v2  ;;  %v3098_v49 = vld [vmem:[#allocation2 + $0x28a] sm:$0xff] }
 0x45e   :  { %v5543_v6 = vadd.f32 %v8888_v24, %v5475_v48  ;;  %v3162_v32 = vpack.c.bf16 %v3098_v49, %v3098_v49 }
 0x45f   :  { %v2872_v54 = vpop.permute.xlu0 %2871 }
 0x460   :  { %v5830_v44 = vpop.f32.mrf.mxu3  ;;  %v2427_v12 = vpop.permute.xlu2 %2426  ;;  %v5607_v5 = vmax.f32 %v5543_v6, 0.0  ;;  %v3099_v6 = vld [vmem:[#allocation2 + $0x292] sm:$0xff] }
 0x461   :  { %5969 = vst.msk [vmem:[#allocation4 + $0x78] sm:$0xff] %vm5953_vm13, %v5830_v44  ;;  %v2423_v59 = vpop.permute.xlu1 %2422  ;;  %v5179_v24 = vpop.f32.mrf.mxu1  ;;  %v3163_v2 = vpack.c.bf16 %v3099_v6, %v3099_v6 }
 0x462   :  { %2578 = vst.msk [vmem:[#allocation3 + $0x148] sm:$0xf] %vm2536_vm8, %v2427_v12  ;;  %v5659_v40 = vpack.c.bf16 %v5607_v5, %v5606_v13  ;;  %v6689_v36 = vld [vmem:[#allocation3 + $0x124] sm:$0xf0]  ;;  %v5349_v38 = vadd.f32 %v8512_v4, %v5179_v24  ;;  %3786 = vrot.lane.b32.xlu2 %v3611_v52, %s6801_s27  ;;  %v3612_v5 = vpack.c.bf16 %v3548_v39, %v3548_v39  ;;  %v3551_v39 = vld [vmem:[#allocation2 + $0x2c0] sm:$0xff] }
 0x463   :  { %2576 = vst.msk [vmem:[#allocation3 + $0x138] sm:$0xf] %vm2536_vm8, %v2423_v59  ;;  %v6439_v41 = vor.u32 %v6689_v36, %v6438_v21  ;;  %v3998_v21 = vld [vmem:[#allocation2 + $0x2a9] sm:$0xff] }
 0x464   :  { %3025 = vst.msk [vmem:[#allocation3 + $0x138] sm:$0xf] %vm2985_vm9, %v2872_v54  ;;  %6631 = vmatmul.msk.bf16.gmra.mxu3 %vm908_vm2, %v5659_v40  ;;  %3784 = vrot.lane.b32.xlu1 %v3610_v42, %s6801_s27  ;;  %v5476_v4 = vmul.f32 %v9112_v43, %v5349_v38  ;;  %v3613_v54 = vpack.c.bf16 %v3549_v23, %v3549_v23 }
 0x465   :  { %3474 = vst.msk [vmem:[#allocation3 + $0x138] sm:$0xf] %vm3434_vm10, %v3321_v28  ;;  %5208 = vmatmul.bf16.gmra.mxu1 %v6439_v41  ;;  %4233 = vrot.lane.b32.xlu0 %v4059_v29, %s6800_s26  ;;  %v4062_v20 = vpack.c.bf16 %v3998_v21, %v3998_v21 }
 0x466   :  { %v5544_v18 = vadd.f32 %v9122_v9, %v5476_v4 }
 0x467   :  { %v3769_v28 = vpop.permute.xlu0 %3768 }
 0x468   :  { %v6032_v57 = vld [vmem:[#allocation4 + $0x70] ss:$2 sm:$0xff]  ;;  %v6096_v22 = vld [vmem:[#allocation4 + $0x71] ss:$2 sm:$0xff]  ;;  %v3323_v34 = vpop.permute.xlu2 %3322  ;;  %v5608_v60 = vmax.f32 %v5544_v18, 0.0 }
 0x469   :  { %v6152_v31 = vmax.f32 %v6032_v57, %v6096_v22  ;;  %v3319_v55 = vpop.permute.xlu1 %3318  ;;  %v5181_v19 = vpop.f32.mrf.mxu1  ;;  %v3550_v18 = vld [vmem:[#allocation2 + $0x2b8] sm:$0xff] }
 0x46a   :  { %3473 = vst.msk [vmem:[#allocation3 + $0x130] sm:$0xf] %vm3434_vm10, %v3319_v55  ;;  %v5351_v27 = vadd.f32 %v8540_v53, %v5181_v19  ;;  %2440 = vrot.lane.b32.xlu2 %v3610_v42, %s6797_s14  ;;  %v4061_v42 = vpack.c.bf16 %v3997_v37, %v3997_v37  ;;  %v3101_v55 = vld [vmem:[#allocation2 + $0x2aa] sm:$0xff] }
 0x46b   :  { %v6180_v51 = vmax.f32 %v6151_v61, %v6152_v31  ;;  %3923 = vst.msk [vmem:[#allocation3 + $0x130] sm:$0xf] %vm3884_vm11, %v3769_v28 }
 0x46c   :  { %4372 = vst.msk [vmem:[#allocation3 + $0x130] sm:$0xf] %vm4333_vm12, %v9085_v3  ;;  %v5477_v63 = vmul.f32 %v9112_v43, %v5351_v27  ;;  %4235 = vrot.lane.b32.xlu1 %v4060_v33, %s6800_s26  ;;  %v3165_v27 = vpack.c.bf16 %v3101_v55, %v3101_v55 }
 0x46d   :  { %6196 = vst.msk [vmem:[#allocation5 + $0x18] sm:$0xff] %vm5953_vm13, %v6180_v51  ;;  %2442 = vrot.lane.b32.xlu0 %v3611_v52, %s6797_s14 }
 0x46e   :  { %v5545_v0 = vadd.f32 %v9122_v9, %v5477_v63 }
 0x46f   :  { %v4220_v10 = vpop.permute.xlu0 %4219 }
 0x470   :  { %v3775_v53 = vpop.permute.xlu2 %3774  ;;  %v5609_v62 = vmax.f32 %v5545_v0, 0.0  ;;  %v3614_v0 = vpack.c.bf16 %v3550_v18, %v3550_v18 }
 0x471   :  { %v3771_v17 = vpop.permute.xlu1 %3770 }
 0x472   :  { %3924 = vst.msk [vmem:[#allocation3 + $0x138] sm:$0xf] %vm3884_vm11, %v3771_v17  ;;  %v5660_v3 = vpack.c.bf16 %v5609_v62, %v5608_v60  ;;  %2891 = vrot.lane.b32.xlu2 %v4060_v33, %s6798_s17  ;;  %v3164_v33 = vpack.c.bf16 %v3100_v14, %v3100_v14  ;;  %v3999_v62 = vld [vmem:[#allocation2 + $0x2b9] sm:$0xff]  ;;  %v3552_v14 = vld [vmem:[#allocation2 + $0x2d0] sm:$0xff] }
 0x473   :  { %4373 = vst.msk [vmem:[#allocation3 + $0x138] sm:$0xf] %vm4333_vm12, %v4220_v10  ;;  %v6446_v44 = vld [vmem:[#allocation3 + $0x130] sm:$0xf] }
 0x474   :  { %6632 = vmatmul.msk.bf16.gmra.mxu3 %vm908_vm2, %v5660_v3  ;;  %2889 = vrot.lane.b32.xlu1 %v4059_v29, %s6798_s17 }
 0x475   :  { %3338 = vrot.lane.b32.xlu0 %v3162_v32, %s6799_s20 }
 0x477   :  { %v2874_v35 = vpop.permute.xlu0 %2873 }
 0x478   :  { %v2429_v30 = vpop.permute.xlu2 %2428 }
 0x479   :  { %2579 = vst.msk [vmem:[#allocation3 + $0x150] sm:$0xf] %vm2536_vm8, %v2429_v30  ;;  %v2425_v47 = vpop.permute.xlu1 %2424  ;;  %v5184_v48 = vpop.f32.mrf.mxu1 }
 0x47a   :  { %2577 = vst.msk [vmem:[#allocation3 + $0x140] sm:$0xf] %vm2536_vm8, %v2425_v47  ;;  %v6691_v12 = vld [vmem:[#allocation3 + $0x134] sm:$0xf0]  ;;  %v5354_v59 = vadd.f32 %v8577_v16, %v5184_v48  ;;  %3788 = vrot.lane.b32.xlu2 %v3612_v5, %s6801_s27  ;;  %v4063_v47 = vpack.c.bf16 %v3999_v62, %v3999_v62  ;;  %v4000_v48 = vld [vmem:[#allocation2 + $0x2c1] sm:$0xff] }
 0x47b   :  { %3026 = vst.msk [vmem:[#allocation3 + $0x140] sm:$0xf] %vm2985_vm9, %v2874_v35  ;;  %v6447_v13 = vor.u32 %v6691_v12, %v6446_v44  ;;  %v3615_v44 = vpack.c.bf16 %v3551_v39, %v3551_v39 }
 0x47c   :  { %3475 = vst.msk [vmem:[#allocation3 + $0x140] sm:$0xf] %vm3434_vm10, %v3323_v34  ;;  %3340 = vrot.lane.b32.xlu1 %v3163_v2, %s6799_s20  ;;  %v5478_v40 = vmul.f32 %v9112_v43, %v5354_v59 }
 0x47d   :  { %5213 = vmatmul.bf16.gmra.mxu1 %v6447_v13  ;;  %3790 = vrot.lane.b32.xlu0 %v3613_v54, %s6801_s27 }
 0x47e   :  { %v5546_v7 = vadd.f32 %v9122_v9, %v5478_v40 }
 0x47f   :  { %v3325_v52 = vpop.permute.xlu0 %3324 }
 0x480   :  { %v2880_v24 = vpop.permute.xlu2 %2879 }
 0x481   :  { %v2876_v36 = vpop.permute.xlu1 %2875  ;;  %v5186_v41 = vpop.f32.mrf.mxu1 }
 0x482   :  { %3027 = vst.msk [vmem:[#allocation3 + $0x148] sm:$0xf] %vm2985_vm9, %v2876_v36  ;;  %v5356_v16 = vadd.f32 %v8594_v50, %v5186_v41  ;;  %4239 = vrot.lane.b32.xlu2 %v4062_v20, %s6800_s26  ;;  %v5610_v50 = vmax.f32 %v5546_v7, 0.0 }
 0x483   :  { %3476 = vst.msk [vmem:[#allocation3 + $0x148] sm:$0xf] %vm3434_vm10, %v3325_v52 }
 0x484   :  { %v5479_v38 = vmul.f32 %v9112_v43, %v5356_v16  ;;  %3926 = vst.msk [vmem:[#allocation3 + $0x148] sm:$0xf] %vm3884_vm11, %v3775_v53  ;;  %4237 = vrot.lane.b32.xlu1 %v4061_v42, %s6800_s26  ;;  %v3102_v16 = vld [vmem:[#allocation2 + $0x2ba] sm:$0xff] }
 0x485   :  { %2444 = vrot.lane.b32.xlu0 %v3612_v5, %s6797_s14 }
 0x486   :  { %v5547_v29 = vadd.f32 %v9122_v9, %v5479_v38  ;;  %v3166_v38 = vpack.c.bf16 %v3102_v16, %v3102_v16  ;;  %v3105_v16 = vld [vmem:[#allocation2 + $0x2da] sm:$0xff] }
 0x487   :  { %v4222_v61 = vpop.permute.xlu0 %4221 }
 0x488   :  { %v3777_v57 = vpop.permute.xlu2 %3776  ;;  %v5611_v22 = vmax.f32 %v5547_v29, 0.0 }
 0x489   :  { %v3773_v34 = vpop.permute.xlu1 %3772 }
 0x48a   :  { %3925 = vst.msk [vmem:[#allocation3 + $0x140] sm:$0xf] %vm3884_vm11, %v3773_v34  ;;  %v5661_v31 = vpack.c.bf16 %v5611_v22, %v5610_v50  ;;  %2893 = vrot.lane.b32.xlu2 %v4061_v42, %s6798_s17  ;;  %v3103_v42 = vld [vmem:[#allocation2 + $0x2c2] sm:$0xff] }
 0x48b   :  { %4374 = vst.msk [vmem:[#allocation3 + $0x140] sm:$0xf] %vm4333_vm12, %v4222_v61  ;;  %v3167_v50 = vpack.c.bf16 %v3103_v42, %v3103_v42 }
 0x48c   :  { %6633 = vmatmul.msk.bf16.gmra.mxu3 %vm908_vm2, %v5661_v31  ;;  %2446 = vrot.lane.b32.xlu1 %v3613_v54, %s6797_s14 }
 0x48d   :  { %2895 = vrot.lane.b32.xlu0 %v4062_v20, %s6798_s17 }
 0x48f   :  { %v2431_v19 = vpop.permute.xlu0 %2430 }
 0x490   :  { %v4228_v4 = vpop.permute.xlu2 %4227  ;;  %2580 = vst.msk [vmem:[#allocation3 + $0x158] sm:$0xf] %vm2536_vm8, %v2431_v19 }
 0x491   :  { %v4224_v51 = vpop.permute.xlu1 %4223  ;;  %v5189_v28 = vpop.f32.mrf.mxu1  ;;  %3029 = vst.msk [vmem:[#allocation3 + $0x158] sm:$0xf] %vm2985_vm9, %v2880_v24 }
 0x492   :  { %4375 = vst.msk [vmem:[#allocation3 + $0x148] sm:$0xf] %vm4333_vm12, %v4224_v51  ;;  %v5359_v63 = vadd.f32 %v8614_v56, %v5189_v28  ;;  %3344 = vrot.lane.b32.xlu2 %v3165_v27, %s6799_s20  ;;  %v6454_v3 = vld [vmem:[#allocation3 + $0x140] sm:$0xf] }
 0x494   :  { %3342 = vrot.lane.b32.xlu1 %v3164_v33, %s6799_s20  ;;  %v5480_v60 = vmul.f32 %v9112_v43, %v5359_v63  ;;  %v4001_v63 = vld [vmem:[#allocation2 + $0x2d1] sm:$0xff]  ;;  %v3616_v33 = vpack.c.bf16 %v3552_v14, %v3552_v14 }
 0x495   :  { %3792 = vrot.lane.b32.xlu0 %v3614_v0, %s6801_s27 }
 0x496   :  { %v5548_v6 = vadd.f32 %v9122_v9, %v5480_v60 }
 0x497   :  { %v3327_v32 = vpop.permute.xlu0 %3326 }
 0x498   :  { %v2882_v53 = vpop.permute.xlu2 %2881  ;;  %v5612_v23 = vmax.f32 %v5548_v6, 0.0 }
 0x499   :  { %v2878_v17 = vpop.permute.xlu1 %2877  ;;  %v5191_v10 = vpop.f32.mrf.mxu1  ;;  %v6693_v49 = vld [vmem:[#allocation3 + $0x144] sm:$0xf0] }
 0x49a   :  { %3028 = vst.msk [vmem:[#allocation3 + $0x150] sm:$0xf] %vm2985_vm9, %v2878_v17  ;;  %v5361_v56 = vadd.f32 %v8631_v58, %v5191_v10  ;;  %v6455_v30 = vor.u32 %v6693_v49, %v6454_v3  ;;  %4241 = vrot.lane.b32.xlu2 %v4063_v47, %s6800_s26  ;;  %v4064_v58 = vpack.c.bf16 %v4000_v48, %v4000_v48  ;;  %v4002_v3 = vld [vmem:[#allocation2 + $0x2d9] sm:$0xff] }
 0x49b   :  { %3477 = vst.msk [vmem:[#allocation3 + $0x150] sm:$0xf] %vm3434_vm10, %v3327_v32 }
 0x49c   :  { %v5481_v35 = vmul.f32 %v9112_v43, %v5361_v56  ;;  %3927 = vst.msk [vmem:[#allocation3 + $0x150] sm:$0xf] %vm3884_vm11, %v3777_v57  ;;  %5218 = vmatmul.bf16.gmra.mxu1 %v6455_v30  ;;  %3794 = vrot.lane.b32.xlu1 %v3615_v44, %s6801_s27  ;;  %v4066_v56 = vpack.c.bf16 %v4002_v3, %v4002_v3 }
 0x49d   :  { %4243 = vrot.lane.b32.xlu0 %v4064_v58, %s6800_s26 }
 0x49e   :  { %v5549_v12 = vadd.f32 %v9122_v9, %v5481_v35  ;;  %v5833_v13 = vpop.f32.mrf.mxu3  ;;  %v3104_v35 = vld [vmem:[#allocation2 + $0x2d2] sm:$0xff] }
 0x49f   :  { %5970 = vst.msk [vmem:[#allocation4 + $0x80] sm:$0xff] %vm5953_vm13, %v5833_v13  ;;  %v3779_v54 = vpop.permute.xlu0 %3778 }
 0x4a0   :  { %v3333_v5 = vpop.permute.xlu2 %3332  ;;  %v5613_v59 = vmax.f32 %v5549_v12, 0.0 }
 0x4a1   :  { %v3329_v2 = vpop.permute.xlu1 %3328 }
 0x4a2   :  { %3478 = vst.msk [vmem:[#allocation3 + $0x158] sm:$0xf] %vm3434_vm10, %v3329_v2  ;;  %v5194_v24 = vpop.f32.mrf.mxu1  ;;  %v5662_v40 = vpack.c.bf16 %v5613_v59, %v5612_v23  ;;  %2450 = vrot.lane.b32.xlu2 %v3615_v44, %s6797_s14  ;;  %v3168_v23 = vpack.c.bf16 %v3104_v35, %v3104_v35  ;;  %v3554_v2 = vld [vmem:[#allocation2 + $0x2e8] sm:$0xff] }
 0x4a3   :  { %3928 = vst.msk [vmem:[#allocation3 + $0x158] sm:$0xf] %vm3884_vm11, %v3779_v54  ;;  %v5364_v21 = vadd.f32 %v8648_v11, %v5194_v24  ;;  %v3618_v42 = vpack.c.bf16 %v3554_v2, %v3554_v2 }
 0x4a4   :  { %4377 = vst.msk [vmem:[#allocation3 + $0x158] sm:$0xf] %vm4333_vm12, %v4228_v4  ;;  %6634 = vmatmul.msk.bf16.gmra.mxu3 %vm908_vm2, %v5662_v40  ;;  %2448 = vrot.lane.b32.xlu1 %v3614_v0, %s6797_s14  ;;  %v4065_v0 = vpack.c.bf16 %v4001_v63, %v4001_v63 }
 0x4a5   :  { %2897 = vrot.lane.b32.xlu0 %v4063_v47, %s6798_s17  ;;  %v5482_v52 = vmul.f32 %v9112_v43, %v5364_v21 }
 0x4a6   :  { %v5835_v36 = vpop.f32.mrf.mxu3 }
 0x4a7   :  { %5971 = vst.msk [vmem:[#allocation4 + $0x88] sm:$0xff] %vm5953_vm13, %v5835_v36  ;;  %v2433_v20 = vpop.permute.xlu0 %2432  ;;  %v5550_v29 = vadd.f32 %v9122_v9, %v5482_v52 }
 0x4a8   :  { %v4230_v41 = vpop.permute.xlu2 %4229  ;;  %2581 = vst.msk [vmem:[#allocation3 + $0x160] sm:$0xf] %vm2536_vm8, %v2433_v20 }
 0x4a9   :  { %v4226_v37 = vpop.permute.xlu1 %4225  ;;  %3030 = vst.msk [vmem:[#allocation3 + $0x160] sm:$0xf] %vm2985_vm9, %v2882_v53  ;;  %v5614_v61 = vmax.f32 %v5550_v29, 0.0  ;;  %v3555_v29 = vld [vmem:[#allocation2 + $0x2f0] sm:$0xff] }
 0x4aa   :  { %4376 = vst.msk [vmem:[#allocation3 + $0x150] sm:$0xf] %vm4333_vm12, %v4226_v37  ;;  %v5196_v7 = vpop.f32.mrf.mxu1  ;;  %3346 = vrot.lane.b32.xlu2 %v3166_v38, %s6799_s20 }
 0x4ab   :  { %v5366_v11 = vadd.f32 %v8665_v8, %v5196_v7  ;;  %v3553_v8 = vld [vmem:[#allocation2 + $0x2d8] sm:$0xff] }
 0x4ac   :  { %2899 = vrot.lane.b32.xlu1 %v4064_v58, %s6798_s17  ;;  %v6695_v51 = vld [vmem:[#allocation3 + $0x154] sm:$0xf0]  ;;  %v3617_v18 = vpack.c.bf16 %v3553_v8, %v3553_v8 }
 0x4ad   :  { %v5483_v57 = vmul.f32 %v9112_v43, %v5366_v11  ;;  %3348 = vrot.lane.b32.xlu0 %v3167_v50, %s6799_s20  ;;  %v3619_v50 = vpack.c.bf16 %v3555_v29, %v3555_v29  ;;  %v4004_v8 = vld [vmem:[#allocation2 + $0x2f1] sm:$0xff] }
 0x4ae   :  { %v6034_v58 = vld [vmem:[#allocation4 + $0x80] ss:$2 sm:$0xff]  ;;  %v6098_v13 = vld [vmem:[#allocation4 + $0x81] ss:$2 sm:$0xff] }
 0x4af   :  { %v5551_v22 = vadd.f32 %v9122_v9, %v5483_v57  ;;  %v2884_v28 = vpop.permute.xlu0 %2883  ;;  %v6153_v21 = vmax.f32 %v6034_v58, %v6098_v13  ;;  %v3169_v57 = vpack.c.bf16 %v3105_v16, %v3105_v16  ;;  %v4005_v58 = vld [vmem:[#allocation2 + $0x301] sm:$0xff] }
 0x4b0   :  { %v2439_v34 = vpop.permute.xlu2 %2438 }
 0x4b1   :  { %2584 = vst.msk [vmem:[#allocation3 + $0x178] sm:$0xf] %vm2536_vm8, %v2439_v34  ;;  %v5615_v31 = vmax.f32 %v5551_v22, 0.0  ;;  %v2435_v4 = vpop.permute.xlu1 %2434  ;;  %v6462_v55 = vld [vmem:[#allocation3 + $0x150] sm:$0xf] }
 0x4b2   :  { %2582 = vst.msk [vmem:[#allocation3 + $0x168] sm:$0xf] %vm2536_vm8, %v2435_v4  ;;  %v6463_v19 = vor.u32 %v6695_v51, %v6462_v55  ;;  %3798 = vrot.lane.b32.xlu2 %v3617_v18, %s6801_s27  ;;  %v4003_v55 = vld [vmem:[#allocation2 + $0x2e9] sm:$0xff]  ;;  %v4068_v51 = vpack.c.bf16 %v4004_v8, %v4004_v8 }
 0x4b3   :  { %3031 = vst.msk [vmem:[#allocation3 + $0x168] sm:$0xf] %vm2985_vm9, %v2884_v28  ;;  %v5663_v27 = vpack.c.bf16 %v5615_v31, %v5614_v61 }
 0x4b4   :  { %3480 = vst.msk [vmem:[#allocation3 + $0x168] sm:$0xf] %vm3434_vm10, %v3333_v5  ;;  %5223 = vmatmul.bf16.gmra.mxu1 %v6463_v19  ;;  %3796 = vrot.lane.b32.xlu1 %v3616_v33, %s6801_s27  ;;  %v4067_v19 = vpack.c.bf16 %v4003_v55, %v4003_v55 }
 0x4b5   :  { %6635 = vmatmul.msk.bf16.gmra.mxu3 %vm908_vm2, %v5663_v27  ;;  %4245 = vrot.lane.b32.xlu0 %v4065_v0, %s6800_s26 }
 0x4b7   :  { %v5838_v60 = vpop.f32.mrf.mxu3  ;;  %v3781_v10 = vpop.permute.xlu0 %3780 }
 0x4b8   :  { %v3335_v53 = vpop.permute.xlu2 %3334  ;;  %5972 = vst.msk [vmem:[#allocation4 + $0x90] sm:$0xff] %vm5953_vm13, %v5838_v60 }
 0x4b9   :  { %v3331_v62 = vpop.permute.xlu1 %3330  ;;  %v5199_v17 = vpop.f32.mrf.mxu1 }
 0x4ba   :  { %3479 = vst.msk [vmem:[#allocation3 + $0x160] sm:$0xf] %vm3434_vm10, %v3331_v62  ;;  %v5369_v49 = vadd.f32 %v8684_v15, %v5199_v17  ;;  %2452 = vrot.lane.b32.xlu2 %v3616_v33, %s6797_s14 }
 0x4bb   :  { %3929 = vst.msk [vmem:[#allocation3 + $0x160] sm:$0xf] %vm3884_vm11, %v3781_v10 }
 0x4bc   :  { %4378 = vst.msk [vmem:[#allocation3 + $0x160] sm:$0xf] %vm4333_vm12, %v4230_v41  ;;  %4247 = vrot.lane.b32.xlu1 %v4066_v56, %s6800_s26  ;;  %v5484_v30 = vmul.f32 %v9112_v43, %v5369_v49  ;;  %v3107_v49 = vld [vmem:[#allocation2 + $0x2f2] sm:$0xff] }
 0x4bd   :  { %2454 = vrot.lane.b32.xlu0 %v3617_v18, %s6797_s14 }
 0x4be   :  { %v5552_v44 = vadd.f32 %v9122_v9, %v5484_v30 }
 0x4bf   :  { %v5840_v39 = vpop.f32.mrf.mxu3  ;;  %v4232_v6 = vpop.permute.xlu0 %4231 }
 0x4c0   :  { %v9217_v32 = vpop.permute.xlu2 %3786  ;;  %5973 = vst.msk [vmem:[#allocation4 + $0x98] sm:$0xff] %vm5953_vm13, %v5840_v39  ;;  %v3106_v39 = vld [vmem:[#allocation2 + $0x2ea] sm:$0xff] }
 0x4c1   :  { %v3783_v47 = vpop.permute.xlu1 %3782  ;;  %v5201_v48 = vpop.f32.mrf.mxu1 }
 0x4c2   :  { %3930 = vst.msk [vmem:[#allocation3 + $0x168] sm:$0xf] %vm3884_vm11, %v3783_v47  ;;  %v5371_v15 = vadd.f32 %v8695_v46, %v5201_v48  ;;  %2903 = vrot.lane.b32.xlu2 %v4066_v56, %s6798_s17  ;;  %v5616_v46 = vmax.f32 %v5552_v44, 0.0  ;;  %v3171_v47 = vpack.c.bf16 %v3107_v49, %v3107_v49  ;;  %v3556_v48 = vld [vmem:[#allocation2 + $0x300] sm:$0xff] }
 0x4c3   :  { %4379 = vst.msk [vmem:[#allocation3 + $0x168] sm:$0xf] %vm4333_vm12, %v4232_v6  ;;  %v6470_v20 = vld [vmem:[#allocation3 + $0x160] sm:$0xf]  ;;  %v3170_v6 = vpack.c.bf16 %v3106_v39, %v3106_v39  ;;  %v3620_v35 = vpack.c.bf16 %v3556_v48, %v3556_v48 }
 0x4c4   :  { %v5485_v12 = vmul.f32 %v9112_v43, %v5371_v15  ;;  %2901 = vrot.lane.b32.xlu1 %v4065_v0, %s6798_s17  ;;  %v4007_v48 = vld [vmem:[#allocation2 + $0x319] sm:$0xff] }
 0x4c5   :  { %3350 = vrot.lane.b32.xlu0 %v3168_v23, %s6799_s20 }
 0x4c6   :  { %v5553_v5 = vadd.f32 %v9122_v9, %v5485_v12 }
 0x4c7   :  { %v6036_v54 = vld [vmem:[#allocation4 + $0x90] ss:$2 sm:$0xff]  ;;  %v6100_v24 = vld [vmem:[#allocation4 + $0x91] ss:$2 sm:$0xff]  ;;  %v2886_v52 = vpop.permute.xlu0 %2885 }
 0x4c8   :  { %v2441_v59 = vpop.permute.xlu2 %2440  ;;  %v5617_v40 = vmax.f32 %v5553_v5, 0.0  ;;  %v6154_v36 = vmax.f32 %v6036_v54, %v6100_v24  ;;  %v3557_v54 = vld [vmem:[#allocation2 + $0x308] sm:$0xff] }
 0x4c9   :  { %2585 = vst.msk [vmem:[#allocation3 + $0x180] sm:$0xf] %vm2536_vm8, %v2441_v59  ;;  %v2437_v41 = vpop.permute.xlu1 %2436  ;;  %v3621_v16 = vpack.c.bf16 %v3557_v54, %v3557_v54 }
 0x4ca   :  { %2583 = vst.msk [vmem:[#allocation3 + $0x170] sm:$0xf] %vm2536_vm8, %v2437_v41  ;;  %v5664_v37 = vpack.c.bf16 %v5617_v40, %v5616_v46  ;;  %v6697_v7 = vld [vmem:[#allocation3 + $0x164] sm:$0xf0]  ;;  %v6181_v11 = vmax.f32 %v6153_v21, %v6154_v36  ;;  %3800 = vrot.lane.b32.xlu2 %v3618_v42, %s6801_s27  ;;  %v4069_v40 = vpack.c.bf16 %v4005_v58, %v4005_v58 }
 0x4cb   :  { %3032 = vst.msk [vmem:[#allocation3 + $0x170] sm:$0xf] %vm2985_vm9, %v2886_v52  ;;  %v6471_v38 = vor.u32 %v6697_v7, %v6470_v20  ;;  %v4006_v21 = vld [vmem:[#allocation2 + $0x309] sm:$0xff] }
 0x4cc   :  { %3481 = vst.msk [vmem:[#allocation3 + $0x170] sm:$0xf] %vm3434_vm10, %v3335_v53  ;;  %6636 = vmatmul.msk.bf16.gmra.mxu3 %vm908_vm2, %v5664_v37  ;;  %3352 = vrot.lane.b32.xlu1 %v3169_v57, %s6799_s20  ;;  %v4070_v52 = vpack.c.bf16 %v4006_v21, %v4006_v21 }
 0x4cd   :  { %6197 = vst.msk [vmem:[#allocation5 + $0x20] sm:$0xff] %vm5953_vm13, %v6181_v11  ;;  %5228 = vmatmul.bf16.gmra.mxu1 %v6471_v38  ;;  %3802 = vrot.lane.b32.xlu0 %v3619_v50, %s6801_s27 }
 0x4cf   :  { %v5843_v22 = vpop.f32.mrf.mxu3  ;;  %v3337_v4 = vpop.permute.xlu0 %3336 }
 0x4d0   :  { %v2892_v34 = vpop.permute.xlu2 %2891  ;;  %5974 = vst.msk [vmem:[#allocation4 + $0xa0] sm:$0xff] %vm5953_vm13, %v5843_v22  ;;  %v5383_v22 = vpop.f32.mrf.mxu2 }
 0x4d1   :  { %v2888_v61 = vpop.permute.xlu1 %2887  ;;  %v5204_v31 = vpop.f32.mrf.mxu1 }
 0x4d2   :  { %3033 = vst.msk [vmem:[#allocation3 + $0x178] sm:$0xf] %vm2985_vm9, %v2888_v61  ;;  %v5374_v28 = vadd.f32 %v8709_v26, %v5204_v31  ;;  %4251 = vrot.lane.b32.xlu2 %v4068_v51, %s6800_s26 }
 0x4d3   :  { %3482 = vst.msk [vmem:[#allocation3 + $0x178] sm:$0xf] %vm3434_vm10, %v3337_v4 }
 0x4d4   :  { %3932 = vst.msk [vmem:[#allocation3 + $0x178] sm:$0xf] %vm3884_vm11, %v9217_v32  ;;  %4249 = vrot.lane.b32.xlu1 %v4067_v19, %s6800_s26  ;;  %v5486_v18 = vmul.f32 %v9112_v43, %v5374_v28 }
 0x4d5   :  { %2456 = vrot.lane.b32.xlu0 %v3618_v42, %s6797_s14 }
 0x4d6   :  { %v5554_v53 = vadd.f32 %v9122_v9, %v5486_v18 }
 0x4d7   :  { %v5845_v14 = vpop.f32.mrf.mxu3  ;;  %v4234_v0 = vpop.permute.xlu0 %4233 }
 0x4d8   :  { %v3789_v27 = vpop.permute.xlu2 %3788  ;;  %5975 = vst.msk [vmem:[#allocation4 + $0xa8] sm:$0xff] %vm5953_vm13, %v5845_v14  ;;  %v5618_v10 = vmax.f32 %v5554_v53, 0.0 }
 0x4d9   :  { %v3785_v63 = vpop.permute.xlu1 %3784  ;;  %v5206_v33 = vpop.f32.mrf.mxu1 }
 0x4da   :  { %3931 = vst.msk [vmem:[#allocation3 + $0x170] sm:$0xf] %vm3884_vm11, %v3785_v63  ;;  %v5376_v26 = vadd.f32 %v8719_v45, %v5206_v33  ;;  %2905 = vrot.lane.b32.xlu2 %v4067_v19, %s6798_s17  ;;  %v3109_v63 = vld [vmem:[#allocation2 + $0x30a] sm:$0xff] }
 0x4db   :  { %4380 = vst.msk [vmem:[#allocation3 + $0x170] sm:$0xf] %vm4333_vm12, %v4234_v0 }
 0x4dc   :  { %v5487_v60 = vmul.f32 %v9112_v43, %v5376_v26  ;;  %2458 = vrot.lane.b32.xlu1 %v3619_v50, %s6797_s14  ;;  %v3173_v26 = vpack.c.bf16 %v3109_v63, %v3109_v63  ;;  %v4010_v63 = vld [vmem:[#allocation2 + $0x339] sm:$0xff] }
 0x4dd   :  { %2907 = vrot.lane.b32.xlu0 %v4068_v51, %s6798_s17  ;;  %v3108_v51 = vld [vmem:[#allocation2 + $0x302] sm:$0xff] }
 0x4de   :  { %v5555_v62 = vadd.f32 %v9122_v9, %v5487_v60  ;;  %v3172_v18 = vpack.c.bf16 %v3108_v51, %v3108_v51  ;;  %v3559_v60 = vld [vmem:[#allocation2 + $0x320] sm:$0xff] }
 0x4df   :  { %v2443_v56 = vpop.permute.xlu0 %2442  ;;  %v6038_v57 = vld [vmem:[#allocation4 + $0xa0] ss:$2 sm:$0xff]  ;;  %v6102_v50 = vld [vmem:[#allocation4 + $0xa1] ss:$2 sm:$0xff] }
 0x4e0   :  { %v4240_v17 = vpop.permute.xlu2 %4239  ;;  %v5619_v3 = vmax.f32 %v5555_v62, 0.0  ;;  %2586 = vst.msk [vmem:[#allocation3 + $0x188] sm:$0xf] %vm2536_vm8, %v2443_v56  ;;  %v6155_v31 = vmax.f32 %v6038_v57, %v6102_v50  ;;  %v5385_v62 = vpop.f32.mrf.mxu2  ;;  %v3561_v50 = vld [vmem:[#allocation2 + $0x338] sm:$0xff] }
 0x4e1   :  { %v4236_v45 = vpop.permute.xlu1 %4235  ;;  %3035 = vst.msk [vmem:[#allocation3 + $0x188] sm:$0xf] %vm2985_vm9, %v2892_v34 }
 0x4e2   :  { %4381 = vst.msk [vmem:[#allocation3 + $0x178] sm:$0xf] %vm4333_vm12, %v4236_v45  ;;  %v5209_v32 = vpop.f32.mrf.mxu1  ;;  %v5665_v30 = vpack.c.bf16 %v5619_v3, %v5618_v10  ;;  %3356 = vrot.lane.b32.xlu2 %v3171_v47, %s6799_s20  ;;  %v6478_v23 = vld [vmem:[#allocation3 + $0x170] sm:$0xf]  ;;  %v3623_v47 = vpack.c.bf16 %v3559_v60, %v3559_v60 }
 0x4e3   :  { %v5379_v15 = vadd.f32 %v9035_v1, %v5209_v32 }
 0x4e4   :  { %6637 = vmatmul.msk.bf16.gmra.mxu3 %vm908_vm2, %v5665_v30  ;;  %3354 = vrot.lane.b32.xlu1 %v3170_v6, %s6799_s20  ;;  %v3558_v30 = vld [vmem:[#allocation2 + $0x318] sm:$0xff] }
 0x4e5   :  { %3804 = vrot.lane.b32.xlu0 %v3620_v35, %s6801_s27  ;;  %v5488_v13 = vmul.f32 %v9112_v43, %v5379_v15 }
 0x4e7   :  { %v5848_v44 = vpop.f32.mrf.mxu3  ;;  %v3339_v1 = vpop.permute.xlu0 %3338  ;;  %v5556_v36 = vadd.f32 %v9122_v9, %v5488_v13 }
 0x4e8   :  { %v2894_v12 = vpop.permute.xlu2 %2893  ;;  %5976 = vst.msk [vmem:[#allocation4 + $0xb0] sm:$0xff] %vm5953_vm13, %v5848_v44  ;;  %v4071_v44 = vpack.c.bf16 %v4007_v48, %v4007_v48 }
 0x4e9   :  { %v2890_v5 = vpop.permute.xlu1 %2889  ;;  %v6699_v59 = vld [vmem:[#allocation3 + $0x174] sm:$0xf0] }
 0x4ea   :  { %3034 = vst.msk [vmem:[#allocation3 + $0x180] sm:$0xf] %vm2985_vm9, %v2890_v5  ;;  %v5211_v2 = vpop.f32.mrf.mxu1  ;;  %v6479_v46 = vor.u32 %v6699_v59, %v6478_v23  ;;  %4253 = vrot.lane.b32.xlu2 %v4069_v40, %s6800_s26 }
 0x4eb   :  { %3483 = vst.msk [vmem:[#allocation3 + $0x180] sm:$0xf] %vm3434_vm10, %v3339_v1  ;;  %v5381_v24 = vadd.f32 %v9049_v25, %v5211_v2  ;;  %v5620_v25 = vmax.f32 %v5556_v36, 0.0  ;;  %v4008_v1 = vld [vmem:[#allocation2 + $0x321] sm:$0xff] }
 0x4ec   :  { %3933 = vst.msk [vmem:[#allocation3 + $0x180] sm:$0xf] %vm3884_vm11, %v3789_v27  ;;  %5233 = vmatmul.bf16.gmra.mxu1 %v6479_v46  ;;  %3806 = vrot.lane.b32.xlu1 %v3621_v16, %s6801_s27  ;;  %v4072_v46 = vpack.c.bf16 %v4008_v1, %v4008_v1  ;;  %v3110_v36 = vld [vmem:[#allocation2 + $0x31a] sm:$0xff] }
 0x4ed   :  { %v5489_v41 = vmul.f32 %v9112_v43, %v5381_v24  ;;  %4255 = vrot.lane.b32.xlu0 %v4070_v52, %s6800_s26 }
 0x4ef   :  { %v5557_v37 = vadd.f32 %v9122_v9, %v5489_v41  ;;  %v5850_v20 = vpop.f32.mrf.mxu3  ;;  %v3791_v42 = vpop.permute.xlu0 %3790 }
 0x4f0   :  { %v3345_v7 = vpop.permute.xlu2 %3344  ;;  %5977 = vst.msk [vmem:[#allocation4 + $0xb8] sm:$0xff] %vm5953_vm13, %v5850_v20  ;;  %v5388_v41 = vpop.f32.mrf.mxu2  ;;  %v3560_v20 = vld [vmem:[#allocation2 + $0x330] sm:$0xff] }
 0x4f1   :  { %v5621_v11 = vmax.f32 %v5557_v37, 0.0  ;;  %v3341_v38 = vpop.permute.xlu1 %3340 }
 0x4f2   :  { %3484 = vst.msk [vmem:[#allocation3 + $0x188] sm:$0xf] %vm3434_vm10, %v3341_v38  ;;  %2462 = vrot.lane.b32.xlu2 %v3621_v16, %s6797_s14  ;;  %v3174_v16 = vpack.c.bf16 %v3110_v36, %v3110_v36 }
 0x4f3   :  { %3934 = vst.msk [vmem:[#allocation3 + $0x188] sm:$0xf] %vm3884_vm11, %v3791_v42  ;;  %v5666_v29 = vpack.c.bf16 %v5621_v11, %v5620_v25  ;;  %v3111_v11 = vld [vmem:[#allocation2 + $0x322] sm:$0xff] }
 0x4f4   :  { %4383 = vst.msk [vmem:[#allocation3 + $0x188] sm:$0xf] %vm4333_vm12, %v4240_v17  ;;  %2460 = vrot.lane.b32.xlu1 %v3620_v35, %s6797_s14  ;;  %v3622_v35 = vpack.c.bf16 %v3558_v30, %v3558_v30 }
 0x4f5   :  { %6638 = vmatmul.msk.bf16.gmra.mxu3 %vm908_vm2, %v5666_v29  ;;  %2909 = vrot.lane.b32.xlu0 %v4069_v40, %s6798_s17 }
 0x4f7   :  { %v6040_v34 = vld [vmem:[#allocation4 + $0xb0] ss:$2 sm:$0xff]  ;;  %v6104_v8 = vld [vmem:[#allocation4 + $0xb1] ss:$2 sm:$0xff]  ;;  %v5853_v55 = vpop.f32.mrf.mxu3  ;;  %v2445_v14 = vpop.permute.xlu0 %2444 }
 0x4f8   :  { %v4242_v61 = vpop.permute.xlu2 %4241  ;;  %v6156_v4 = vmax.f32 %v6040_v34, %v6104_v8  ;;  %5978 = vst.msk [vmem:[#allocation4 + $0xc0] sm:$0xff] %vm5953_vm13, %v5853_v55 }
 0x4f9   :  { %v4238_v28 = vpop.permute.xlu1 %4237  ;;  %2587 = vst.msk [vmem:[#allocation3 + $0x190] sm:$0xf] %vm2536_vm8, %v2445_v14 }
 0x4fa   :  { %v6182_v19 = vmax.f32 %v6155_v31, %v6156_v4  ;;  %4382 = vst.msk [vmem:[#allocation3 + $0x180] sm:$0xf] %vm4333_vm12, %v4238_v28  ;;  %v5214_v27 = vpop.f32.mrf.mxu1  ;;  %3358 = vrot.lane.b32.xlu2 %v3172_v18, %s6799_s20  ;;  %v3175_v31 = vpack.c.bf16 %v3111_v11, %v3111_v11  ;;  %v3625_v4 = vpack.c.bf16 %v3561_v50, %v3561_v50 }
 0x4fb   :  { %3036 = vst.msk [vmem:[#allocation3 + $0x190] sm:$0xf] %vm2985_vm9, %v2894_v12  ;;  %v5384_v33 = vadd.f32 %v5383_v22, %v5214_v27  ;;  %v6701_v49 = vld [vmem:[#allocation3 + $0x184] sm:$0xf0]  ;;  %v3624_v22 = vpack.c.bf16 %v3560_v20, %v3560_v20 }
 0x4fc   :  { %6198 = vst.msk [vmem:[#allocation5 + $0x28] sm:$0xff] %vm5953_vm13, %v6182_v19  ;;  %2911 = vrot.lane.b32.xlu1 %v4070_v52, %s6798_s17  ;;  %v5390_v19 = vpop.f32.mrf.mxu2 }
 0x4fd   :  { %3360 = vrot.lane.b32.xlu0 %v3173_v26, %s6799_s20  ;;  %v5490_v17 = vmul.f32 %v9112_v43, %v5384_v33 }
 0x4ff   :  { %v5855_v53 = vpop.f32.mrf.mxu3  ;;  %v2896_v45 = vpop.permute.xlu0 %2895  ;;  %v5558_v15 = vadd.f32 %v9122_v9, %v5490_v17  ;;  %v4074_v17 = vpack.c.bf16 %v4010_v63, %v4010_v63 }
 0x500   :  { %v2451_v0 = vpop.permute.xlu2 %2450  ;;  %5979 = vst.msk [vmem:[#allocation4 + $0xc8] sm:$0xff] %vm5953_vm13, %v5855_v53 }
 0x501   :  { %2590 = vst.msk [vmem:[#allocation3 + $0x1a8] sm:$0xf] %vm2536_vm8, %v2451_v0  ;;  %v2447_v10 = vpop.permute.xlu1 %2446  ;;  %v6486_v3 = vld [vmem:[#allocation3 + $0x180] sm:$0xf]  ;;  %v5622_v13 = vmax.f32 %v5558_v15, 0.0 }
 0x502   :  { %2588 = vst.msk [vmem:[#allocation3 + $0x198] sm:$0xf] %vm2536_vm8, %v2447_v10  ;;  %v5216_v56 = vpop.f32.mrf.mxu1  ;;  %v6487_v32 = vor.u32 %v6701_v49, %v6486_v3  ;;  %3810 = vrot.lane.b32.xlu2 %v3623_v47, %s6801_s27 }
 0x503   :  { %3037 = vst.msk [vmem:[#allocation3 + $0x198] sm:$0xf] %vm2985_vm9, %v2896_v45  ;;  %v5386_v39 = vadd.f32 %v5385_v62, %v5216_v56  ;;  %v4009_v62 = vld [vmem:[#allocation2 + $0x331] sm:$0xff] }
 0x504   :  { %3486 = vst.msk [vmem:[#allocation3 + $0x198] sm:$0xf] %vm3434_vm10, %v3345_v7  ;;  %5238 = vmatmul.bf16.gmra.mxu1 %v6487_v32  ;;  %3808 = vrot.lane.b32.xlu1 %v3622_v35, %s6801_s27  ;;  %v4073_v49 = vpack.c.bf16 %v4009_v62, %v4009_v62 }
 0x505   :  { %v5491_v6 = vmul.f32 %v9112_v43, %v5386_v39  ;;  %4257 = vrot.lane.b32.xlu0 %v4071_v44, %s6800_s26 }
 0x507   :  { %v5559_v12 = vadd.f32 %v9122_v9, %v5491_v6  ;;  %v3793_v59 = vpop.permute.xlu0 %3792  ;;  %v6042_v8 = vld [vmem:[#allocation4 + $0xc0] ss:$2 sm:$0xff] }
 0x508   :  { %v3347_v58 = vpop.permute.xlu2 %3346 }
 0x509   :  { %v5623_v5 = vmax.f32 %v5559_v12, 0.0  ;;  %v3343_v23 = vpop.permute.xlu1 %3342 }
 0x50a   :  { %3485 = vst.msk [vmem:[#allocation3 + $0x190] sm:$0xf] %vm3434_vm10, %v3343_v23  ;;  %2464 = vrot.lane.b32.xlu2 %v3622_v35, %s6797_s14  ;;  %v3113_v35 = vld [vmem:[#allocation2 + $0x33a] sm:$0xff] }
 0x50b   :  { %3935 = vst.msk [vmem:[#allocation3 + $0x190] sm:$0xf] %vm3884_vm11, %v3793_v59  ;;  %v5667_v2 = vpack.c.bf16 %v5623_v5, %v5622_v13  ;;  %v3112_v5 = vld [vmem:[#allocation2 + $0x332] sm:$0xff]  ;;  %v3177_v23 = vpack.c.bf16 %v3113_v35, %v3113_v35 }
 0x50c   :  { %4384 = vst.msk [vmem:[#allocation3 + $0x190] sm:$0xf] %vm4333_vm12, %v4242_v61  ;;  %4259 = vrot.lane.b32.xlu1 %v4072_v46, %s6800_s26  ;;  %v6106_v61 = vld [vmem:[#allocation4 + $0xc1] ss:$2 sm:$0xff] }
 0x50d   :  { %6639 = vmatmul.msk.bf16.gmra.mxu3 %vm908_vm2, %v5667_v2  ;;  %2466 = vrot.lane.b32.xlu0 %v3623_v47, %s6797_s14  ;;  %v6157_v14 = vmax.f32 %v6042_v8, %v6106_v61  ;;  %v3176_v2 = vpack.c.bf16 %v3112_v5, %v3112_v5 }
 0x50f   :  { %v5858_v54 = vpop.f32.mrf.mxu3  ;;  %v4244_v21 = vpop.permute.xlu0 %4243 }
 0x510   :  { %v3799_v24 = vpop.permute.xlu2 %3798  ;;  %5980 = vst.msk [vmem:[#allocation4 + $0xd0] sm:$0xff] %vm5953_vm13, %v5858_v54  ;;  %v4011_v54 = vld [vmem:[#allocation2 + $0x349] sm:$0xff] }
 0x511   :  { %v3795_v40 = vpop.permute.xlu1 %3794 }
 0x512   :  { %3936 = vst.msk [vmem:[#allocation3 + $0x198] sm:$0xf] %vm3884_vm11, %v3795_v40  ;;  %2915 = vrot.lane.b32.xlu2 %v4072_v46, %s6798_s17  ;;  %v9356_v40 = vld [vmem:[%s9525_s7] ss:$0 sm:$0xff] }
 0x513   :  { %4385 = vst.msk [vmem:[#allocation3 + $0x198] sm:$0xf] %vm4333_vm12, %v4244_v21  ;;  %v6494_v42 = vld [vmem:[#allocation3 + $0x190] sm:$0xf] }
 0x514   :  { %2913 = vrot.lane.b32.xlu1 %v4071_v44, %s6798_s17 }
 0x515   :  { %3362 = vrot.lane.b32.xlu0 %v3174_v16, %s6799_s20 }
 0x517   :  { %v5860_v52 = vpop.f32.mrf.mxu3  ;;  %v2898_v38 = vpop.permute.xlu0 %2897 }
 0x518   :  { %v2453_v37 = vpop.permute.xlu2 %2452  ;;  %5981 = vst.msk [vmem:[#allocation4 + $0xd8] sm:$0xff] %vm5953_vm13, %v5860_v52 }
 0x519   :  { %2591 = vst.msk [vmem:[#allocation3 + $0x1b0] sm:$0xf] %vm2536_vm8, %v2453_v37  ;;  %v2449_v7 = vpop.permute.xlu1 %2448  ;;  %v5219_v25 = vpop.f32.mrf.mxu1 }
 0x51a   :  { %2589 = vst.msk [vmem:[#allocation3 + $0x1a0] sm:$0xf] %vm2536_vm8, %v2449_v7  ;;  %v6703_v29 = vld [vmem:[#allocation3 + $0x194] sm:$0xf0]  ;;  %v5389_v34 = vadd.f32 %v5388_v41, %v5219_v25  ;;  %3812 = vrot.lane.b32.xlu2 %v3624_v22, %s6801_s27  ;;  %v3563_v41 = vld [vmem:[#allocation2 + $0x350] sm:$0xff]  ;;  %v4075_v25 = vpack.c.bf16 %v4011_v54, %v4011_v54 }
 0x51b   :  { %3038 = vst.msk [vmem:[#allocation3 + $0x1a0] sm:$0xf] %vm2985_vm9, %v2898_v38  ;;  %v6495_v57 = vor.u32 %v6703_v29, %v6494_v42  ;;  %v4012_v7 = vld [vmem:[#allocation2 + $0x351] sm:$0xff]  ;;  %v3627_v29 = vpack.c.bf16 %v3563_v41, %v3563_v41 }
 0x51c   :  { %3487 = vst.msk [vmem:[#allocation3 + $0x1a0] sm:$0xf] %vm3434_vm10, %v3347_v58  ;;  %3364 = vrot.lane.b32.xlu1 %v3175_v31, %s6799_s20  ;;  %v5492_v18 = vmul.f32 %v9112_v43, %v5389_v34  ;;  %v3562_v58 = vld [vmem:[#allocation2 + $0x348] sm:$0xff]  ;;  %v4076_v34 = vpack.c.bf16 %v4012_v7, %v4012_v7 }
 0x51d   :  { %5243 = vmatmul.bf16.gmra.mxu1 %v6495_v57  ;;  %3814 = vrot.lane.b32.xlu0 %v3625_v4, %s6801_s27  ;;  %v3626_v1 = vpack.c.bf16 %v3562_v58, %v3562_v58  ;;  %v9366_v57 = vld [vmem:[%s9526_s8] ss:$0 sm:$0xff]  ;;  %s6802_s8 = smov [#allocation5]  }
 0x51e   :  { %v5560_v10 = vadd.f32 %v9122_v9, %v5492_v18 }
 0x51f   :  { %v6044_v55 = vld [vmem:[#allocation4 + $0xd0] ss:$2 sm:$0xff]  ;;  %v6108_v51 = vld [vmem:[#allocation4 + $0xd1] ss:$2 sm:$0xff]  ;;  %v3349_v60 = vpop.permute.xlu0 %3348 }
 0x520   :  { %v2904_v28 = vpop.permute.xlu2 %2903  ;;  %v6158_v27 = vmax.f32 %v6044_v55, %v6108_v51  ;;  %v5624_v30 = vmax.f32 %v5560_v10, 0.0 }
 0x521   :  { %v2900_v33 = vpop.permute.xlu1 %2899  ;;  %v5221_v26 = vpop.f32.mrf.mxu1 }
 0x522   :  { %v6183_v0 = vmax.f32 %v6157_v14, %v6158_v27  ;;  %3039 = vst.msk [vmem:[#allocation3 + $0x1a8] sm:$0xf] %vm2985_vm9, %v2900_v33  ;;  %v5391_v53 = vadd.f32 %v5390_v19, %v5221_v26  ;;  %4263 = vrot.lane.b32.xlu2 %v4074_v17, %s6800_s26 }
 0x523   :  { %3488 = vst.msk [vmem:[#allocation3 + $0x1a8] sm:$0xf] %vm3434_vm10, %v3349_v60 }
 0x524   :  { %6199 = vst.msk [vmem:[#allocation5 + $0x30] sm:$0xff] %vm5953_vm13, %v6183_v0  ;;  %v5493_v3 = vmul.f32 %v9112_v43, %v5391_v53  ;;  %4261 = vrot.lane.b32.xlu1 %v4073_v49, %s6800_s26 }
 0x525   :  { %3938 = vst.msk [vmem:[#allocation3 + $0x1a8] sm:$0xf] %vm3884_vm11, %v3799_v24  ;;  %2468 = vrot.lane.b32.xlu0 %v3624_v22, %s6797_s14 }
 0x526   :  { %v5561_v45 = vadd.f32 %v9122_v9, %v5493_v3  ;;  %v5393_v9 = vpop.f32.mrf.mxu2 }
 0x527   :  { %v5863_v56 = vpop.f32.mrf.mxu3  ;;  %v4246_v43 = vpop.permute.xlu0 %4245 }
 0x528   :  { %v3801_v32 = vpop.permute.xlu2 %3800  ;;  %v5625_v39 = vmax.f32 %v5561_v45, 0.0  ;;  %5982 = vst.msk [vmem:[#allocation4 + $0xe0] sm:$0xff] %vm5953_vm13, %v5863_v56 }
 0x529   :  { %v3797_v47 = vpop.permute.xlu1 %3796 }
 0x52a   :  { %v5668_v48 = vpack.c.bf16 %v5625_v39, %v5624_v30  ;;  %3937 = vst.msk [vmem:[#allocation3 + $0x1a0] sm:$0xf] %vm3884_vm11, %v3797_v47  ;;  %2917 = vrot.lane.b32.xlu2 %v4073_v49, %s6798_s17 }
 0x52b   :  { %4386 = vst.msk [vmem:[#allocation3 + $0x1a0] sm:$0xf] %vm4333_vm12, %v4246_v43 }
 0x52c   :  { %6640 = vmatmul.msk.bf16.gmra.mxu3 %vm908_vm2, %v5668_v48  ;;  %2470 = vrot.lane.b32.xlu1 %v3625_v4, %s6797_s14 }
 0x52d   :  { %2919 = vrot.lane.b32.xlu0 %v4074_v17, %s6798_s17 }
 0x52e   :  { %v5395_v24 = vpop.f32.mrf.mxu2 }
 0x52f   :  { %v5865_v15 = vpop.f32.mrf.mxu3  ;;  %v2455_v13 = vpop.permute.xlu0 %2454 }
 0x530   :  { %v4252_v6 = vpop.permute.xlu2 %4251  ;;  %5983 = vst.msk [vmem:[#allocation4 + $0xe8] sm:$0xff] %vm5953_vm13, %v5865_v15 }
 0x531   :  { %v4248_v44 = vpop.permute.xlu1 %4247  ;;  %v5224_v12 = vpop.f32.mrf.mxu1  ;;  %2592 = vst.msk [vmem:[#allocation3 + $0x1b8] sm:$0xf] %vm2536_vm8, %v2455_v13 }
 0x532   :  { %4387 = vst.msk [vmem:[#allocation3 + $0x1a8] sm:$0xf] %vm4333_vm12, %v4248_v44  ;;  %v5394_v59 = vadd.f32 %v5393_v9, %v5224_v12  ;;  %3368 = vrot.lane.b32.xlu2 %v3177_v23, %s6799_s20  ;;  %v6502_v37 = vld [vmem:[#allocation3 + $0x1a0] sm:$0xf] }
 0x533   :  { %3041 = vst.msk [vmem:[#allocation3 + $0x1b8] sm:$0xf] %vm2985_vm9, %v2904_v28 }
 0x534   :  { %3366 = vrot.lane.b32.xlu1 %v3176_v2, %s6799_s20  ;;  %v5494_v21 = vmul.f32 %v9356_v40, %v5394_v59 }
 0x535   :  { %3816 = vrot.lane.b32.xlu0 %v3626_v1, %s6801_s27 }
 0x536   :  { %v5562_v50 = vadd.f32 %v9366_v57, %v5494_v21  ;;  %v5398_v18 = vpop.f32.mrf.mxu2 }
 0x537   :  { %v3351_v38 = vpop.permute.xlu0 %3350  ;;  %v6046_v14 = vld [vmem:[#allocation4 + $0xe0] ss:$2 sm:$0xff]  ;;  %v6110_v27 = vld [vmem:[#allocation4 + $0xe1] ss:$2 sm:$0xff] }
 0x538   :  { %v2906_v46 = vpop.permute.xlu2 %2905  ;;  %v5868_v36 = vpop.f32.mrf.mxu3  ;;  %v5626_v31 = vmax.f32 %v5562_v50, 0.0  ;;  %v6159_v0 = vmax.f32 %v6046_v14, %v6110_v27 }
 0x539   :  { %5984 = vst.msk [vmem:[#allocation4 + $0xf0] sm:$0xff] %vm5953_vm13, %v5868_v36  ;;  %v2902_v16 = vpop.permute.xlu1 %2901  ;;  %v5226_v52 = vpop.f32.mrf.mxu1  ;;  %v6705_v20 = vld [vmem:[#allocation3 + $0x1a4] sm:$0xf0] }
 0x53a   :  { %3040 = vst.msk [vmem:[#allocation3 + $0x1b0] sm:$0xf] %vm2985_vm9, %v2902_v16  ;;  %v5396_v11 = vadd.f32 %v5395_v24, %v5226_v52  ;;  %v6503_v42 = vor.u32 %v6705_v20, %v6502_v37  ;;  %4265 = vrot.lane.b32.xlu2 %v4075_v25, %s6800_s26 }
 0x53b   :  { %3489 = vst.msk [vmem:[#allocation3 + $0x1b0] sm:$0xf] %vm3434_vm10, %v3351_v38 }
 0x53c   :  { %v5495_v22 = vmul.f32 %v9356_v40, %v5396_v11  ;;  %3939 = vst.msk [vmem:[#allocation3 + $0x1b0] sm:$0xf] %vm3884_vm11, %v3801_v32  ;;  %5248 = vmatmul.bf16.gmra.mxu1 %v6503_v42  ;;  %3818 = vrot.lane.b32.xlu1 %v3627_v29, %s6801_s27 }
 0x53d   :  { %4267 = vrot.lane.b32.xlu0 %v4076_v34, %s6800_s26  ;;  %s6213_s26 = sshll.u32 %s6802_s8, 4  ;;  %s6214_s26 = int_to_ptr.vmem [resolvable:$true] %s6213_s26 }
 0x53e   :  { %v5563_v8 = vadd.f32 %v9366_v57, %v5495_v22  ;;  %v5400_v56 = vpop.f32.mrf.mxu2 }
 0x53f   :  { %v3803_v19 = vpop.permute.xlu0 %3802 }
 0x540   :  { %v3357_v61 = vpop.permute.xlu2 %3356  ;;  %v5627_v4 = vmax.f32 %v5563_v8, 0.0  ;;  %v5870_v55 = vpop.f32.mrf.mxu3 }
 0x541   :  { %5985 = vst.msk [vmem:[#allocation4 + $0xf8] sm:$0xff] %vm5953_vm13, %v5870_v55  ;;  %v3353_v51 = vpop.permute.xlu1 %3352 }
 0x542   :  { %v5669_v28 = vpack.c.bf16 %v5627_v4, %v5626_v31  ;;  %3490 = vst.msk [vmem:[#allocation3 + $0x1b8] sm:$0xf] %vm3434_vm10, %v3353_v51 }
 0x543   :  { %3940 = vst.msk [vmem:[#allocation3 + $0x1b8] sm:$0xf] %vm3884_vm11, %v3803_v19 }
 0x544   :  { %4389 = vst.msk [vmem:[#allocation3 + $0x1b8] sm:$0xf] %vm4333_vm12, %v4252_v6  ;;  %6641 = vmatmul.msk.bf16.gmra.mxu3 %vm908_vm2, %v5669_v28 }
 0x546   :  { %v5403_v24 = vpop.f32.mrf.mxu2 }
 0x547   :  { %v2457_v62 = vpop.permute.xlu0 %2456 }
 0x548   :  { %v4254_v63 = vpop.permute.xlu2 %4253  ;;  %v6048_v33 = vld [vmem:[#allocation4 + $0xf0] ss:$2 sm:$0xff]  ;;  %v6112_v26 = vld [vmem:[#allocation4 + $0xf1] ss:$2 sm:$0xff]  ;;  %2593 = vst.msk [vmem:[#allocation3 + $0x1c0] sm:$0xf] %vm2536_vm8, %v2457_v62 }
 0x549   :  { %v6160_v53 = vmax.f32 %v6048_v33, %v6112_v26  ;;  %v4250_v60 = vpop.permute.xlu1 %4249  ;;  %3042 = vst.msk [vmem:[#allocation3 + $0x1c0] sm:$0xf] %vm2985_vm9, %v2906_v46 }
 0x54a   :  { %4388 = vst.msk [vmem:[#allocation3 + $0x1b0] sm:$0xf] %vm4333_vm12, %v4250_v60  ;;  %v5229_v17 = vpop.f32.mrf.mxu1 }
 0x54b   :  { %v6184_v10 = vmax.f32 %v6159_v0, %v6160_v53  ;;  %v5399_v3 = vadd.f32 %v5398_v18, %v5229_v17  ;;  %v6707_v47 = vld [vmem:[#allocation3 + $0x1b4] sm:$0xf0] }
 0x54d   :  { %6200 = vst.msk [vmem:[#allocation5 + $0x38] sm:$0xff] %vm5953_vm13, %v6184_v10  ;;  %v5496_v32 = vmul.f32 %v9356_v40, %v5399_v3 }
 0x54e   :  { %v5405_v38 = vpop.f32.mrf.mxu2 }
 0x54f   :  { %v5873_v49 = vpop.f32.mrf.mxu3  ;;  %v2908_v48 = vpop.permute.xlu0 %2907  ;;  %v5564_v6 = vadd.f32 %v9366_v57, %v5496_v32  ;;  %v4460_v32 = vld [vmem:[#allocation2 + $0x34a] sm:$0xff] }
 0x550   :  { %v2463_v45 = vpop.permute.xlu2 %2462  ;;  %5986 = vst.msk [vmem:[#allocation4 + $0x100] sm:$0xff] %vm5953_vm13, %v5873_v49 }
 0x551   :  { %2596 = vst.msk [vmem:[#allocation3 + $0x1d8] sm:$0xf] %vm2536_vm8, %v2463_v45  ;;  %v2459_v30 = vpop.permute.xlu1 %2458  ;;  %v6510_v39 = vld [vmem:[#allocation3 + $0x1b0] sm:$0xf]  ;;  %v5628_v13 = vmax.f32 %v5564_v6, 0.0 }
 0x552   :  { %2594 = vst.msk [vmem:[#allocation3 + $0x1c8] sm:$0xf] %vm2536_vm8, %v2459_v30  ;;  %v5231_v43 = vpop.f32.mrf.mxu1  ;;  %v6511_v9 = vor.u32 %v6707_v47, %v6510_v39  ;;  %v4461_v30 = vld [vmem:[#allocation2 + $0x352] sm:$0xff]  ;;  %v4524_v39 = vpack.c.bf16 %v4460_v32, %v4460_v32 }
 0x553   :  { %3043 = vst.msk [vmem:[#allocation3 + $0x1c8] sm:$0xf] %vm2985_vm9, %v2908_v48  ;;  %v5401_v15 = vadd.f32 %v5400_v56, %v5231_v43  ;;  %v4525_v47 = vpack.c.bf16 %v4461_v30, %v4461_v30 }
 0x554   :  { %3492 = vst.msk [vmem:[#allocation3 + $0x1c8] sm:$0xf] %vm3434_vm10, %v3357_v61  ;;  %5253 = vmatmul.bf16.gmra.mxu1 %v6511_v9 }
 0x555   :  { %v5497_v35 = vmul.f32 %v9356_v40, %v5401_v15  ;;  %4588 = vst.msk [vmem:[#allocation3 + $0x1f4] sm:$0xf] %vm1189_vm5, %v4524_v39 }
 0x556   :  { %v5408_v62 = vpop.f32.mrf.mxu2  ;;  %4589 = vst.msk [vmem:[#allocation3 + $0x1fc] sm:$0xf] %vm1189_vm5, %v4525_v47 }
 0x557   :  { %v5565_v44 = vadd.f32 %v9366_v57, %v5497_v35  ;;  %v5875_v12 = vpop.f32.mrf.mxu3  ;;  %v3805_v59 = vpop.permute.xlu0 %3804 }
 0x558   :  { %v3359_v58 = vpop.permute.xlu2 %3358  ;;  %5987 = vst.msk [vmem:[#allocation4 + $0x108] sm:$0xff] %vm5953_vm13, %v5875_v12 }
 0x559   :  { %v5629_v5 = vmax.f32 %v5565_v44, 0.0  ;;  %v3355_v23 = vpop.permute.xlu1 %3354 }
 0x55a   :  { %3491 = vst.msk [vmem:[#allocation3 + $0x1c0] sm:$0xf] %vm3434_vm10, %v3355_v23 }
 0x55b   :  { %v5670_v1 = vpack.c.bf16 %v5629_v5, %v5628_v13  ;;  %3941 = vst.msk [vmem:[#allocation3 + $0x1c0] sm:$0xf] %vm3884_vm11, %v3805_v59 }
 0x55c   :  { %4390 = vst.msk [vmem:[#allocation3 + $0x1c0] sm:$0xf] %vm4333_vm12, %v4254_v63 }
 0x55d   :  { %6642 = vmatmul.msk.bf16.gmra.mxu3 %vm908_vm2, %v5670_v1  ;;  %v6714_v1 = vld [vmem:[#allocation3 + $0x1f4] sm:$0xf] }
 0x55e   :  { %v5410_v48 = vpop.f32.mrf.mxu2 }
 0x55f   :  { %v4256_v54 = vpop.permute.xlu0 %4255  ;;  %v6050_v31 = vld [vmem:[#allocation4 + $0x100] ss:$2 sm:$0xff]  ;;  %v6114_v4 = vld [vmem:[#allocation4 + $0x101] ss:$2 sm:$0xff] }
 0x560   :  { %v3811_v2 = vpop.permute.xlu2 %3810  ;;  %v6161_v19 = vmax.f32 %v6050_v31, %v6114_v4 }
 0x561   :  { %v3807_v46 = vpop.permute.xlu1 %3806 }
 0x562   :  { %3942 = vst.msk [vmem:[#allocation3 + $0x1c8] sm:$0xf] %vm3884_vm11, %v3807_v46 }
 0x563   :  { %4391 = vst.msk [vmem:[#allocation3 + $0x1c8] sm:$0xf] %vm4333_vm12, %v4256_v54  ;;  %v6518_v37 = vld [vmem:[#allocation3 + $0x1c0] sm:$0xf] }
 0x567   :  { %v5878_v21 = vpop.f32.mrf.mxu3  ;;  %v2910_v52 = vpop.permute.xlu0 %2909 }
 0x568   :  { %v2465_v36 = vpop.permute.xlu2 %2464  ;;  %5988 = vst.msk [vmem:[#allocation4 + $0x110] sm:$0xff] %vm5953_vm13, %v5878_v21 }
 0x569   :  { %2597 = vst.msk [vmem:[#allocation3 + $0x1e0] sm:$0xf] %vm2536_vm8, %v2465_v36  ;;  %v2461_v41 = vpop.permute.xlu1 %2460  ;;  %v5234_v16 = vpop.f32.mrf.mxu1 }
 0x56a   :  { %2595 = vst.msk [vmem:[#allocation3 + $0x1d0] sm:$0xf] %vm2536_vm8, %v2461_v41  ;;  %v6709_v20 = vld [vmem:[#allocation3 + $0x1c4] sm:$0xf0]  ;;  %v5404_v25 = vadd.f32 %v5403_v24, %v5234_v16  ;;  %v6544_v24 = vld [vmem:[#allocation3 + $0x1f8] sm:$0xf0] }
 0x56b   :  { %3044 = vst.msk [vmem:[#allocation3 + $0x1d0] sm:$0xf] %vm2985_vm9, %v2910_v52  ;;  %v6519_v7 = vor.u32 %v6709_v20, %v6518_v37  ;;  %v6547_v36 = vor.u32 %v6714_v1, %v6544_v24  ;;  %v5413_v52 = vpop.f32.mrf.mxu2 }
 0x56c   :  { %3493 = vst.msk [vmem:[#allocation3 + $0x1d0] sm:$0xf] %vm3434_vm10, %v3359_v58  ;;  %v5498_v42 = vmul.f32 %v9356_v40, %v5404_v25 }
 0x56d   :  { %5258 = vmatmul.bf16.gmra.mxu1 %v6519_v7  ;;  %6615 = vmatmul.msk.bf16.gmra.mxu2 %vm908_vm2, %v6547_v36 }
 0x56e   :  { %v5566_v8 = vadd.f32 %v9366_v57, %v5498_v42 }
 0x56f   :  { %v5880_v11 = vpop.f32.mrf.mxu3  ;;  %v3361_v34 = vpop.permute.xlu0 %3360 }
 0x570   :  { %5989 = vst.msk [vmem:[#allocation4 + $0x118] sm:$0xff] %vm5953_vm13, %v5880_v11  ;;  %v5630_v14 = vmax.f32 %v5566_v8, 0.0  ;;  %v2916_v33 = vpop.permute.xlu2 %2915 }
 0x571   :  { %v2912_v29 = vpop.permute.xlu1 %2911  ;;  %v5236_v50 = vpop.f32.mrf.mxu1 }
 0x572   :  { %3045 = vst.msk [vmem:[#allocation3 + $0x1d8] sm:$0xf] %vm2985_vm9, %v2912_v29  ;;  %v5406_v22 = vadd.f32 %v5405_v38, %v5236_v50 }
 0x573   :  { %3494 = vst.msk [vmem:[#allocation3 + $0x1d8] sm:$0xf] %vm3434_vm10, %v3361_v34  ;;  %v5415_v50 = vpop.f32.mrf.mxu2 }
 0x574   :  { %v5499_v61 = vmul.f32 %v9356_v40, %v5406_v22  ;;  %3944 = vst.msk [vmem:[#allocation3 + $0x1d8] sm:$0xf] %vm3884_vm11, %v3811_v2 }
 0x576   :  { %v5567_v55 = vadd.f32 %v9366_v57, %v5499_v61 }
 0x577   :  { %v6052_v51 = vld [vmem:[#allocation4 + $0x110] ss:$2 sm:$0xff]  ;;  %v6116_v28 = vld [vmem:[#allocation4 + $0x111] ss:$2 sm:$0xff]  ;;  %v4258_v60 = vpop.permute.xlu0 %4257 }
 0x578   :  { %v6162_v27 = vmax.f32 %v6052_v51, %v6116_v28  ;;  %v5631_v18 = vmax.f32 %v5567_v55, 0.0  ;;  %v5883_v63 = vpop.f32.mrf.mxu3  ;;  %v3813_v45 = vpop.permute.xlu2 %3812 }
 0x579   :  { %5990 = vst.msk [vmem:[#allocation4 + $0x120] sm:$0xff] %vm5953_vm13, %v5883_v63  ;;  %v3809_v26 = vpop.permute.xlu1 %3808 }
 0x57a   :  { %v6185_v0 = vmax.f32 %v6161_v19, %v6162_v27  ;;  %v5671_v53 = vpack.c.bf16 %v5631_v18, %v5630_v14  ;;  %3943 = vst.msk [vmem:[#allocation3 + $0x1d0] sm:$0xf] %vm3884_vm11, %v3809_v26 }
 0x57b   :  { %4392 = vst.msk [vmem:[#allocation3 + $0x1d0] sm:$0xf] %vm4333_vm12, %v4258_v60  ;;  %v5418_v32 = vpop.f32.mrf.mxu2 }
 0x57c   :  { %6201 = vst.msk [vmem:[#allocation5 + $0x40] sm:$0xff] %vm5953_vm13, %v6185_v0  ;;  %6643 = vmatmul.msk.bf16.gmra.mxu3 %vm908_vm2, %v5671_v53 }
 0x57f   :  { %v2467_v49 = vpop.permute.xlu0 %2466 }
 0x580   :  { %v5885_v17 = vpop.f32.mrf.mxu3  ;;  %2598 = vst.msk [vmem:[#allocation3 + $0x1e8] sm:$0xf] %vm2536_vm8, %v2467_v49  ;;  %v4264_v23 = vpop.permute.xlu2 %4263 }
 0x581   :  { %5991 = vst.msk [vmem:[#allocation4 + $0x128] sm:$0xff] %vm5953_vm13, %v5885_v17  ;;  %v4260_v10 = vpop.permute.xlu1 %4259  ;;  %v5239_v3 = vpop.f32.mrf.mxu1 }
 0x582   :  { %4393 = vst.msk [vmem:[#allocation3 + $0x1d8] sm:$0xf] %vm4333_vm12, %v4260_v10  ;;  %v5409_v56 = vadd.f32 %v5408_v62, %v5239_v3  ;;  %v6526_v6 = vld [vmem:[#allocation3 + $0x1d0] sm:$0xf] }
 0x583   :  { %3047 = vst.msk [vmem:[#allocation3 + $0x1e8] sm:$0xf] %vm2985_vm9, %v2916_v33 }
 0x584   :  { %v5500_v43 = vmul.f32 %v9356_v40, %v5409_v56 }
 0x586   :  { %v5568_v13 = vadd.f32 %v9366_v57, %v5500_v43 }
 0x587   :  { %v3363_v12 = vpop.permute.xlu0 %3362 }
 0x588   :  { %v5632_v2 = vmax.f32 %v5568_v13, 0.0  ;;  %v2918_v37 = vpop.permute.xlu2 %2917  ;;  %v6054_v42 = vld [vmem:[#allocation4 + $0x120] ss:$2 sm:$0xff]  ;;  %v6118_v29 = vld [vmem:[#allocation4 + $0x121] ss:$2 sm:$0xff] }
 0x589   :  { %v2914_v9 = vpop.permute.xlu1 %2913  ;;  %v5241_v15 = vpop.f32.mrf.mxu1  ;;  %v6711_v35 = vld [vmem:[#allocation3 + $0x1d4] sm:$0xf0]  ;;  %v6163_v8 = vmax.f32 %v6054_v42, %v6118_v29 }
 0x58a   :  { %3046 = vst.msk [vmem:[#allocation3 + $0x1e0] sm:$0xf] %vm2985_vm9, %v2914_v9  ;;  %v5411_v44 = vadd.f32 %v5410_v48, %v5241_v15  ;;  %v6527_v58 = vor.u32 %v6711_v35, %v6526_v6  ;;  %v5420_v6 = vpop.f32.mrf.mxu2 }
 0x58b   :  { %3495 = vst.msk [vmem:[#allocation3 + $0x1e0] sm:$0xf] %vm3434_vm10, %v3363_v12 }
 0x58c   :  { %v5501_v5 = vmul.f32 %v9356_v40, %v5411_v44  ;;  %3945 = vst.msk [vmem:[#allocation3 + $0x1e0] sm:$0xf] %vm3884_vm11, %v3813_v45  ;;  %5263 = vmatmul.bf16.gmra.mxu1 %v6527_v58 }
 0x58e   :  { %v5569_v59 = vadd.f32 %v9366_v57, %v5501_v5 }
 0x58f   :  { %v3815_v16 = vpop.permute.xlu0 %3814 }
 0x590   :  { %v5633_v46 = vmax.f32 %v5569_v59, 0.0  ;;  %v5888_v54 = vpop.f32.mrf.mxu3  ;;  %v3369_v61 = vpop.permute.xlu2 %3368 }
 0x591   :  { %5992 = vst.msk [vmem:[#allocation4 + $0x130] sm:$0xff] %vm5953_vm13, %v5888_v54  ;;  %v3365_v21 = vpop.permute.xlu1 %3364 }
 0x592   :  { %v5672_v41 = vpack.c.bf16 %v5633_v46, %v5632_v2  ;;  %3496 = vst.msk [vmem:[#allocation3 + $0x1e8] sm:$0xf] %vm3434_vm10, %v3365_v21  ;;  %v5423_v2 = vpop.f32.mrf.mxu2 }
 0x593   :  { %3946 = vst.msk [vmem:[#allocation3 + $0x1e8] sm:$0xf] %vm3884_vm11, %v3815_v16 }
 0x594   :  { %4395 = vst.msk [vmem:[#allocation3 + $0x1e8] sm:$0xf] %vm4333_vm12, %v4264_v23  ;;  %6644 = vmatmul.msk.bf16.gmra.mxu3 %vm908_vm2, %v5672_v41 }
 0x597   :  { %v2469_v25 = vpop.permute.xlu0 %2468 }
 0x598   :  { %v5890_v20 = vpop.f32.mrf.mxu3  ;;  %2599 = vst.msk [vmem:[#allocation3 + $0x1f0] sm:$0xf] %vm2536_vm8, %v2469_v25  ;;  %v4266_v17 = vpop.permute.xlu2 %4265 }
 0x599   :  { %5993 = vst.msk [vmem:[#allocation4 + $0x138] sm:$0xff] %vm5953_vm13, %v5890_v20  ;;  %v4262_v7 = vpop.permute.xlu1 %4261 }
 0x59a   :  { %4394 = vst.msk [vmem:[#allocation3 + $0x1e0] sm:$0xf] %vm4333_vm12, %v4262_v7  ;;  %v5244_v11 = vpop.f32.mrf.mxu1  ;;  %v5425_v7 = vpop.f32.mrf.mxu2 }
 0x59b   :  { %3048 = vst.msk [vmem:[#allocation3 + $0x1f0] sm:$0xf] %vm2985_vm9, %v2918_v37  ;;  %v5414_v38 = vadd.f32 %v5413_v52, %v5244_v11  ;;  %v6713_v28 = vld [vmem:[#allocation3 + $0x1e4] sm:$0xf0] }
 0x59d   :  { %v5502_v4 = vmul.f32 %v9356_v40, %v5414_v38 }
 0x59f   :  { %v2920_v19 = vpop.permute.xlu0 %2919  ;;  %v5570_v33 = vadd.f32 %v9366_v57, %v5502_v4 }
 0x5a0   :  { %v6056_v22 = vld [vmem:[#allocation4 + $0x130] ss:$2 sm:$0xff]  ;;  %v6120_v34 = vld [vmem:[#allocation4 + $0x131] ss:$2 sm:$0xff] }
 0x5a1   :  { %v6164_v31 = vmax.f32 %v6056_v22, %v6120_v34  ;;  %v2471_v55 = vpop.permute.xlu1 %2470  ;;  %v6534_v51 = vld [vmem:[#allocation3 + $0x1e0] sm:$0xf]  ;;  %v5634_v53 = vmax.f32 %v5570_v33, 0.0 }
 0x5a2   :  { %2600 = vst.msk [vmem:[#allocation3 + $0x1f8] sm:$0xf] %vm2536_vm8, %v2471_v55  ;;  %v5246_v14 = vpop.f32.mrf.mxu1  ;;  %v6535_v27 = vor.u32 %v6713_v28, %v6534_v51 }
 0x5a3   :  { %v6186_v18 = vmax.f32 %v6163_v8, %v6164_v31  ;;  %3049 = vst.msk [vmem:[#allocation3 + $0x1f8] sm:$0xf] %vm2985_vm9, %v2920_v19  ;;  %v5416_v63 = vadd.f32 %v5415_v50, %v5246_v14  ;;  %v5428_v31 = vpop.f32.mrf.mxu2 }
 0x5a4   :  { %3498 = vst.msk [vmem:[#allocation3 + $0x1f8] sm:$0xf] %vm3434_vm10, %v3369_v61  ;;  %5268 = vmatmul.bf16.gmra.mxu1 %v6535_v27 }
 0x5a5   :  { %6202 = vst.msk [vmem:[#allocation5 + $0x48] sm:$0xff] %vm5953_vm13, %v6186_v18  ;;  %v5503_v26 = vmul.f32 %v9356_v40, %v5416_v63 }
 0x5a7   :  { %v5571_v0 = vadd.f32 %v9366_v57, %v5503_v26  ;;  %v3817_v10 = vpop.permute.xlu0 %3816 }
 0x5a9   :  { %v5635_v60 = vmax.f32 %v5571_v0, 0.0  ;;  %v3367_v62 = vpop.permute.xlu1 %3366 }
 0x5aa   :  { %3497 = vst.msk [vmem:[#allocation3 + $0x1f0] sm:$0xf] %vm3434_vm10, %v3367_v62 }
 0x5ab   :  { %v5673_v3 = vpack.c.bf16 %v5635_v60, %v5634_v53  ;;  %3947 = vst.msk [vmem:[#allocation3 + $0x1f0] sm:$0xf] %vm3884_vm11, %v3817_v10  ;;  %v5430_v19 = vpop.f32.mrf.mxu2 }
 0x5ac   :  { %4396 = vst.msk [vmem:[#allocation3 + $0x1f0] sm:$0xf] %vm4333_vm12, %v4266_v17 }
 0x5ad   :  { %6645 = vmatmul.msk.bf16.gmra.mxu3 %vm908_vm2, %v5673_v3 }
 0x5af   :  { %v5893_v49 = vpop.f32.mrf.mxu3  ;;  %v4268_v56 = vpop.permute.xlu0 %4267 }
 0x5b0   :  { %5994 = vst.msk [vmem:[#allocation4 + $0x140] sm:$0xff] %vm5953_vm13, %v5893_v49 }
 0x5b1   :  { %v3819_v45 = vpop.permute.xlu1 %3818 }
 0x5b2   :  { %3948 = vst.msk [vmem:[#allocation3 + $0x1f8] sm:$0xf] %vm3884_vm11, %v3819_v45 }
 0x5b3   :  { %4397 = vst.msk [vmem:[#allocation3 + $0x1f8] sm:$0xf] %vm4333_vm12, %v4268_v56  ;;  %v6542_v39 = vld [vmem:[#allocation3 + $0x1f0] sm:$0xf]  ;;  %v5433_v62 = vpop.f32.mrf.mxu2 }
 0x5b7   :  { %v5895_v30 = vpop.f32.mrf.mxu3 }
 0x5b8   :  { %5995 = vst.msk [vmem:[#allocation4 + $0x148] sm:$0xff] %vm5953_vm13, %v5895_v30 }
 0x5b9   :  { %v5249_v47 = vpop.f32.mrf.mxu1 }
 0x5ba   :  { %v6715_v48 = vld [vmem:[#allocation3 + $0x1f4] sm:$0xf0]  ;;  %v5419_v9 = vadd.f32 %v5418_v32, %v5249_v47 }
 0x5bb   :  { %v6543_v43 = vor.u32 %v6715_v48, %v6542_v39  ;;  %v5435_v48 = vpop.f32.mrf.mxu2 }
 0x5bc   :  { %v5504_v15 = vmul.f32 %v9356_v40, %v5419_v9 }
 0x5bd   :  { %5273 = vmatmul.bf16.gmra.mxu1 %v6543_v43 }
 0x5be   :  { %v5572_v12 = vadd.f32 %v9366_v57, %v5504_v15 }
 0x5bf   :  { %v6058_v21 = vld [vmem:[#allocation4 + $0x140] ss:$2 sm:$0xff]  ;;  %v6122_v36 = vld [vmem:[#allocation4 + $0x141] ss:$2 sm:$0xff] }
 0x5c0   :  { %v5636_v23 = vmax.f32 %v5572_v12, 0.0  ;;  %v6165_v52 = vmax.f32 %v6058_v21, %v6122_v36 }
 0x5c1   :  { %v5251_v35 = vpop.f32.mrf.mxu1 }
 0x5c2   :  { %v5421_v44 = vadd.f32 %v5420_v6, %v5251_v35 }
 0x5c4   :  { %v5505_v58 = vmul.f32 %v9356_v40, %v5421_v44 }
 0x5c6   :  { %v5573_v13 = vadd.f32 %v9366_v57, %v5505_v58 }
 0x5c7   :  { %v5898_v5 = vpop.f32.mrf.mxu3 }
 0x5c8   :  { %v5637_v59 = vmax.f32 %v5573_v13, 0.0  ;;  %5996 = vst.msk [vmem:[#allocation4 + $0x150] sm:$0xff] %vm5953_vm13, %v5898_v5 }
 0x5ca   :  { %v5674_v1 = vpack.c.bf16 %v5637_v59, %v5636_v23  ;;  %v5438_v23 = vpop.f32.mrf.mxu2 }
 0x5cc   :  { %6646 = vmatmul.msk.bf16.gmra.mxu3 %vm908_vm2, %v5674_v1 }
 0x5cf   :  { %v5900_v46 = vpop.f32.mrf.mxu3 }
 0x5d0   :  { %5997 = vst.msk [vmem:[#allocation4 + $0x158] sm:$0xff] %vm5953_vm13, %v5900_v46 }
 0x5d1   :  { %v5254_v54 = vpop.f32.mrf.mxu1 }
 0x5d2   :  { %v5424_v24 = vadd.f32 %v5423_v2, %v5254_v54  ;;  %v5440_v54 = vpop.f32.mrf.mxu2 }
 0x5d4   :  { %v5506_v20 = vmul.f32 %v9356_v40, %v5424_v24 }
 0x5d6   :  { %v5574_v42 = vadd.f32 %v9366_v57, %v5506_v20 }
 0x5d7   :  { %v6060_v41 = vld [vmem:[#allocation4 + $0x150] ss:$2 sm:$0xff]  ;;  %v6124_v16 = vld [vmem:[#allocation4 + $0x151] ss:$2 sm:$0xff] }
 0x5d8   :  { %v6166_v37 = vmax.f32 %v6060_v41, %v6124_v16  ;;  %v5638_v22 = vmax.f32 %v5574_v42, 0.0 }
 0x5d9   :  { %v5256_v25 = vpop.f32.mrf.mxu1 }
 0x5da   :  { %v6187_v11 = vmax.f32 %v6165_v52, %v6166_v37  ;;  %v5426_v38 = vadd.f32 %v5425_v7, %v5256_v25 }
 0x5dc   :  { %6203 = vst.msk [vmem:[#allocation5 + $0x50] sm:$0xff] %vm5953_vm13, %v6187_v11  ;;  %v5507_v29 = vmul.f32 %v9356_v40, %v5426_v38 }
 0x5de   :  { %v5575_v50 = vadd.f32 %v9366_v57, %v5507_v29 }
 0x5e0   :  { %v5639_v34 = vmax.f32 %v5575_v50, 0.0  ;;  %v5903_v8 = vpop.f32.mrf.mxu3 }
 0x5e1   :  { %5998 = vst.msk [vmem:[#allocation4 + $0x160] sm:$0xff] %vm5953_vm13, %v5903_v8 }
 0x5e2   :  { %v5675_v61 = vpack.c.bf16 %v5639_v34, %v5638_v22 }
 0x5e4   :  { %6647 = vmatmul.msk.bf16.gmra.mxu3 %vm908_vm2, %v5675_v61 }
 0x5e8   :  { %v5905_v4 = vpop.f32.mrf.mxu3 }
 0x5e9   :  { %5999 = vst.msk [vmem:[#allocation4 + $0x168] sm:$0xff] %vm5953_vm13, %v5905_v4 }
 0x5ea   :  { %v5259_v55 = vpop.f32.mrf.mxu1 }
 0x5eb   :  { %v5429_v51 = vadd.f32 %v5428_v31, %v5259_v55 }
 0x5ed   :  { %v5508_v28 = vmul.f32 %v9356_v40, %v5429_v51 }
 0x5ef   :  { %v5576_v18 = vadd.f32 %v9366_v57, %v5508_v28 }
 0x5f0   :  { %v6062_v49 = vld [vmem:[#allocation4 + $0x160] ss:$2 sm:$0xff]  ;;  %v6126_v45 = vld [vmem:[#allocation4 + $0x161] ss:$2 sm:$0xff]  ;;  %v5443_v25 = vpop.f32.mrf.mxu2 }
 0x5f1   :  { %v5640_v26 = vmax.f32 %v5576_v18, 0.0  ;;  %v6167_v30 = vmax.f32 %v6062_v49, %v6126_v45 }
 0x5f2   :  { %v5261_v14 = vpop.f32.mrf.mxu1 }
 0x5f3   :  { %v5431_v27 = vadd.f32 %v5430_v19, %v5261_v14 }
 0x5f5   :  { %v5509_v63 = vmul.f32 %v9356_v40, %v5431_v27 }
 0x5f7   :  { %v5577_v33 = vadd.f32 %v9366_v57, %v5509_v63 }
 0x5f8   :  { %v5445_v4 = vpop.f32.mrf.mxu2 }
 0x5f9   :  { %v5641_v0 = vmax.f32 %v5577_v33, 0.0 }
 0x5fb   :  { %v5676_v53 = vpack.c.bf16 %v5641_v0, %v5640_v26 }
 0x5fd   :  { %6648 = vmatmul.msk.bf16.gmra.mxu3 %vm908_vm2, %v5676_v53 }
 0x5ff   :  { %v5908_v60 = vpop.f32.mrf.mxu3 }
 0x600   :  { %6000 = vst.msk [vmem:[#allocation4 + $0x170] sm:$0xff] %vm5953_vm13, %v5908_v60 }
 0x607   :  { %v5910_v17 = vpop.f32.mrf.mxu3 }
 0x608   :  { %6001 = vst.msk [vmem:[#allocation4 + $0x178] sm:$0xff] %vm5953_vm13, %v5910_v17 }
 0x609   :  { %v5264_v10 = vpop.f32.mrf.mxu1 }
 0x60a   :  { %v5434_v3 = vadd.f32 %v5433_v62, %v5264_v10 }
 0x60c   :  { %v5510_v47 = vmul.f32 %v9356_v40, %v5434_v3 }
 0x60e   :  { %v5578_v6 = vadd.f32 %v9366_v57, %v5510_v47 }
 0x60f   :  { %v6064_v56 = vld [vmem:[#allocation4 + $0x170] ss:$2 sm:$0xff]  ;;  %v6128_v32 = vld [vmem:[#allocation4 + $0x171] ss:$2 sm:$0xff] }
 0x610   :  { %v6168_v39 = vmax.f32 %v6064_v56, %v6128_v32  ;;  %v5642_v58 = vmax.f32 %v5578_v6, 0.0 }
 0x611   :  { %v5266_v43 = vpop.f32.mrf.mxu1 }
 0x612   :  { %v6188_v9 = vmax.f32 %v6167_v30, %v6168_v39  ;;  %v5436_v15 = vadd.f32 %v5435_v48, %v5266_v43 }
 0x614   :  { %6204 = vst.msk [vmem:[#allocation5 + $0x58] sm:$0xff] %vm5953_vm13, %v6188_v9  ;;  %v5511_v35 = vmul.f32 %v9356_v40, %v5436_v15 }
 0x616   :  { %v5579_v44 = vadd.f32 %v9366_v57, %v5511_v35 }
 0x617   :  { %v5913_v12 = vpop.f32.mrf.mxu3 }
 0x618   :  { %v5643_v13 = vmax.f32 %v5579_v44, 0.0  ;;  %6002 = vst.msk [vmem:[#allocation4 + $0x180] sm:$0xff] %vm5953_vm13, %v5913_v12 }
 0x61a   :  { %v5677_v5 = vpack.c.bf16 %v5643_v13, %v5642_v58 }
 0x61c   :  { %6649 = vmatmul.msk.bf16.gmra.mxu3 %vm908_vm2, %v5677_v5 }
 0x61f   :  { %v5915_v59 = vpop.f32.mrf.mxu3 }
 0x620   :  { %6003 = vst.msk [vmem:[#allocation4 + $0x188] sm:$0xff] %vm5953_vm13, %v5915_v59 }
 0x621   :  { %v5269_v1 = vpop.f32.mrf.mxu1 }
 0x622   :  { %v5439_v2 = vadd.f32 %v5438_v23, %v5269_v1 }
 0x624   :  { %v5512_v46 = vmul.f32 %v9356_v40, %v5439_v2 }
 0x626   :  { %v5580_v36 = vadd.f32 %v9366_v57, %v5512_v46 }
 0x627   :  { %v6066_v29 = vld [vmem:[#allocation4 + $0x180] ss:$2 sm:$0xff]  ;;  %v6130_v50 = vld [vmem:[#allocation4 + $0x181] ss:$2 sm:$0xff] }
 0x628   :  { %v5644_v52 = vmax.f32 %v5580_v36, 0.0  ;;  %v6169_v8 = vmax.f32 %v6066_v29, %v6130_v50 }
 0x629   :  { %v5271_v24 = vpop.f32.mrf.mxu1 }
 0x62a   :  { %v5441_v21 = vadd.f32 %v5440_v54, %v5271_v24 }
 0x62c   :  { %v5513_v41 = vmul.f32 %v9356_v40, %v5441_v21 }
 0x62e   :  { %v5581_v16 = vadd.f32 %v9366_v57, %v5513_v41 }
 0x630   :  { %v5645_v37 = vmax.f32 %v5581_v16, 0.0  ;;  %v5918_v20 = vpop.f32.mrf.mxu3 }
 0x631   :  { %6004 = vst.msk [vmem:[#allocation4 + $0x190] sm:$0xff] %vm5953_vm13, %v5918_v20 }
 0x632   :  { %v5678_v7 = vpack.c.bf16 %v5645_v37, %v5644_v52 }
 0x634   :  { %6650 = vmatmul.msk.bf16.gmra.mxu3 %vm908_vm2, %v5678_v7 }
 0x638   :  { %v5920_v11 = vpop.f32.mrf.mxu3 }
 0x639   :  { %6005 = vst.msk [vmem:[#allocation4 + $0x198] sm:$0xff] %vm5953_vm13, %v5920_v11 }
 0x63a   :  { %v5274_v38 = vpop.f32.mrf.mxu1 }
 0x63b   :  { %v5444_v42 = vadd.f32 %v5443_v25, %v5274_v38 }
 0x63d   :  { %v5514_v31 = vmul.f32 %v9356_v40, %v5444_v42 }
 0x63f   :  { %v5582_v19 = vadd.f32 %v9366_v57, %v5514_v31 }
 0x640   :  { %v6068_v22 = vld [vmem:[#allocation4 + $0x190] ss:$2 sm:$0xff]  ;;  %v6132_v34 = vld [vmem:[#allocation4 + $0x191] ss:$2 sm:$0xff] }
 0x641   :  { %v6170_v61 = vmax.f32 %v6068_v22, %v6132_v34  ;;  %v5646_v18 = vmax.f32 %v5582_v19, 0.0 }
 0x642   :  { %v5276_v55 = vpop.f32.mrf.mxu1 }
 0x643   :  { %v6189_v51 = vmax.f32 %v6169_v8, %v6170_v61  ;;  %v5446_v28 = vadd.f32 %v5445_v4, %v5276_v55 }
 0x645   :  { %6205 = vst.msk [vmem:[#allocation5 + $0x60] sm:$0xff] %vm5953_vm13, %v6189_v51  ;;  %v5515_v14 = vmul.f32 %v9356_v40, %v5446_v28 }
 0x647   :  { %v5583_v27 = vadd.f32 %v9366_v57, %v5515_v14 }
 0x649   :  { %v5647_v63 = vmax.f32 %v5583_v27, 0.0 }
 0x64b   :  { %v5679_v33 = vpack.c.bf16 %v5647_v63, %v5646_v18 }
 0x64d   :  { %6651 = vmatmul.msk.bf16.gmra.mxu3 %vm908_vm2, %v5679_v33 }
 0x64f   :  { %v5923_v26 = vpop.f32.mrf.mxu3 }
 0x650   :  { %6006 = vst.msk [vmem:[#allocation4 + $0x1a0] sm:$0xff] %vm5953_vm13, %v5923_v26 }
 0x657   :  { %v5925_v0 = vpop.f32.mrf.mxu3 }
 0x658   :  { %6007 = vst.msk [vmem:[#allocation4 + $0x1a8] sm:$0xff] %vm5953_vm13, %v5925_v0 }
 0x65f   :  { %v6070_v40 = vld [vmem:[#allocation4 + $0x1a0] ss:$2 sm:$0xff]  ;;  %v6134_v62 = vld [vmem:[#allocation4 + $0x1a1] ss:$2 sm:$0xff] }
 0x660   :  { %v6171_v10 = vmax.f32 %v6070_v40, %v6134_v62 }
 0x667   :  { %v5928_v53 = vpop.f32.mrf.mxu3 }
 0x668   :  { %6008 = vst.msk [vmem:[#allocation4 + $0x1b0] sm:$0xff] %vm5953_vm13, %v5928_v53 }
 0x66f   :  { %v5930_v60 = vpop.f32.mrf.mxu3 }
 0x670   :  { %6009 = vst.msk [vmem:[#allocation4 + $0x1b8] sm:$0xff] %vm5953_vm13, %v5930_v60 }
 0x677   :  { %v6072_v57 = vld [vmem:[#allocation4 + $0x1b0] ss:$2 sm:$0xff]  ;;  %v6136_v17 = vld [vmem:[#allocation4 + $0x1b1] ss:$2 sm:$0xff] }
 0x678   :  { %v6172_v3 = vmax.f32 %v6072_v57, %v6136_v17 }
 0x67a   :  { %v6190_v49 = vmax.f32 %v6171_v10, %v6172_v3 }
 0x67c   :  { %6206 = vst.msk [vmem:[#allocation5 + $0x68] sm:$0xff] %vm5953_vm13, %v6190_v49 }
 0x680   :  { %v5933_v45 = vpop.f32.mrf.mxu3 }
 0x681   :  { %6010 = vst.msk [vmem:[#allocation4 + $0x1c0] sm:$0xff] %vm5953_vm13, %v5933_v45 }
 0x688   :  { %v5935_v56 = vpop.f32.mrf.mxu3 }
 0x689   :  { %6011 = vst.msk [vmem:[#allocation4 + $0x1c8] sm:$0xff] %vm5953_vm13, %v5935_v56 }
 0x690   :  { %v6074_v39 = vld [vmem:[#allocation4 + $0x1c0] ss:$2 sm:$0xff]  ;;  %v6138_v47 = vld [vmem:[#allocation4 + $0x1c1] ss:$2 sm:$0xff] }
 0x691   :  { %v6173_v9 = vmax.f32 %v6074_v39, %v6138_v47 }
 0x69f   :  { %v5938_v32 = vpop.f32.mrf.mxu3 }
 0x6a0   :  { %6012 = vst.msk [vmem:[#allocation4 + $0x1d0] sm:$0xff] %vm5953_vm13, %v5938_v32 }
 0x6a7   :  { %v5940_v30 = vpop.f32.mrf.mxu3 }
 0x6a8   :  { %6013 = vst.msk [vmem:[#allocation4 + $0x1d8] sm:$0xff] %vm5953_vm13, %v5940_v30 }
 0x6af   :  { %v6076_v48 = vld [vmem:[#allocation4 + $0x1d0] ss:$2 sm:$0xff]  ;;  %v6140_v43 = vld [vmem:[#allocation4 + $0x1d1] ss:$2 sm:$0xff] }
 0x6b0   :  { %v6174_v15 = vmax.f32 %v6076_v48, %v6140_v43 }
 0x6b2   :  { %v6191_v6 = vmax.f32 %v6173_v9, %v6174_v15 }
 0x6b4   :  { %6207 = vst.msk [vmem:[#allocation5 + $0x70] sm:$0xff] %vm5953_vm13, %v6191_v6 }
 0x6b7   :  { %v5943_v35 = vpop.f32.mrf.mxu3 }
 0x6b8   :  { %6014 = vst.msk [vmem:[#allocation4 + $0x1e0] sm:$0xff] %vm5953_vm13, %v5943_v35 }
 0x6bf   :  { %v5945_v44 = vpop.f32.mrf.mxu3 }
 0x6c0   :  { %6015 = vst.msk [vmem:[#allocation4 + $0x1e8] sm:$0xff] %vm5953_vm13, %v5945_v44 }
 0x6c7   :  { %v6078_v13 = vld [vmem:[#allocation4 + $0x1e0] ss:$2 sm:$0xff]  ;;  %v6142_v5 = vld [vmem:[#allocation4 + $0x1e1] ss:$2 sm:$0xff] }
 0x6c8   :  { %v6175_v1 = vmax.f32 %v6078_v13, %v6142_v5 }
 0x6d0   :  { %v5948_v12 = vpop.f32.mrf.mxu3 }
 0x6d1   :  { %6016 = vst.msk [vmem:[#allocation4 + $0x1f0] sm:$0xff] %vm5953_vm13, %v5948_v12 }
 0x6d8   :  { %v5950_v58 = vpop.f32.mrf.mxu3 }
 0x6d9   :  { %6017 = vst.msk [vmem:[#allocation4 + $0x1f8] sm:$0xff] %vm5953_vm13, %v5950_v58 }
 0x6e0   :  { %v6080_v23 = vld [vmem:[#allocation4 + $0x1f0] ss:$2 sm:$0xff]  ;;  %v6144_v59 = vld [vmem:[#allocation4 + $0x1f1] ss:$2 sm:$0xff] }
 0x6e1   :  { %v6176_v2 = vmax.f32 %v6080_v23, %v6144_v59 }
 0x6e3   :  { %v6192_v46 = vmax.f32 %v6175_v1, %v6176_v2 }
 0x6e5   :  { %6208 = vst.msk [vmem:[#allocation5 + $0x78] sm:$0xff] %vm5953_vm13, %v6192_v46 }
 0x6e6   :  { %6221 = dma.vmem_to_hbm [thread:$0]  %s6214_s26, 2048, %s6216_s19, [#allocation6], %s6803_s21, %s6803_s21, %s6804_s22  }
 0x6e7   :  { %6792 = dma.done.wait [#allocation6], 2048  }
 0x6e8   :  { %6793 = vsyncadd [#allocation6], 4294965248 }
 0x6e9   :  { %6226 = vsyncpa [#allocation6], 1 }

</bundles_post_ra>
